<compile_context>
chip_gen: v7x
topology: tpu7x:2x2x1
jax: 0.10.0
libtpu: 0.0.40
codegen_flags: <defaults>
</compile_context>

<pallas_src>
import functools
import math

import jax
import jax.numpy as jnp
from jax.experimental import pallas as pl
from jax.experimental.pallas import tpu as pltpu

_LN_EPS = 1e-5


# ------------------------------ Pallas kernel ------------------------------ #

def _gelu_tanh(x):
    # BERT-pytorch GELU (tanh approximation)
    return 0.5 * x * (1.0 + jnp.tanh(
        math.sqrt(2.0 / math.pi) * (x + 0.044715 * x * x * x)))


def _layernorm(v, g, b, eps=_LN_EPS):
    # TODO(synk): if ChromBERT uses BERT-pytorch's custom LayerNorm ((x-mean)/(std+eps),
    # unbiased std) instead of nn.LayerNorm, switch this to match exactly.
    mu = jnp.mean(v, axis=-1, keepdims=True)
    var = jnp.mean((v - mu) ** 2, axis=-1, keepdims=True)
    return (v - mu) * jax.lax.rsqrt(var + eps) * g + b


def encoder_stack_kernel(x_ref, bias_ref,
                         wqkv_ref, bqkv_ref, wo_ref,
                         w1_ref, b1_ref, w2_ref, vec_ref,
                         o_ref, *, num_heads, head_dim):
    """grid = (batch_tiles, layer).  Output block index is constant over the layer axis,
    so o_ref is the resident residual stream carried layer-to-layer in VMEM."""
    layer = pl.program_id(1)

    # Seed the residual stream from the embedding output at the first layer.
    # (Kept explicitly: Pallas output blocks are write-only windows, they are NOT
    #  pre-loaded from the aliased HBM buffer.)
    @pl.when(layer == 0)
    def _():
        o_ref[...] = x_ref[...]

    Bt, S, H = o_ref.shape
    nh, hd = num_heads, head_dim
    M = Bt * S
    bf16 = jnp.bfloat16

    x = o_ref[...].reshape(M, H)            # (M, H) f32 residual stream
    bias = bias_ref[...]                    # (Bt, 1, S) additive key-padding bias (0 / -1e9)

    vec = vec_ref[0]                        # (6, H) packed: ln1_g, ln1_b, ln2_g, ln2_b, bo, b2
    ln1_g, ln1_b = vec[0], vec[1]
    ln2_g, ln2_b = vec[2], vec[3]
    bo_b, b2_b = vec[4], vec[5]

    # ---------------- self-attention sublayer (pre-LN) ----------------
    xn = _layernorm(x, ln1_g, ln1_b)
    # Fused QKV projection: one (M, H) @ (H, 3H) MXU pass (bf16 operands, f32 accumulate).
    # 1/sqrt(head_dim) has been folded into the Q columns of wqkv/bqkv at prep time.
    qkv = jnp.dot(xn.astype(bf16), wqkv_ref[0],
                  preferred_element_type=jnp.float32) + bqkv_ref[0]      # (M, 3H) f32

    q = qkv[:, :H]
    k = qkv[:, H:2 * H]
    v = qkv[:, 2 * H:]

    # Packed head split: (M, H) -> (Bt*nh, S, hd) via one reshape + one transpose
    # (no per-head stack/concat of 32-wide lane slices).
    def split_heads(t):
        t = t.astype(bf16)
        return t.reshape(Bt, S, nh, hd).swapaxes(1, 2).reshape(Bt * nh, S, hd)

    q_h, k_h, v_h = split_heads(q), split_heads(k), split_heads(v)

    s = jnp.einsum('gqd,gkd->gqk', q_h, k_h,
                   preferred_element_type=jnp.float32)                   # (Bt*nh, S, S)
    s = s.reshape(Bt, nh, S, S) + bias[:, :, None, :]                    # broadcast heads/queries
    s = s - jnp.max(s, axis=-1, keepdims=True)                           # f32 softmax
    p = jnp.exp(s)
    # approx reciprocal on the EUP slot; ~1e-3..1e-4 relative error, fine for inference
    p = p * pl.reciprocal(jnp.sum(p, axis=-1, keepdims=True), approx=True)
    p = p.reshape(Bt * nh, S, S)

    ctx = jnp.einsum('gqk,gkd->gqd', p.astype(bf16), v_h,
                     preferred_element_type=jnp.float32)                 # (Bt*nh, S, hd)
    # Merge heads back with a single transpose + reshape (lane-dense (M, H) slab).
    ctx2d = ctx.reshape(Bt, nh, S, hd).swapaxes(1, 2).reshape(M, H)

    attn_out = jnp.dot(ctx2d.astype(bf16), wo_ref[0],
                       preferred_element_type=jnp.float32) + bo_b
    x1 = x + attn_out

    # ---------------- feed-forward sublayer (pre-LN) ----------------
    xn2 = _layernorm(x1, ln2_g, ln2_b)
    h1 = jnp.dot(xn2.astype(bf16), w1_ref[0],
                 preferred_element_type=jnp.float32) + b1_ref[0]
    h1 = _gelu_tanh(h1)                                                  # f32 elementwise
    h2 = jnp.dot(h1.astype(bf16), w2_ref[0],
                 preferred_element_type=jnp.float32) + b2_b

    o_ref[...] = (x1 + h2).reshape(Bt, S, H)
    # TODO(synk): for long sequences add a KV-tile grid axis with flash-style online
    # softmax (and a lane-padded / SMEM key-padding bias) instead of materializing the
    # full (Bt,nh,S,S) scores and (M,4H) FFN blocks — mandatory on v7x (64 MiB VMEM).


def _choose_batch_tile(B, S, min_rows=128):
    """Smallest divisor of B giving B_tile*S >= min_rows rows per MXU pass, while keeping
    >= 2 blocks along the parallel batch axis when possible (v7x has 2 TensorCores)."""
    best = B
    for d in range(1, B + 1):
        if B % d == 0 and d * S >= min_rows:
            best = d
            break
    if best == B and B % 2 == 0 and (B // 2) * S >= min_rows:
        best = B // 2
    return best


def _vmem_budget_bytes(Bt, S, H, F, nh):
    """Rough working-set estimate: double-buffered per-layer weights + per-tile IO blocks
    + activation temporaries, with generous headroom, capped below v7x's 64 MiB."""
    f32, bf16 = 4, 2
    per_layer_w = (H * 3 * H + H * H + H * F + F * H) * bf16 + (3 * H + F + 6 * H) * f32
    io_in = (Bt * S * H + Bt * S) * f32                     # embedding block + bias block
    out = Bt * S * H * f32                                  # resident residual block
    acts = (Bt * S * 3 * H + 2 * Bt * nh * S * S + Bt * S * F + 4 * Bt * S * H) * f32
    need = 2 * (per_layer_w + io_in) + out + acts
    return int(min(48 * 1024 * 1024, max(16 * 1024 * 1024, 2 * need)))


def run_encoder_stack(x, bias, stack, *, num_heads, batch_tile=None):
    """x: (B, S, H) f32 embedding output; bias: (B, 1, S) f32 key-padding bias;
    stack: dict of per-layer weights stacked along a leading layer axis (matmul weights bf16)."""
    B, S, H = x.shape
    L, _, F = stack["w1"].shape
    head_dim = H // num_heads

    if batch_tile is None:
        batch_tile = _choose_batch_tile(B, S)
    Bt = batch_tile
    assert B % Bt == 0, "batch must be divisible by the batch tile"

    def per_batch(shape):
        return pl.BlockSpec(shape, lambda b, l: (b, 0, 0))

    def per_layer(shape):
        return pl.BlockSpec(shape, lambda b, l: (l, 0, 0))

    in_specs = [
        per_batch((Bt, S, H)),           # embedding output (aliased to the output buffer)
        per_batch((Bt, 1, S)),           # key-padding bias
        per_layer((1, H, 3 * H)),        # fused Wqkv (bf16, Q columns pre-scaled)
        per_layer((1, 1, 3 * H)),        # fused bqkv (f32)
        per_layer((1, H, H)),            # Wo (bf16)
        per_layer((1, H, F)),            # W1 (bf16)
        per_layer((1, 1, F)),            # b1 (f32)
        per_layer((1, F, H)),            # W2 (bf16)
        per_layer((1, 6, H)),            # packed LN gammas/betas + bo + b2 (f32)
    ]

    kernel = functools.partial(encoder_stack_kernel,
                               num_heads=num_heads, head_dim=head_dim)

    return pl.pallas_call(
        kernel,
        out_shape=jax.ShapeDtypeStruct((B, S, H), jnp.float32),
        grid_spec=pltpu.PrefetchScalarGridSpec(
            num_scalar_prefetch=0,
            grid=(B // Bt, L),     # layer axis innermost: residual resident in out block
            in_specs=in_specs,
            out_specs=pl.BlockSpec((Bt, S, H), lambda b, l: (b, 0, 0)),
        ),
        input_output_aliases={0: 0},     # embedding HBM buffer donated to the output
        compiler_params=pltpu.CompilerParams(
            dimension_semantics=("parallel", "arbitrary"),
            vmem_limit_bytes=_vmem_budget_bytes(Bt, S, H, F, num_heads)),
    )(x, bias, stack["wqkv"], stack["bqkv"], stack["wo"],
      stack["w1"], stack["b1"], stack["w2"], stack["vecs"])


# ------------------------------ Model wrapper ------------------------------ #

def init_params(key, *, vocab_size, max_pos, hidden, num_layers, num_heads):
    """Builds parameters already in 'prepared' form: matmul weights bf16, 1/sqrt(head_dim)
    folded into the Q projection, small per-layer vectors packed.  When loading a torch
    checkpoint, the same one-time prep transform would be applied after load."""
    ffn = hidden * 4
    head_dim = hidden // num_heads
    keys = jax.random.split(key, 2 + num_layers * 4)
    tok_emb = jax.random.normal(keys[0], (vocab_size, hidden), jnp.float32) * 0.02
    pos_emb = jax.random.normal(keys[1], (max_pos, hidden), jnp.float32) * 0.02

    def wrand(k, shape):
        return jax.random.normal(k, shape, jnp.float32) * 0.02

    wqkv = jnp.stack([wrand(keys[2 + i * 4 + 0], (hidden, 3 * hidden))
                      for i in range(num_layers)])
    wo = jnp.stack([wrand(keys[2 + i * 4 + 1], (hidden, hidden))
                    for i in range(num_layers)])
    w1 = jnp.stack([wrand(keys[2 + i * 4 + 2], (hidden, ffn))
                    for i in range(num_layers)])
    w2 = jnp.stack([wrand(keys[2 + i * 4 + 3], (ffn, hidden))
                    for i in range(num_layers)])
    bqkv = jnp.zeros((num_layers, 1, 3 * hidden), jnp.float32)
    b1 = jnp.zeros((num_layers, 1, ffn), jnp.float32)

    # One-time prep: fold the attention scale into the Q projection columns.
    scale = 1.0 / math.sqrt(head_dim)
    wqkv = wqkv.at[:, :, :hidden].multiply(scale)
    bqkv = bqkv.at[:, :, :hidden].multiply(scale)

    ones = jnp.ones((num_layers, 1, hidden), jnp.float32)
    zeros = jnp.zeros((num_layers, 1, hidden), jnp.float32)
    # packed rows: ln1_g, ln1_b, ln2_g, ln2_b, bo, b2
    vecs = jnp.concatenate([ones, zeros, ones, zeros, zeros, zeros], axis=1)

    bf16 = jnp.bfloat16
    return {
        "tok_emb": tok_emb,
        "pos_emb": pos_emb,
        "stack": {"wqkv": wqkv.astype(bf16), "bqkv": bqkv, "wo": wo.astype(bf16),
                  "w1": w1.astype(bf16), "b1": b1, "w2": w2.astype(bf16), "vecs": vecs},
    }


def chrombert_forward(params, x_tokens, position_ids, key_padding_mask=None,
                      *, num_heads):
    """ChromBERT.forward (attn_weight=False path), eval mode.

    x_tokens:         (B, S) int32 token ids
    position_ids:     (B, S) int32 position ids
    key_padding_mask: (B, S) bool, True = position is padding (ignored by attention)
    returns (B, S, H) float32
    """
    # BERTEmbedding: token lookup + position lookup (+ dropout == identity in eval)
    x = jnp.take(params["tok_emb"], x_tokens, axis=0) + \
        jnp.take(params["pos_emb"], position_ids, axis=0)          # (B, S, H)
    x = x.astype(jnp.float32)

    B, S, _ = x.shape
    if key_padding_mask is None:
        bias = jnp.zeros((B, 1, S), jnp.float32)
    else:
        bias = jnp.where(key_padding_mask[:, None, :], -1e9, 0.0).astype(jnp.float32)

    # TODO(synk): attn_weight=True path (returning per-layer attention maps) not exposed;
    # it would require an additional (L, nh, S, S) kernel output.
    return run_encoder_stack(x, bias, params["stack"], num_heads=num_heads)


# ---------------------------------- main ----------------------------------- #

if __name__ == "__main__":
    # small ChromBERTConfig-like settings (hidden lane-aligned at 128; seq chosen so a
    # batch tile of 2 sequences gives 128 matmul rows and >= 2 parallel grid blocks)
    hidden_dim = 128
    num_layers = 2
    num_attention_heads = 4   # head_dim = 32
    vocab_size = 16
    batch, seq = 4, 64

    key = jax.random.PRNGKey(0)
    k_param, k_tok = jax.random.split(key)

    params = init_params(k_param, vocab_size=vocab_size, max_pos=seq,
                         hidden=hidden_dim, num_layers=num_layers,
                         num_heads=num_attention_heads)

    x_tokens = jax.random.randint(k_tok, (batch, seq), 0, vocab_size, dtype=jnp.int32)
    position_ids = jnp.broadcast_to(jnp.arange(seq, dtype=jnp.int32), (batch, seq))
    # last few positions of the last sequence are padding
    key_padding_mask = jnp.zeros((batch, seq), dtype=bool).at[-1, -8:].set(True)

    fwd = jax.jit(functools.partial(chrombert_forward, num_heads=num_attention_heads))
    out = fwd(params, x_tokens, position_ids, key_padding_mask)
    out = jax.block_until_ready(out)
    assert out.shape == (batch, seq, hidden_dim)
    assert bool(jnp.all(jnp.isfinite(out)))
    print("KERNEL_OK")
</pallas_src>

<mosaic_0001>
module attributes {stable_mosaic.version = 11 : i64} {
  func.func @encoder_stack_kernel(%arg0: i32, %arg1: i32, %arg2: memref<2x64x128xf32, #tpu.memory_space<vmem>>, %arg3: memref<2x1x64xf32, #tpu.memory_space<vmem>>, %arg4: memref<1x128x384xbf16, #tpu.memory_space<vmem>>, %arg5: memref<1x1x384xf32, #tpu.memory_space<vmem>>, %arg6: memref<1x128x128xbf16, #tpu.memory_space<vmem>>, %arg7: memref<1x128x512xbf16, #tpu.memory_space<vmem>>, %arg8: memref<1x1x512xf32, #tpu.memory_space<vmem>>, %arg9: memref<1x512x128xbf16, #tpu.memory_space<vmem>>, %arg10: memref<1x6x128xf32, #tpu.memory_space<vmem>>, %arg11: memref<2x64x128xf32, #tpu.memory_space<vmem>>) attributes {dimension_semantics = [#tpu.dimension_semantics<parallel>, #tpu.dimension_semantics<arbitrary>], iteration_bounds = array<i64: 2, 2>, scalar_prefetch = 0 : i64, scratch_operands = 0 : i64, tpu.core_type = #tpu.core_type<tc>, window_params = [{transform_indices = @transform_0, window_bounds = array<i64: 2, 64, 128>}, {transform_indices = @transform_1, window_bounds = array<i64: 2, 1, 64>}, {transform_indices = @transform_2, window_bounds = array<i64: 1, 128, 384>}, {transform_indices = @transform_3, window_bounds = array<i64: 1, 1, 384>}, {transform_indices = @transform_4, window_bounds = array<i64: 1, 128, 128>}, {transform_indices = @transform_5, window_bounds = array<i64: 1, 128, 512>}, {transform_indices = @transform_6, window_bounds = array<i64: 1, 1, 512>}, {transform_indices = @transform_7, window_bounds = array<i64: 1, 512, 128>}, {transform_indices = @transform_8, window_bounds = array<i64: 1, 6, 128>}, {transform_indices = @transform_9, window_bounds = array<i64: 2, 64, 128>}]} {
    %c0_i32 = arith.constant 0 : i32
    %0 = arith.cmpi eq, %arg1, %c0_i32 : i32
    %1 = arith.extui %0 : i1 to i32
    %c0_i32_0 = arith.constant 0 : i32
    %2 = arith.cmpi ne, %1, %c0_i32_0 : i32
    scf.if %2 {
      %c0_51 = arith.constant 0 : index
      %c0_52 = arith.constant 0 : index
      %c0_53 = arith.constant 0 : index
      %151 = vector.load %arg2[%c0_51, %c0_52, %c0_53] : memref<2x64x128xf32, #tpu.memory_space<vmem>>, vector<2x64x128xf32>
      %c0_54 = arith.constant 0 : index
      %c0_55 = arith.constant 0 : index
      %c0_56 = arith.constant 0 : index
      %152 = vector.load %arg11[%c0_54, %c0_55, %c0_56] : memref<2x64x128xf32, #tpu.memory_space<vmem>>, vector<2x64x128xf32>
      tpu.vector_store %arg11[%c0_54, %c0_55, %c0_56], %151 {strides = array<i32>} : memref<2x64x128xf32, #tpu.memory_space<vmem>>, vector<2x64x128xf32>,
    } else {
    }
    %c0 = arith.constant 0 : index
    %c0_1 = arith.constant 0 : index
    %c0_2 = arith.constant 0 : index
    %3 = vector.load %arg11[%c0, %c0_1, %c0_2] : memref<2x64x128xf32, #tpu.memory_space<vmem>>, vector<2x64x128xf32>
    %4 = vector.shape_cast %3 : vector<2x64x128xf32> to vector<128x128xf32>
    %c0_3 = arith.constant 0 : index
    %c0_4 = arith.constant 0 : index
    %c0_5 = arith.constant 0 : index
    %5 = vector.load %arg3[%c0_3, %c0_4, %c0_5] : memref<2x1x64xf32, #tpu.memory_space<vmem>>, vector<2x1x64xf32>
    %c0_6 = arith.constant 0 : index
    %c0_7 = arith.constant 0 : index
    %c0_8 = arith.constant 0 : index
    %6 = vector.load %arg10[%c0_6, %c0_7, %c0_8] : memref<1x6x128xf32, #tpu.memory_space<vmem>>, vector<1x6x128xf32>
    %7 = vector.shape_cast %6 : vector<1x6x128xf32> to vector<6x128xf32>
    %8 = vector.extract_strided_slice %7 {offsets = [0, 0], sizes = [1, 128], strides = [1, 1]} : vector<6x128xf32> to vector<1x128xf32>
    %9 = vector.shape_cast %8 : vector<1x128xf32> to vector<128xf32>
    %10 = vector.extract_strided_slice %7 {offsets = [1, 0], sizes = [1, 128], strides = [1, 1]} : vector<6x128xf32> to vector<1x128xf32>
    %11 = vector.shape_cast %10 : vector<1x128xf32> to vector<128xf32>
    %12 = vector.extract_strided_slice %7 {offsets = [2, 0], sizes = [1, 128], strides = [1, 1]} : vector<6x128xf32> to vector<1x128xf32>
    %13 = vector.shape_cast %12 : vector<1x128xf32> to vector<128xf32>
    %14 = vector.extract_strided_slice %7 {offsets = [3, 0], sizes = [1, 128], strides = [1, 1]} : vector<6x128xf32> to vector<1x128xf32>
    %15 = vector.shape_cast %14 : vector<1x128xf32> to vector<128xf32>
    %16 = vector.extract_strided_slice %7 {offsets = [4, 0], sizes = [1, 128], strides = [1, 1]} : vector<6x128xf32> to vector<1x128xf32>
    %17 = vector.shape_cast %16 : vector<1x128xf32> to vector<128xf32>
    %18 = vector.extract_strided_slice %7 {offsets = [5, 0], sizes = [1, 128], strides = [1, 1]} : vector<6x128xf32> to vector<1x128xf32>
    %19 = vector.shape_cast %18 : vector<1x128xf32> to vector<128xf32>
    %cst = arith.constant dense<0.000000e+00> : vector<128xf32>
    %20 = vector.multi_reduction <add>, %4, %cst [1] : vector<128x128xf32> to vector<128xf32>
    %21 = vector.shape_cast %20 : vector<128xf32> to vector<128x1xf32>
    %cst_9 = arith.constant 1.280000e+02 : f32
    %22 = vector.broadcast %cst_9 : f32 to vector<128x1xf32>
    %23 = arith.divf %21, %22 : vector<128x1xf32>
    %24 = vector.broadcast %23 : vector<128x1xf32> to vector<128x128xf32>
    %25 = arith.subf %4, %24 : vector<128x128xf32>
    %26 = arith.mulf %25, %25 : vector<128x128xf32>
    %cst_10 = arith.constant dense<0.000000e+00> : vector<128xf32>
    %27 = vector.multi_reduction <add>, %26, %cst_10 [1] : vector<128x128xf32> to vector<128xf32>
    %28 = vector.shape_cast %27 : vector<128xf32> to vector<128x1xf32>
    %cst_11 = arith.constant 1.280000e+02 : f32
    %29 = vector.broadcast %cst_11 : f32 to vector<128x1xf32>
    %30 = arith.divf %28, %29 : vector<128x1xf32>
    %31 = vector.broadcast %23 : vector<128x1xf32> to vector<128x128xf32>
    %32 = arith.subf %4, %31 : vector<128x128xf32>
    %cst_12 = arith.constant 9.99999974E-6 : f32
    %33 = vector.broadcast %cst_12 : f32 to vector<128x1xf32>
    %34 = arith.addf %30, %33 : vector<128x1xf32>
    %35 = math.rsqrt %34 : vector<128x1xf32>
    %36 = vector.broadcast %35 : vector<128x1xf32> to vector<128x128xf32>
    %37 = arith.mulf %32, %36 : vector<128x128xf32>
    %38 = vector.shape_cast %9 : vector<128xf32> to vector<1x128xf32>
    %39 = vector.broadcast %38 : vector<1x128xf32> to vector<128x128xf32>
    %40 = arith.mulf %37, %39 : vector<128x128xf32>
    %41 = vector.shape_cast %11 : vector<128xf32> to vector<1x128xf32>
    %42 = vector.broadcast %41 : vector<1x128xf32> to vector<128x128xf32>
    %43 = arith.addf %40, %42 : vector<128x128xf32>
    %44 = arith.truncf %43 : vector<128x128xf32> to vector<128x128xbf16>
    %c0_13 = arith.constant 0 : index
    %c0_14 = arith.constant 0 : index
    %c0_15 = arith.constant 0 : index
    %45 = vector.load %arg4[%c0_13, %c0_14, %c0_15] : memref<1x128x384xbf16, #tpu.memory_space<vmem>>, vector<1x128x384xbf16>
    %46 = vector.shape_cast %45 : vector<1x128x384xbf16> to vector<128x384xbf16>
    %cst_16 = arith.constant dense<0.000000e+00> : vector<128x384xf32>
    %47 = tpu.matmul %44, %46, %cst_16 {dimension_numbers = #tpu.dot_dimension_numbers<[1], [0], [0], [1], [0, 0, 1, 1], [], []>} : vector<128x128xbf16>, vector<128x384xbf16>, vector<128x384xf32> -> vector<128x384xf32>
    %c0_17 = arith.constant 0 : index
    %c0_18 = arith.constant 0 : index
    %c0_19 = arith.constant 0 : index
    %48 = vector.load %arg5[%c0_17, %c0_18, %c0_19] : memref<1x1x384xf32, #tpu.memory_space<vmem>>, vector<1x1x384xf32>
    %49 = vector.shape_cast %48 : vector<1x1x384xf32> to vector<1x384xf32>
    %50 = vector.broadcast %49 : vector<1x384xf32> to vector<128x384xf32>
    %51 = arith.addf %47, %50 : vector<128x384xf32>
    %52 = vector.extract_strided_slice %51 {offsets = [0, 0], sizes = [128, 128], strides = [1, 1]} : vector<128x384xf32> to vector<128x128xf32>
    %53 = vector.extract_strided_slice %51 {offsets = [0, 128], sizes = [128, 128], strides = [1, 1]} : vector<128x384xf32> to vector<128x128xf32>
    %54 = vector.extract_strided_slice %51 {offsets = [0, 256], sizes = [128, 128], strides = [1, 1]} : vector<128x384xf32> to vector<128x128xf32>
    %55 = arith.truncf %52 : vector<128x128xf32> to vector<128x128xbf16>
    %56 = vector.shape_cast %55 : vector<128x128xbf16> to vector<2x64x4x32xbf16>
    %57 = tpu.transpose %56, [0, 2, 1, 3] : vector<2x64x4x32xbf16> -> vector<2x4x64x32xbf16>
    %58 = vector.shape_cast %57 : vector<2x4x64x32xbf16> to vector<8x64x32xbf16>
    %59 = arith.truncf %53 : vector<128x128xf32> to vector<128x128xbf16>
    %60 = vector.shape_cast %59 : vector<128x128xbf16> to vector<2x64x4x32xbf16>
    %61 = tpu.transpose %60, [0, 2, 1, 3] : vector<2x64x4x32xbf16> -> vector<2x4x64x32xbf16>
    %62 = vector.shape_cast %61 : vector<2x4x64x32xbf16> to vector<8x64x32xbf16>
    %63 = arith.truncf %54 : vector<128x128xf32> to vector<128x128xbf16>
    %64 = vector.shape_cast %63 : vector<128x128xbf16> to vector<2x64x4x32xbf16>
    %65 = tpu.transpose %64, [0, 2, 1, 3] : vector<2x64x4x32xbf16> -> vector<2x4x64x32xbf16>
    %66 = vector.shape_cast %65 : vector<2x4x64x32xbf16> to vector<8x64x32xbf16>
    "tpu.trace_start"() <{level = 10 : i32, message = "gqd,gkd->gqk"}> : () -> ()
    %cst_20 = arith.constant dense<0.000000e+00> : vector<8x64x64xf32>
    %67 = tpu.matmul %58, %62, %cst_20 {dimension_numbers = #tpu.dot_dimension_numbers<[2], [2], [1], [1], [0, 0, 0, 1, 1, 1], [0], [0]>} : vector<8x64x32xbf16>, vector<8x64x32xbf16>, vector<8x64x64xf32> -> vector<8x64x64xf32>
    "tpu.trace_stop"() : () -> ()
    %68 = vector.shape_cast %67 : vector<8x64x64xf32> to vector<2x4x64x64xf32>
    %69 = vector.shape_cast %5 : vector<2x1x64xf32> to vector<2x1x1x64xf32>
    %70 = vector.broadcast %69 : vector<2x1x1x64xf32> to vector<2x4x64x64xf32>
    %71 = arith.addf %68, %70 : vector<2x4x64x64xf32>
    %cst_21 = arith.constant dense<0xFF800000> : vector<2x4x64xf32>
    %72 = vector.multi_reduction <maximumf>, %71, %cst_21 [3] : vector<2x4x64x64xf32> to vector<2x4x64xf32>
    %73 = vector.shape_cast %72 : vector<2x4x64xf32> to vector<2x4x64x1xf32>
    %74 = vector.broadcast %73 : vector<2x4x64x1xf32> to vector<2x4x64x64xf32>
    %75 = arith.subf %71, %74 : vector<2x4x64x64xf32>
    %76 = math.exp %75 : vector<2x4x64x64xf32>
    %cst_22 = arith.constant dense<0.000000e+00> : vector<2x4x64xf32>
    %77 = vector.multi_reduction <add>, %76, %cst_22 [3] : vector<2x4x64x64xf32> to vector<2x4x64xf32>
    %78 = vector.shape_cast %77 : vector<2x4x64xf32> to vector<2x4x64x1xf32>
    %79 = tpu.reciprocal %78 {approx = true} : vector<2x4x64x1xf32> -> vector<2x4x64x1xf32>
    %80 = vector.broadcast %79 : vector<2x4x64x1xf32> to vector<2x4x64x64xf32>
    %81 = arith.mulf %76, %80 : vector<2x4x64x64xf32>
    %82 = vector.shape_cast %81 : vector<2x4x64x64xf32> to vector<8x64x64xf32>
    %83 = arith.truncf %82 : vector<8x64x64xf32> to vector<8x64x64xbf16>
    "tpu.trace_start"() <{level = 10 : i32, message = "gqk,gkd->gqd"}> : () -> ()
    %cst_23 = arith.constant dense<0.000000e+00> : vector<8x64x32xf32>
    %84 = tpu.matmul %83, %66, %cst_23 {dimension_numbers = #tpu.dot_dimension_numbers<[2], [1], [1], [2], [0, 0, 0, 1, 1, 2], [0], [0]>} : vector<8x64x64xbf16>, vector<8x64x32xbf16>, vector<8x64x32xf32> -> vector<8x64x32xf32>
    "tpu.trace_stop"() : () -> ()
    %85 = vector.shape_cast %84 : vector<8x64x32xf32> to vector<2x4x64x32xf32>
    %86 = tpu.transpose %85, [0, 2, 1, 3] : vector<2x4x64x32xf32> -> vector<2x64x4x32xf32>
    %87 = vector.shape_cast %86 : vector<2x64x4x32xf32> to vector<128x128xf32>
    %88 = arith.truncf %87 : vector<128x128xf32> to vector<128x128xbf16>
    %c0_24 = arith.constant 0 : index
    %c0_25 = arith.constant 0 : index
    %c0_26 = arith.constant 0 : index
    %89 = vector.load %arg6[%c0_24, %c0_25, %c0_26] : memref<1x128x128xbf16, #tpu.memory_space<vmem>>, vector<1x128x128xbf16>
    %90 = vector.shape_cast %89 : vector<1x128x128xbf16> to vector<128x128xbf16>
    %cst_27 = arith.constant dense<0.000000e+00> : vector<128x128xf32>
    %91 = tpu.matmul %88, %90, %cst_27 {dimension_numbers = #tpu.dot_dimension_numbers<[1], [0], [0], [1], [0, 0, 1, 1], [], []>} : vector<128x128xbf16>, vector<128x128xbf16>, vector<128x128xf32> -> vector<128x128xf32>
    %92 = vector.shape_cast %17 : vector<128xf32> to vector<1x128xf32>
    %93 = vector.broadcast %92 : vector<1x128xf32> to vector<128x128xf32>
    %94 = arith.addf %91, %93 : vector<128x128xf32>
    %95 = arith.addf %4, %94 : vector<128x128xf32>
    %cst_28 = arith.constant dense<0.000000e+00> : vector<128xf32>
    %96 = vector.multi_reduction <add>, %95, %cst_28 [1] : vector<128x128xf32> to vector<128xf32>
    %97 = vector.shape_cast %96 : vector<128xf32> to vector<128x1xf32>
    %cst_29 = arith.constant 1.280000e+02 : f32
    %98 = vector.broadcast %cst_29 : f32 to vector<128x1xf32>
    %99 = arith.divf %97, %98 : vector<128x1xf32>
    %100 = vector.broadcast %99 : vector<128x1xf32> to vector<128x128xf32>
    %101 = arith.subf %95, %100 : vector<128x128xf32>
    %102 = arith.mulf %101, %101 : vector<128x128xf32>
    %cst_30 = arith.constant dense<0.000000e+00> : vector<128xf32>
    %103 = vector.multi_reduction <add>, %102, %cst_30 [1] : vector<128x128xf32> to vector<128xf32>
    %104 = vector.shape_cast %103 : vector<128xf32> to vector<128x1xf32>
    %cst_31 = arith.constant 1.280000e+02 : f32
    %105 = vector.broadcast %cst_31 : f32 to vector<128x1xf32>
    %106 = arith.divf %104, %105 : vector<128x1xf32>
    %107 = vector.broadcast %99 : vector<128x1xf32> to vector<128x128xf32>
    %108 = arith.subf %95, %107 : vector<128x128xf32>
    %cst_32 = arith.constant 9.99999974E-6 : f32
    %109 = vector.broadcast %cst_32 : f32 to vector<128x1xf32>
    %110 = arith.addf %106, %109 : vector<128x1xf32>
    %111 = math.rsqrt %110 : vector<128x1xf32>
    %112 = vector.broadcast %111 : vector<128x1xf32> to vector<128x128xf32>
    %113 = arith.mulf %108, %112 : vector<128x128xf32>
    %114 = vector.shape_cast %13 : vector<128xf32> to vector<1x128xf32>
    %115 = vector.broadcast %114 : vector<1x128xf32> to vector<128x128xf32>
    %116 = arith.mulf %113, %115 : vector<128x128xf32>
    %117 = vector.shape_cast %15 : vector<128xf32> to vector<1x128xf32>
    %118 = vector.broadcast %117 : vector<1x128xf32> to vector<128x128xf32>
    %119 = arith.addf %116, %118 : vector<128x128xf32>
    %120 = arith.truncf %119 : vector<128x128xf32> to vector<128x128xbf16>
    %c0_33 = arith.constant 0 : index
    %c0_34 = arith.constant 0 : index
    %c0_35 = arith.constant 0 : index
    %121 = vector.load %arg7[%c0_33, %c0_34, %c0_35] : memref<1x128x512xbf16, #tpu.memory_space<vmem>>, vector<1x128x512xbf16>
    %122 = vector.shape_cast %121 : vector<1x128x512xbf16> to vector<128x512xbf16>
    %cst_36 = arith.constant dense<0.000000e+00> : vector<128x512xf32>
    %123 = tpu.matmul %120, %122, %cst_36 {dimension_numbers = #tpu.dot_dimension_numbers<[1], [0], [0], [1], [0, 0, 1, 1], [], []>} : vector<128x128xbf16>, vector<128x512xbf16>, vector<128x512xf32> -> vector<128x512xf32>
    %c0_37 = arith.constant 0 : index
    %c0_38 = arith.constant 0 : index
    %c0_39 = arith.constant 0 : index
    %124 = vector.load %arg8[%c0_37, %c0_38, %c0_39] : memref<1x1x512xf32, #tpu.memory_space<vmem>>, vector<1x1x512xf32>
    %125 = vector.shape_cast %124 : vector<1x1x512xf32> to vector<1x512xf32>
    %126 = vector.broadcast %125 : vector<1x512xf32> to vector<128x512xf32>
    %127 = arith.addf %123, %126 : vector<128x512xf32>
    %cst_40 = arith.constant 5.000000e-01 : f32
    %128 = vector.broadcast %cst_40 : f32 to vector<128x512xf32>
    %129 = arith.mulf %128, %127 : vector<128x512xf32>
    %cst_41 = arith.constant 4.471500e-02 : f32
    %130 = vector.broadcast %cst_41 : f32 to vector<128x512xf32>
    %131 = arith.mulf %130, %127 : vector<128x512xf32>
    %132 = arith.mulf %131, %127 : vector<128x512xf32>
    %133 = arith.mulf %132, %127 : vector<128x512xf32>
    %134 = arith.addf %127, %133 : vector<128x512xf32>
    %cst_42 = arith.constant 0.797884583 : f32
    %135 = vector.broadcast %cst_42 : f32 to vector<128x512xf32>
    %136 = arith.mulf %135, %134 : vector<128x512xf32>
    %137 = math.tanh %136 : vector<128x512xf32>
    %cst_43 = arith.constant 1.000000e+00 : f32
    %138 = vector.broadcast %cst_43 : f32 to vector<128x512xf32>
    %139 = arith.addf %138, %137 : vector<128x512xf32>
    %140 = arith.mulf %129, %139 : vector<128x512xf32>
    %141 = arith.truncf %140 : vector<128x512xf32> to vector<128x512xbf16>
    %c0_44 = arith.constant 0 : index
    %c0_45 = arith.constant 0 : index
    %c0_46 = arith.constant 0 : index
    %142 = vector.load %arg9[%c0_44, %c0_45, %c0_46] : memref<1x512x128xbf16, #tpu.memory_space<vmem>>, vector<1x512x128xbf16>
    %143 = vector.shape_cast %142 : vector<1x512x128xbf16> to vector<512x128xbf16>
    %cst_47 = arith.constant dense<0.000000e+00> : vector<128x128xf32>
    %144 = tpu.matmul %141, %143, %cst_47 {dimension_numbers = #tpu.dot_dimension_numbers<[1], [0], [0], [1], [0, 0, 1, 1], [], []>} : vector<128x512xbf16>, vector<512x128xbf16>, vector<128x128xf32> -> vector<128x128xf32>
    %145 = vector.shape_cast %19 : vector<128xf32> to vector<1x128xf32>
    %146 = vector.broadcast %145 : vector<1x128xf32> to vector<128x128xf32>
    %147 = arith.addf %144, %146 : vector<128x128xf32>
    %148 = arith.addf %95, %147 : vector<128x128xf32>
    %149 = vector.shape_cast %148 : vector<128x128xf32> to vector<2x64x128xf32>
    %c0_48 = arith.constant 0 : index
    %c0_49 = arith.constant 0 : index
    %c0_50 = arith.constant 0 : index
    %150 = vector.load %arg11[%c0_48, %c0_49, %c0_50] : memref<2x64x128xf32, #tpu.memory_space<vmem>>, vector<2x64x128xf32>
    tpu.vector_store %arg11[%c0_48, %c0_49, %c0_50], %149 {strides = array<i32>} : memref<2x64x128xf32, #tpu.memory_space<vmem>>, vector<2x64x128xf32>,
    return
  }
  func.func @transform_0(%arg0: i32, %arg1: i32) -> (i32, i32, i32) {
    %c0_i32 = arith.constant 0 : i32
    %c0_i32_0 = arith.constant 0 : i32
    %c0_i32_1 = arith.constant 0 : i32
    return %arg0, %c0_i32, %c0_i32_0 : i32, i32, i32
  }
  func.func @transform_1(%arg0: i32, %arg1: i32) -> (i32, i32, i32) {
    %c0_i32 = arith.constant 0 : i32
    %c0_i32_0 = arith.constant 0 : i32
    %c0_i32_1 = arith.constant 0 : i32
    return %arg0, %c0_i32, %c0_i32_0 : i32, i32, i32
  }
  func.func @transform_2(%arg0: i32, %arg1: i32) -> (i32, i32, i32) {
    %c0_i32 = arith.constant 0 : i32
    %c0_i32_0 = arith.constant 0 : i32
    %c0_i32_1 = arith.constant 0 : i32
    return %arg1, %c0_i32, %c0_i32_0 : i32, i32, i32
  }
  func.func @transform_3(%arg0: i32, %arg1: i32) -> (i32, i32, i32) {
    %c0_i32 = arith.constant 0 : i32
    %c0_i32_0 = arith.constant 0 : i32
    %c0_i32_1 = arith.constant 0 : i32
    return %arg1, %c0_i32, %c0_i32_0 : i32, i32, i32
  }
  func.func @transform_4(%arg0: i32, %arg1: i32) -> (i32, i32, i32) {
    %c0_i32 = arith.constant 0 : i32
    %c0_i32_0 = arith.constant 0 : i32
    %c0_i32_1 = arith.constant 0 : i32
    return %arg1, %c0_i32, %c0_i32_0 : i32, i32, i32
  }
  func.func @transform_5(%arg0: i32, %arg1: i32) -> (i32, i32, i32) {
    %c0_i32 = arith.constant 0 : i32
    %c0_i32_0 = arith.constant 0 : i32
    %c0_i32_1 = arith.constant 0 : i32
    return %arg1, %c0_i32, %c0_i32_0 : i32, i32, i32
  }
  func.func @transform_6(%arg0: i32, %arg1: i32) -> (i32, i32, i32) {
    %c0_i32 = arith.constant 0 : i32
    %c0_i32_0 = arith.constant 0 : i32
    %c0_i32_1 = arith.constant 0 : i32
    return %arg1, %c0_i32, %c0_i32_0 : i32, i32, i32
  }
  func.func @transform_7(%arg0: i32, %arg1: i32) -> (i32, i32, i32) {
    %c0_i32 = arith.constant 0 : i32
    %c0_i32_0 = arith.constant 0 : i32
    %c0_i32_1 = arith.constant 0 : i32
    return %arg1, %c0_i32, %c0_i32_0 : i32, i32, i32
  }
  func.func @transform_8(%arg0: i32, %arg1: i32) -> (i32, i32, i32) {
    %c0_i32 = arith.constant 0 : i32
    %c0_i32_0 = arith.constant 0 : i32
    %c0_i32_1 = arith.constant 0 : i32
    return %arg1, %c0_i32, %c0_i32_0 : i32, i32, i32
  }
  func.func @transform_9(%arg0: i32, %arg1: i32) -> (i32, i32, i32) {
    %c0_i32 = arith.constant 0 : i32
    %c0_i32_0 = arith.constant 0 : i32
    %c0_i32_1 = arith.constant 0 : i32
    return %arg0, %c0_i32, %c0_i32_0 : i32, i32, i32
  }
}

</mosaic_0001>

<bundles_post_ra>
// kernel: chrombert_forward.1
= control target key start
LH: loop header
LB: loop body
LE: loop exit
PB: predicated region body
PF: predicated region fallthrough
CT: control target
= control target key end

     0   :  { %s22784_s0 = inlined_call_operand.hbm [shape: f32[4,64,128], index: 0, kind: input, shape index: {}, may-alias: {0,9}]   ;;  %s22785_s1 = inlined_call_operand.vmem [shape: f32[4,1,64], index: 1, kind: input, shape index: {}]   ;;  %s22786_s2 = inlined_call_operand.vmem [shape: bf16[2,128,384], index: 2, kind: input, shape index: {}]   ;;  %s22787_s3 = inlined_call_operand.vmem [shape: f32[2,1,384], index: 3, kind: input, shape index: {}]   ;;  %s22788_s4 = inlined_call_operand.vmem [shape: bf16[2,128,128], index: 4, kind: input, shape index: {}]   ;;  %s22789_s5 = inlined_call_operand.vmem [shape: bf16[2,128,512], index: 5, kind: input, shape index: {}]   ;;  %s22790_s6 = inlined_call_operand.vmem [shape: f32[2,1,512], index: 6, kind: input, shape index: {}]   ;;  %s22791_s7 = inlined_call_operand.vmem [shape: bf16[2,512,128], index: 7, kind: input, shape index: {}]   ;;  %s22792_s8 = inlined_call_operand.vmem [shape: f32[2,6,128], index: 8, kind: input, shape index: {}]   ;;  %s22793_s9 = inlined_call_operand.hbm [shape: f32[4,64,128], index: 9, kind: output, shape index: {}, may-alias: {0,9}]  }
   0x1   :  { %23022 = sst [smem:[#allocation77_spill]] %s22784_s0 }
   0x2   :  { %23023 = sst [smem:[#allocation78_spill]] %s22785_s1 }
   0x3   :  { %23024 = sst [smem:[#allocation79_spill]] %s22786_s2 }
   0x4   :  { %23025 = sst [smem:[#allocation80_spill]] %s22793_s9 }
   0x5   :  { %14 = vsyncpa [#allocation3], 0 }
   0x6   :  { %16 = vsyncpa [#allocation3 + $0x1], 0 }
   0x7   :  { %17 = vsyncpa [#allocation4], 0 }
   0x8   :  { %19 = vsyncpa [#allocation4 + $0x1], 0  ;;  %s16305_s30 = smov 0   ;;  %s16307_s10 = smov 0  }
   0x9   :  { %s16309_s11 = smov 0   ;;  %s16311_s12 = smov 0  }
   0xa   :  { %s16313_s13 = smov 0   ;;  %s16315_s14 = smov 0  }
   0xb   :  { %s16317_s15 = smov 0   ;;  %s16319_s16 = smov 0  }
   0xc LB: > { %23026 = sst [smem:[#allocation8_spill]] %s16213_s30  ;;  %s14352_s17 = sadd.s32 4294967295, %s16241_s16   ;;  %s16241_s16 = sphi %s16319_s16, %s25_s16   ;;  %s16237_s15 = sphi %s16317_s15, %s23624_s15   ;;  %s16233_s14 = sphi %s16315_s14, %s23623_s14   ;;  %s16229_s13 = sphi %s16313_s13, %s23622_s13   ;;  %s16225_s12 = sphi %s16311_s12, %s23621_s12   ;;  %s16221_s11 = sphi %s16309_s11, %s23620_s11   ;;  %s16217_s10 = sphi %s16307_s10, %s23619_s10   ;;  %s16213_s30 = sphi %s16305_s30, %s23618_s30  }
   0xd   : > { %23027 = sst [smem:[#allocation9_spill]] %s16217_s10  ;;  %s14353_s18 = sadd.s32 4294967294, %s16241_s16  }
   0xe   : > { %23028 = sst [smem:[#allocation10_spill]] %s16221_s11  ;;  %s34_s19 = sadd.s32 1, %s16233_s14 }
   0xf   : > { %23029 = sst [smem:[#allocation11_spill]] %s16233_s14  ;;  %s37_s20 = sadd.s32 1, %s16237_s15 }
  0x10   : > { %23030 = sst [smem:[#allocation12_spill]] %s16237_s15  ;;  %p35_p0 = scmp.ge.s32.totalorder %s34_s19, 2 }
  0x11   : > { %23031 = sst [smem:[#allocation13_spill]] %s16241_s16  ;;  %s44_s21 = sadd.s32 1, %s16221_s11 }
  0x12   : > { %p51_p1 = scmp.ne.s32.totalorder %s16221_s11, %s16217_s10  ;;  %p52_p2 = scmp.eq.s32.totalorder %s16241_s16, 0 }
  0x13   : > { %s23626_s19 = smov (%p35_p0, %s34_s19), 0  ;;  %s23628_s20 = smov (!%p35_p0, %s37_s20), %s16237_s15 }
  0x14   : > { %23032 = sst [smem:[#allocation14_spill]] %s23626_s19  ;;  %p16356_p3 = por %p52_p2, %p51_p1 }
  0x15   : > { %p57_p4 = scmp.ne.s32.totalorder %s16217_s10, %s16213_s30  ;;  %p39_p5 = scmp.ge.s32.totalorder %s23628_s20, 2 }
  0x16   : > { %p58_p6 = scmp.eq.s32.totalorder %s14352_s17, 0  ;;  %p289_p7 = scmp.eq.s32.totalorder %s14352_s17, 3 }
  0x17   : > { %p295_p8 = scmp.eq.s32.totalorder %s14353_s18, 3  ;;  %s23630_s20 = smov (%p39_p5, %s23628_s20), 0 }
  0x18   : > { %23034 = sst [smem:[#allocation15_spill]] %s23630_s20  ;;  %p16364_p9 = por %p58_p6, %p57_p4 }
  0x19   : > { %p16368_p10 = por %p289_p7, %p51_p1  ;;  %s41_s25 = ssub.s32 %s16237_s15, %s23630_s20 }
  0x1a   : > { %p16374_p11 = por %p295_p8, %p57_p4  ;;  %p42_p12 = scmp.eq.s32.totalorder %s41_s25, 0 }
  0x1b   : > { %s23036_s24 = scalar_select %p16368_p10, 1, 0 }
  0x1c   : > { %s23038_s26 = scalar_select %p16374_p11, 1, 0 }
  0x1d   : > { %23037 = sst [smem:[#allocation16_spill]] %s23036_s24  ;;  %p15331_p13 = scmp.lt.s32.totalorder %s16241_s16, 4 }
  0x1e   : > { %23039 = sst [smem:[#allocation17_spill]] %s23038_s26  ;;  %s315_s27 = sand.u32 1, %s16221_s11  }
  0x1f   : > { %s16381_s28 = scalar_select %p42_p12, %s16221_s11, %s44_s21  }
  0x20   : > { %s14356_s29 = sshll.u32 %s315_s27, 7  ;;  %s14671_s17 = sshll.u32 %s16237_s15, 11 }
  0x21   : > { %23040 = sst [smem:[#allocation18_spill]] %s16381_s28  ;;  %s23041_s0 = sld [smem:[#allocation77_spill]] }
  0x22   : > { %s319_s20 = scalar_lea.vmem [#allocation2], %s14356_s29  ;;  %p16393_p0 = pnand %p15331_p13, %p16356_p3 }
  0x23   : > { %s327_s30 = sshll.u32 %s319_s20, 4  ;;  %s16398_s21 = scalar_lea.sflag [#allocation3], %s315_s27  ;;  %s16389_s30 = int_to_ptr.vmem [resolvable:$true] %s327_s30 }
  0x24   : > { %p16115_p4 = pneg %p16393_p0 }
  0x27   : > { %s16387_s14 = scalar_lea.hbm %s23041_s0, %s14671_s17  ;;  %s16118_s22 = scalar_lea.hbm %s23041_s0, 4096 }
  0x28   : > { %s16113_s19 = scalar_lea.hbm %s16387_s14, 2048  ;;  %p16119_p3 = scmp.lt.u32.totalorder %s16387_s14, %s23041_s0 }
  0x29   : > { %p16114_p2 = scmp.ne.s32.totalorder %s16387_s14, %s16113_s19  ;;  %p16120_p7 = scmp.lt.u32.totalorder %s16118_s22, %s16113_s19 }
  0x2a   : > { %p16122_p12 = scmp.lt.u32.totalorder %s16113_s19, %s16387_s14 }
  0x2b   : > { %p16116_p5 = pnand %p16115_p4, %p16114_p2  ;;  %p16121_p8 = por %p16120_p7, %p16119_p3 }
  0x2d   : > { %p16117_p6 = pneg %p16116_p5  ;;  %p16123_p13 = por %p16122_p12, %p16121_p8 }
  0x2f   : > { %p16124_p1 = pnand %p16123_p13, %p16117_p6 }
  0x31   : > { %16127 = shalt.err (!%p16124_p1)
}
  0x32   : > { %s16128_s27 = scalar_lea.vmem %s16389_s30, 2048  ;;  %s16243_s20 = smov [#allocation2]  }
  0x33   : > { %p16129_p2 = scmp.ne.s32.totalorder %s16389_s30, %s16128_s27  ;;  %s16133_s29 = sshll.u32 %s16243_s20, 4  ;;  %s16134_s29 = int_to_ptr.vmem [resolvable:$false] %s16133_s29 }
  0x34   : > { %s16135_s17 = scalar_lea.vmem %s16134_s29, 4096  ;;  %p16136_p10 = scmp.lt.s32.totalorder %s16389_s30, %s16134_s29 }
  0x35   : > { %p16131_p5 = pnand %p16129_p2, %p16115_p4  ;;  %p16137_p3 = scmp.lt.s32.totalorder %s16135_s17, %s16128_s27 }
  0x37   : > { %p16132_p11 = pneg %p16131_p5  ;;  %p16138_p7 = por %p16137_p3, %p16136_p10 }
  0x39   : > { %p16139_p8 = pnand %p16138_p7, %p16132_p11 }
  0x3b   : > { %16142 = shalt.err (!%p16139_p8)
}
  0x3c   : > { %s16244_s19 = smov 128   ;;  %s16245_s22 = smov 8  }
  0x3d   : > { %15326 = dma.hbm_to_vmem [thread:$0]  (!%p16393_p0), %s16387_s14, 2048, %s16389_s30, %s16398_s21, %s16244_s19, %s16244_s19, %s16245_s22  }
  0x3e   : > { %p396_p1 = scmp.lt.s32.totalorder %s16241_s16, 5  ;;  %p23043_p4 = scmp.ge.s32.totalorder %s16241_s16, 1 }
  0x40   : > { %p397_p6 = pnand %p23043_p4, %p396_p1 }
  0x42   : > { %400 = sbr.rel (%p397_p6) target bundleno = 3145 (0xc49), region = 56 }
  0x49   : > { %s16430_s18 = sand.u32 1, %s16217_s10  }
  0x4a   : > { %s14361_s27 = sshll.u32 %s16430_s18, 7  ;;  %s403_s20 = scalar_lea.sflag [#allocation3], %s16430_s18 }
  0x4b   : > { %s16434_s29 = scalar_lea.vmem [#allocation2], %s14361_s27 }
  0x4c   : > { %16204 = dma.done.wait (%p16364_p9), %s403_s20, 2048  }
  0x4d   : > { %16206 = vsyncadd (%p16364_p9), %s403_s20, 4294965248  ;;  %s14363_s30 = sshll.u32 %s16229_s13, 1  ;;  %p483_p11 = scmp.lt.s32.totalorder %s16225_s12, 1 }
  0x4e   : > { %p479_p10 = scmp.lt.s32.totalorder %s14363_s30, 3  ;;  %s23044_s1 = sld [smem:[#allocation78_spill]] }
  0x4f   : > { %s484_s14 = scalar_select %p483_p11, %s16225_s12, 1 }
  0x50   : > { %s23632_s30 = smov (!%p479_p10, %s14363_s30), 3  ;;  %s23045_s2 = sld [smem:[#allocation79_spill]] }
  0x51   : > { %s15317_s19 = smul.u32 192, %s484_s14  ;;  %s14672_s22 = sshll.u32 %s484_s14, 6 }
  0x52   : > { %s15318_s0 = smul.u32 3, %s484_s14  ;;  %s16451_s23 = scalar_lea.vmem %s22788_s4, %s14672_s22 }
  0x53   : > { %s14673_s26 = sshll.u32 %s484_s14, 8  ;;  %s14369_s24 = sshll.u32 %s484_s14, 2 }
  0x54   : > { %s16446_s17 = scalar_lea.vmem %s23044_s1, %s23632_s30  ;;  %s16461_s25 = scalar_lea.vmem %s22787_s3, %s15318_s0 }
  0x55   : > { %s16466_s1 = scalar_lea.vmem %s22789_s5, %s14673_s26  ;;  %s16471_s22 = scalar_lea.vmem %s22791_s7, %s14673_s26 }
  0x56   : > { %s16456_s10 = scalar_lea.vmem %s23045_s2, %s15317_s19  ;;  %s16476_s20 = scalar_lea.vmem %s22790_s6, %s14369_s24 }
  0x57   : > { %s14372_s2 = sshll.u32 %s484_s14, 3  ;;  %s16483_s30 = scalar_lea.vmem [#allocation5], %s14361_s27 }
  0x58   : > { %s16481_s16 = scalar_lea.vmem %s22792_s8, %s14372_s2  ;;  %p14373_p9 = scmp.ne.s32.totalorder %s16225_s12, 0 }
  0x59   : > { %v521_v0 = vld [vmem:[%s16434_s29] sm:$0xff] (!%p14373_p9)  ;;  %v522_v1 = vld [vmem:[%s16434_s29 + $0x8] sm:$0xff] (!%p14373_p9)  ;;  %v523_v2 = vld [vmem:[%s16434_s29 + $0x10] sm:$0xff] (!%p14373_p9) }
  0x5a   : > { %520 = sbr.rel (%p14373_p9) target bundleno = 98 (0x62), region = 64  ;;  %537 = vst [vmem:[%s16483_s30] sm:$0xff] (!%p14373_p9), %v521_v0  ;;  %538 = vst [vmem:[%s16483_s30 + $0x8] sm:$0xff] (!%p14373_p9), %v522_v1  ;;  %v524_v3 = vld [vmem:[%s16434_s29 + $0x18] sm:$0xff] (!%p14373_p9)  ;;  %v525_v4 = vld [vmem:[%s16434_s29 + $0x20] sm:$0xff] (!%p14373_p9) }
  0x5b   : > { %539 = vst [vmem:[%s16483_s30 + $0x10] sm:$0xff] (!%p14373_p9), %v523_v2  ;;  %v526_v5 = vld [vmem:[%s16434_s29 + $0x28] sm:$0xff] (!%p14373_p9)  ;;  %540 = vst [vmem:[%s16483_s30 + $0x18] sm:$0xff] (!%p14373_p9), %v524_v3  ;;  %v527_v6 = vld [vmem:[%s16434_s29 + $0x30] sm:$0xff] (!%p14373_p9) }
  0x5c   : > { %541 = vst [vmem:[%s16483_s30 + $0x20] sm:$0xff] (!%p14373_p9), %v525_v4  ;;  %542 = vst [vmem:[%s16483_s30 + $0x28] sm:$0xff] (!%p14373_p9), %v526_v5  ;;  %v528_v7 = vld [vmem:[%s16434_s29 + $0x38] sm:$0xff] (!%p14373_p9)  ;;  %v529_v8 = vld [vmem:[%s16434_s29 + $0x40] sm:$0xff] (!%p14373_p9) }
  0x5d   : > { %543 = vst [vmem:[%s16483_s30 + $0x30] sm:$0xff] (!%p14373_p9), %v527_v6  ;;  %544 = vst [vmem:[%s16483_s30 + $0x38] sm:$0xff] (!%p14373_p9), %v528_v7  ;;  %v530_v9 = vld [vmem:[%s16434_s29 + $0x48] sm:$0xff] (!%p14373_p9)  ;;  %v531_v10 = vld [vmem:[%s16434_s29 + $0x50] sm:$0xff] (!%p14373_p9) }
  0x5e   : > { %545 = vst [vmem:[%s16483_s30 + $0x40] sm:$0xff] (!%p14373_p9), %v529_v8  ;;  %v532_v11 = vld [vmem:[%s16434_s29 + $0x58] sm:$0xff] (!%p14373_p9)  ;;  %546 = vst [vmem:[%s16483_s30 + $0x48] sm:$0xff] (!%p14373_p9), %v530_v9  ;;  %v533_v12 = vld [vmem:[%s16434_s29 + $0x60] sm:$0xff] (!%p14373_p9) }
  0x5f   : > { %547 = vst [vmem:[%s16483_s30 + $0x50] sm:$0xff] (!%p14373_p9), %v531_v10  ;;  %548 = vst [vmem:[%s16483_s30 + $0x58] sm:$0xff] (!%p14373_p9), %v532_v11  ;;  %v534_v13 = vld [vmem:[%s16434_s29 + $0x68] sm:$0xff] (!%p14373_p9)  ;;  %v535_v14 = vld [vmem:[%s16434_s29 + $0x70] sm:$0xff] (!%p14373_p9) }
  0x60   : > { %549 = vst [vmem:[%s16483_s30 + $0x60] sm:$0xff] (!%p14373_p9), %v533_v12  ;;  %550 = vst [vmem:[%s16483_s30 + $0x68] sm:$0xff] (!%p14373_p9), %v534_v13  ;;  %v536_v15 = vld [vmem:[%s16434_s29 + $0x78] sm:$0xff] (!%p14373_p9) }
  0x61   : > { %551 = vst [vmem:[%s16483_s30 + $0x70] sm:$0xff] %v535_v14  ;;  %552 = vst [vmem:[%s16483_s30 + $0x78] sm:$0xff] %v536_v15 }
  0x62 PF: > { %v553_v16 = vld [vmem:[%s16483_s30] sm:$0xff]  ;;  %v554_v18 = vld [vmem:[%s16483_s30 + $0x8] sm:$0xff]  ;;  %v15536_v12 = vld [vmem:[%s16456_s10 + $0x30] ss:$12 sps:$4 sm:$0xff]   ;;  %s16247_s2 = smov 64   ;;  %s16249_s12 = smov 32  }
  0x63   : > { %v555_v17 = vld [vmem:[%s16483_s30 + $0x10] sm:$0xff]  ;;  %572 = vadd.xlane.f32.xlu0 %v553_v16  ;;  %v556_v19 = vld [vmem:[%s16483_s30 + $0x18] sm:$0xff]  ;;  %v15529_v29 = vld [vmem:[%s16456_s10] ss:$12 sps:$4 sm:$0xff]   ;;  %vm7654_vm0 = vcmask 261120   ;;  %vm8443_vm1 = vcmask 523264  }
  0x64   : > { %576 = vadd.xlane.f32.xlu1 %v555_v17  ;;  %v557_v20 = vld [vmem:[%s16483_s30 + $0x20] sm:$0xff]  ;;  %v558_v21 = vld [vmem:[%s16483_s30 + $0x28] sm:$0xff]  ;;  %vm12196_vm2 = vcmask 785408   ;;  %s14676_s24 = sshll.u32 %s16229_s13, 11  ;;  %s14175_s26 = sshll.u32 %s16483_s30, 4  ;;  %s22727_s26 = int_to_ptr.vmem [resolvable:$true] %s14175_s26 }
  0x65   : > { %v559_v22 = vld [vmem:[%s16483_s30 + $0x30] sm:$0xff]  ;;  %v16526_v23 = vld [vmem:[%s16483_s30 + $0x38] sm:$0xff]  ;;  %s23610_s14 = sld [smem:[#allocation80_spill]]  ;;  %s16143_s13 = scalar_lea.vmem %s22727_s26, 2048 }
  0x66   : > { %v16529_v24 = vld [vmem:[%s16483_s30 + $0x40] sm:$0xff]  ;;  %v16532_v25 = vld [vmem:[%s16483_s30 + $0x48] sm:$0xff]  ;;  %p16144_p0 = scmp.ne.s32.totalorder %s22727_s26, %s16143_s13  ;;  %s16252_s21 = smov [#allocation5]  }
  0x67   : > { %574 = vadd.xlane.f32.xlu0 %v554_v18  ;;  %v16536_v26 = vld [vmem:[%s16483_s30 + $0x50] sm:$0xff]  ;;  %v16539_v27 = vld [vmem:[%s16483_s30 + $0x58] sm:$0xff]  ;;  %s16147_s15 = sshll.u32 %s16252_s21, 4  ;;  %s16148_s15 = int_to_ptr.vmem [resolvable:$false] %s16147_s15 }
  0x68   : > { %578 = vadd.xlane.f32.xlu1 %v556_v19  ;;  %v15527_v28 = vld [vmem:[%s16456_s10 + $0x4] ss:$12 sps:$4 sm:$0xff]   ;;  %v15530_v30 = vld [vmem:[%s16456_s10 + $0x1c] ss:$12 sps:$4 sm:$0xff]   ;;  %v15533_v6 = vld [vmem:[%s16456_s10 + $0x34] ss:$12 sps:$4 sm:$0xff]   ;;  %p16150_p5 = scmp.lt.s32.totalorder %s22727_s26, %s16148_s15 }
  0x69   : > { %974 = vmatprep.subr.bf16.mxu0 %v15527_v28  ;;  %v16557_v43 = vld [vmem:[%s16483_s30 + $0x60] sm:$0xff]  ;;  %v16567_v50 = vld [vmem:[%s16483_s30 + $0x68] sm:$0xff]  ;;  %v16575_v57 = vld [vmem:[%s16483_s30 + $0x70] sm:$0xff]  ;;  %s16149_s28 = scalar_lea.vmem %s16148_s15, 4096 }
  0x6a   : > { %975 = vmatpush1.bf16.msra.mxu0 %v15529_v29  ;;  %v15532_v1 = vld [vmem:[%s16456_s10 + $0x18] ss:$12 sps:$4 sm:$0xff]   ;;  %v15535_v7 = vld [vmem:[%s16456_s10 + $0x8] ss:$12 sps:$4 sm:$0xff]   ;;  %v15544_v28 = vld [vmem:[%s16456_s10 + $0x60] ss:$12 sps:$4 sm:$0xff]   ;;  %p16151_p3 = scmp.lt.s32.totalorder %s16149_s28, %s16143_s13 }
  0x6b   : > { %580 = vadd.xlane.f32.xlu0 %v557_v20  ;;  %976 = vmatprep.subr.bf16.mxu0 %v15530_v30  ;;  %v16586_v2 = vld [vmem:[%s16483_s30 + $0x78] sm:$0xff] }
  0x6c   : > { %582 = vadd.xlane.f32.xlu1 %v558_v21  ;;  %14965 = vmatprep.subr.bf16.mxu1 %v15535_v7  ;;  %v15537_v15 = vld [vmem:[%s16456_s10 + $0x4c] ss:$12 sps:$4 sm:$0xff]   ;;  %v15545_v29 = vld [vmem:[%s16456_s10 + $0x7c] ss:$12 sps:$4 sm:$0xff]   ;;  %p16152_p7 = por %p16151_p3, %p16150_p5 }
  0x6d   : > { %14966 = vmatpush3.bf16.msra.mxu1 %v15535_v7  ;;  %v15547_v30 = vld [vmem:[%s16456_s10 + $0x50] ss:$12 sps:$4 sm:$0xff]  }
  0x6e   : > { %977 = vmatpush1.bf16.msra.mxu0 %v15532_v1 }
  0x6f   : > { %584 = vadd.xlane.f32.xlu0 %v559_v22  ;;  %978 = vmatprep.subr.bf16.mxu0 %v15533_v6 }
  0x70   : > { %586 = vadd.xlane.f32.xlu1 %v16526_v23 }
  0x72   : > { %979 = vmatpush1.bf16.msra.mxu0 %v15536_v12 }
  0x73   : > { %588 = vadd.xlane.f32.xlu0 %v16529_v24  ;;  %980 = vmatprep.subr.bf16.mxu0 %v15537_v15 }
  0x74   : > { %590 = vadd.xlane.f32.xlu1 %v16532_v25 }
  0x77   : > { %592 = vadd.xlane.f32.xlu0 %v16536_v26 }
  0x78   : > { %594 = vadd.xlane.f32.xlu1 %v16539_v27 }
  0xf0   : > { %v573_v31 = vpop.xlane.xlu0 %572 }
  0xf1   : > { %v577_v32 = vpop.xlane.xlu1 %576  ;;  %v605_v33 = vmul.f32 0.0078125, %v573_v31 }
  0xf2   : > { %v607_v35 = vmul.f32 0.0078125, %v577_v32  ;;  %v15549_v32 = vld [vmem:[%s16456_s10 + $0x94] ss:$12 sps:$4 sm:$0xff]  }
  0xf3   : > { %v16548_v34 = vsub.f32 %v553_v16, %v605_v33  ;;  %v15539_v16 = vld [vmem:[%s16456_s10 + $0x20] ss:$12 sps:$4 sm:$0xff]   ;;  %v15551_v33 = vld [vmem:[%s16456_s10 + $0x68] ss:$12 sps:$4 sm:$0xff]  }
  0xf4   : > { %v575_v36 = vpop.xlane.xlu0 %574  ;;  %v16554_v42 = vsub.f32 %v555_v17, %v607_v35  ;;  %14967 = vmatprep.subr.bf16.mxu1 %v15539_v16  ;;  %v15552_v35 = vld [vmem:[%s16456_s10 + $0x90] ss:$12 sps:$4 sm:$0xff]  }
  0xf5   : > { %v579_v37 = vpop.xlane.xlu1 %578  ;;  %v606_v38 = vmul.f32 0.0078125, %v575_v36  ;;  %v637_v39 = vmul.f32 %v16548_v34, %v16548_v34  ;;  %14968 = vmatpush3.bf16.msra.mxu1 %v15539_v16  ;;  %v15553_v36 = vld [vmem:[%s16456_s10 + $0xac] ss:$12 sps:$4 sm:$0xff]  }
  0xf6   : > { %v608_v41 = vmul.f32 0.0078125, %v579_v37  ;;  %v639_v47 = vmul.f32 %v16554_v42, %v16554_v42  ;;  %v15555_v37 = vld [vmem:[%s16456_s10 + $0x80] ss:$12 sps:$4 sm:$0xff]  }
  0xf7   : > { %653 = vadd.xlane.f32.xlu0 %v637_v39  ;;  %v16552_v40 = vsub.f32 %v554_v18, %v606_v38  ;;  %v15556_v38 = vld [vmem:[%s16456_s10 + $0xa8] ss:$12 sps:$4 sm:$0xff]   ;;  %v15557_v39 = vld [vmem:[%s16456_s10 + $0x98] ss:$12 sps:$4 sm:$0xff]  }
  0xf8   : > { %v581_v44 = vpop.xlane.xlu0 %580  ;;  %v16564_v49 = vsub.f32 %v556_v19, %v608_v41  ;;  %v22807_v41 = vmov 0  }
  0xf9   : > { %v583_v45 = vpop.xlane.xlu1 %582  ;;  %v638_v46 = vmul.f32 %v16552_v40, %v16552_v40  ;;  %v609_v48 = vmul.f32 0.0078125, %v581_v44  ;;  %1006 = vmatprep.mubr.bf16.mxu0 %v22807_v41  ;;  %v15558_v44 = vld [vmem:[%s16456_s10 + $0xb0] ss:$12 sps:$4 sm:$0xff]  }
  0xfa   : > { %v610_v53 = vmul.f32 0.0078125, %v583_v45  ;;  %v640_v54 = vmul.f32 %v16564_v49, %v16564_v49 }
  0xfb   : > { %596 = vadd.xlane.f32.xlu0 %v16557_v43  ;;  %655 = vadd.xlane.f32.xlu1 %v638_v46  ;;  %v16572_v56 = vsub.f32 %v557_v20, %v609_v48 }
  0xfc   : > { %v585_v51 = vpop.xlane.xlu0 %584  ;;  %v16577_v60 = vsub.f32 %v558_v21, %v610_v53  ;;  %v15540_v21 = vld [vmem:[%s16456_s10 + $0x48] ss:$12 sps:$4 sm:$0xff]  }
  0xfd   : > { %v587_v52 = vpop.xlane.xlu1 %586  ;;  %v611_v55 = vmul.f32 0.0078125, %v585_v51  ;;  %v641_v62 = vmul.f32 %v16572_v56, %v16572_v56  ;;  %981 = vmatpush1.bf16.msra.mxu0 %v15540_v21 }
  0xfe   : > { %v612_v59 = vmul.f32 0.0078125, %v587_v52  ;;  %v642_v4 = vmul.f32 %v16577_v60, %v16577_v60  ;;  %v749_v52 = vlaneseq }
  0xff   : > { %657 = vadd.xlane.f32.xlu0 %v639_v47  ;;  %598 = vadd.xlane.f32.xlu1 %v16567_v50  ;;  %v16582_v0 = vsub.f32 %v559_v22, %v611_v55  ;;  %v15541_v22 = vld [vmem:[%s16456_s10 + $0x64] ss:$12 sps:$4 sm:$0xff]  }
 0x100   : > { %v589_v58 = vpop.xlane.xlu0 %588  ;;  %v16591_v5 = vsub.f32 %v16526_v23, %v612_v59  ;;  %v15543_v23 = vld [vmem:[%s16456_s10 + $0x38] ss:$12 sps:$4 sm:$0xff]   ;;  %982 = vmatprep.subr.bf16.mxu0 %v15541_v22 }
 0x101   : > { %v591_v61 = vpop.xlane.xlu1 %590  ;;  %v613_v63 = vmul.f32 0.0078125, %v589_v58  ;;  %v643_v8 = vmul.f32 %v16582_v0, %v16582_v0  ;;  %14969 = vmatprep.subr.bf16.mxu1 %v15543_v23  ;;  %983 = vmatpush1.bf16.msra.mxu0 %v15544_v28 }
 0x102   : > { %v614_v9 = vmul.f32 0.0078125, %v591_v61  ;;  %v644_v14 = vmul.f32 %v16591_v5, %v16591_v5  ;;  %14970 = vmatpush3.bf16.msra.mxu1 %v15543_v23  ;;  %984 = vmatprep.subr.bf16.mxu0 %v15545_v29 }
 0x103   : > { %600 = vadd.xlane.f32.xlu0 %v16575_v57  ;;  %659 = vadd.xlane.f32.xlu1 %v640_v54  ;;  %v16599_v11 = vsub.f32 %v16529_v24, %v613_v63 }
 0x104   : > { %v593_v3 = vpop.xlane.xlu0 %592  ;;  %v16609_v19 = vsub.f32 %v16532_v25, %v614_v9  ;;  %14971 = vmatprep.subr.bf16.mxu1 %v15547_v30 }
 0x105   : > { %v615_v10 = vmul.f32 0.0078125, %v593_v3  ;;  %v595_v13 = vpop.xlane.xlu1 %594  ;;  %v645_v17 = vmul.f32 %v16599_v11, %v16599_v11 }
 0x106   : > { %v616_v18 = vmul.f32 0.0078125, %v595_v13  ;;  %v646_v24 = vmul.f32 %v16609_v19, %v16609_v19  ;;  %14972 = vmatpush3.bf16.msra.mxu1 %v15547_v30  ;;  %v571_v13 = vld [vmem:[%s16481_s16] sm:$0x3f] }
 0x107   : > { %602 = vadd.xlane.f32.xlu1 %v16586_v2  ;;  %661 = vadd.xlane.f32.xlu0 %v641_v62  ;;  %v16612_v20 = vsub.f32 %v16536_v26, %v615_v10  ;;  %v16642_v62 = vshrl.u32 %v749_v52, 7 }
 0x108   : > { %v16622_v26 = vsub.f32 %v16539_v27, %v616_v18  ;;  %v15548_v27 = vld [vmem:[%s16456_s10 + $0x78] ss:$12 sps:$4 sm:$0xff]   ;;  %14973 = vmatprep.subr.bf16.mxu1 %v15551_v33  ;;  %s16248_s10 = smov 96  }
 0x109   : > { %v647_v25 = vmul.f32 %v16612_v20, %v16612_v20  ;;  %985 = vmatpush1.bf16.msra.mxu0 %v15548_v27  ;;  %23046 = vst [vmem:[#allocation19_spill] sm:$0xff] %v16642_v62  ;;  %v16663_v22 = vsub.s32 1, %v16642_v62 }
 0x10a   : > { %v648_v31 = vmul.f32 %v16622_v26, %v16622_v26  ;;  %986 = vmatprep.subr.bf16.mxu0 %v15549_v32  ;;  %14974 = vmatpush3.bf16.msra.mxu1 %v15551_v33 }
 0x10b   : > { %663 = vadd.xlane.f32.xlu1 %v642_v4  ;;  %665 = vadd.xlane.f32.xlu0 %v643_v8  ;;  %23048 = vst [vmem:[#allocation21_spill] sm:$0xff] %v16663_v22  ;;  %v16673_v32 = vrot.slane %v571_v13, %v16663_v22 }
 0x10c   : > { %14975 = vmatprep.subr.bf16.mxu1 %v15555_v37 }
 0x10d   : > { %987 = vmatpush1.bf16.msra.mxu0 %v15552_v35 }
 0x10e   : > { %988 = vmatprep.subr.bf16.mxu0 %v15553_v36  ;;  %14976 = vmatpush3.bf16.msra.mxu1 %v15555_v37 }
 0x10f   : > { %667 = vadd.xlane.f32.xlu1 %v644_v14  ;;  %669 = vadd.xlane.f32.xlu0 %v645_v17 }
 0x110   : > { %14977 = vmatprep.subr.bf16.mxu1 %v15557_v39 }
 0x111   : > { %989 = vmatpush1.bf16.msra.mxu0 %v15556_v38 }
 0x112   : > { %14978 = vmatpush3.bf16.msra.mxu1 %v15557_v39 }
 0x113   : > { %671 = vadd.xlane.f32.xlu1 %v646_v24  ;;  %673 = vadd.xlane.f32.xlu0 %v647_v25 }
 0x114   : > { %14979 = vmatprep.subr.bf16.mxu1 %v15558_v44 }
 0x116   : > { %14980 = vmatpush3.bf16.msra.mxu1 %v15558_v44 }
 0x117   : > { %675 = vadd.xlane.f32.xlu1 %v648_v31 }
 0x184   : > { %v654_v45 = vpop.xlane.xlu0 %653 }
 0x185   : > { %v685_v46 = vmul.f32 0.0078125, %v654_v45 }
 0x187   : > { %v701_v47 = vadd.f32 1e-05, %v685_v46 }
 0x188   : > { %v656_v48 = vpop.xlane.xlu1 %655  ;;  %v597_v51 = vpop.xlane.xlu0 %596 }
 0x189   : > { %15647 = vrsqrt.f32 %v701_v47  ;;  %v686_v53 = vmul.f32 0.0078125, %v656_v48  ;;  %v617_v54 = vmul.f32 0.0078125, %v597_v51 }
 0x18b   : > { %v702_v55 = vadd.f32 1e-05, %v686_v53  ;;  %v16640_v58 = vsub.f32 %v16557_v43, %v617_v54  ;;  %v16650_v43 = vsub.s32 0, %v16642_v62 }
 0x18c   : > { %v599_v59 = vpop.xlane.xlu1 %598  ;;  %v658_v61 = vpop.xlane.xlu0 %657 }
 0x18d   : > { %15649 = vrsqrt.f32 %v702_v55  ;;  %v618_v63 = vmul.f32 0.0078125, %v599_v59  ;;  %v687_v1 = vmul.f32 0.0078125, %v658_v61  ;;  %v649_v3 = vmul.f32 %v16640_v58, %v16640_v58  ;;  %23047 = vst [vmem:[#allocation20_spill] sm:$0xff] %v16650_v43 }
 0x18e   : > { %v16660_v21 = vrot.slane %v571_v13, %v16650_v43 }
 0x18f   : > { %v703_v4 = vadd.f32 1e-05, %v687_v1  ;;  %677 = vadd.xlane.f32.xlu0 %v649_v3  ;;  %v16647_v6 = vsub.f32 %v16567_v50, %v618_v63 }
 0x190   : > { %v660_v7 = vpop.xlane.xlu1 %659  ;;  %v601_v8 = vpop.xlane.xlu0 %600 }
 0x191   : > { %15651 = vrsqrt.f32 %v703_v4  ;;  %v688_v9 = vmul.f32 0.0078125, %v660_v7  ;;  %v619_v10 = vmul.f32 0.0078125, %v601_v8  ;;  %v650_v12 = vmul.f32 %v16647_v6, %v16647_v6 }
 0x193   : > { %v15648_v14 = vpop.eup %15647  ;;  %v704_v15 = vadd.f32 1e-05, %v688_v9  ;;  %679 = vadd.xlane.f32.xlu1 %v650_v12  ;;  %v16656_v16 = vsub.f32 %v16575_v57, %v619_v10 }
 0x194   : > { %v603_v50 = vpop.xlane.xlu1 %602  ;;  %v662_v17 = vpop.xlane.xlu0 %661  ;;  %v733_v18 = vmul.f32 %v15648_v14, %v16548_v34 }
 0x195   : > { %15653 = vrsqrt.f32 %v704_v15  ;;  %v620_v23 = vmul.f32 0.0078125, %v603_v50  ;;  %v689_v24 = vmul.f32 0.0078125, %v662_v17  ;;  %v651_v25 = vmul.f32 %v16656_v16, %v16656_v16 }
 0x196   : > { %v753_v27 = vmul.f32 %v16660_v21, %v733_v18 }
 0x197   : > { %v15650_v28 = vpop.eup %15649  ;;  %v705_v29 = vadd.f32 1e-05, %v689_v24  ;;  %681 = vadd.xlane.f32.xlu0 %v651_v25  ;;  %v16668_v57 = vsub.f32 %v16586_v2, %v620_v23 }
 0x198   : > { %v664_v30 = vpop.xlane.xlu1 %663  ;;  %v666_v34 = vpop.xlane.xlu0 %665  ;;  %v734_v31 = vmul.f32 %v15650_v28, %v16552_v40  ;;  %v773_v40 = vadd.f32 %v16673_v32, %v753_v27 }
 0x199   : > { %15655 = vrsqrt.f32 %v705_v29  ;;  %v690_v33 = vmul.f32 0.0078125, %v664_v30  ;;  %v691_v35 = vmul.f32 0.0078125, %v666_v34  ;;  %v652_v36 = vmul.f32 %v16668_v57, %v16668_v57 }
 0x19a   : > { %v754_v37 = vmul.f32 %v16660_v21, %v734_v31 }
 0x19b   : > { %v15652_v38 = vpop.eup %15651  ;;  %v706_v2 = vadd.f32 1e-05, %v690_v33  ;;  %v707_v39 = vadd.f32 1e-05, %v691_v35  ;;  %683 = vadd.xlane.f32.xlu1 %v652_v36 }
 0x19c   : > { %v668_v44 = vpop.xlane.xlu1 %667  ;;  %v670_v45 = vpop.xlane.xlu0 %669  ;;  %v774_v46 = vadd.f32 %v16673_v32, %v754_v37  ;;  %v735_v47 = vmul.f32 %v15652_v38, %v16554_v42 }
 0x19d   : > { %15657 = vrsqrt.f32 %v706_v2  ;;  %v692_v48 = vmul.f32 0.0078125, %v668_v44  ;;  %v693_v51 = vmul.f32 0.0078125, %v670_v45 }
 0x19e   : > { %15659 = vrsqrt.f32 %v707_v39  ;;  %v789_v52 = vpack.c.bf16 %v774_v46, %v773_v40  ;;  %v755_v1 = vmul.f32 %v16660_v21, %v735_v47 }
 0x19f   : > { %v15654_v53 = vpop.eup %15653  ;;  %v708_v54 = vadd.f32 1e-05, %v692_v48  ;;  %v709_v55 = vadd.f32 1e-05, %v693_v51 }
 0x1a0   : > { %v672_v59 = vpop.xlane.xlu1 %671  ;;  %1007 = vmatmul.mubr.bf16.vlgmr.msra.gmra.mrb[0].mxu0 %v789_v52  ;;  %14981 = vmatprep.mubr.bf16.mxu1 %v789_v52  ;;  %v674_v61 = vpop.xlane.xlu0 %673  ;;  %v736_v63 = vmul.f32 %v15654_v53, %v16564_v49  ;;  %v775_v12 = vadd.f32 %v16673_v32, %v755_v1 }
 0x1a1   : > { %15661 = vrsqrt.f32 %v708_v54  ;;  %v694_v3 = vmul.f32 0.0078125, %v672_v59  ;;  %v695_v4 = vmul.f32 0.0078125, %v674_v61  ;;  %1016 = vmatprep.mubr.bf16.mxu0 %v22807_v41 }
 0x1a2   : > { %15663 = vrsqrt.f32 %v709_v55  ;;  %v756_v42 = vmul.f32 %v16660_v21, %v736_v63 }
 0x1a3   : > { %v15656_v7 = vpop.eup %15655  ;;  %v710_v8 = vadd.f32 1e-05, %v694_v3  ;;  %v711_v9 = vadd.f32 1e-05, %v695_v4 }
 0x1a4   : > { %v676_v10 = vpop.xlane.xlu1 %675  ;;  %v776_v13 = vadd.f32 %v16673_v32, %v756_v42  ;;  %v737_v49 = vmul.f32 %v15656_v7, %v16572_v56 }
 0x1a5   : > { %15665 = vrsqrt.f32 %v710_v8  ;;  %v696_v14 = vmul.f32 0.0078125, %v676_v10 }
 0x1a6   : > { %15667 = vrsqrt.f32 %v711_v9  ;;  %v790_v15 = vpack.c.bf16 %v776_v13, %v775_v12  ;;  %v757_v24 = vmul.f32 %v16660_v21, %v737_v49 }
 0x1a7   : > { %v15658_v50 = vpop.eup %15657  ;;  %v712_v17 = vadd.f32 1e-05, %v696_v14 }
 0x1a8   : > { %v15660_v18 = vpop.eup %15659  ;;  %1017 = vmatmul.mubr.bf16.gmra.mrb[4].mxu0 %v790_v15  ;;  %14982 = vmatmul.mubr.bf16.vlgmr.msra.gmra.mrb[0].mxu1 %v790_v15  ;;  %v738_v23 = vmul.f32 %v15658_v50, %v16577_v60  ;;  %v777_v34 = vadd.f32 %v16673_v32, %v757_v24 }
 0x1a9   : > { %15669 = vrsqrt.f32 %v712_v17  ;;  %1026 = vmatprep.mubr.bf16.mxu0 %v22807_v41  ;;  %v739_v25 = vmul.f32 %v15660_v18, %v16582_v0 }
 0x1aa   : > { %v758_v56 = vmul.f32 %v16660_v21, %v738_v23 }
 0x1ab   : > { %v15662_v28 = vpop.eup %15661  ;;  %v759_v29 = vmul.f32 %v16660_v21, %v739_v25 }
 0x1ac   : > { %v15664_v30 = vpop.eup %15663  ;;  %v778_v31 = vadd.f32 %v16673_v32, %v758_v56  ;;  %v740_v27 = vmul.f32 %v15662_v28, %v16591_v5 }
 0x1ad   : > { %v741_v60 = vmul.f32 %v15664_v30, %v16599_v11  ;;  %v779_v0 = vadd.f32 %v16673_v32, %v759_v29 }
 0x1ae   : > { %v791_v33 = vpack.c.bf16 %v778_v31, %v777_v34  ;;  %v760_v35 = vmul.f32 %v16660_v21, %v740_v27  ;;  %v16737_v27 = vsub.s32 2, %v16642_v62 }
 0x1af   : > { %v15666_v36 = vpop.eup %15665  ;;  %v761_v39 = vmul.f32 %v16660_v21, %v741_v60 }
 0x1b0   : > { %v15668_v37 = vpop.eup %15667  ;;  %1027 = vmatmul.mubr.bf16.gmra.mrb[8].mxu0 %v791_v33  ;;  %14985 = vmatprep.mubr.bf16.mxu1 %v791_v33  ;;  %v780_v38 = vadd.f32 %v16673_v32, %v760_v35  ;;  %v742_v2 = vmul.f32 %v15666_v36, %v16609_v19  ;;  %23049 = vst [vmem:[#allocation22_spill] sm:$0xff] %v16737_v27 }
 0x1b1   : > { %1036 = vmatprep.mubr.bf16.mxu0 %v22807_v41  ;;  %v743_v5 = vmul.f32 %v15668_v37, %v16612_v20  ;;  %v781_v40 = vadd.f32 %v16673_v32, %v761_v39 }
 0x1b2   : > { %v792_v11 = vpack.c.bf16 %v780_v38, %v779_v0  ;;  %v762_v44 = vmul.f32 %v16660_v21, %v742_v2 }
 0x1b3   : > { %v15670_v45 = vpop.eup %15669  ;;  %v763_v48 = vmul.f32 %v16660_v21, %v743_v5 }
 0x1b4   : > { %14986 = vmatmul.mubr.bf16.gmra.mrb[4].mxu1 %v792_v11  ;;  %v782_v46 = vadd.f32 %v16673_v32, %v762_v44  ;;  %v744_v47 = vmul.f32 %v15670_v45, %v16622_v26 }
 0x1b5   : > { %v783_v20 = vadd.f32 %v16673_v32, %v763_v48 }
 0x1b6   : > { %v793_v19 = vpack.c.bf16 %v782_v46, %v781_v40  ;;  %v764_v51 = vmul.f32 %v16660_v21, %v744_v47 }
 0x1b8   : > { %1037 = vmatmul.mubr.bf16.gmra.mrb[12].mxu0 %v792_v11  ;;  %14989 = vmatprep.mubr.bf16.mxu1 %v793_v19  ;;  %v784_v52 = vadd.f32 %v16673_v32, %v764_v51 }
 0x1b9   : > { %1046 = vmatprep.mubr.bf16.mxu0 %v22807_v41 }
 0x1ba   : > { %v794_v53 = vpack.c.bf16 %v784_v52, %v783_v20 }
 0x1bc   : > { %14990 = vmatmul.mubr.bf16.gmra.mrb[8].mxu1 %v794_v53 }
 0x1c0   : > { %1047 = vmatmul.mubr.bf16.gmra.mrb[16].mxu0 %v793_v19 }
 0x1c1   : > { %1056 = vmatprep.mubr.bf16.mxu0 %v22807_v41 }
 0x1c8   : > { %1057 = vmatmul.mubr.bf16.gmra.mrb[20].mxu0 %v794_v53 }
 0x1c9   : > { %1066 = vmatprep.mubr.bf16.mxu0 %v22807_v41 }
 0x21c   : > { %v678_v26 = vpop.xlane.xlu0 %677 }
 0x21d   : > { %v697_v54 = vmul.f32 0.0078125, %v678_v26 }
 0x21f   : > { %v713_v55 = vadd.f32 1e-05, %v697_v54 }
 0x220   : > { %v680_v59 = vpop.xlane.xlu1 %679 }
 0x221   : > { %15671 = vrsqrt.f32 %v713_v55  ;;  %v698_v61 = vmul.f32 0.0078125, %v680_v59 }
 0x223   : > { %v714_v63 = vadd.f32 1e-05, %v698_v61 }
 0x224   : > { %v682_v1 = vpop.xlane.xlu0 %681 }
 0x225   : > { %15673 = vrsqrt.f32 %v714_v63  ;;  %v699_v3 = vmul.f32 0.0078125, %v682_v1 }
 0x227   : > { %v715_v4 = vadd.f32 1e-05, %v699_v3 }
 0x228   : > { %v684_v42 = vpop.xlane.xlu1 %683 }
 0x229   : > { %15675 = vrsqrt.f32 %v715_v4  ;;  %v700_v7 = vmul.f32 0.0078125, %v684_v42 }
 0x22b   : > { %v15672_v8 = vpop.eup %15671  ;;  %v716_v9 = vadd.f32 1e-05, %v700_v7 }
 0x22c   : > { %v745_v10 = vmul.f32 %v15672_v8, %v16640_v58 }
 0x22d   : > { %15677 = vrsqrt.f32 %v716_v9 }
 0x22e   : > { %v765_v49 = vmul.f32 %v16660_v21, %v745_v10 }
 0x22f   : > { %v15674_v12 = vpop.eup %15673 }
 0x230   : > { %v746_v13 = vmul.f32 %v15674_v12, %v16647_v6  ;;  %v785_v50 = vadd.f32 %v16673_v32, %v765_v49 }
 0x232   : > { %v766_v14 = vmul.f32 %v16660_v21, %v746_v13 }
 0x233   : > { %v15676_v15 = vpop.eup %15675 }
 0x234   : > { %v786_v17 = vadd.f32 %v16673_v32, %v766_v14  ;;  %v747_v18 = vmul.f32 %v15676_v15, %v16656_v16  ;;  %v829_v16 = vld [vmem:[%s16461_s25] sm:$0x7]  ;;  %s14161_s25 = scalar_lea.sflag [#allocation4], %s16430_s18 }
 0x235   : > { %v16731_v30 = vrot.slane %v829_v16, %v16650_v43  ;;  %v16746_v37 = vrot.slane %v829_v16, %v16737_v27 }
 0x236   : > { %v795_v23 = vpack.c.bf16 %v786_v17, %v785_v50  ;;  %v767_v6 = vmul.f32 %v16660_v21, %v747_v18 }
 0x237   : > { %v15678_v24 = vpop.eup %15677 }
 0x238   : > { %1067 = vmatmul.mubr.bf16.gmra.mrb[24].mxu0 %v795_v23  ;;  %14993 = vmatprep.mubr.bf16.mxu1 %v795_v23  ;;  %v748_v58 = vmul.f32 %v15678_v24, %v16668_v57  ;;  %v787_v56 = vadd.f32 %v16673_v32, %v767_v6  ;;  %v16734_v57 = vrot.slane %v829_v16, %v16663_v22 }
 0x239   : > { %1076 = vmatprep.mubr.bf16.mxu0 %v22807_v41 }
 0x23a   : > { %v768_v25 = vmul.f32 %v16660_v21, %v748_v58 }
 0x23c   : > { %v788_v28 = vadd.f32 %v16673_v32, %v768_v25 }
 0x23e   : > { %v796_v29 = vpack.c.bf16 %v788_v28, %v787_v56 }
 0x240   : > { %1077 = vmatmul.mubr.bf16.gmra.mrb[28].mxu0 %v796_v29  ;;  %14994 = vmatmul.mubr.bf16.gmra.mrb[12].mxu1 %v796_v29 }
 0x273   : > { %v1008_v34 = vpop.f32.mrb[0].mxu0 }
 0x274   : > { %v1010_v31 = vpop.f32.mrb[1].mxu0  ;;  %v1009_v60 = vadd.f32 %v1008_v34, %v16731_v30 }
 0x275   : > { %v1012_v21 = vpop.f32.mrb[2].mxu0  ;;  %v1011_v35 = vadd.f32 %v1010_v31, %v16734_v57 }
 0x276   : > { %v1013_v32 = vadd.f32 %v1012_v21, %v16731_v30  ;;  %v1014_v33 = vpop.f32.mrb[3].mxu0 }
 0x277   : > { %v1015_v36 = vadd.f32 %v1014_v33, %v16734_v57 }
 0x278   : > { %v16743_v0 = vpack.c.bf16 %v1013_v32, %v1009_v60 }
 0x279   : > { %v16748_v38 = vpack.c.bf16 %v1015_v36, %v1011_v35 }
 0x27b   : > { %3366 = vrot.lane.b32.xlu1 %v16748_v38, %s16247_s2  ;;  %v1018_v2 = vpop.f32.mrb[4].mxu0  ;;  %v14983_v39 = vpop.f32.mrb[0].mxu1  ;;  %3350 = vrot.lane.b32.xlu0 %v16748_v38, %s16248_s10 }
 0x27c   : > { %v1130_v5 = vadd.f32 %v14983_v39, %v16746_v37  ;;  %v1020_v11 = vpop.f32.mrb[5].mxu0  ;;  %v1121_v44 = vpop.f32.mrb[1].mxu1  ;;  %v1019_v47 = vadd.f32 %v1018_v2, %v16731_v30 }
 0x27d   : > { %v1122_v45 = vadd.f32 %v1121_v44, %v16746_v37  ;;  %v1022_v40 = vpop.f32.mrb[6].mxu0  ;;  %v14984_v46 = vpop.f32.mrb[2].mxu1  ;;  %v1021_v52 = vadd.f32 %v1020_v11, %v16734_v57 }
 0x27e   : > { %v1023_v48 = vadd.f32 %v1022_v40, %v16731_v30  ;;  %v1133_v19 = vadd.f32 %v14984_v46, %v16746_v37  ;;  %v1024_v51 = vpop.f32.mrb[7].mxu0  ;;  %v1124_v20 = vpop.f32.mrb[3].mxu1 }
 0x27f   : > { %v1025_v53 = vadd.f32 %v1024_v51, %v16734_v57  ;;  %v1125_v26 = vadd.f32 %v1124_v20, %v16746_v37  ;;  %3382 = vrot.lane.b32.xlu1 %v16748_v38, %s16249_s12 }
 0x280   : > { %v16764_v54 = vpack.c.bf16 %v1023_v48, %v1019_v47  ;;  %v16766_v55 = vpack.c.bf16 %v1133_v19, %v1130_v5 }
 0x281   : > { %v16768_v59 = vpack.c.bf16 %v1025_v53, %v1021_v52  ;;  %v16770_v61 = vpack.c.bf16 %v1125_v26, %v1122_v45 }
 0x282   : > { %23050 = vst [vmem:[#allocation23_spill] sm:$0xff] %v16766_v55 }
 0x283   : > { %23051 = vst [vmem:[#allocation24_spill] sm:$0xff] %v16770_v61  ;;  %3352 = vrot.lane.b32.xlu1 %v16768_v59, %s16248_s10  ;;  %3368 = vrot.lane.b32.xlu0 %v16768_v59, %s16247_s2  ;;  %v1028_v63 = vpop.f32.mrb[8].mxu0 }
 0x284   : > { %v1030_v1 = vpop.f32.mrb[9].mxu0  ;;  %v1029_v4 = vadd.f32 %v1028_v63, %v16731_v30 }
 0x285   : > { %v1032_v3 = vpop.f32.mrb[10].mxu0  ;;  %v1031_v8 = vadd.f32 %v1030_v1, %v16734_v57 }
 0x286   : > { %v1033_v42 = vadd.f32 %v1032_v3, %v16731_v30  ;;  %v1034_v7 = vpop.f32.mrb[11].mxu0 }
 0x287   : > { %v1035_v9 = vadd.f32 %v1034_v7, %v16734_v57  ;;  %3384 = vrot.lane.b32.xlu1 %v16768_v59, %s16249_s12  ;;  %v14987_v10 = vpop.f32.mrb[4].mxu1 }
 0x288   : > { %v16782_v12 = vpack.c.bf16 %v1033_v42, %v1029_v4  ;;  %v1146_v13 = vadd.f32 %v14987_v10, %v16746_v37  ;;  %v1137_v49 = vpop.f32.mrb[5].mxu1 }
 0x289   : > { %v16785_v14 = vpack.c.bf16 %v1035_v9, %v1031_v8  ;;  %v1138_v15 = vadd.f32 %v1137_v49, %v16746_v37  ;;  %v14988_v50 = vpop.f32.mrb[6].mxu1  ;;  %v16250_v49 = vmov 1983009808  }
 0x28a   : > { %v1149_v17 = vadd.f32 %v14988_v50, %v16746_v37  ;;  %v1140_v18 = vpop.f32.mrb[7].mxu1  ;;  %v16251_v50 = vmov 1934713408  }
 0x28b   : > { %v1141_v23 = vadd.f32 %v1140_v18, %v16746_v37  ;;  %3370 = vrot.lane.b32.xlu1 %v16785_v14, %s16247_s2  ;;  %3354 = vrot.lane.b32.xlu0 %v16785_v14, %s16248_s10  ;;  %v1038_v24 = vpop.f32.mrb[12].mxu0 }
 0x28c   : > { %v16794_v58 = vpack.c.bf16 %v1149_v17, %v1146_v13  ;;  %v1040_v6 = vpop.f32.mrb[13].mxu0  ;;  %v1039_v28 = vadd.f32 %v1038_v24, %v16731_v30  ;;  %v1415_v17 = vunpack.c.l.s4 %v16251_v50  ;;  %v16876_v24 = vpack.i.b16 %v22807_v41, %v22807_v41 }
 0x28d   : > { %v16796_v25 = vpack.c.bf16 %v1141_v23, %v1138_v15  ;;  %v1042_v56 = vpop.f32.mrb[14].mxu0  ;;  %v1041_v34 = vadd.f32 %v1040_v6, %v16734_v57  ;;  %v1384_v15 = vunpack.c.l.s4 %v16250_v49 }
 0x28e   : > { %23052 = vst [vmem:[#allocation25_spill] sm:$0xff] %v16794_v58  ;;  %v1043_v29 = vadd.f32 %v1042_v56, %v16731_v30  ;;  %v1044_v16 = vpop.f32.mrb[15].mxu0  ;;  %v1416_v23 = vunpack.c.0.s8 %v1415_v17 }
 0x28f   : > { %23053 = vst [vmem:[#allocation26_spill] sm:$0xff] %v16796_v25  ;;  %v1045_v31 = vadd.f32 %v1044_v16, %v16734_v57  ;;  %3386 = vrot.lane.b32.xlu0 %v16785_v14, %s16249_s12  ;;  %v14991_v21 = vpop.f32.mrb[8].mxu1  ;;  %v1385_v18 = vunpack.c.0.s8 %v1384_v15 }
 0x290   : > { %v16804_v60 = vpack.c.bf16 %v1043_v29, %v1039_v28  ;;  %v1162_v32 = vadd.f32 %v14991_v21, %v16746_v37  ;;  %v1153_v33 = vpop.f32.mrb[9].mxu1  ;;  %v3402_v28 = vshrl.u32 %v16748_v38, 16  ;;  %v16884_v21 = vsub.s32 %v1416_v23, %v16642_v62 }
 0x291   : > { %v16807_v35 = vpack.c.bf16 %v1045_v31, %v1041_v34  ;;  %v1154_v36 = vadd.f32 %v1153_v33, %v16746_v37  ;;  %v14992_v2 = vpop.f32.mrb[10].mxu1  ;;  %v16881_v34 = vsub.s32 %v1385_v18, %v16642_v62 }
 0x292   : > { %23054 = vst [vmem:[#allocation27_spill] sm:$0xff] %v16804_v60  ;;  %v1165_v39 = vadd.f32 %v14992_v2, %v16746_v37  ;;  %v1156_v5 = vpop.f32.mrb[11].mxu1  ;;  %23062 = vst [vmem:[#allocation35_spill] sm:$0xff] %v16884_v21  ;;  %v3418_v2 = vshrl.u32 %v16768_v59, 16 }
 0x293   : > { %v1157_v11 = vadd.f32 %v1156_v5, %v16746_v37  ;;  %3372 = vrot.lane.b32.xlu0 %v16807_v35, %s16247_s2  ;;  %3356 = vrot.lane.b32.xlu1 %v16807_v35, %s16248_s10  ;;  %v1048_v44 = vpop.f32.mrb[16].mxu0  ;;  %23061 = vst [vmem:[#allocation34_spill] sm:$0xff] %v16881_v34 }
 0x294   : > { %v16816_v45 = vpack.c.bf16 %v1165_v39, %v1162_v32  ;;  %v1050_v40 = vpop.f32.mrb[17].mxu0  ;;  %v1049_v48 = vadd.f32 %v1048_v44, %v16731_v30  ;;  %v3434_v44 = vshrl.u32 %v16785_v14, 16 }
 0x295   : > { %v16818_v46 = vpack.c.bf16 %v1157_v11, %v1154_v36  ;;  %v1052_v47 = vpop.f32.mrb[18].mxu0  ;;  %v1051_v20 = vadd.f32 %v1050_v40, %v16734_v57 }
 0x296   : > { %23055 = vst [vmem:[#allocation28_spill] sm:$0xff] %v16816_v45  ;;  %v1053_v19 = vadd.f32 %v1052_v47, %v16731_v30  ;;  %v1054_v51 = vpop.f32.mrb[19].mxu0 }
 0x297   : > { %23056 = vst [vmem:[#allocation29_spill] sm:$0xff] %v16818_v46  ;;  %v1055_v52 = vadd.f32 %v1054_v51, %v16734_v57  ;;  %1200 = vrot.lane.b32.xlu0 %v16743_v0, %s16248_s10  ;;  %3388 = vrot.lane.b32.xlu1 %v16807_v35, %s16249_s12 }
 0x298   : > { %v16828_v53 = vpack.c.bf16 %v1053_v19, %v1049_v48 }
 0x299   : > { %v16830_v26 = vpack.c.bf16 %v1055_v52, %v1051_v20 }
 0x29a   : > { %23057 = vst [vmem:[#allocation30_spill] sm:$0xff] %v16828_v53 }
 0x29b   : > { %23058 = vst [vmem:[#allocation31_spill] sm:$0xff] %v16830_v26  ;;  %1232 = vrot.lane.b32.xlu0 %v16743_v0, %s16249_s12  ;;  %1216 = vrot.lane.b32.xlu1 %v16743_v0, %s16247_s2  ;;  %v1058_v63 = vpop.f32.mrb[20].mxu0 }
 0x29c   : > { %v1060_v1 = vpop.f32.mrb[21].mxu0  ;;  %v1059_v4 = vadd.f32 %v1058_v63, %v16731_v30 }
 0x29d   : > { %v1062_v3 = vpop.f32.mrb[22].mxu0  ;;  %v1061_v8 = vadd.f32 %v1060_v1, %v16734_v57 }
 0x29e   : > { %v1063_v42 = vadd.f32 %v1062_v3, %v16731_v30  ;;  %v1064_v7 = vpop.f32.mrb[23].mxu0 }
 0x29f   : > { %v1065_v9 = vadd.f32 %v1064_v7, %v16734_v57  ;;  %1218 = vrot.lane.b32.xlu0 %v16764_v54, %s16247_s2  ;;  %1202 = vrot.lane.b32.xlu1 %v16764_v54, %s16248_s10 }
 0x2a0   : > { %v16844_v10 = vpack.c.bf16 %v1063_v42, %v1059_v4 }
 0x2a1   : > { %v16846_v13 = vpack.c.bf16 %v1065_v9, %v1061_v8 }
 0x2a2   : > { %23059 = vst [vmem:[#allocation32_spill] sm:$0xff] %v16844_v10 }
 0x2a3   : > { %23060 = vst [vmem:[#allocation33_spill] sm:$0xff] %v16846_v13  ;;  %1204 = vrot.lane.b32.xlu0 %v16782_v12, %s16248_s10  ;;  %1234 = vrot.lane.b32.xlu1 %v16764_v54, %s16249_s12 }
 0x2a7   : > { %1236 = vrot.lane.b32.xlu0 %v16782_v12, %s16249_s12  ;;  %1220 = vrot.lane.b32.xlu1 %v16782_v12, %s16247_s2 }
 0x2ab   : > { %1222 = vrot.lane.b32.xlu0 %v16804_v60, %s16247_s2  ;;  %1206 = vrot.lane.b32.xlu1 %v16804_v60, %s16248_s10 }
 0x2af   : > { %1238 = vrot.lane.b32.xlu1 %v16804_v60, %s16249_s12  ;;  %3358 = vrot.lane.b32.xlu0 %v16830_v26, %s16248_s10 }
 0x2b3   : > { %3374 = vrot.lane.b32.xlu1 %v16830_v26, %s16247_s2  ;;  %3390 = vrot.lane.b32.xlu0 %v16830_v26, %s16249_s12 }
 0x2b7   : > { %3376 = vrot.lane.b32.xlu0 %v16846_v13, %s16247_s2  ;;  %3360 = vrot.lane.b32.xlu1 %v16846_v13, %s16248_s10 }
 0x2bb   : > { %3392 = vrot.lane.b32.xlu1 %v16846_v13, %s16249_s12 }
 0x2ed   : > { %v3367_v6 = vpop.permute.xlu1 %3366  ;;  %v3351_v56 = vpop.permute.xlu0 %3350 }
 0x2ee   : > { %v3400_v29 = vpack.i.b16 %v3351_v56, %v16748_v38  ;;  %v3403_v16 = vshrl.u32 %v3351_v56, 16  ;;  %v3410_v47 = vshrl.u32 %v3367_v6, 16 }
 0x2f0   : > { %v3404_v31 = vpack.i.b16 %v3403_v16, %v3402_v28  ;;  %v3526_v33 = vcombine.high %v3400_v29, %v16876_v24  ;;  %v3533_v20 = vrot.slane %v3400_v29, %v16881_v34 }
 0x2f1   : > { %v3383_v36 = vpop.permute.xlu1 %3382 }
 0x2f2   : > { %v3592_v38 = vcombine.high %v3404_v31, %v16876_v24  ;;  %v3408_v11 = vpack.i.b16 %v3383_v36, %v3367_v6  ;;  %v3411_v48 = vshrl.u32 %v3383_v36, 16  ;;  %v3540_v3 = vrot.slane %v3526_v33, %v16881_v34 }
 0x2f3   : > { %v3599_v4 = vrot.slane %v3404_v31, %v16881_v34 }
 0x2f4   : > { %v3541_v52 = vcombine.high %v3408_v11, %v16876_v24  ;;  %v3548_v63 = vrot.slane %v3408_v11, %v16881_v34  ;;  %v3606_v42 = vrot.slane %v3592_v38, %v16881_v34  ;;  %v3412_v7 = vpack.i.b16 %v3411_v48, %v3410_v47 }
 0x2f5   : > { %v3353_v8 = vpop.permute.xlu1 %3352  ;;  %v3369_v9 = vpop.permute.xlu0 %3368 }
 0x2f6   : > { %v3555_v49 = vrot.slane %v3541_v52, %v16881_v34  ;;  %v3556_v15 = vcombine.low %v3533_v20, %v3548_v63  ;;  %v3557_v50 = vcombine.high %v3533_v20, %v3548_v63  ;;  %v3416_v17 = vpack.i.b16 %v3353_v8, %v16768_v59 }
 0x2f7   : > { %v3607_v18 = vcombine.high %v3412_v7, %v16876_v24  ;;  %v3614_v23 = vrot.slane %v3412_v7, %v16881_v34  ;;  %v3419_v6 = vshrl.u32 %v3353_v8, 16  ;;  %v3426_v56 = vshrl.u32 %v3369_v9, 16 }
 0x2f8   : > { %v3564_v28 = vrot.slane %v3556_v15, %v16884_v21  ;;  %v3571_v29 = vrot.slane %v3557_v50, %v16884_v21  ;;  %v3572_v16 = vcombine.low %v3540_v3, %v3555_v49  ;;  %v3573_v31 = vcombine.high %v3540_v3, %v3555_v49 }
 0x2f9   : > { %v3621_v33 = vrot.slane %v3607_v18, %v16881_v34  ;;  %v3622_v36 = vcombine.low %v3599_v4, %v3614_v23  ;;  %v3623_v38 = vcombine.high %v3599_v4, %v3614_v23  ;;  %v3420_v11 = vpack.i.b16 %v3419_v6, %v3418_v2  ;;  %v3385_v47 = vpop.permute.xlu1 %3384 }
 0x2fa   : > { %v16911_v59 = vrot.slane %v3572_v16, %v16884_v21  ;;  %v16914_v48 = vrot.slane %v3573_v31, %v16884_v21  ;;  %v4582_v20 = vcombine.low %v3564_v28, %v3571_v29  ;;  %v14430_v52 = vcombine.high %v3564_v28, %v3571_v29 }
 0x2fb   : > { %v16917_v63 = vrot.slane %v3622_v36, %v16884_v21  ;;  %v16920_v7 = vrot.slane %v3623_v38, %v16884_v21  ;;  %v3638_v3 = vcombine.low %v3606_v42, %v3621_v33  ;;  %v3639_v8 = vcombine.high %v3606_v42, %v3621_v33 }
 0x2fc   : > { %v16923_v4 = vrot.slane %v4582_v20, %v16881_v34  ;;  %v16926_v2 = vrot.slane %v14430_v52, %v16881_v34  ;;  %v3658_v29 = vcombine.high %v3416_v17, %v16876_v24  ;;  %v3665_v16 = vrot.slane %v3416_v17, %v16881_v34 }
 0x2fd   : > { %v16933_v50 = vrot.slane %v3638_v3, %v16884_v21  ;;  %v16936_v18 = vrot.slane %v3639_v8, %v16884_v21  ;;  %v3371_v6 = vpop.permute.xlu1 %3370  ;;  %v3355_v28 = vpop.permute.xlu0 %3354  ;;  %v3724_v31 = vcombine.high %v3420_v11, %v16876_v24  ;;  %v3731_v33 = vrot.slane %v3420_v11, %v16881_v34 }
 0x2fe   : > { %v3424_v20 = vpack.i.b16 %v3385_v47, %v3369_v9  ;;  %v3427_v52 = vshrl.u32 %v3385_v47, 16  ;;  %v3672_v3 = vrot.slane %v3658_v29, %v16881_v34  ;;  %v3442_v41 = vshrl.u32 %v3371_v6, 16 }
 0x2ff   : > { %v3738_v8 = vrot.slane %v3724_v31, %v16881_v34  ;;  %v3432_v1 = vpack.i.b16 %v3355_v28, %v16785_v14  ;;  %v3435_v40 = vshrl.u32 %v3355_v28, 16 }
 0x300   : > { %v3428_v17 = vpack.i.b16 %v3427_v52, %v3426_v56  ;;  %v3673_v51 = vcombine.high %v3424_v20, %v16876_v24  ;;  %v3680_v11 = vrot.slane %v3424_v20, %v16881_v34 }
 0x301   : > { %v3387_v5 = vpop.permute.xlu0 %3386  ;;  %v3790_v39 = vcombine.high %v3432_v1, %v16876_v24  ;;  %v3797_v38 = vrot.slane %v3432_v1, %v16881_v34  ;;  %v3436_v52 = vpack.i.b16 %v3435_v40, %v3434_v44 }
 0x302   : > { %v3440_v9 = vpack.i.b16 %v3387_v5, %v3371_v6  ;;  %v3443_v47 = vshrl.u32 %v3387_v5, 16  ;;  %v3687_v29 = vrot.slane %v3673_v51, %v16881_v34  ;;  %v3688_v36 = vcombine.low %v3665_v16, %v3680_v11 }
 0x303   : > { %v3689_v31 = vcombine.high %v3665_v16, %v3680_v11  ;;  %v3739_v23 = vcombine.high %v3428_v17, %v16876_v24  ;;  %v3746_v56 = vrot.slane %v3428_v17, %v16881_v34  ;;  %v3804_v28 = vrot.slane %v3790_v39, %v16881_v34 }
 0x304   : > { %v3444_v20 = vpack.i.b16 %v3443_v47, %v3442_v41  ;;  %v3696_v42 = vrot.slane %v3688_v36, %v16884_v21  ;;  %v3704_v6 = vcombine.low %v3672_v3, %v3687_v29  ;;  %v3705_v5 = vcombine.high %v3672_v3, %v3687_v29 }
 0x305   : > { %v3703_v1 = vrot.slane %v3689_v31, %v16884_v21  ;;  %v3753_v51 = vrot.slane %v3739_v23, %v16881_v34  ;;  %v3754_v15 = vcombine.low %v3731_v33, %v3746_v56  ;;  %v3755_v16 = vcombine.high %v3731_v33, %v3746_v56  ;;  %v3357_v56 = vpop.permute.xlu1 %3356  ;;  %v3373_v31 = vpop.permute.xlu0 %3372 }
 0x306   : > { %v3856_v11 = vcombine.high %v3436_v52, %v16876_v24  ;;  %v16968_v17 = vrot.slane %v3704_v6, %v16884_v21  ;;  %v16971_v14 = vrot.slane %v3705_v5, %v16884_v21  ;;  %v3805_v5 = vcombine.high %v3440_v9, %v16876_v24 }
 0x307   : > { %v4682_v39 = vcombine.low %v3696_v42, %v3703_v1  ;;  %v14434_v41 = vcombine.high %v3696_v42, %v3703_v1  ;;  %v16974_v44 = vrot.slane %v3754_v15, %v16884_v21  ;;  %v16977_v40 = vrot.slane %v3755_v16, %v16884_v21 }
 0x308   : > { %v3770_v36 = vcombine.low %v3738_v8, %v3753_v51  ;;  %v3771_v23 = vcombine.high %v3738_v8, %v3753_v51  ;;  %v3863_v1 = vrot.slane %v3436_v52, %v16881_v34  ;;  %v3870_v6 = vrot.slane %v3856_v11, %v16881_v34 }
 0x309   : > { %v16980_v33 = vrot.slane %v4682_v39, %v16881_v34  ;;  %v16983_v3 = vrot.slane %v14434_v41, %v16881_v34  ;;  %v3812_v51 = vrot.slane %v3440_v9, %v16881_v34  ;;  %v3819_v11 = vrot.slane %v3805_v5, %v16881_v34 }
 0x30a   : > { %v16990_v15 = vrot.slane %v3770_v36, %v16884_v21  ;;  %v16993_v29 = vrot.slane %v3771_v23, %v16884_v21  ;;  %v3871_v36 = vcombine.high %v3444_v20, %v16876_v24  ;;  %v3878_v23 = vrot.slane %v3444_v20, %v16881_v34 }
 0x30b   : > { %v17003_v16 = vpop.f32.mrb[24].mxu0  ;;  %v3820_v8 = vcombine.low %v3797_v38, %v3812_v51  ;;  %v3821_v42 = vcombine.high %v3797_v38, %v3812_v51  ;;  %v3448_v9 = vpack.i.b16 %v3357_v56, %v16807_v35  ;;  %v3451_v41 = vshrl.u32 %v3357_v56, 16 }
 0x30c   : > { %v17011_v52 = vpop.f32.mrb[25].mxu0  ;;  %v3885_v39 = vrot.slane %v3871_v36, %v16881_v34  ;;  %v3886_v32 = vcombine.low %v3863_v1, %v3878_v23  ;;  %v3887_v49 = vcombine.high %v3863_v1, %v3878_v23  ;;  %v3836_v43 = vcombine.low %v3804_v28, %v3819_v11 }
 0x30d   : > { %v17015_v47 = vpop.f32.mrb[26].mxu0  ;;  %v3828_v20 = vrot.slane %v3820_v8, %v16884_v21  ;;  %v3835_v22 = vrot.slane %v3821_v42, %v16884_v21  ;;  %v3837_v27 = vcombine.high %v3804_v28, %v3819_v11  ;;  %v3458_v45 = vshrl.u32 %v3373_v31, 16 }
 0x30e   : > { %v17018_v19 = vpop.f32.mrb[27].mxu0  ;;  %v17023_v5 = vrot.slane %v3886_v32, %v16884_v21  ;;  %v17026_v38 = vrot.slane %v3887_v49, %v16884_v21  ;;  %v3902_v51 = vcombine.low %v3870_v6, %v3885_v39  ;;  %v3903_v62 = vcombine.high %v3870_v6, %v3885_v39  ;;  %v3389_v6 = vpop.permute.xlu1 %3388 }
 0x30f   : > { %v17029_v36 = vrot.slane %v3836_v43, %v16884_v21  ;;  %v17032_v56 = vrot.slane %v3837_v27, %v16884_v21  ;;  %v4782_v1 = vcombine.low %v3828_v20, %v3835_v22  ;;  %v14438_v8 = vcombine.high %v3828_v20, %v3835_v22  ;;  %v1201_v43 = vpop.permute.xlu0 %1200 }
 0x310   : > { %23063 = vst [vmem:[#allocation36_spill] sm:$0xff] %v17023_v5  ;;  %23064 = vst [vmem:[#allocation37_spill] sm:$0xff] %v17026_v38  ;;  %v17035_v42 = vrot.slane %v3902_v51, %v16884_v21  ;;  %v17038_v28 = vrot.slane %v3903_v62, %v16884_v21  ;;  %v3922_v49 = vcombine.high %v3448_v9, %v16876_v24  ;;  %v3459_v13 = vshrl.u32 %v3389_v6, 16 }
 0x311   : > { %v17045_v39 = vrot.slane %v4782_v1, %v16881_v34  ;;  %v17048_v27 = vrot.slane %v14438_v8, %v16881_v34  ;;  %v23068_v1 = vshrl.u32 %v16807_v35, 16  ;;  %v3929_v62 = vrot.slane %v3448_v9, %v16881_v34 }
 0x312   : > { %23065 = vst [vmem:[#allocation38_spill] sm:$0xff] %v17035_v42  ;;  %23066 = vst [vmem:[#allocation39_spill] sm:$0xff] %v17038_v28  ;;  %v3456_v46 = vpack.i.b16 %v3389_v6, %v3373_v31  ;;  %v3936_v20 = vrot.slane %v3922_v49, %v16881_v34  ;;  %v3460_v25 = vpack.i.b16 %v3459_v13, %v3458_v45  ;;  %v1253_v61 = vshrl.u32 %v1201_v43, 16 }
 0x313   : > { %23067 = vst [vmem:[#allocation40_spill] sm:$0xff] %v17045_v39  ;;  %v17054_v23 = vpop.f32.mrb[28].mxu0  ;;  %v17056_v11 = vpop.f32.mrb[12].mxu1  ;;  %v3452_v8 = vpack.i.b16 %v3451_v41, %v23068_v1  ;;  %v1250_v41 = vpack.i.b16 %v1201_v43, %v16743_v0  ;;  %v23069_v45 = vcombine.low %v16911_v59, %v16914_v48 }
 0x314   : > { %v17065_v32 = vpop.f32.mrb[29].mxu0  ;;  %v17067_v22 = vpop.f32.mrb[13].mxu1  ;;  %v3937_v55 = vcombine.high %v3456_v46, %v16876_v24  ;;  %v3944_v9 = vrot.slane %v3456_v46, %v16881_v34  ;;  %v4003_v60 = vcombine.high %v3460_v25, %v16876_v24  ;;  %v4010_v53 = vrot.slane %v3460_v25, %v16881_v34 }
 0x315   : > { %v17070_v58 = vpop.f32.mrb[30].mxu0  ;;  %v3988_v51 = vcombine.high %v3452_v8, %v16876_v24  ;;  %v3995_v35 = vrot.slane %v3452_v8, %v16881_v34  ;;  %v17076_v1 = vpop.f32.mrb[14].mxu1  ;;  %v1382_v10 = vcombine.high %v1250_v41, %v16876_v24  ;;  %v17087_v8 = vrot.slane %v1250_v41, %v16881_v34 }
 0x316   : > { %v17080_v31 = vpop.f32.mrb[31].mxu0  ;;  %v17082_v6 = vpop.f32.mrb[15].mxu1  ;;  %v4605_v13 = vrot.slane %v23069_v45, %v16881_v34  ;;  %v3951_v26 = vrot.slane %v3937_v55, %v16881_v34  ;;  %v3952_v46 = vcombine.low %v3929_v62, %v3944_v9  ;;  %v3953_v43 = vcombine.high %v3929_v62, %v3944_v9 }
 0x317   : > { %v4002_v49 = vrot.slane %v3988_v51, %v16881_v34  ;;  %v23070_v51 = vshrl.u32 %v16743_v0, 16  ;;  %v17099_v42 = vrot.slane %v1382_v10, %v16881_v34  ;;  %v23071_v41 = vcombine.high %v16911_v59, %v16914_v48 }
 0x318   : > { %v3960_v45 = vrot.slane %v3952_v46, %v16884_v21  ;;  %v3967_v55 = vrot.slane %v3953_v43, %v16884_v21  ;;  %v3968_v62 = vcombine.low %v3936_v20, %v3951_v26  ;;  %v3969_v9 = vcombine.high %v3936_v20, %v3951_v26 }
 0x319   : > { %v1254_v28 = vpack.i.b16 %v1253_v61, %v23070_v51  ;;  %v4613_v38 = vrot.slane %v23071_v41, %v16881_v34  ;;  %v4017_v5 = vrot.slane %v4003_v60, %v16881_v34  ;;  %v4018_v25 = vcombine.low %v3995_v35, %v4010_v53  ;;  %v1217_v51 = vpop.permute.xlu1 %1216 }
 0x31a   : > { %v4019_v39 = vcombine.high %v3995_v35, %v4010_v53  ;;  %v17110_v61 = vrot.slane %v3968_v62, %v16884_v21  ;;  %v17113_v10 = vrot.slane %v3969_v9, %v16884_v21  ;;  %v4882_v59 = vcombine.low %v3960_v45, %v3967_v55 }
 0x31b   : > { %v1448_v0 = vcombine.high %v1254_v28, %v16876_v24  ;;  %v14442_v48 = vcombine.high %v3960_v45, %v3967_v55  ;;  %v17116_v46 = vrot.slane %v4018_v25, %v16884_v21  ;;  %v4034_v60 = vcombine.low %v4002_v49, %v4017_v5 }
 0x31c   : > { %v17119_v26 = vrot.slane %v4019_v39, %v16884_v21  ;;  %v4035_v20 = vcombine.high %v4002_v49, %v4017_v5  ;;  %v17122_v53 = vrot.slane %v4882_v59, %v16881_v34  ;;  %v17142_v55 = vrot.slane %v1254_v28, %v16881_v34  ;;  %v1233_v49 = vpop.permute.xlu0 %1232 }
 0x31d   : > { %v17125_v35 = vrot.slane %v14442_v48, %v16881_v34  ;;  %v17132_v45 = vrot.slane %v4034_v60, %v16884_v21  ;;  %v17145_v62 = vrot.slane %v1448_v0, %v16881_v34  ;;  %v4614_v9 = vcombine.low %v16923_v4, %v16926_v2 }
 0x31e   : > { %v17135_v39 = vrot.slane %v4035_v20, %v16884_v21  ;;  %v4622_v25 = vcombine.low %v4605_v13, %v4613_v38  ;;  %v23072_v60 = vcombine.low %v16917_v63, %v16920_v7  ;;  %v23073_v28 = vcombine.high %v16917_v63, %v16920_v7  ;;  %v17175_v63 = vpop.permute.xlu1 %1202 }
 0x31f   : > { %v17162_v4 = vrot.slane %v4614_v9, %v16884_v21  ;;  %v23074_v38 = vcombine.low %v16933_v50, %v16936_v18  ;;  %v1069_v9 = vadd.f32 %v17003_v16, %v16731_v30  ;;  %v1258_v41 = vpack.i.b16 %v1233_v49, %v1217_v51 }
 0x320   : > { %v4639_v20 = vrot.slane %v23072_v60, %v16881_v34  ;;  %v4647_v0 = vrot.slane %v23073_v28, %v16881_v34  ;;  %v17165_v2 = vrot.slane %v4622_v25, %v16884_v21  ;;  %v23075_v60 = vcombine.high %v16933_v50, %v16936_v18 }
 0x321   : > { %v4655_v13 = vrot.slane %v23074_v38, %v16881_v34  ;;  %v1071_v25 = vadd.f32 %v17011_v52, %v16734_v57  ;;  %v1260_v28 = vshrl.u32 %v1217_v51, 16  ;;  %v1073_v38 = vadd.f32 %v17015_v47, %v16731_v30 }
 0x322   : > { %v4663_v48 = vrot.slane %v23075_v60, %v16881_v34  ;;  %v4664_v7 = vcombine.low %v4639_v20, %v4647_v0  ;;  %v4630_v59 = vcombine.low %v17162_v4, %v17165_v2  ;;  %v1261_v18 = vshrl.u32 %v1233_v49, 16 }
 0x323   : > { %v1075_v20 = vadd.f32 %v17018_v19, %v16734_v57  ;;  %v1272_v16 = vpack.i.b16 %v17175_v63, %v16764_v54  ;;  %v17195_v60 = vpack.c.bf16 %v1073_v38, %v1069_v9  ;;  %v1404_v51 = vrot.slane %v1258_v41, %v16881_v34 }
 0x324   : > { %v4672_v5 = vcombine.low %v4655_v13, %v4663_v48  ;;  %v17186_v50 = vrot.slane %v4664_v7, %v16884_v21  ;;  %v5385_v0 = vshrl.u32 %v4630_v59, 16  ;;  %v1397_v48 = vcombine.high %v1258_v41, %v16876_v24 }
 0x325   : > { %23076 = vst [vmem:[#allocation41_spill] sm:$0xff] %v17195_v60  ;;  %v1262_v47 = vpack.i.b16 %v1261_v18, %v1260_v28  ;;  %v17199_v13 = vpack.c.bf16 %v1075_v20, %v1071_v25  ;;  %v1275_v49 = vshrl.u32 %v17175_v63, 16  ;;  %v17207_v43 = vrot.slane %v1272_v16, %v16881_v34 }
 0x326   : > { %v17193_v52 = vrot.slane %v4672_v5, %v16884_v21  ;;  %v1411_v7 = vrot.slane %v1397_v48, %v16881_v34  ;;  %v1514_v5 = vcombine.high %v1272_v16, %v16876_v24  ;;  %v1412_v9 = vcombine.low %v17087_v8, %v1404_v51 }
 0x327   : > { %23077 = vst [vmem:[#allocation42_spill] sm:$0xff] %v17199_v13  ;;  %v1413_v28 = vcombine.high %v17087_v8, %v1404_v51  ;;  %v1463_v41 = vcombine.high %v1262_v47, %v16876_v24  ;;  %v1470_v25 = vrot.slane %v1262_v47, %v16881_v34  ;;  %3378 = vrot.lane.b32.xlu1 %v17199_v13, %s16247_s2 }
 0x328   : > { %v4680_v19 = vcombine.low %v17186_v50, %v17193_v52  ;;  %v1428_v18 = vcombine.low %v17099_v42, %v1411_v7  ;;  %v1429_v20 = vcombine.high %v17099_v42, %v1411_v7  ;;  %3362 = vrot.lane.b32.xlu0 %v17199_v13, %s16248_s10  ;;  %v1420_v16 = vrot.slane %v1412_v9, %v16884_v21 }
 0x329   : > { %v1427_v8 = vrot.slane %v1413_v28, %v16884_v21  ;;  %v1477_v48 = vrot.slane %v1463_v41, %v16881_v34  ;;  %v1478_v47 = vcombine.low %v17142_v55, %v1470_v25  ;;  %v1479_v7 = vcombine.high %v17142_v55, %v1470_v25 }
 0x32a   : > { %v5384_v63 = vpack.i.b16 %v4680_v19, %v4630_v59  ;;  %v5386_v38 = vshrl.u32 %v4680_v19, 16  ;;  %v17226_v19 = vrot.slane %v1428_v18, %v16884_v21  ;;  %v17229_v42 = vrot.slane %v1429_v20, %v16884_v21  ;;  %v1235_v18 = vpop.permute.xlu1 %1234 }
 0x32b   : > { %v17233_v9 = vrot.slane %v1478_v47, %v16884_v21  ;;  %v1494_v28 = vcombine.low %v17145_v62, %v1477_v48  ;;  %v1495_v41 = vcombine.high %v17145_v62, %v1477_v48  ;;  %v17244_v55 = vrot.slane %v1479_v7, %v16884_v21 }
 0x32c   : > { %15285 = vmatprep.subr.msk.bf16.mxu1 %vm7654_vm0, %v5384_v63  ;;  %v7668_v59 = vsel %vm7654_vm0, %v5384_v63, 0  ;;  %v5387_v51 = vpack.i.b16 %v5386_v38, %v5385_v0  ;;  %v2438_v63 = vcombine.low %v1420_v16, %v1427_v8  ;;  %v14398_v38 = vcombine.high %v1420_v16, %v1427_v8  ;;  %3394 = vrot.lane.b32.xlu0 %v17199_v13, %s16249_s12  ;;  %v1219_v16 = vpop.permute.xlu0 %1218 }
 0x32d   : > { %14998 = vmatpush3.bf16.xpose.msra.mxu1 %v7668_v59  ;;  %v17247_v25 = vrot.slane %v1494_v28, %v16884_v21  ;;  %v17250_v62 = vrot.slane %v1495_v41, %v16884_v21  ;;  %v23078_v47 = vshrl.u32 %v16764_v54, 16  ;;  %v4714_v41 = vcombine.low %v16980_v33, %v16983_v3 }
 0x32e   : > { %15289 = vmatprep.subr.msk.bf16.mxu0 %vm7654_vm0, %v5387_v51  ;;  %v7757_v0 = vsel %vm7654_vm0, %v5387_v51, 0  ;;  %v17255_v8 = vrot.slane %v2438_v63, %v16881_v34  ;;  %v17258_v48 = vrot.slane %v14398_v38, %v16881_v34  ;;  %v17263_v51 = vrot.slane %v1514_v5, %v16881_v34 }
 0x32f   : > { %15014 = vmatpush3.bf16.xpose.msra.mxu0 %v7757_v0  ;;  %v1276_v59 = vpack.i.b16 %v1275_v49, %v23078_v47  ;;  %v1282_v49 = vshrl.u32 %v1219_v16, 16  ;;  %v23079_v5 = vcombine.low %v16968_v17, %v16971_v14  ;;  %v23080_v47 = vcombine.high %v16968_v17, %v16971_v14 }
 0x330   : > { %v23081_v0 = vcombine.low %v16974_v44, %v16977_v40  ;;  %v23083_v17 = vcombine.low %v16990_v15, %v16993_v29  ;;  %v23084_v33 = vcombine.high %v16990_v15, %v16993_v29  ;;  %v17315_v15 = vadd.f32 %v17067_v22, %v16746_v37 }
 0x331   : > { %v1580_v63 = vcombine.high %v1276_v59, %v16876_v24  ;;  %v1587_v54 = vrot.slane %v1276_v59, %v16881_v34  ;;  %v4705_v38 = vrot.slane %v23079_v5, %v16881_v34  ;;  %v4713_v28 = vrot.slane %v23080_v47, %v16881_v34 }
 0x332   : > { %v4739_v7 = vrot.slane %v23081_v0, %v16881_v34  ;;  %v23082_v59 = vcombine.high %v16974_v44, %v16977_v40  ;;  %v4755_v14 = vrot.slane %v23083_v17, %v16881_v34  ;;  %v4763_v3 = vrot.slane %v23084_v33, %v16881_v34  ;;  %v17317_v33 = vpop.permute.xlu0 %1204 }
 0x333   : > { %v1594_v5 = vrot.slane %v1580_v63, %v16881_v34  ;;  %v1079_v0 = vadd.f32 %v17054_v23, %v16731_v30  ;;  %v17305_v47 = vrot.slane %v4714_v41, %v16884_v21  ;;  %v4722_v44 = vcombine.low %v4705_v38, %v4713_v28 }
 0x334   : > { %v4747_v20 = vrot.slane %v23082_v59, %v16881_v34  ;;  %v1178_v63 = vadd.f32 %v17056_v11, %v16746_v37  ;;  %v4772_v59 = vcombine.low %v4755_v14, %v4763_v3  ;;  %v17311_v17 = vadd.f32 %v17065_v32, %v16734_v57 }
 0x335   : > { %v1280_v29 = vpack.i.b16 %v1235_v18, %v1219_v16  ;;  %v17320_v23 = vrot.slane %v4722_v44, %v16884_v21  ;;  %v1083_v11 = vadd.f32 %v17070_v58, %v16731_v30  ;;  %v1181_v16 = vadd.f32 %v17076_v1, %v16746_v37 }
 0x336   : > { %v4764_v40 = vcombine.low %v4739_v7, %v4747_v20  ;;  %v1283_v7 = vshrl.u32 %v1235_v18, 16  ;;  %v17328_v32 = vrot.slane %v4772_v59, %v16884_v21  ;;  %v1288_v18 = vpack.i.b16 %v17317_v33, %v16782_v12 }
 0x337   : > { %v1529_v28 = vcombine.high %v1280_v29, %v16876_v24  ;;  %v1536_v22 = vrot.slane %v1280_v29, %v16881_v34  ;;  %v4730_v41 = vcombine.low %v17305_v47, %v17320_v23  ;;  %v17336_v14 = vpack.c.bf16 %v1083_v11, %v1079_v0 }
 0x338   : > { %v17323_v20 = vrot.slane %v4764_v40, %v16884_v21  ;;  %v1284_v38 = vpack.i.b16 %v1283_v7, %v1282_v49  ;;  %v17347_v49 = vpack.c.bf16 %v1181_v16, %v1178_v63 }
 0x339   : > { %23086 = vst [vmem:[#allocation44_spill] sm:$0xff] %v17336_v14  ;;  %v1543_v58 = vrot.slane %v1529_v28, %v16881_v34  ;;  %v1544_v3 = vcombine.low %v17207_v43, %v1536_v22  ;;  %v1545_v44 = vcombine.high %v17207_v43, %v1536_v22  ;;  %v5397_v40 = vshrl.u32 %v4730_v41, 16 }
 0x33a   : > { %23085 = vst [vmem:[#allocation43_spill] sm:$0xff] %v17323_v20  ;;  %v4780_v30 = vcombine.low %v17323_v20, %v17328_v32  ;;  %v1595_v1 = vcombine.high %v1284_v38, %v16876_v24  ;;  %v1602_v59 = vrot.slane %v1284_v38, %v16881_v34  ;;  %23087 = vst [vmem:[#allocation45_spill] sm:$0xff] %v17347_v49 }
 0x33b   : > { %v1552_v7 = vrot.slane %v1544_v3, %v16884_v21  ;;  %v1559_v11 = vrot.slane %v1545_v44, %v16884_v21  ;;  %v1560_v13 = vcombine.low %v17263_v51, %v1543_v58  ;;  %v1561_v28 = vcombine.high %v17263_v51, %v1543_v58 }
 0x33c   : > { %v5396_v0 = vpack.i.b16 %v4780_v30, %v4730_v41  ;;  %v5398_v29 = vshrl.u32 %v4780_v30, 16  ;;  %v1609_v20 = vrot.slane %v1595_v1, %v16881_v34  ;;  %v1610_v43 = vcombine.low %v1587_v54, %v1602_v59 }
 0x33d   : > { %v1611_v63 = vcombine.high %v1587_v54, %v1602_v59  ;;  %v2538_v16 = vcombine.low %v1552_v7, %v1559_v11  ;;  %v1568_v41 = vrot.slane %v1560_v13, %v16884_v21  ;;  %v1575_v30 = vrot.slane %v1561_v28, %v16884_v21 }
 0x33e   : > { %15286 = vmatprep.subr.msk.bf16.mxu1 %vm7654_vm0, %v5396_v0  ;;  %v7671_v22 = vsel %vm7654_vm0, %v5396_v0, 0  ;;  %v5399_v38 = vpack.i.b16 %v5398_v29, %v5397_v40  ;;  %v1618_v3 = vrot.slane %v1610_v43, %v16884_v21  ;;  %v1626_v44 = vcombine.low %v1594_v5, %v1609_v20 }
 0x33f   : > { %15000 = vmatpush3.bf16.xpose.msra.mxu1 %v7671_v22  ;;  %v1625_v51 = vrot.slane %v1611_v63, %v16884_v21  ;;  %v1627_v58 = vcombine.high %v1594_v5, %v1609_v20  ;;  %v2545_v1 = vrot.slane %v2538_v16, %v16881_v34  ;;  %v14402_v49 = vcombine.high %v1552_v7, %v1559_v11 }
 0x340   : > { %15290 = vmatprep.subr.msk.bf16.mxu0 %vm7654_vm0, %v5399_v38  ;;  %v1634_v40 = vrot.slane %v1626_v44, %v16884_v21  ;;  %v2554_v54 = vcombine.low %v1568_v41, %v1575_v30  ;;  %v14403_v59 = vcombine.high %v1568_v41, %v1575_v30  ;;  %v7760_v0 = vsel %vm7654_vm0, %v5399_v38, 0 }
 0x341   : > { %v1641_v13 = vrot.slane %v1627_v58, %v16884_v21  ;;  %v2553_v29 = vrot.slane %v14402_v49, %v16881_v34  ;;  %v2588_v28 = vcombine.low %v1618_v3, %v1625_v51  ;;  %v14404_v43 = vcombine.high %v1618_v3, %v1625_v51  ;;  %15016 = vmatpush3.bf16.xpose.msra.mxu0 %v7760_v0  ;;  %v1221_v51 = vpop.permute.xlu1 %1220 }
 0x342   : > { %v2561_v22 = vrot.slane %v2554_v54, %v16881_v34  ;;  %v2569_v5 = vrot.slane %v14403_v59, %v16881_v34  ;;  %v1291_v20 = vshrl.u32 %v17317_v33, 16  ;;  %v1646_v7 = vcombine.high %v1288_v18, %v16876_v24  ;;  %v1237_v59 = vpop.permute.xlu0 %1236 }
 0x343   : > { %v2570_v11 = vcombine.low %v2545_v1, %v2553_v29  ;;  %v2595_v63 = vrot.slane %v2588_v28, %v16881_v34  ;;  %v2603_v38 = vrot.slane %v14404_v43, %v16881_v34  ;;  %v2604_v16 = vcombine.low %v1634_v40, %v1641_v13 }
 0x344   : > { %v2578_v41 = vcombine.low %v2561_v22, %v2569_v5  ;;  %v14405_v30 = vcombine.high %v1634_v40, %v1641_v13  ;;  %v23088_v49 = vshrl.u32 %v16782_v12, 16  ;;  %v1653_v44 = vrot.slane %v1288_v18, %v16881_v34 }
 0x345   : > { %v17376_v58 = vrot.slane %v2570_v11, %v16884_v21  ;;  %v17379_v33 = vrot.slane %v2604_v16, %v16881_v34  ;;  %v2620_v1 = vcombine.low %v2595_v63, %v2603_v38  ;;  %v1660_v54 = vrot.slane %v1646_v7, %v16881_v34 }
 0x346   : > { %v1292_v3 = vpack.i.b16 %v1291_v20, %v23088_v49  ;;  %v17383_v0 = vrot.slane %v2578_v41, %v16884_v21  ;;  %v17386_v40 = vrot.slane %v14405_v30, %v16881_v34  ;;  %v1085_v29 = vadd.f32 %v17080_v31, %v16734_v57  ;;  %v23096_v49 = vld [vmem:[#allocation36_spill] sm:$0xff] }
 0x347   : > { %23089 = vst [vmem:[#allocation46_spill] sm:$0xff] %v17376_v58  ;;  %v17391_v13 = vrot.slane %v2620_v1, %v16884_v21  ;;  %v1173_v28 = vadd.f32 %v17082_v6, %v16746_v37  ;;  %v1298_v43 = vshrl.u32 %v1221_v51, 16  ;;  %v1296_v20 = vpack.i.b16 %v1237_v59, %v1221_v51 }
 0x348   : > { %v1712_v12 = vcombine.high %v1292_v3, %v16876_v24  ;;  %v1719_v18 = vrot.slane %v1292_v3, %v16881_v34  ;;  %v1299_v7 = vshrl.u32 %v1237_v59, 16  ;;  %v17401_v11 = vpack.c.bf16 %v1085_v29, %v17311_v17  ;;  %v23095_v17 = vld [vmem:[#allocation40_spill] sm:$0xff]  ;;  %v23097_v3 = vld [vmem:[#allocation37_spill] sm:$0xff] }
 0x349   : > { %23090 = vst [vmem:[#allocation47_spill] sm:$0xff] %v17391_v13  ;;  %v17404_v63 = vpack.c.bf16 %v1173_v28, %v17315_v15  ;;  %v23093_v57 = vcombine.low %v17029_v36, %v17032_v56  ;;  %v23094_v37 = vcombine.high %v17029_v36, %v17032_v56  ;;  %v1661_v16 = vcombine.high %v1296_v20, %v16876_v24  ;;  %v23100_v56 = vld [vmem:[#allocation38_spill] sm:$0xff] }
 0x34a   : > { %v1726_v5 = vrot.slane %v1712_v12, %v16881_v34  ;;  %23091 = vst [vmem:[#allocation48_spill] sm:$0xff] %v17401_v11  ;;  %v1300_v38 = vpack.i.b16 %v1299_v7, %v1298_v43  ;;  %v1668_v41 = vrot.slane %v1296_v20, %v16881_v34  ;;  %v4814_v30 = vcombine.low %v23095_v17, %v17048_v27  ;;  %v23101_v12 = vld [vmem:[#allocation39_spill] sm:$0xff] }
 0x34b   : > { %23092 = vst [vmem:[#allocation49_spill] sm:$0xff] %v17404_v63  ;;  %v4805_v31 = vrot.slane %v23093_v57, %v16881_v34  ;;  %v4813_v6 = vrot.slane %v23094_v37, %v16881_v34  ;;  %v23098_v51 = vcombine.low %v23096_v49, %v23097_v3  ;;  %v23099_v59 = vcombine.high %v23096_v49, %v23097_v3  ;;  %v1207_v3 = vpop.permute.xlu1 %1206 }
 0x34c   : > { %v23102_v29 = vcombine.low %v23100_v56, %v23101_v12  ;;  %3380 = vrot.lane.b32.xlu0 %v17401_v11, %s16247_s2  ;;  %v1675_v27 = vrot.slane %v1661_v16, %v16881_v34  ;;  %v1676_v43 = vcombine.low %v1653_v44, %v1668_v41  ;;  %v1677_v20 = vcombine.high %v1653_v44, %v1668_v41 }
 0x34d   : > { %v4822_v15 = vcombine.low %v4805_v31, %v4813_v6  ;;  %v4839_v1 = vrot.slane %v23098_v51, %v16881_v34  ;;  %v4847_v36 = vrot.slane %v23099_v59, %v16881_v34  ;;  %v1727_v7 = vcombine.high %v1300_v38, %v16876_v24  ;;  %3364 = vrot.lane.b32.xlu1 %v17401_v11, %s16248_s10  ;;  %v1223_v51 = vpop.permute.xlu0 %1222 }
 0x34e   : > { %v4855_v28 = vrot.slane %v23102_v29, %v16881_v34  ;;  %v1734_v57 = vrot.slane %v1300_v38, %v16881_v34  ;;  %v17438_v31 = vrot.slane %v4814_v30, %v16884_v21  ;;  %v23105_v6 = vcombine.high %v23100_v56, %v23101_v12  ;;  %v23106_v29 = vld [vmem:[#allocation30_spill] sm:$0xff] }
 0x34f   : > { %v17441_v37 = vrot.slane %v4822_v15, %v16884_v21  ;;  %v1684_v44 = vrot.slane %v1676_v43, %v16884_v21  ;;  %v1691_v41 = vrot.slane %v1677_v20, %v16884_v21  ;;  %v1692_v17 = vcombine.low %v1660_v54, %v1675_v27 }
 0x350   : > { %23103 = vst [vmem:[#allocation40_spill] sm:$0xff] %v17438_v31  ;;  %v4863_v16 = vrot.slane %v23105_v6, %v16881_v34  ;;  %v1693_v49 = vcombine.high %v1660_v54, %v1675_v27  ;;  %v1741_v38 = vrot.slane %v1727_v7, %v16881_v34  ;;  %v1742_v30 = vcombine.low %v1719_v18, %v1734_v57 }
 0x351   : > { %23104 = vst [vmem:[#allocation36_spill] sm:$0xff] %v17441_v37  ;;  %v1743_v59 = vcombine.high %v1719_v18, %v1734_v57  ;;  %v4830_v15 = vcombine.low %v17438_v31, %v17441_v37  ;;  %1208 = vrot.lane.b32.xlu0 %v23106_v29, %s16248_s10  ;;  %v17455_v56 = vrot.slane %v1692_v17, %v16884_v21  ;;  %v1314_v22 = vshrl.u32 %v1223_v51, 16  ;;  %v23116_v37 = vld [vmem:[#allocation31_spill] sm:$0xff] }
 0x352   : > { %v17458_v12 = vrot.slane %v1693_v49, %v16884_v21  ;;  %v2638_v43 = vcombine.low %v1684_v44, %v1691_v41  ;;  %v14406_v54 = vcombine.high %v1684_v44, %v1691_v41  ;;  %3396 = vrot.lane.b32.xlu1 %v17401_v11, %s16249_s12  ;;  %v17463_v27 = vrot.slane %v1742_v30, %v16884_v21  ;;  %v1239_v44 = vpop.permute.xlu1 %1238 }
 0x353   : > { %v17466_v18 = vrot.slane %v1743_v59, %v16884_v21  ;;  %v1758_v20 = vcombine.low %v1726_v5, %v1741_v38  ;;  %v1759_v7 = vcombine.high %v1726_v5, %v1741_v38  ;;  %v4864_v30 = vcombine.low %v4839_v1, %v4847_v36 }
 0x354   : > { %23107 = vst [vmem:[#allocation37_spill] sm:$0xff] %v17463_v27  ;;  %v17469_v57 = vrot.slane %v2638_v43, %v16881_v34  ;;  %v17472_v6 = vrot.slane %v14406_v54, %v16881_v34  ;;  %v4872_v59 = vcombine.low %v4855_v28, %v4863_v16  ;;  %v5409_v43 = vshrl.u32 %v4830_v15, 16  ;;  %v23112_v54 = vld [vmem:[#allocation27_spill] sm:$0xff] }
 0x355   : > { %23108 = vst [vmem:[#allocation38_spill] sm:$0xff] %v17466_v18  ;;  %v17479_v17 = vrot.slane %v1758_v20, %v16884_v21  ;;  %v17482_v49 = vrot.slane %v1759_v7, %v16884_v21  ;;  %1240 = vrot.lane.b32.xlu0 %v23106_v29, %s16249_s12  ;;  %v1304_v41 = vpack.i.b16 %v1207_v3, %v23112_v54  ;;  %v3359_v20 = vpop.permute.xlu0 %3358  ;;  %v1307_v38 = vshrl.u32 %v1207_v3, 16  ;;  %v23117_v3 = vld [vmem:[#allocation32_spill] sm:$0xff] }
 0x356   : > { %23109 = vst [vmem:[#allocation39_spill] sm:$0xff] %v17469_v57  ;;  %1224 = vrot.lane.b32.xlu1 %v23106_v29, %s16247_s2  ;;  %v17498_v11 = vrot.slane %v4864_v30, %v16884_v21  ;;  %v17501_v1 = vrot.slane %v4872_v59, %v16884_v21  ;;  %v23115_v16 = vshrl.u32 %v23112_v54, 16  ;;  %v1312_v31 = vpack.i.b16 %v1239_v44, %v1223_v51 }
 0x357   : > { %23110 = vst [vmem:[#allocation50_spill] sm:$0xff] %v17479_v17  ;;  %23111 = vst [vmem:[#allocation51_spill] sm:$0xff] %v17482_v49  ;;  %v1778_v36 = vcombine.high %v1304_v41, %v16876_v24  ;;  %v1785_v28 = vrot.slane %v1304_v41, %v16881_v34  ;;  %v1315_v7 = vshrl.u32 %v1239_v44, 16  ;;  %v3464_v18 = vpack.i.b16 %v3359_v20, %v23116_v37 }
 0x358   : > { %23113 = vst [vmem:[#allocation27_spill] sm:$0xff] %v17498_v11  ;;  %23114 = vst [vmem:[#allocation52_spill] sm:$0xff] %v17501_v1  ;;  %v1308_v29 = vpack.i.b16 %v1307_v38, %v23115_v16  ;;  %v4880_v30 = vcombine.low %v17498_v11, %v17501_v1  ;;  %v3467_v5 = vshrl.u32 %v3359_v20, 16  ;;  %v23118_v41 = vcombine.low %v17110_v61, %v17113_v10 }
 0x359   : > { %1226 = vrot.lane.b32.xlu0 %v23117_v3, %s16247_s2  ;;  %v1792_v59 = vrot.slane %v1778_v36, %v16881_v34  ;;  %v1316_v38 = vpack.i.b16 %v1315_v7, %v1314_v22  ;;  %v1793_v54 = vcombine.high %v1312_v31, %v16876_v24  ;;  %v1800_v20 = vrot.slane %v1312_v31, %v16881_v34 }
 0x35a   : > { %v17517_v49 = vrot.slane %v23118_v41, %v16881_v34  ;;  %1210 = vrot.lane.b32.xlu1 %v23117_v3, %s16248_s10  ;;  %v1844_v51 = vcombine.high %v1308_v29, %v16876_v24  ;;  %v1851_v44 = vrot.slane %v1308_v29, %v16881_v34  ;;  %v5408_v16 = vpack.i.b16 %v4880_v30, %v4830_v15 }
 0x35b   : > { %v5410_v11 = vshrl.u32 %v4880_v30, 16  ;;  %v23119_v36 = vshrl.u32 %v23116_v37, 16  ;;  %v1807_v17 = vrot.slane %v1793_v54, %v16881_v34  ;;  %v1859_v27 = vcombine.high %v1316_v38, %v16876_v24 }
 0x35c   : > { %v1858_v41 = vrot.slane %v1844_v51, %v16881_v34  ;;  %v1866_v57 = vrot.slane %v1316_v38, %v16881_v34  ;;  %15287 = vmatprep.subr.msk.bf16.mxu1 %vm7654_vm0, %v5408_v16  ;;  %v7674_v22 = vsel %vm7654_vm0, %v5408_v16, 0  ;;  %v1808_v31 = vcombine.low %v1785_v28, %v1800_v20 }
 0x35d   : > { %v3468_v1 = vpack.i.b16 %v3467_v5, %v23119_v36  ;;  %1212 = vrot.lane.b32.xlu0 %v17195_v60, %s16248_s10  ;;  %v5411_v15 = vpack.i.b16 %v5410_v11, %v5409_v43  ;;  %v1809_v29 = vcombine.high %v1785_v28, %v1800_v20  ;;  %15002 = vmatpush3.bf16.xpose.msra.mxu1 %v7674_v22 }
 0x35e   : > { %1242 = vrot.lane.b32.xlu1 %v23117_v3, %s16249_s12  ;;  %v1824_v37 = vcombine.low %v1792_v59, %v1807_v17  ;;  %v1825_v5 = vcombine.high %v1792_v59, %v1807_v17  ;;  %v1873_v7 = vrot.slane %v1859_v27, %v16881_v34  ;;  %v1874_v30 = vcombine.low %v1851_v44, %v1866_v57 }
 0x35f   : > { %15291 = vmatprep.subr.msk.bf16.mxu0 %vm7654_vm0, %v5411_v15  ;;  %v7763_v51 = vsel %vm7654_vm0, %v5411_v15, 0  ;;  %v1816_v38 = vrot.slane %v1808_v31, %v16884_v21  ;;  %v1823_v54 = vrot.slane %v1809_v29, %v16884_v21  ;;  %v1875_v11 = vcombine.high %v1851_v44, %v1866_v57 }
 0x360   : > { %15018 = vmatpush3.bf16.xpose.msra.mxu0 %v7763_v51  ;;  %v17543_v43 = vrot.slane %v1824_v37, %v16884_v21  ;;  %v17546_v28 = vrot.slane %v1825_v5, %v16884_v21  ;;  %v17549_v17 = vrot.slane %v1874_v30, %v16884_v21  ;;  %v1890_v27 = vcombine.low %v1858_v41, %v1873_v7 }
 0x361   : > { %v17552_v59 = vrot.slane %v1875_v11, %v16884_v21  ;;  %v1891_v16 = vcombine.high %v1858_v41, %v1873_v7  ;;  %v2738_v20 = vcombine.low %v1816_v38, %v1823_v54  ;;  %v14410_v36 = vcombine.high %v1816_v38, %v1823_v54  ;;  %1244 = vrot.lane.b32.xlu0 %v17195_v60, %s16249_s12 }
 0x362   : > { %v17557_v57 = vrot.slane %v1890_v27, %v16884_v21  ;;  %v4054_v15 = vcombine.high %v3464_v18, %v16876_v24  ;;  %1228 = vrot.lane.b32.xlu1 %v17195_v60, %s16247_s2  ;;  %v4061_v7 = vrot.slane %v3464_v18, %v16881_v34  ;;  %v4120_v51 = vcombine.high %v3468_v1, %v16876_v24  ;;  %v3375_v18 = vpop.permute.xlu1 %3374 }
 0x363   : > { %v17567_v41 = vrot.slane %v1891_v16, %v16884_v21  ;;  %v17570_v31 = vrot.slane %v2738_v20, %v16881_v34  ;;  %v17573_v29 = vrot.slane %v14410_v36, %v16881_v34  ;;  %v17589_v11 = vrot.slane %v3468_v1, %v16881_v34 }
 0x364   : > { %v17581_v30 = vrot.slane %v4054_v15, %v16881_v34  ;;  %v23120_v27 = vcombine.high %v17110_v61, %v17113_v10  ;;  %v17598_v20 = vrot.slane %v4120_v51, %v16881_v34  ;;  %v4914_v36 = vcombine.low %v17122_v53, %v17125_v35 }
 0x365   : > { %1230 = vrot.lane.b32.xlu0 %v17336_v14, %s16247_s2  ;;  %v23121_v1 = vcombine.low %v17116_v46, %v17119_v26  ;;  %v23122_v61 = vcombine.high %v17116_v46, %v17119_v26  ;;  %v23123_v53 = vcombine.low %v17132_v45, %v17135_v39  ;;  %v17623_v46 = vcombine.high %v17162_v4, %v17165_v2 }
 0x366   : > { %v4913_v16 = vrot.slane %v23120_v27, %v16881_v34  ;;  %v3391_v27 = vpop.permute.xlu0 %3390  ;;  %1214 = vrot.lane.b32.xlu1 %v17336_v14, %s16248_s10  ;;  %v17626_v26 = vrot.slane %v4914_v36, %v16884_v21 }
 0x367   : > { %v4939_v15 = vrot.slane %v23121_v1, %v16881_v34  ;;  %v4947_v10 = vrot.slane %v23122_v61, %v16881_v34  ;;  %v4955_v35 = vrot.slane %v23123_v53, %v16881_v34  ;;  %v23124_v1 = vcombine.high %v17132_v45, %v17135_v39  ;;  %v23125_v39 = vld [vmem:[#allocation24_spill] sm:$0xff] }
 0x368   : > { %v4922_v51 = vcombine.low %v17517_v49, %v4913_v16  ;;  %v17630_v49 = vcombine.high %v17186_v50, %v17193_v52  ;;  %v3474_v16 = vshrl.u32 %v3375_v18, 16  ;;  %v3472_v5 = vpack.i.b16 %v3391_v27, %v3375_v18 }
 0x369   : > { %v4963_v54 = vrot.slane %v23124_v1, %v16881_v34  ;;  %v4964_v61 = vcombine.low %v4939_v15, %v4947_v10  ;;  %v3475_v45 = vshrl.u32 %v3391_v27, 16  ;;  %5494 = vrot.lane.b32.xlu0 %v23125_v39, %s16248_s10  ;;  %v23126_v50 = vcombine.low %v17226_v19, %v17229_v42 }
 0x36a   : > { %v17633_v53 = vrot.slane %v4922_v51, %v16884_v21  ;;  %v17642_v2 = vpack.i.b16 %v17630_v49, %v17623_v46  ;;  %1246 = vrot.lane.b32.xlu1 %v17336_v14, %s16249_s12  ;;  %v4069_v27 = vcombine.high %v3472_v5, %v16876_v24  ;;  %v4076_v51 = vrot.slane %v3472_v5, %v16881_v34  ;;  %v23129_v5 = vld [vmem:[#allocation23_spill] sm:$0xff] }
 0x36b   : > { %v4972_v38 = vcombine.low %v4955_v35, %v4963_v54  ;;  %v17638_v4 = vrot.slane %v4964_v61, %v16884_v21  ;;  %v2461_v52 = vrot.slane %v23126_v50, %v16881_v34  ;;  %v23127_v54 = vcombine.high %v17226_v19, %v17229_v42 }
 0x36c   : > { %v4930_v36 = vcombine.low %v17626_v26, %v17633_v53  ;;  %v3476_v10 = vpack.i.b16 %v3475_v45, %v3474_v16  ;;  %v2470_v35 = vcombine.low %v17255_v8, %v17258_v48  ;;  %v23128_v19 = vcombine.low %v17233_v9, %v17244_v55 }
 0x36d   : > { %v2469_v18 = vrot.slane %v23127_v54, %v16881_v34  ;;  %v17657_v15 = vrot.slane %v4972_v38, %v16884_v21  ;;  %v4083_v16 = vrot.slane %v4069_v27, %v16881_v34  ;;  %5512 = vrot.lane.b32.xlu0 %v23129_v5, %s16247_s2  ;;  %v4084_v50 = vcombine.low %v4061_v7, %v4076_v51 }
 0x36e   : > { %v17667_v42 = vrot.slane %v23128_v19, %v16881_v34  ;;  %v5421_v38 = vshrl.u32 %v4930_v36, 16  ;;  %v4135_v45 = vcombine.high %v3476_v10, %v16876_v24  ;;  %v4085_v8 = vcombine.high %v4061_v7, %v4076_v51  ;;  %5510 = vrot.lane.b32.xlu1 %v23125_v39, %s16247_s2 }
 0x36f   : > { %v2478_v1 = vcombine.low %v2461_v52, %v2469_v18  ;;  %v4980_v61 = vcombine.low %v17638_v4, %v17657_v15  ;;  %v4142_v48 = vrot.slane %v3476_v10, %v16881_v34  ;;  %v17677_v52 = vrot.slane %v2470_v35, %v16884_v21 }
 0x370   : > { %v4100_v19 = vcombine.low %v17581_v30, %v4083_v16  ;;  %v4101_v27 = vcombine.high %v17581_v30, %v4083_v16  ;;  %v4092_v37 = vrot.slane %v4084_v50, %v16884_v21  ;;  %v4099_v22 = vrot.slane %v4085_v8, %v16884_v21  ;;  %v23130_v30 = vld [vmem:[#allocation26_spill] sm:$0xff] }
 0x371   : > { %v5420_v54 = vpack.i.b16 %v4980_v61, %v4930_v36  ;;  %v5422_v18 = vshrl.u32 %v4980_v61, 16  ;;  %v4149_v7 = vrot.slane %v4135_v45, %v16881_v34  ;;  %v4150_v10 = vcombine.low %v17589_v11, %v4142_v48  ;;  %5530 = vrot.lane.b32.xlu0 %v23130_v30, %s16249_s12 }
 0x372   : > { %v17690_v36 = vrot.slane %v4100_v19, %v16884_v21  ;;  %v17693_v61 = vrot.slane %v4101_v27, %v16884_v21  ;;  %v4151_v16 = vcombine.high %v17589_v11, %v4142_v48  ;;  %v14446_v19 = vcombine.high %v4092_v37, %v4099_v22  ;;  %5526 = vrot.lane.b32.xlu1 %v23125_v39, %s16249_s12 }
 0x373   : > { %15288 = vmatprep.subr.msk.bf16.mxu1 %vm7654_vm0, %v5420_v54  ;;  %v7677_v51 = vsel %vm7654_vm0, %v5420_v54, 0  ;;  %v5423_v35 = vpack.i.b16 %v5422_v18, %v5421_v38  ;;  %v17699_v45 = vrot.slane %v4150_v10, %v16884_v21  ;;  %v4166_v50 = vcombine.low %v17598_v20, %v4149_v7  ;;  %v3361_v38 = vpop.permute.xlu1 %3360 }
 0x374   : > { %15004 = vmatpush3.bf16.xpose.msra.mxu1 %v7677_v51  ;;  %v4167_v8 = vcombine.high %v17598_v20, %v4149_v7  ;;  %v4982_v18 = vcombine.low %v4092_v37, %v4099_v22  ;;  %v17710_v48 = vrot.slane %v4151_v16, %v16884_v21  ;;  %v17724_v22 = vrot.slane %v14446_v19, %v16881_v34  ;;  %v23135_v7 = vld [vmem:[#allocation33_spill] sm:$0xff] }
 0x375   : > { %15292 = vmatprep.subr.msk.bf16.mxu0 %vm7654_vm0, %v5423_v35  ;;  %15293 = vmatprep.subr.msk.bf16.mxu1 %vm7654_vm0, %v17642_v2  ;;  %v7766_v54 = vsel %vm7654_vm0, %v5423_v35, 0  ;;  %v17713_v27 = vrot.slane %v4166_v50, %v16884_v21  ;;  %v17727_v37 = vrot.slane %v2478_v1, %v16884_v21  ;;  %v23131_v51 = vcombine.high %v17233_v9, %v17244_v55 }
 0x376   : > { %15020 = vmatpush3.bf16.xpose.msra.mxu0 %v7766_v54  ;;  %v17716_v20 = vrot.slane %v4167_v8, %v16884_v21  ;;  %v17721_v10 = vrot.slane %v4982_v18, %v16881_v34  ;;  %v3377_v54 = vpop.permute.xlu0 %3376  ;;  %v23132_v18 = vld [vmem:[#allocation25_spill] sm:$0xff]  ;;  %v23133_v55 = vcombine.low %v17247_v25, %v17250_v62  ;;  %v5391_v1 = vshrl.u32 %v17623_v46, 16  ;;  %5496 = vrot.lane.b32.xlu1 %v23129_v5, %s16248_s10 }
 0x377   : > { %v2503_v35 = vrot.slane %v23131_v51, %v16881_v34  ;;  %5516 = vrot.lane.b32.xlu0 %v23132_v18, %s16247_s2  ;;  %v2486_v9 = vcombine.low %v17677_v52, %v17727_v37  ;;  %v23134_v51 = vcombine.high %v17247_v25, %v17250_v62  ;;  %v5392_v16 = vshrl.u32 %v17630_v49, 16  ;;  %v3393_v14 = vpop.permute.xlu1 %3392 }
 0x378   : > { %v2511_v19 = vrot.slane %v23133_v55, %v16881_v34  ;;  %v3480_v11 = vpack.i.b16 %v3361_v38, %v23135_v7  ;;  %v3483_v44 = vshrl.u32 %v3361_v38, 16  ;;  %v3490_v39 = vshrl.u32 %v3377_v54, 16  ;;  %v23137_v38 = vld [vmem:[#allocation29_spill] sm:$0xff] }
 0x379   : > { %v2519_v8 = vrot.slane %v23134_v51, %v16881_v34  ;;  %v2520_v50 = vcombine.low %v17667_v42, %v2503_v35  ;;  %v3241_v55 = vshrl.u32 %v2486_v9, 16  ;;  %v17764_v25 = vpack.i.b16 %v5392_v16, %v5391_v1 }
 0x37a   : > { %v23136_v62 = vshrl.u32 %v23135_v7, 16  ;;  %v4186_v49 = vcombine.high %v3480_v11, %v16876_v24  ;;  %v4193_v42 = vrot.slane %v3480_v11, %v16881_v34  ;;  %5528 = vrot.lane.b32.xlu1 %v23129_v5, %s16249_s12 }
 0x37b   : > { %v17760_v60 = vrot.slane %v2520_v50, %v16884_v21  ;;  %v2528_v3 = vcombine.low %v2511_v19, %v2519_v8  ;;  %5502 = vrot.lane.b32.xlu0 %v23137_v38, %s16248_s10  ;;  %v3488_v50 = vpack.i.b16 %v3393_v14, %v3377_v54  ;;  %v3491_v8 = vshrl.u32 %v3393_v14, 16  ;;  %15297 = vmatprep.subr.msk.bf16.mxu0 %vm7654_vm0, %v17764_v25 }
 0x37c   : > { %v3484_v46 = vpack.i.b16 %v3483_v44, %v23136_v62  ;;  %v17777_v19 = vcombine.low %v17376_v58, %v17383_v0  ;;  %v4200_v44 = vrot.slane %v4186_v49, %v16881_v34 }
 0x37d   : > { %v17773_v35 = vrot.slane %v2528_v3, %v16884_v21  ;;  %v23138_v3 = vcombine.low %v17379_v33, %v17386_v40  ;;  %v3492_v1 = vpack.i.b16 %v3491_v8, %v3490_v39  ;;  %v4201_v54 = vcombine.high %v3488_v50, %v16876_v24  ;;  %v23140_v39 = vld [vmem:[#allocation28_spill] sm:$0xff] }
 0x37e   : > { %v4252_v7 = vcombine.high %v3484_v46, %v16876_v24  ;;  %v4259_v11 = vrot.slane %v3484_v46, %v16881_v34  ;;  %v4208_v51 = vrot.slane %v3488_v50, %v16881_v34  ;;  %v7846_v33 = vsel %vm7654_vm0, %v17642_v2, 0  ;;  %5498 = vrot.lane.b32.xlu1 %v23130_v30, %s16248_s10 }
 0x37f   : > { %v17788_v16 = vrot.slane %v23138_v3, %v16884_v21  ;;  %v2536_v14 = vcombine.low %v17760_v60, %v17773_v35  ;;  %v4731_v40 = vcombine.high %v17305_v47, %v17320_v23  ;;  %5520 = vrot.lane.b32.xlu0 %v23140_v39, %s16247_s2  ;;  %v4215_v50 = vrot.slane %v4201_v54, %v16881_v34 }
 0x380   : > { %v4266_v62 = vrot.slane %v4252_v7, %v16881_v34  ;;  %v4216_v3 = vcombine.low %v4193_v42, %v4208_v51  ;;  %v4217_v5 = vcombine.high %v4193_v42, %v4208_v51  ;;  %v4267_v7 = vcombine.high %v3492_v1, %v16876_v24 }
 0x381   : > { %23139 = vst [vmem:[#allocation31_spill] sm:$0xff] %v17788_v16  ;;  %v2636_v46 = vcombine.low %v17391_v13, %v17788_v16  ;;  %v3240_v49 = vpack.i.b16 %v2536_v14, %v2486_v9  ;;  %v3242_v8 = vshrl.u32 %v2536_v14, 16  ;;  %v4274_v58 = vrot.slane %v3492_v1, %v16881_v34 }
 0x382   : > { %v4224_v47 = vrot.slane %v4216_v3, %v16884_v21  ;;  %v4232_v23 = vcombine.low %v4200_v44, %v4215_v50  ;;  %v4233_v16 = vcombine.high %v4200_v44, %v4215_v50  ;;  %v4231_v9 = vrot.slane %v4217_v5, %v16884_v21  ;;  %5514 = vrot.lane.b32.xlu1 %v23130_v30, %s16247_s2 }
 0x383   : > { %v3252_v13 = vpack.i.b16 %v2636_v46, %v17777_v19  ;;  %15005 = vmatprep.mubr.msk.bf16.mxu1 %vm7654_vm0, %v3240_v49  ;;  %v3243_v2 = vpack.i.b16 %v3242_v8, %v3241_v55  ;;  %v4281_v14 = vrot.slane %v4267_v7, %v16881_v34  ;;  %v4282_v54 = vcombine.low %v4259_v11, %v4274_v58  ;;  %v23141_v55 = vld [vmem:[#allocation43_spill] sm:$0xff]  ;;  %v23150_v8 = vld [vmem:[#allocation50_spill] sm:$0xff] }
 0x384   : > { %v4283_v39 = vcombine.high %v4259_v11, %v4274_v58  ;;  %v17816_v42 = vrot.slane %v4232_v23, %v16884_v21  ;;  %v17819_v1 = vrot.slane %v4233_v16, %v16884_v21  ;;  %v4781_v44 = vcombine.high %v23141_v55, %v17328_v32  ;;  %5506 = vrot.lane.b32.xlu0 %v17404_v63, %s16248_s10  ;;  %v23146_v23 = vld [vmem:[#allocation37_spill] sm:$0xff] }
 0x385   : > { %15006 = vmatmul.mubr.msk.bf16.vlgmr.msra.gmra.mrb[16].mxu1 %vm7654_vm0, %v3252_v13  ;;  %15021 = vmatprep.mubr.msk.bf16.mxu0 %vm7654_vm0, %v3243_v2  ;;  %v3253_v5 = vshrl.u32 %v17777_v19, 16  ;;  %v17825_v51 = vrot.slane %v4282_v54, %v16884_v21  ;;  %v4298_v13 = vcombine.low %v4266_v62, %v4281_v14  ;;  %v4299_v11 = vcombine.high %v4266_v62, %v4281_v14 }
 0x386   : > { %15030 = vmatpush3.bf16.xpose.msra.mxu1 %v7846_v33  ;;  %v17828_v58 = vrot.slane %v4283_v39, %v16884_v21  ;;  %v5082_v49 = vcombine.low %v4224_v47, %v4231_v9  ;;  %v14450_v16 = vcombine.high %v4224_v47, %v4231_v9  ;;  %v5402_v7 = vpack.i.b16 %v4781_v44, %v4731_v40  ;;  %v23155_v33 = vld [vmem:[#allocation40_spill] sm:$0xff] }
 0x387   : > { %v17839_v19 = vrot.slane %v4298_v13, %v16884_v21  ;;  %v17842_v39 = vrot.slane %v4299_v11, %v16884_v21  ;;  %v3254_v2 = vshrl.u32 %v2636_v46, 16  ;;  %v7935_v9 = vsel %vm7654_vm0, %v17764_v25, 0  ;;  %v23144_v25 = vld [vmem:[#allocation45_spill] sm:$0xff]  ;;  %5500 = vrot.lane.b32.xlu1 %v23132_v18, %s16248_s10 }
 0x388   : > { %v17849_v50 = vrot.slane %v5082_v49, %v16881_v34  ;;  %v17852_v3 = vrot.slane %v14450_v16, %v16881_v34  ;;  %v5403_v14 = vshrl.u32 %v4731_v40, 16  ;;  %15294 = vmatprep.subr.msk.bf16.mxu1 %vm7654_vm0, %v5402_v7  ;;  %v5404_v55 = vshrl.u32 %v4781_v44, 16  ;;  %5524 = vrot.lane.b32.xlu0 %v23144_v25, %s16247_s2  ;;  %v23145_v40 = vld [vmem:[#allocation39_spill] sm:$0xff] }
 0x389   : > { %v3255_v54 = vpack.i.b16 %v3254_v2, %v3253_v5  ;;  %v23142_v46 = vcombine.low %v17455_v56, %v17458_v12  ;;  %v23143_v11 = vcombine.high %v17455_v56, %v17458_v12  ;;  %v2670_v16 = vcombine.low %v23145_v40, %v17472_v6  ;;  %v23147_v5 = vld [vmem:[#allocation38_spill] sm:$0xff]  ;;  %v23151_v56 = vld [vmem:[#allocation51_spill] sm:$0xff] }
 0x38a   : > { %v23148_v44 = vcombine.low %v23146_v23, %v23147_v5  ;;  %v23152_v12 = vcombine.low %v23150_v8, %v23151_v56  ;;  %v5405_v62 = vpack.i.b16 %v5404_v55, %v5403_v14  ;;  %v23153_v6 = vcombine.high %v23150_v8, %v23151_v56  ;;  %v23156_v55 = vld [vmem:[#allocation52_spill] sm:$0xff]  ;;  %v23157_v8 = vld [vmem:[#allocation27_spill] sm:$0xff] }
 0x38b   : > { %v2661_v13 = vrot.slane %v23142_v46, %v16881_v34  ;;  %v2669_v49 = vrot.slane %v23143_v11, %v16881_v34  ;;  %v23149_v46 = vcombine.high %v23146_v23, %v23147_v5  ;;  %15022 = vmatmul.mubr.msk.bf16.vlgmr.msra.gmra.mrb[32].mxu0 %vm7654_vm0, %v3255_v54  ;;  %v17894_v23 = vrot.slane %v2670_v16, %v16884_v21 }
 0x38c   : > { %v2695_v2 = vrot.slane %v23148_v44, %v16881_v34  ;;  %v2711_v11 = vrot.slane %v23152_v12, %v16881_v34  ;;  %v2719_v40 = vrot.slane %v23153_v6, %v16881_v34  ;;  %v7849_v44 = vsel %vm7654_vm0, %v5402_v7, 0  ;;  %15046 = vmatpush3.bf16.xpose.msra.mxu0 %v7935_v9  ;;  %5532 = vrot.lane.b32.xlu1 %v23132_v18, %s16249_s12 }
 0x38d   : > { %v2703_v47 = vrot.slane %v23149_v46, %v16881_v34  ;;  %v2678_v32 = vcombine.low %v2661_v13, %v2669_v49  ;;  %v23154_v46 = vld [vmem:[#allocation36_spill] sm:$0xff]  ;;  %15298 = vmatprep.subr.msk.bf16.mxu0 %vm7654_vm0, %v5405_v62  ;;  %v4881_v13 = vcombine.high %v23157_v8, %v23156_v55  ;;  %v7938_v7 = vsel %vm7654_vm0, %v5405_v62, 0 }
 0x38e   : > { %15032 = vmatpush3.bf16.xpose.msra.mxu1 %v7849_v44  ;;  %v4831_v12 = vcombine.high %v23155_v33, %v23154_v46  ;;  %v2728_v54 = vcombine.low %v2711_v11, %v2719_v40  ;;  %v23158_v33 = vcombine.low %v17543_v43, %v17546_v28  ;;  %v2770_v6 = vcombine.low %v17570_v31, %v17573_v29 }
 0x38f   : > { %v2720_v5 = vcombine.low %v2695_v2, %v2703_v47  ;;  %v17900_v14 = vrot.slane %v2678_v32, %v16884_v21  ;;  %v23159_v32 = vcombine.high %v17543_v43, %v17546_v28  ;;  %v5416_v11 = vshrl.u32 %v4881_v13, 16 }
 0x390   : > { %v5415_v9 = vshrl.u32 %v4831_v12, 16  ;;  %v2761_v49 = vrot.slane %v23158_v33, %v16881_v34  ;;  %v17921_v2 = vrot.slane %v2728_v54, %v16884_v21  ;;  %v5414_v56 = vpack.i.b16 %v4881_v13, %v4831_v12  ;;  %5518 = vrot.lane.b32.xlu1 %v23137_v38, %s16247_s2 }
 0x391   : > { %v17908_v47 = vrot.slane %v2720_v5, %v16884_v21  ;;  %v2769_v16 = vrot.slane %v23159_v32, %v16881_v34  ;;  %v2686_v62 = vcombine.low %v17894_v23, %v17900_v14  ;;  %v23160_v44 = vcombine.low %v17549_v17, %v17552_v59 }
 0x392   : > { %v23161_v43 = vcombine.high %v17549_v17, %v17552_v59  ;;  %15295 = vmatprep.subr.msk.bf16.mxu1 %vm7654_vm0, %v5414_v56  ;;  %v5417_v12 = vpack.i.b16 %v5416_v11, %v5415_v9  ;;  %v23162_v31 = vcombine.low %v17557_v57, %v17567_v41  ;;  %v17943_v55 = vrot.slane %v2770_v6, %v16884_v21 }
 0x393   : > { %v2778_v40 = vcombine.low %v2761_v49, %v2769_v16  ;;  %v2795_v5 = vrot.slane %v23160_v44, %v16881_v34  ;;  %v2736_v46 = vcombine.low %v17908_v47, %v17921_v2  ;;  %v3265_v54 = vshrl.u32 %v2686_v62, 16 }
 0x394   : > { %v2803_v28 = vrot.slane %v23161_v43, %v16881_v34  ;;  %v2811_v29 = vrot.slane %v23162_v31, %v16881_v34  ;;  %v23163_v59 = vcombine.high %v17557_v57, %v17567_v41  ;;  %v2487_v49 = vcombine.high %v17677_v52, %v17727_v37  ;;  %15048 = vmatpush3.bf16.xpose.msra.mxu0 %v7938_v7 }
 0x395   : > { %v17946_v17 = vrot.slane %v2778_v40, %v16884_v21  ;;  %v3264_v9 = vpack.i.b16 %v2736_v46, %v2686_v62  ;;  %v3266_v33 = vshrl.u32 %v2736_v46, 16  ;;  %v2537_v32 = vcombine.high %v17760_v60, %v17773_v35  ;;  %15299 = vmatprep.subr.msk.bf16.mxu0 %vm7654_vm0, %v5417_v12  ;;  %5534 = vrot.lane.b32.xlu1 %v23137_v38, %s16249_s12 }
 0x396   : > { %v2819_v8 = vrot.slane %v23163_v59, %v16881_v34  ;;  %v2820_v13 = vcombine.low %v2795_v5, %v2803_v28  ;;  %v7852_v57 = vsel %vm7654_vm0, %v5414_v56, 0  ;;  %v3247_v52 = vshrl.u32 %v2487_v49, 16 }
 0x397   : > { %v2786_v16 = vcombine.low %v17943_v55, %v17946_v17  ;;  %15009 = vmatprep.mubr.msk.bf16.mxu1 %vm7654_vm0, %v3264_v9  ;;  %v3267_v41 = vpack.i.b16 %v3266_v33, %v3265_v54  ;;  %v3246_v62 = vpack.i.b16 %v2537_v32, %v2487_v49  ;;  %v3248_v37 = vshrl.u32 %v2537_v32, 16  ;;  %15034 = vmatpush3.bf16.xpose.msra.mxu1 %v7852_v57  ;;  %v23171_v57 = vld [vmem:[#allocation42_spill] sm:$0xff] }
 0x398   : > { %v17959_v11 = vrot.slane %v2820_v13, %v16884_v21  ;;  %v2828_v6 = vcombine.low %v2811_v29, %v2819_v8  ;;  %v4931_v35 = vcombine.high %v17626_v26, %v17633_v53  ;;  %v4981_v7 = vcombine.high %v17638_v4, %v17657_v15 }
 0x399   : > { %15025 = vmatprep.mubr.msk.bf16.mxu0 %vm7654_vm0, %v3267_v41  ;;  %v3277_v56 = vshrl.u32 %v2786_v16, 16  ;;  %v3249_v40 = vpack.i.b16 %v3248_v37, %v3247_v52  ;;  %v23164_v44 = vcombine.low %v17690_v36, %v17693_v61  ;;  %v23165_v43 = vcombine.high %v17690_v36, %v17693_v61  ;;  %v23172_v37 = vld [vmem:[#allocation31_spill] sm:$0xff] }
 0x39a   : > { %v17965_v60 = vrot.slane %v2828_v6, %v16884_v21  ;;  %v5426_v4 = vpack.i.b16 %v4981_v7, %v4931_v35  ;;  %v5427_v15 = vshrl.u32 %v4931_v35, 16  ;;  %v5428_v28 = vshrl.u32 %v4981_v7, 16  ;;  %v23173_v35 = vld [vmem:[#allocation47_spill] sm:$0xff] }
 0x39b   : > { %v5005_v5 = vrot.slane %v23164_v44, %v16881_v34  ;;  %v5013_v26 = vrot.slane %v23165_v43, %v16881_v34  ;;  %v5014_v46 = vcombine.low %v17721_v10, %v17724_v22  ;;  %v23166_v31 = vcombine.low %v17699_v45, %v17710_v48 }
 0x39c   : > { %v2836_v53 = vcombine.low %v17959_v11, %v17965_v60  ;;  %v23167_v36 = vcombine.high %v17699_v45, %v17710_v48  ;;  %15296 = vmatprep.subr.msk.bf16.mxu1 %vm7654_vm0, %v5426_v4  ;;  %v7941_v13 = vsel %vm7654_vm0, %v5417_v12, 0  ;;  %v5429_v9 = vpack.i.b16 %v5428_v28, %v5427_v15  ;;  %v3363_v15 = vpop.permute.xlu0 %3362 }
 0x39d   : > { %v5022_v54 = vcombine.low %v5005_v5, %v5013_v26  ;;  %v5039_v29 = vrot.slane %v23166_v31, %v16881_v34  ;;  %v17999_v10 = vrot.slane %v5014_v46, %v16884_v21  ;;  %v23168_v45 = vcombine.low %v17713_v27, %v17716_v20  ;;  %15050 = vmatpush3.bf16.xpose.msra.mxu0 %v7941_v13 }
 0x39e   : > { %v5047_v61 = vrot.slane %v23167_v36, %v16881_v34  ;;  %v3276_v59 = vpack.i.b16 %v2836_v53, %v2786_v16  ;;  %v3278_v8 = vshrl.u32 %v2836_v53, 16  ;;  %v23169_v33 = vcombine.high %v17713_v27, %v17716_v20  ;;  %v23170_v16 = vld [vmem:[#allocation46_spill] sm:$0xff]  ;;  %15300 = vmatprep.subr.msk.bf16.mxu0 %vm7654_vm0, %v5429_v9 }
 0x39f   : > { %v18002_v22 = vrot.slane %v5022_v54, %v16884_v21  ;;  %v5055_v48 = vrot.slane %v23168_v45, %v16881_v34  ;;  %v2587_v6 = vcombine.high %v23170_v16, %v17383_v0  ;;  %v3498_v41 = vshrl.u32 %v23171_v57, 16 }
 0x3a0   : > { %v5063_v12 = vrot.slane %v23169_v33, %v16881_v34  ;;  %15010 = vmatmul.mubr.msk.bf16.gmra.mrb[20].mxu1 %vm7654_vm0, %v3276_v59  ;;  %v3279_v49 = vpack.i.b16 %v3278_v8, %v3277_v56  ;;  %v5064_v32 = vcombine.low %v5039_v29, %v5047_v61  ;;  %v7855_v52 = vsel %vm7654_vm0, %v5426_v4, 0  ;;  %v23174_v4 = vld [vmem:[#allocation28_spill] sm:$0xff] }
 0x3a1   : > { %15037 = vmatprep.mubr.msk.bf16.mxu1 %vm7654_vm0, %v3246_v62  ;;  %v5030_v27 = vcombine.low %v17999_v10, %v18002_v22  ;;  %v2637_v7 = vcombine.high %v23173_v35, %v23172_v37  ;;  %15036 = vmatpush3.bf16.xpose.msra.mxu1 %v7855_v52  ;;  %v7944_v56 = vsel %vm7654_vm0, %v5429_v9, 0  ;;  %v2687_v62 = vcombine.high %v17894_v23, %v17900_v14 }
 0x3a2   : > { %v5072_v20 = vcombine.low %v5055_v48, %v5063_v12  ;;  %15026 = vmatmul.mubr.msk.bf16.gmra.mrb[36].mxu0 %vm7654_vm0, %v3279_v49  ;;  %v18025_v0 = vrot.slane %v5064_v32, %v16884_v21  ;;  %v2737_v44 = vcombine.high %v17908_v47, %v17921_v2  ;;  %v3259_v26 = vshrl.u32 %v2587_v6, 16  ;;  %5504 = vrot.lane.b32.xlu1 %v23174_v4, %s16248_s10 }
 0x3a3   : > { %15053 = vmatprep.mubr.msk.bf16.mxu0 %vm7654_vm0, %v3249_v40  ;;  %v5433_v43 = vshrl.u32 %v5030_v27, 16  ;;  %v3260_v53 = vshrl.u32 %v2637_v7, 16  ;;  %v3258_v28 = vpack.i.b16 %v2637_v7, %v2587_v6  ;;  %v23175_v23 = vcombine.low %v17816_v42, %v17819_v1  ;;  %v3395_v6 = vpop.permute.xlu0 %3394 }
 0x3a4   : > { %v18034_v5 = vrot.slane %v5072_v20, %v16884_v21  ;;  %v23176_v47 = vcombine.high %v17816_v42, %v17819_v1  ;;  %v5114_v40 = vcombine.low %v17849_v50, %v17852_v3  ;;  %v3270_v54 = vpack.i.b16 %v2737_v44, %v2687_v62 }
 0x3a5   : > { %v5105_v14 = vrot.slane %v23175_v23, %v16881_v34  ;;  %v23177_v31 = vcombine.low %v17825_v51, %v17828_v58  ;;  %v23178_v36 = vcombine.high %v17825_v51, %v17828_v58  ;;  %v3261_v59 = vpack.i.b16 %v3260_v53, %v3259_v26  ;;  %v3379_v51 = vpop.permute.xlu1 %3378  ;;  %15052 = vmatpush3.bf16.xpose.msra.mxu0 %v7944_v56 }
 0x3a6   : > { %v5113_v2 = vrot.slane %v23176_v47, %v16881_v34  ;;  %v5080_v46 = vcombine.low %v18025_v0, %v18034_v5  ;;  %v23179_v1 = vcombine.low %v17839_v19, %v17842_v39  ;;  %v23180_v3 = vcombine.high %v17839_v19, %v17842_v39  ;;  %5536 = vrot.lane.b32.xlu1 %v23174_v4, %s16249_s12 }
 0x3a7   : > { %v5139_v29 = vrot.slane %v23177_v31, %v16881_v34  ;;  %v5147_v61 = vrot.slane %v23178_v36, %v16881_v34  ;;  %v18067_v45 = vrot.slane %v5114_v40, %v16884_v21  ;;  %v3272_v12 = vshrl.u32 %v2737_v44, 16 }
 0x3a8   : > { %v5122_v42 = vcombine.low %v5105_v14, %v5113_v2  ;;  %v5155_v50 = vrot.slane %v23179_v1, %v16881_v34  ;;  %v5163_v8 = vrot.slane %v23180_v3, %v16881_v34  ;;  %v5432_v13 = vpack.i.b16 %v5080_v46, %v5030_v27  ;;  %15038 = vmatmul.mubr.msk.bf16.vlgmr.msra.gmra.mrb[24].mxu1 %vm7654_vm0, %v3258_v28 }
 0x3a9   : > { %v5434_v9 = vshrl.u32 %v5080_v46, 16  ;;  %v5164_v48 = vcombine.low %v5139_v29, %v5147_v61  ;;  %v2787_v19 = vcombine.high %v17943_v55, %v17946_v17  ;;  %v3271_v32 = vshrl.u32 %v2687_v62, 16  ;;  %15041 = vmatprep.mubr.msk.bf16.mxu1 %vm7654_vm0, %v3270_v54  ;;  %v23181_v46 = vld [vmem:[#allocation23_spill] sm:$0xff] }
 0x3aa   : > { %v18072_v58 = vrot.slane %v5122_v42, %v16884_v21  ;;  %v5172_v33 = vcombine.low %v5155_v50, %v5163_v8  ;;  %15301 = vmatprep.subr.msk.bf16.mxu1 %vm7654_vm0, %v5432_v13  ;;  %v8024_v49 = vsel %vm7654_vm0, %v5432_v13, 0  ;;  %v2837_v16 = vcombine.high %v17959_v11, %v17965_v60  ;;  %5522 = vrot.lane.b32.xlu1 %v17404_v63, %s16247_s2  ;;  %v23182_v8 = vld [vmem:[#allocation24_spill] sm:$0xff] }
 0x3ab   : > { %v5435_v39 = vpack.i.b16 %v5434_v9, %v5433_v43  ;;  %15062 = vmatpush3.bf16.xpose.msra.mxu1 %v8024_v49  ;;  %v18085_v55 = vrot.slane %v5164_v48, %v16884_v21  ;;  %v3506_v27 = vshrl.u32 %v3379_v51, 16  ;;  %v3273_v20 = vpack.i.b16 %v3272_v12, %v3271_v32 }
 0x3ac   : > { %v5130_v52 = vcombine.low %v18067_v45, %v18072_v58  ;;  %v18088_v17 = vrot.slane %v5172_v33, %v16884_v21  ;;  %v3283_v37 = vshrl.u32 %v2787_v19, 16  ;;  %v3284_v35 = vshrl.u32 %v2837_v16, 16  ;;  %15054 = vmatmul.mubr.msk.bf16.vlgmr.msra.gmra.mrb[40].mxu0 %vm7654_vm0, %v3261_v59 }
 0x3ad   : > { %15305 = vmatprep.subr.msk.bf16.mxu0 %vm7654_vm0, %v5435_v39  ;;  %v3496_v11 = vpack.i.b16 %v3363_v15, %v23171_v57  ;;  %v3282_v7 = vpack.i.b16 %v2837_v16, %v2787_v19  ;;  %v3499_v56 = vshrl.u32 %v3363_v15, 16  ;;  %v3504_v62 = vpack.i.b16 %v3395_v6, %v3379_v51  ;;  %15057 = vmatprep.mubr.msk.bf16.mxu0 %vm7654_vm0, %v3273_v20 }
 0x3ae   : > { %v5180_v60 = vcombine.low %v18085_v55, %v18088_v17  ;;  %v5445_v44 = vshrl.u32 %v5130_v52, 16  ;;  %v3285_v43 = vpack.i.b16 %v3284_v35, %v3283_v37  ;;  %v3507_v53 = vshrl.u32 %v3395_v6, 16  ;;  %5538 = vrot.lane.b32.xlu1 %v17404_v63, %s16249_s12 }
 0x3af   : > { %v4318_v26 = vcombine.high %v3496_v11, %v16876_v24  ;;  %v3500_v14 = vpack.i.b16 %v3499_v56, %v3498_v41  ;;  %v4333_v47 = vcombine.high %v3504_v62, %v16876_v24  ;;  %v4325_v15 = vrot.slane %v3496_v11, %v16881_v34 }
 0x3b0   : > { %v5444_v28 = vpack.i.b16 %v5180_v60, %v5130_v52  ;;  %v5446_v23 = vshrl.u32 %v5180_v60, 16  ;;  %v3508_v2 = vpack.i.b16 %v3507_v53, %v3506_v27  ;;  %v4340_v40 = vrot.slane %v3504_v62, %v16881_v34  ;;  %15042 = vmatmul.mubr.msk.bf16.gmra.mrb[28].mxu1 %vm7654_vm0, %v3282_v7 }
 0x3b1   : > { %v8113_v57 = vsel %vm7654_vm0, %v5435_v39, 0  ;;  %v4332_v31 = vrot.slane %v4318_v26, %v16881_v34  ;;  %v4384_v29 = vcombine.high %v3500_v14, %v16876_v24  ;;  %v4347_v61 = vrot.slane %v4333_v47, %v16881_v34 }
 0x3b2   : > { %15302 = vmatprep.subr.msk.bf16.mxu1 %vm7654_vm0, %v5444_v28  ;;  %v5447_v41 = vpack.i.b16 %v5446_v23, %v5445_v44  ;;  %15078 = vmatpush3.bf16.xpose.msra.mxu0 %v8113_v57  ;;  %v8027_v36 = vsel %vm7654_vm0, %v5444_v28, 0  ;;  %v4348_v59 = vcombine.low %v4325_v15, %v4340_v40  ;;  %v4349_v42 = vcombine.high %v4325_v15, %v4340_v40 }
 0x3b3   : > { %15064 = vmatpush3.bf16.xpose.msra.mxu1 %v8027_v36  ;;  %v4391_v1 = vrot.slane %v3500_v14, %v16881_v34  ;;  %v4399_v50 = vcombine.high %v3508_v2, %v16876_v24  ;;  %v4406_v3 = vrot.slane %v3508_v2, %v16881_v34  ;;  %5508 = vrot.lane.b32.xlu1 %v23144_v25, %s16248_s10 }
 0x3b4   : > { %15306 = vmatprep.subr.msk.bf16.mxu0 %vm7654_vm0, %v5447_v41  ;;  %v4356_v9 = vrot.slane %v4348_v59, %v16884_v21  ;;  %v4363_v48 = vrot.slane %v4349_v42, %v16884_v21  ;;  %v4364_v51 = vcombine.low %v4332_v31, %v4347_v61  ;;  %v4365_v33 = vcombine.high %v4332_v31, %v4347_v61 }
 0x3b5   : > { %v4398_v12 = vrot.slane %v4384_v29, %v16881_v34  ;;  %v4413_v19 = vrot.slane %v4399_v50, %v16881_v34  ;;  %v4414_v39 = vcombine.low %v4391_v1, %v4406_v3  ;;  %v4415_v49 = vcombine.high %v4391_v1, %v4406_v3  ;;  %15058 = vmatmul.mubr.msk.bf16.gmra.mrb[44].mxu0 %vm7654_vm0, %v3285_v43  ;;  %v23183_v3 = vld [vmem:[#allocation30_spill] sm:$0xff] }
 0x3b6   : > { %v4372_v32 = vrot.slane %v4364_v51, %v16884_v21  ;;  %v4379_v16 = vrot.slane %v4365_v33, %v16884_v21  ;;  %v5182_v6 = vcombine.low %v4356_v9, %v4363_v48  ;;  %v14454_v52 = vcombine.high %v4356_v9, %v4363_v48 }
 0x3b7   : > { %v4422_v27 = vrot.slane %v4414_v39, %v16884_v21  ;;  %v4429_v20 = vrot.slane %v4415_v49, %v16884_v21  ;;  %v4430_v37 = vcombine.low %v4398_v12, %v4413_v19  ;;  %v4431_v35 = vcombine.high %v4398_v12, %v4413_v19  ;;  %5540 = vrot.lane.b32.xlu1 %v23144_v25, %s16249_s12 }
 0x3b8   : > { %v8116_v11 = vsel %vm7654_vm0, %v5447_v41, 0  ;;  %v5189_v60 = vrot.slane %v5182_v6, %v16881_v34  ;;  %v5197_v7 = vrot.slane %v14454_v52, %v16881_v34  ;;  %v5198_v56 = vcombine.low %v4372_v32, %v4379_v16  ;;  %v23185_v52 = vld [vmem:[#allocation48_spill] sm:$0xff] }
 0x3b9   : > { %v4438_v62 = vrot.slane %v4430_v37, %v16884_v21  ;;  %v4445_v44 = vrot.slane %v4431_v35, %v16884_v21  ;;  %v14455_v26 = vcombine.high %v4372_v32, %v4379_v16  ;;  %v5232_v53 = vcombine.low %v4422_v27, %v4429_v20 }
 0x3ba   : > { %15080 = vmatpush3.bf16.xpose.msra.mxu0 %v8116_v11  ;;  %v14456_v28 = vcombine.high %v4422_v27, %v4429_v20  ;;  %v5205_v43 = vrot.slane %v5198_v56, %v16881_v34  ;;  %v5214_v23 = vcombine.low %v5189_v60, %v5197_v7  ;;  %v5031_v14 = vcombine.high %v17999_v10, %v18002_v22  ;;  %v23186_v7 = vld [vmem:[#allocation41_spill] sm:$0xff] }
 0x3bb   : > { %v5248_v47 = vcombine.low %v4438_v62, %v4445_v44  ;;  %v14457_v15 = vcombine.high %v4438_v62, %v4445_v44  ;;  %v5213_v2 = vrot.slane %v14455_v26, %v16881_v34  ;;  %v5239_v40 = vrot.slane %v5232_v53, %v16881_v34  ;;  %v23187_v62 = vld [vmem:[#allocation44_spill] sm:$0xff] }
 0x3bc   : > { %v5247_v57 = vrot.slane %v14456_v28, %v16881_v34  ;;  %v5081_v41 = vcombine.high %v18025_v0, %v18034_v5  ;;  %v5439_v31 = vshrl.u32 %v5031_v14, 16  ;;  %v5131_v10 = vcombine.high %v18067_v45, %v18072_v58 }
 0x3bd   : > { %v5222_v36 = vcombine.low %v5205_v43, %v5213_v2  ;;  %v5255_v61 = vrot.slane %v5248_v47, %v16881_v34  ;;  %v5263_v59 = vrot.slane %v14457_v15, %v16881_v34  ;;  %v5181_v50 = vcombine.high %v18085_v55, %v18088_v17  ;;  %v23184_v17 = vld [vmem:[#allocation32_spill] sm:$0xff] }
 0x3be   : > { %v5264_v22 = vcombine.low %v5239_v40, %v5247_v57  ;;  %v18150_v42 = vpack.i.b16 %v5081_v41, %v5031_v14  ;;  %v5440_v1 = vshrl.u32 %v5081_v41, 16  ;;  %v1322_v0 = vshrl.u32 %v23183_v3, 16  ;;  %v3381_v20 = vpop.permute.xlu0 %3380 }
 0x3bf   : > { %v5221_v5 = vrot.slane %v5214_v23, %v16884_v21  ;;  %v5229_v9 = vrot.slane %v5222_v36, %v16884_v21  ;;  %v5272_v48 = vcombine.low %v5255_v61, %v5263_v59  ;;  %v18159_v33 = vpack.i.b16 %v5181_v50, %v5131_v10  ;;  %v3365_v60 = vpop.permute.xlu1 %3364 }
 0x3c0   : > { %v18157_v51 = vpack.i.b16 %v5440_v1, %v5439_v31  ;;  %v5451_v12 = vshrl.u32 %v5131_v10, 16  ;;  %v5271_v58 = vrot.slane %v5264_v22, %v16884_v21  ;;  %v5452_v39 = vshrl.u32 %v5181_v50, 16 }
 0x3c1   : > { %v5279_v19 = vrot.slane %v5272_v48, %v16884_v21  ;;  %v5231_v55 = vcombine.high %v5221_v5, %v5229_v9  ;;  %v1338_v49 = vshrl.u32 %v23184_v17, 16  ;;  %v5230_v32 = vcombine.low %v5221_v5, %v5229_v9 }
 0x3c2   : > { %v3514_v27 = vshrl.u32 %v23185_v52, 16  ;;  %v18168_v35 = vpack.i.b16 %v5452_v39, %v5451_v12  ;;  %v1354_v56 = vshrl.u32 %v23186_v7, 16  ;;  %v18174_v26 = vsel %vm7654_vm0, %v18150_v42, 0 }
 0x3c3   : > { %v5280_v37 = vcombine.low %v5271_v58, %v5279_v19  ;;  %v5281_v11 = vcombine.high %v5271_v58, %v5279_v19  ;;  %v3512_v28 = vpack.i.b16 %v3365_v60, %v23185_v52  ;;  %v3515_v43 = vshrl.u32 %v3365_v60, 16  ;;  %v1209_v31 = vpop.permute.xlu0 %1208 }
 0x3c4   : > { %v5457_v47 = vshrl.u32 %v5230_v32, 16  ;;  %v5463_v2 = vshrl.u32 %v5231_v55, 16  ;;  %v18185_v61 = vsel %vm7654_vm0, %v18157_v51, 0  ;;  %v3397_v59 = vpop.permute.xlu1 %3396  ;;  %v1320_v10 = vpack.i.b16 %v1209_v31, %v23183_v3 }
 0x3c5   : > { %v5456_v23 = vpack.i.b16 %v5280_v37, %v5230_v32  ;;  %v5458_v14 = vshrl.u32 %v5280_v37, 16  ;;  %v18178_v15 = vpack.i.b16 %v5281_v11, %v5231_v55  ;;  %v5464_v40 = vshrl.u32 %v5281_v11, 16 }
 0x3c6   : > { %v3516_v57 = vpack.i.b16 %v3515_v43, %v3514_v27  ;;  %v4450_v41 = vcombine.high %v3512_v28, %v16876_v24  ;;  %v1323_v22 = vshrl.u32 %v1209_v31, 16  ;;  %v3522_v9 = vshrl.u32 %v3381_v20, 16 }
 0x3c7   : > { %23188 = vst [vmem:[#allocation33_spill] sm:$0xff] %v18178_v15  ;;  %15303 = vmatprep.subr.msk.bf16.mxu1 %vm7654_vm0, %v5456_v23  ;;  %v8030_v36 = vsel %vm7654_vm0, %v5456_v23, 0  ;;  %v5459_v1 = vpack.i.b16 %v5458_v14, %v5457_v47  ;;  %v18188_v50 = vpack.i.b16 %v5464_v40, %v5463_v2  ;;  %v3520_v48 = vpack.i.b16 %v3397_v59, %v3381_v20  ;;  %v1241_v27 = vpop.permute.xlu0 %1240 }
 0x3c8   : > { %15066 = vmatpush3.bf16.xpose.msra.mxu1 %v8030_v36  ;;  %v4516_v5 = vcombine.high %v3516_v57, %v16876_v24  ;;  %v18193_v12 = vsel %vm7654_vm0, %v18159_v33, 0  ;;  %v4457_v58 = vrot.slane %v3512_v28, %v16881_v34  ;;  %v4464_v19 = vrot.slane %v4450_v41, %v16881_v34  ;;  %v1225_v43 = vpop.permute.xlu1 %1224 }
 0x3c9   : > { %23189 = vst [vmem:[#allocation29_spill] sm:$0xff] %v18188_v50  ;;  %23190 = vst [vmem:[#allocation43_spill] sm:$0xff] %v18193_v12  ;;  %v3523_v39 = vshrl.u32 %v3397_v59, 16  ;;  %v1324_v55 = vpack.i.b16 %v1323_v22, %v1322_v0  ;;  %15307 = vmatprep.subr.msk.bf16.mxu0 %vm7654_vm0, %v5459_v1  ;;  %v4523_v3 = vrot.slane %v3516_v57, %v16881_v34  ;;  %v8119_v20 = vsel %vm7654_vm0, %v5459_v1, 0 }
 0x3ca   : > { %v4465_v32 = vcombine.high %v3520_v48, %v16876_v24  ;;  %v4472_v52 = vrot.slane %v3520_v48, %v16881_v34  ;;  %v4530_v37 = vrot.slane %v4516_v5, %v16881_v34  ;;  %v1910_v60 = vcombine.high %v1320_v10, %v16876_v24  ;;  %15082 = vmatpush3.bf16.xpose.msra.mxu0 %v8119_v20 }
 0x3cb   : > { %v3524_v11 = vpack.i.b16 %v3523_v39, %v3522_v9  ;;  %v1917_v28 = vrot.slane %v1320_v10, %v16881_v34  ;;  %v1976_v47 = vcombine.high %v1324_v55, %v16876_v24  ;;  %v1330_v57 = vshrl.u32 %v1225_v43, 16 }
 0x3cc   : > { %v4479_v0 = vrot.slane %v4465_v32, %v16881_v34  ;;  %v4480_v23 = vcombine.low %v4457_v58, %v4472_v52  ;;  %v4481_v14 = vcombine.high %v4457_v58, %v4472_v52  ;;  %v1328_v41 = vpack.i.b16 %v1241_v27, %v1225_v43  ;;  %v1211_v43 = vpop.permute.xlu1 %1210 }
 0x3cd   : > { %v4531_v2 = vcombine.high %v3524_v11, %v16876_v24  ;;  %v4538_v40 = vrot.slane %v3524_v11, %v16881_v34  ;;  %v1331_v9 = vshrl.u32 %v1241_v27, 16  ;;  %v1924_v27 = vrot.slane %v1910_v60, %v16881_v34 }
 0x3ce   : > { %v4488_v31 = vrot.slane %v4480_v23, %v16884_v21  ;;  %v4495_v36 = vrot.slane %v4481_v14, %v16884_v21  ;;  %v4496_v59 = vcombine.low %v4464_v19, %v4479_v0  ;;  %v4497_v10 = vcombine.high %v4464_v19, %v4479_v0 }
 0x3cf   : > { %v4545_v22 = vrot.slane %v4531_v2, %v16881_v34  ;;  %v4546_v1 = vcombine.low %v4523_v3, %v4538_v40  ;;  %v4547_v5 = vcombine.high %v4523_v3, %v4538_v40  ;;  %v1983_v0 = vrot.slane %v1324_v55, %v16881_v34 }
 0x3d0   : > { %v18213_v48 = vrot.slane %v4496_v59, %v16884_v21  ;;  %v18216_v58 = vrot.slane %v4497_v10, %v16884_v21  ;;  %v5282_v39 = vcombine.low %v4488_v31, %v4495_v36  ;;  %v14458_v32 = vcombine.high %v4488_v31, %v4495_v36 }
 0x3d1   : > { %v18219_v52 = vrot.slane %v4546_v1, %v16884_v21  ;;  %v18222_v20 = vrot.slane %v4547_v5, %v16884_v21  ;;  %v4562_v19 = vcombine.low %v4530_v37, %v4545_v22  ;;  %v4563_v11 = vcombine.high %v4530_v37, %v4545_v22 }
 0x3d2   : > { %v18225_v3 = vrot.slane %v5282_v39, %v16881_v34  ;;  %v1990_v23 = vrot.slane %v1976_v47, %v16881_v34  ;;  %v18237_v40 = vrot.slane %v14458_v32, %v16881_v34  ;;  %v1332_v31 = vpack.i.b16 %v1331_v9, %v1330_v57  ;;  %v1227_v39 = vpop.permute.xlu0 %1226 }
 0x3d3   : > { %v18231_v14 = vrot.slane %v4562_v19, %v16884_v21  ;;  %v18234_v2 = vrot.slane %v4563_v11, %v16884_v21  ;;  %v1925_v36 = vcombine.high %v1328_v41, %v16876_v24  ;;  %v1932_v60 = vrot.slane %v1328_v41, %v16881_v34 }
 0x3d4   : > { %v1336_v55 = vpack.i.b16 %v1211_v43, %v23184_v17  ;;  %v1339_v22 = vshrl.u32 %v1211_v43, 16  ;;  %v1991_v9 = vcombine.high %v1332_v31, %v16876_v24  ;;  %v1998_v19 = vrot.slane %v1332_v31, %v16881_v34 }
 0x3d5   : > { %v1939_v1 = vrot.slane %v1925_v36, %v16881_v34  ;;  %v1940_v5 = vcombine.low %v1917_v28, %v1932_v60  ;;  %v1941_v57 = vcombine.high %v1917_v28, %v1932_v60 }
 0x3d6   : > { %v2042_v11 = vcombine.high %v1336_v55, %v16876_v24  ;;  %v2005_v28 = vrot.slane %v1991_v9, %v16881_v34  ;;  %v2006_v60 = vcombine.low %v1983_v0, %v1998_v19  ;;  %v2007_v53 = vcombine.high %v1983_v0, %v1998_v19  ;;  %v1213_v9 = vpop.permute.xlu0 %1212 }
 0x3d7   : > { %v1948_v6 = vrot.slane %v1940_v5, %v16884_v21  ;;  %v1955_v43 = vrot.slane %v1941_v57, %v16884_v21  ;;  %v1956_v36 = vcombine.low %v1924_v27, %v1939_v1  ;;  %v1957_v29 = vcombine.high %v1924_v27, %v1939_v1  ;;  %v1243_v5 = vpop.permute.xlu1 %1242 }
 0x3d8   : > { %v1340_v45 = vpack.i.b16 %v1339_v22, %v1338_v49  ;;  %v18270_v57 = vrot.slane %v2006_v60, %v16884_v21  ;;  %v18273_v27 = vrot.slane %v2007_v53, %v16884_v21  ;;  %v2022_v1 = vcombine.low %v1990_v23, %v2005_v28 }
 0x3d9   : > { %v18264_v16 = vrot.slane %v1956_v36, %v16884_v21  ;;  %v18267_v31 = vrot.slane %v1957_v29, %v16884_v21  ;;  %v2838_v54 = vcombine.low %v1948_v6, %v1955_v43  ;;  %v14414_v32 = vcombine.high %v1948_v6, %v1955_v43 }
 0x3da   : > { %v2023_v0 = vcombine.high %v1990_v23, %v2005_v28  ;;  %v2049_v49 = vrot.slane %v1336_v55, %v16881_v34  ;;  %v2056_v22 = vrot.slane %v2042_v11, %v16881_v34  ;;  %v1346_v29 = vshrl.u32 %v1227_v39, 16  ;;  %v1245_v4 = vpop.permute.xlu0 %1244 }
 0x3db   : > { %v18276_v17 = vrot.slane %v2838_v54, %v16881_v34  ;;  %v18281_v6 = vrot.slane %v2022_v1, %v16884_v21  ;;  %v18287_v53 = vrot.slane %v14414_v32, %v16881_v34  ;;  %v2108_v55 = vcombine.high %v1340_v45, %v16876_v24  ;;  %v1229_v41 = vpop.permute.xlu1 %1228 }
 0x3dc   : > { %v18284_v19 = vrot.slane %v2023_v0, %v16884_v21  ;;  %v1344_v11 = vpack.i.b16 %v1243_v5, %v1227_v39  ;;  %v1347_v43 = vshrl.u32 %v1243_v5, 16  ;;  %v1352_v60 = vpack.i.b16 %v1213_v9, %v23186_v7 }
 0x3dd   : > { %v1355_v32 = vshrl.u32 %v1213_v9, 16  ;;  %v2115_v1 = vrot.slane %v1340_v45, %v16881_v34  ;;  %v2122_v36 = vrot.slane %v2108_v55, %v16881_v34  ;;  %v1362_v59 = vshrl.u32 %v1229_v41, 16 }
 0x3de   : > { %v1348_v0 = vpack.i.b16 %v1347_v43, %v1346_v29  ;;  %v2057_v23 = vcombine.high %v1344_v11, %v16876_v24  ;;  %v2064_v54 = vrot.slane %v1344_v11, %v16881_v34  ;;  %v2174_v10 = vcombine.high %v1352_v60, %v16876_v24 }
 0x3df   : > { %v1356_v28 = vpack.i.b16 %v1355_v32, %v1354_v56  ;;  %v2181_v39 = vrot.slane %v1352_v60, %v16881_v34  ;;  %v1215_v18 = vpop.permute.xlu1 %1214 }
 0x3e0   : > { %v2071_v9 = vrot.slane %v2057_v23, %v16881_v34  ;;  %v2072_v45 = vcombine.low %v2049_v49, %v2064_v54  ;;  %v2073_v29 = vcombine.high %v2049_v49, %v2064_v54  ;;  %v2123_v43 = vcombine.high %v1348_v0, %v16876_v24 }
 0x3e1   : > { %v2130_v11 = vrot.slane %v1348_v0, %v16881_v34  ;;  %v2240_v49 = vcombine.high %v1356_v28, %v16876_v24 }
 0x3e2   : > { %v2080_v5 = vrot.slane %v2072_v45, %v16884_v21  ;;  %v2087_v55 = vrot.slane %v2073_v29, %v16884_v21  ;;  %v2088_v47 = vcombine.low %v2056_v22, %v2071_v9  ;;  %v2089_v7 = vcombine.high %v2056_v22, %v2071_v9 }
 0x3e3   : > { %v2137_v56 = vrot.slane %v2123_v43, %v16881_v34  ;;  %v2138_v23 = vcombine.low %v2115_v1, %v2130_v11  ;;  %v2139_v32 = vcombine.high %v2115_v1, %v2130_v11 }
 0x3e4   : > { %v2096_v54 = vrot.slane %v2088_v47, %v16884_v21  ;;  %v2103_v0 = vrot.slane %v2089_v7, %v16884_v21  ;;  %v2938_v37 = vcombine.low %v2080_v5, %v2087_v55  ;;  %v14418_v13 = vcombine.high %v2080_v5, %v2087_v55 }
 0x3e5   : > { %v2146_v60 = vrot.slane %v2138_v23, %v16884_v21  ;;  %v2153_v45 = vrot.slane %v2139_v32, %v16884_v21  ;;  %v2154_v44 = vcombine.low %v2122_v36, %v2137_v56  ;;  %v2155_v29 = vcombine.high %v2122_v36, %v2137_v56 }
 0x3e6   : > { %v2945_v22 = vrot.slane %v2938_v37, %v16881_v34  ;;  %v2953_v9 = vrot.slane %v14418_v13, %v16881_v34  ;;  %v2954_v1 = vcombine.low %v2096_v54, %v2103_v0  ;;  %v14419_v43 = vcombine.high %v2096_v54, %v2103_v0 }
 0x3e7   : > { %v2162_v11 = vrot.slane %v2154_v44, %v16884_v21  ;;  %v2169_v47 = vrot.slane %v2155_v29, %v16884_v21  ;;  %v2988_v7 = vcombine.low %v2146_v60, %v2153_v45  ;;  %v14420_v25 = vcombine.high %v2146_v60, %v2153_v45 }
 0x3e8   : > { %v2961_v5 = vrot.slane %v2954_v1, %v16881_v34  ;;  %v2969_v55 = vrot.slane %v14419_v43, %v16881_v34  ;;  %v2970_v23 = vcombine.low %v2945_v22, %v2953_v9  ;;  %v1360_v32 = vpack.i.b16 %v1245_v4, %v1229_v41 }
 0x3e9   : > { %v2995_v36 = vrot.slane %v2988_v7, %v16881_v34  ;;  %v3003_v37 = vrot.slane %v14420_v25, %v16881_v34  ;;  %v3004_v56 = vcombine.low %v2162_v11, %v2169_v47  ;;  %v14421_v13 = vcombine.high %v2162_v11, %v2169_v47 }
 0x3ea   : > { %v2188_v54 = vrot.slane %v2174_v10, %v16881_v34  ;;  %v2247_v44 = vrot.slane %v1356_v28, %v16881_v34  ;;  %v1363_v0 = vshrl.u32 %v1245_v4, 16  ;;  %v2189_v60 = vcombine.high %v1360_v32, %v16876_v24 }
 0x3eb   : > { %v18334_v45 = vrot.slane %v2970_v23, %v16884_v21  ;;  %v2978_v29 = vcombine.low %v2961_v5, %v2969_v55  ;;  %v2254_v41 = vrot.slane %v2240_v49, %v16881_v34  ;;  %v2196_v22 = vrot.slane %v1360_v32, %v16881_v34  ;;  %v1231_v55 = vpop.permute.xlu0 %1230 }
 0x3ec   : > { %v18339_v25 = vrot.slane %v3004_v56, %v16881_v34  ;;  %v1364_v9 = vpack.i.b16 %v1363_v0, %v1362_v59  ;;  %v2203_v1 = vrot.slane %v2189_v60, %v16881_v34  ;;  %v1368_v10 = vpack.i.b16 %v1215_v18, %v23187_v62 }
 0x3ed   : > { %23191 = vst [vmem:[#allocation39_spill] sm:$0xff] %v18334_v45  ;;  %v18344_v4 = vrot.slane %v14421_v13, %v16881_v34  ;;  %v3020_v28 = vcombine.low %v2995_v36, %v3003_v37  ;;  %v2204_v43 = vcombine.low %v2181_v39, %v2196_v22  ;;  %v2205_v11 = vcombine.high %v2181_v39, %v2196_v22 }
 0x3ee   : > { %v2220_v47 = vcombine.low %v2188_v54, %v2203_v1  ;;  %v2221_v7 = vcombine.high %v2188_v54, %v2203_v1  ;;  %v2255_v49 = vcombine.high %v1364_v9, %v16876_v24  ;;  %v2262_v5 = vrot.slane %v1364_v9, %v16881_v34 }
 0x3ef   : > { %v2212_v23 = vrot.slane %v2204_v43, %v16884_v21  ;;  %v2219_v59 = vrot.slane %v2205_v11, %v16884_v21  ;;  %v1371_v32 = vshrl.u32 %v1215_v18, 16  ;;  %v2306_v56 = vcombine.high %v1368_v10, %v16876_v24 }
 0x3f0   : > { %v18352_v13 = vrot.slane %v2220_v47, %v16884_v21  ;;  %v18355_v36 = vrot.slane %v2221_v7, %v16884_v21  ;;  %v2269_v39 = vrot.slane %v2255_v49, %v16881_v34  ;;  %v2270_v37 = vcombine.low %v2247_v44, %v2262_v5  ;;  %v1247_v49 = vpop.permute.xlu1 %1246 }
 0x3f1   : > { %v2271_v54 = vcombine.high %v2247_v44, %v2262_v5  ;;  %v3038_v0 = vcombine.low %v2212_v23, %v2219_v59  ;;  %v14422_v60 = vcombine.high %v2212_v23, %v2219_v59  ;;  %v23192_v22 = vshrl.u32 %v23187_v62, 16  ;;  %v5495_v23 = vpop.permute.xlu0 %5494 }
 0x3f2   : > { %v18361_v1 = vrot.slane %v2978_v29, %v16884_v21  ;;  %v18364_v18 = vrot.slane %v2270_v37, %v16884_v21  ;;  %v2286_v43 = vcombine.low %v2254_v41, %v2269_v39  ;;  %v2287_v11 = vcombine.high %v2254_v41, %v2269_v39 }
 0x3f3   : > { %v1372_v9 = vpack.i.b16 %v1371_v32, %v23192_v22  ;;  %v18367_v47 = vrot.slane %v3020_v28, %v16884_v21  ;;  %v18372_v44 = vrot.slane %v2271_v54, %v16884_v21  ;;  %v18383_v41 = vrot.slane %v3038_v0, %v16881_v34 }
 0x3f4   : > { %23193 = vst [vmem:[#allocation37_spill] sm:$0xff] %v18361_v1  ;;  %v18377_v29 = vrot.slane %v2286_v43, %v16884_v21  ;;  %v18380_v5 = vrot.slane %v2287_v11, %v16884_v21  ;;  %v18386_v28 = vrot.slane %v14422_v60, %v16881_v34  ;;  %v2313_v32 = vrot.slane %v1368_v10, %v16881_v34 }
 0x3f5   : > { %23194 = vst [vmem:[#allocation38_spill] sm:$0xff] %v18367_v47  ;;  %v2320_v39 = vrot.slane %v2306_v56, %v16881_v34  ;;  %v2372_v37 = vcombine.high %v1372_v9, %v16876_v24  ;;  %v2379_v22 = vrot.slane %v1372_v9, %v16881_v34  ;;  %v1376_v60 = vpack.i.b16 %v1247_v49, %v1231_v55 }
 0x3f6   : > { %v1378_v43 = vshrl.u32 %v1231_v55, 16  ;;  %v1379_v11 = vshrl.u32 %v1247_v49, 16  ;;  %v5544_v62 = vpack.i.b16 %v5495_v23, %v23182_v8  ;;  %v5547_v59 = vshrl.u32 %v5495_v23, 16 }
 0x3f7   : > { %v2321_v7 = vcombine.high %v1376_v60, %v16876_v24  ;;  %v2328_v54 = vrot.slane %v1376_v60, %v16881_v34  ;;  %v2386_v0 = vrot.slane %v2372_v37, %v16881_v34  ;;  %v23195_v9 = vshrl.u32 %v23182_v8, 16 }
 0x3f8   : > { %v1380_v63 = vpack.i.b16 %v1379_v11, %v1378_v43  ;;  %v23196_v49 = vcombine.low %v18213_v48, %v18216_v58  ;;  %v23197_v56 = vcombine.high %v18213_v48, %v18216_v58  ;;  %v5670_v8 = vcombine.high %v5544_v62, %v16876_v24 }
 0x3f9   : > { %v5548_v55 = vpack.i.b16 %v5547_v59, %v23195_v9  ;;  %v2335_v10 = vrot.slane %v2321_v7, %v16881_v34  ;;  %v2336_v50 = vcombine.low %v2313_v32, %v2328_v54  ;;  %v2337_v15 = vcombine.high %v2313_v32, %v2328_v54 }
 0x3fa   : > { %v5305_v23 = vrot.slane %v23196_v49, %v16881_v34  ;;  %v5313_v60 = vrot.slane %v23197_v56, %v16881_v34  ;;  %v2387_v37 = vcombine.high %v1380_v63, %v16876_v24  ;;  %v2394_v43 = vrot.slane %v1380_v63, %v16881_v34  ;;  %v5511_v56 = vpop.permute.xlu1 %5510 }
 0x3fb   : > { %v18421_v59 = vrot.slane %v5544_v62, %v16881_v34  ;;  %v2344_v11 = vrot.slane %v2336_v50, %v16884_v21  ;;  %v2351_v7 = vrot.slane %v2337_v15, %v16884_v21  ;;  %v2352_v9 = vcombine.low %v2320_v39, %v2335_v10 }
 0x3fc   : > { %v2353_v32 = vcombine.high %v2320_v39, %v2335_v10  ;;  %v2401_v54 = vrot.slane %v2387_v37, %v16881_v34  ;;  %v2402_v49 = vcombine.low %v2379_v22, %v2394_v43  ;;  %v2403_v48 = vcombine.high %v2379_v22, %v2394_v43 }
 0x3fd   : > { %v5736_v58 = vcombine.high %v5548_v55, %v16876_v24  ;;  %v18428_v63 = vrot.slane %v2352_v9, %v16884_v21  ;;  %v3138_v62 = vcombine.low %v2344_v11, %v2351_v7  ;;  %v14426_v30 = vcombine.high %v2344_v11, %v2351_v7 }
 0x3fe   : > { %v18431_v12 = vrot.slane %v2353_v32, %v16884_v21  ;;  %v18434_v50 = vrot.slane %v2402_v49, %v16884_v21  ;;  %v18437_v15 = vrot.slane %v2403_v48, %v16884_v21  ;;  %v2418_v39 = vcombine.low %v2386_v0, %v2401_v54 }
 0x3ff   : > { %v2419_v10 = vcombine.high %v2386_v0, %v2401_v54  ;;  %v18440_v22 = vrot.slane %v3138_v62, %v16881_v34  ;;  %v18443_v37 = vrot.slane %v5670_v8, %v16881_v34  ;;  %v18446_v43 = vrot.slane %v5548_v55, %v16881_v34 }
 0x400   : > { %v5314_v11 = vcombine.low %v18225_v3, %v18237_v40  ;;  %v18451_v7 = vrot.slane %v2418_v39, %v16884_v21  ;;  %v18457_v0 = vrot.slane %v14426_v30, %v16881_v34  ;;  %v5322_v54 = vcombine.low %v5305_v23, %v5313_v60  ;;  %v18482_v39 = vpop.permute.xlu0 %5512 }
 0x401   : > { %v18454_v9 = vrot.slane %v2419_v10, %v16884_v21  ;;  %v23198_v3 = vcombine.low %v18219_v52, %v18222_v20  ;;  %v18472_v30 = vrot.slane %v5736_v58, %v16881_v34  ;;  %v23199_v48 = vcombine.high %v18219_v52, %v18222_v20  ;;  %v5527_v10 = vpop.permute.xlu1 %5526 }
 0x402   : > { %v23200_v23 = vcombine.low %v18231_v14, %v18234_v2  ;;  %v18487_v49 = vrot.slane %v5314_v11, %v16884_v21  ;;  %v18490_v58 = vrot.slane %v5322_v54, %v16884_v21  ;;  %v23201_v52 = vcombine.high %v18231_v14, %v18234_v2 }
 0x403   : > { %v5339_v40 = vrot.slane %v23198_v3, %v16881_v34  ;;  %v5347_v62 = vrot.slane %v23199_v48, %v16881_v34  ;;  %v23203_v3 = vcombine.high %v18264_v16, %v18267_v31  ;;  %v2870_v54 = vcombine.low %v18276_v17, %v18287_v53 }
 0x404   : > { %v5355_v60 = vrot.slane %v23200_v23, %v16881_v34  ;;  %v5363_v20 = vrot.slane %v23201_v52, %v16881_v34  ;;  %v23202_v23 = vcombine.low %v18264_v16, %v18267_v31  ;;  %v5330_v8 = vcombine.low %v18487_v49, %v18490_v58 }
 0x405   : > { %v5364_v48 = vcombine.low %v5339_v40, %v5347_v62  ;;  %v2869_v11 = vrot.slane %v23203_v3, %v16881_v34  ;;  %v23204_v14 = vcombine.low %v18270_v57, %v18273_v27  ;;  %v23205_v40 = vcombine.high %v18270_v57, %v18273_v27 }
 0x406   : > { %v2861_v55 = vrot.slane %v23202_v23, %v16881_v34  ;;  %v5372_v32 = vcombine.low %v5355_v60, %v5363_v20  ;;  %v5554_v31 = vshrl.u32 %v5511_v56, 16  ;;  %v23206_v17 = vcombine.low %v18281_v6, %v18284_v19 }
 0x407   : > { %v2895_v2 = vrot.slane %v23204_v14, %v16881_v34  ;;  %v2903_v62 = vrot.slane %v23205_v40, %v16881_v34  ;;  %v18523_v60 = vrot.slane %v5364_v48, %v16884_v21  ;;  %v23209_v57 = vcombine.high %v18281_v6, %v18284_v19  ;;  %v18538_v40 = vpop.permute.xlu0 %5530  ;;  %v5497_v48 = vpop.permute.xlu1 %5496 }
 0x408   : > { %v2878_v3 = vcombine.low %v2861_v55, %v2869_v11  ;;  %v2911_v53 = vrot.slane %v23206_v17, %v16881_v34  ;;  %v18526_v52 = vrot.slane %v5372_v32, %v16884_v21  ;;  %v18533_v23 = vrot.slane %v2870_v54, %v16884_v21 }
 0x409   : > { %23207 = vst [vmem:[#allocation50_spill] sm:$0xff] %v18523_v60  ;;  %v2919_v27 = vrot.slane %v23209_v57, %v16881_v34  ;;  %v2920_v20 = vcombine.low %v2895_v2, %v2903_v62  ;;  %v5552_v11 = vpack.i.b16 %v5527_v10, %v5511_v56  ;;  %v5555_v14 = vshrl.u32 %v5527_v10, 16 }
 0x40a   : > { %23208 = vst [vmem:[#allocation51_spill] sm:$0xff] %v18526_v52  ;;  %v18536_v55 = vrot.slane %v2878_v3, %v16884_v21  ;;  %v5380_v32 = vcombine.low %v18523_v60, %v18526_v52  ;;  %v5469_v17 = vshrl.u32 %v5330_v8, 16  ;;  %v5563_v57 = vshrl.u32 %v5497_v48, 16 }
 0x40b   : > { %v18543_v16 = vrot.slane %v2920_v20, %v16884_v21  ;;  %v2928_v6 = vcombine.low %v2911_v53, %v2919_v27  ;;  %v5556_v54 = vpack.i.b16 %v5555_v14, %v5554_v31  ;;  %v5685_v2 = vcombine.high %v5552_v11, %v16876_v24 }
 0x40c   : > { %v2886_v19 = vcombine.low %v18533_v23, %v18536_v55  ;;  %v5692_v56 = vrot.slane %v5552_v11, %v16881_v34  ;;  %v5468_v10 = vpack.i.b16 %v5380_v32, %v5330_v8  ;;  %v5470_v62 = vshrl.u32 %v5380_v32, 16 }
 0x40d   : > { %v18550_v3 = vrot.slane %v2928_v6, %v16884_v21  ;;  %v5699_v52 = vrot.slane %v5685_v2, %v16881_v34  ;;  %v5751_v11 = vcombine.high %v5556_v54, %v16876_v24  ;;  %v18568_v2 = vpop.permute.xlu0 %5516 }
 0x40e   : > { %v3289_v60 = vshrl.u32 %v2886_v19, 16  ;;  %v5700_v20 = vcombine.low %v18421_v59, %v5692_v56  ;;  %v5701_v53 = vcombine.high %v18421_v59, %v5692_v56  ;;  %15304 = vmatprep.subr.msk.bf16.mxu1 %vm7654_vm0, %v5468_v10  ;;  %v8033_v31 = vsel %vm7654_vm0, %v5468_v10, 0 }
 0x40f   : > { %v5471_v27 = vpack.i.b16 %v5470_v62, %v5469_v17  ;;  %v2936_v8 = vcombine.low %v18543_v16, %v18550_v3  ;;  %15068 = vmatpush3.bf16.xpose.msra.mxu1 %v8033_v31  ;;  %v5716_v6 = vcombine.low %v18443_v37, %v5699_v52  ;;  %v5717_v59 = vcombine.high %v18443_v37, %v5699_v52 }
 0x410   : > { %v18561_v14 = vrot.slane %v5700_v20, %v16884_v21  ;;  %v18564_v32 = vrot.slane %v5701_v53, %v16884_v21  ;;  %15309 = vmatprep.subr.msk.bf16.mxu1 %vm7654_vm0, %v18150_v42  ;;  %v5758_v62 = vrot.slane %v5556_v54, %v16881_v34  ;;  %v5765_v37 = vrot.slane %v5751_v11, %v16881_v34 }
 0x411   : > { %15308 = vmatprep.subr.msk.bf16.mxu0 %vm7654_vm0, %v5471_v27  ;;  %v8122_v17 = vsel %vm7654_vm0, %v5471_v27, 0  ;;  %v3288_v56 = vpack.i.b16 %v2936_v8, %v2886_v19  ;;  %v3290_v10 = vshrl.u32 %v2936_v8, 16  ;;  %v18576_v20 = vrot.slane %v5716_v6, %v16884_v21 }
 0x412   : > { %15084 = vmatpush3.bf16.xpose.msra.mxu0 %v8122_v17  ;;  %v18579_v53 = vrot.slane %v5717_v59, %v16884_v21  ;;  %v5560_v52 = vpack.i.b16 %v5497_v48, %v23181_v46  ;;  %v5766_v19 = vcombine.low %v18446_v43, %v5758_v62  ;;  %v5767_v54 = vcombine.high %v18446_v43, %v5758_v62  ;;  %v5529_v17 = vpop.permute.xlu1 %5528 }
 0x413   : > { %15069 = vmatprep.mubr.msk.bf16.mxu1 %vm7654_vm0, %v3288_v56  ;;  %15313 = vmatprep.subr.msk.bf16.mxu0 %vm7654_vm0, %v18157_v51  ;;  %v3291_v42 = vpack.i.b16 %v3290_v10, %v3289_v60  ;;  %v18590_v31 = vsel %vm7654_vm0, %v18168_v35, 0  ;;  %v5570_v27 = vshrl.u32 %v18482_v39, 16  ;;  %v5782_v8 = vcombine.low %v18472_v30, %v5765_v37 }
 0x414   : > { %v5783_v48 = vcombine.high %v18472_v30, %v5765_v37  ;;  %v18598_v51 = vrot.slane %v5766_v19, %v16884_v21  ;;  %v18601_v60 = vrot.slane %v5767_v54, %v16884_v21  ;;  %v23210_v6 = vshrl.u32 %v23181_v46, 16  ;;  %v5503_v37 = vpop.permute.xlu0 %5502 }
 0x415   : > { %15085 = vmatprep.mubr.msk.bf16.mxu0 %vm7654_vm0, %v3291_v42  ;;  %v5802_v62 = vcombine.high %v5560_v52, %v16876_v24  ;;  %v18615_v42 = vrot.slane %v5782_v8, %v16884_v21  ;;  %v5809_v46 = vrot.slane %v5560_v52, %v16881_v34  ;;  %v23213_v10 = vcombine.low %v18339_v25, %v18344_v4 }
 0x416   : > { %v5564_v59 = vpack.i.b16 %v5563_v57, %v23210_v6  ;;  %v18618_v19 = vrot.slane %v5783_v48, %v16884_v21  ;;  %v2986_v6 = vcombine.low %v18334_v45, %v18361_v1  ;;  %v5568_v8 = vpack.i.b16 %v5529_v17, %v18482_v39 }
 0x417   : > { %23211 = vst [vmem:[#allocation36_spill] sm:$0xff] %v18615_v42  ;;  %v18630_v56 = vrot.slane %v23213_v10, %v16884_v21  ;;  %v5571_v30 = vshrl.u32 %v5529_v17, 16  ;;  %v5608_v52 = vpack.i.b16 %v5503_v37, %v23137_v38  ;;  %v5611_v43 = vshrl.u32 %v5503_v37, 16 }
 0x418   : > { %23212 = vst [vmem:[#allocation40_spill] sm:$0xff] %v18618_v19  ;;  %v5868_v57 = vcombine.high %v5564_v59, %v16876_v24  ;;  %v5875_v48 = vrot.slane %v5564_v59, %v16881_v34  ;;  %v5816_v11 = vrot.slane %v5802_v62, %v16881_v34  ;;  %v5817_v45 = vcombine.high %v5568_v8, %v16876_v24 }
 0x419   : > { %23214 = vst [vmem:[#allocation52_spill] sm:$0xff] %v18630_v56  ;;  %v3036_v54 = vcombine.low %v18367_v47, %v18630_v56  ;;  %v5824_v1 = vrot.slane %v5568_v8, %v16881_v34  ;;  %v3301_v4 = vshrl.u32 %v2986_v6, 16  ;;  %v5572_v10 = vpack.i.b16 %v5571_v30, %v5570_v27  ;;  %v5499_v30 = vpop.permute.xlu1 %5498 }
 0x41a   : > { %v5882_v25 = vrot.slane %v5868_v57, %v16881_v34  ;;  %v23215_v39 = vshrl.u32 %v23137_v38, 16  ;;  %v5831_v37 = vrot.slane %v5817_v45, %v16881_v34  ;;  %v6198_v8 = vcombine.high %v5608_v52, %v16876_v24 }
 0x41b   : > { %v3300_v17 = vpack.i.b16 %v3036_v54, %v2986_v6  ;;  %v3302_v42 = vshrl.u32 %v3036_v54, 16  ;;  %v5832_v62 = vcombine.low %v5809_v46, %v5824_v1  ;;  %v5833_v19 = vcombine.high %v5809_v46, %v5824_v1 }
 0x41c   : > { %v18643_v59 = vpack.i.b16 %v5611_v43, %v23215_v39  ;;  %v5883_v47 = vcombine.high %v5572_v10, %v16876_v24  ;;  %v5890_v56 = vrot.slane %v5572_v10, %v16881_v34  ;;  %v5848_v38 = vcombine.low %v5816_v11, %v5831_v37 }
 0x41d   : > { %15070 = vmatmul.mubr.msk.bf16.vlgmr.msra.gmra.mrb[32].mxu1 %vm7654_vm0, %v3300_v17  ;;  %v3303_v57 = vpack.i.b16 %v3302_v42, %v3301_v4  ;;  %v18651_v27 = vrot.slane %v5832_v62, %v16884_v21  ;;  %v5849_v43 = vcombine.high %v5816_v11, %v5831_v37  ;;  %v18655_v45 = vrot.slane %v5833_v19, %v16884_v21 }
 0x41e   : > { %15094 = vmatpush3.bf16.xpose.msra.mxu1 %v18174_v26  ;;  %v5897_v1 = vrot.slane %v5883_v47, %v16881_v34  ;;  %v5898_v46 = vcombine.low %v5875_v48, %v5890_v56  ;;  %v5899_v54 = vcombine.high %v5875_v48, %v5890_v56  ;;  %v18665_v11 = vrot.slane %v5848_v38, %v16884_v21 }
 0x41f   : > { %15310 = vmatprep.subr.msk.bf16.mxu1 %vm7654_vm0, %v18159_v33  ;;  %15086 = vmatmul.mubr.msk.bf16.vlgmr.msra.gmra.mrb[48].mxu0 %vm7654_vm0, %v3303_v57  ;;  %v18668_v26 = vrot.slane %v5849_v43, %v16884_v21  ;;  %v18672_v19 = vrot.slane %v5608_v52, %v16881_v34  ;;  %v18675_v48 = vrot.slane %v6198_v8, %v16881_v34  ;;  %v5579_v10 = vshrl.u32 %v5499_v30, 16  ;;  %v23228_v52 = vld [vmem:[#allocation43_spill] sm:$0xff] }
 0x420   : > { %23216 = vst [vmem:[#allocation27_spill] sm:$0xff] %v18665_v11  ;;  %15110 = vmatpush3.bf16.xpose.msra.mxu0 %v18185_v61  ;;  %v5914_v47 = vcombine.low %v5882_v25, %v5897_v1  ;;  %v5915_v56 = vcombine.high %v5882_v25, %v5897_v1  ;;  %v18678_v33 = vrot.slane %v5898_v46, %v16884_v21  ;;  %v18687_v25 = vpop.permute.xlu0 %5520  ;;  %v5515_v1 = vpop.permute.xlu1 %5514 }
 0x421   : > { %23217 = vst [vmem:[#allocation46_spill] sm:$0xff] %v18668_v26  ;;  %v18681_v4 = vrot.slane %v5899_v54, %v16884_v21  ;;  %15314 = vmatprep.subr.msk.bf16.mxu0 %vm7654_vm0, %v18168_v35  ;;  %v23220_v8 = vcombine.low %v18352_v13, %v18355_v36  ;;  %v23221_v38 = vcombine.high %v18352_v13, %v18355_v36 }
 0x422   : > { %v18698_v35 = vrot.slane %v5914_v47, %v16884_v21  ;;  %v18701_v62 = vrot.slane %v5915_v56, %v16884_v21  ;;  %v3070_v46 = vcombine.low %v18383_v41, %v18386_v28  ;;  %v23222_v54 = vcombine.low %v18364_v18, %v18372_v44 }
 0x423   : > { %v3061_v57 = vrot.slane %v23220_v8, %v16881_v34  ;;  %v3069_v43 = vrot.slane %v23221_v38, %v16881_v34  ;;  %v23223_v56 = vcombine.high %v18364_v18, %v18372_v44  ;;  %v23224_v8 = vcombine.low %v18377_v29, %v18380_v5  ;;  %v23226_v38 = vld [vmem:[#allocation26_spill] sm:$0xff] }
 0x424   : > { %23218 = vst [vmem:[#allocation42_spill] sm:$0xff] %v18698_v35  ;;  %23219 = vst [vmem:[#allocation31_spill] sm:$0xff] %v18701_v62  ;;  %v3095_v47 = vrot.slane %v23222_v54, %v16881_v34  ;;  %v23225_v41 = vcombine.high %v18377_v29, %v18380_v5  ;;  %v5576_v17 = vpack.i.b16 %v5499_v30, %v23226_v38  ;;  %v23227_v54 = vshrl.u32 %v23226_v38, 16 }
 0x425   : > { %v3103_v37 = vrot.slane %v23223_v56, %v16881_v34  ;;  %v3111_v13 = vrot.slane %v23224_v8, %v16881_v34  ;;  %v3078_v36 = vcombine.low %v3061_v57, %v3069_v43  ;;  %v18735_v44 = vrot.slane %v3070_v46, %v16884_v21  ;;  %v5507_v8 = vpop.permute.xlu0 %5506 }
 0x426   : > { %v3119_v28 = vrot.slane %v23225_v41, %v16881_v34  ;;  %v5580_v39 = vpack.i.b16 %v5579_v10, %v23227_v54  ;;  %15096 = vmatpush3.bf16.xpose.msra.mxu1 %v23228_v52  ;;  %v5584_v57 = vpack.i.b16 %v18538_v40, %v5515_v1  ;;  %v5934_v5 = vcombine.high %v5576_v17, %v16876_v24  ;;  %v23229_v10 = vld [vmem:[#allocation33_spill] sm:$0xff] }
 0x427   : > { %v3120_v56 = vcombine.low %v3095_v47, %v3103_v37  ;;  %v18740_v43 = vrot.slane %v3078_v36, %v16884_v21  ;;  %v5941_v30 = vrot.slane %v5576_v17, %v16881_v34  ;;  %15311 = vmatprep.subr.msk.bf16.mxu1 %vm7654_vm0, %v23229_v10  ;;  %v5586_v47 = vshrl.u32 %v5515_v1, 16  ;;  %v23232_v1 = vld [vmem:[#allocation49_spill] sm:$0xff] }
 0x428   : > { %v3128_v29 = vcombine.low %v3111_v13, %v3119_v28  ;;  %v6000_v37 = vcombine.high %v5580_v39, %v16876_v24  ;;  %v6007_v52 = vrot.slane %v5580_v39, %v16881_v34  ;;  %15112 = vmatpush3.bf16.xpose.msra.mxu0 %v18590_v31  ;;  %v5948_v17 = vrot.slane %v5934_v5, %v16881_v34  ;;  %v23230_v28 = vld [vmem:[#allocation29_spill] sm:$0xff] }
 0x429   : > { %v18747_v46 = vrot.slane %v3120_v56, %v16884_v21  ;;  %v3086_v13 = vcombine.low %v18735_v44, %v18740_v43  ;;  %v5949_v41 = vcombine.high %v5584_v57, %v16876_v24  ;;  %15315 = vmatprep.subr.msk.bf16.mxu0 %vm7654_vm0, %v23230_v28  ;;  %v23231_v39 = vshrl.u32 %v18538_v40, 16 }
 0x42a   : > { %v18755_v36 = vrot.slane %v3128_v29, %v16884_v21  ;;  %v6014_v38 = vrot.slane %v6000_v37, %v16881_v34  ;;  %v5956_v31 = vrot.slane %v5584_v57, %v16881_v34  ;;  %v5640_v56 = vpack.i.b16 %v5507_v8, %v23232_v1 }
 0x42b   : > { %v5588_v54 = vpack.i.b16 %v23231_v39, %v5586_v47  ;;  %v3313_v18 = vshrl.u32 %v3086_v13, 16  ;;  %v5963_v5 = vrot.slane %v5949_v41, %v16881_v34  ;;  %v5643_v6 = vshrl.u32 %v5507_v8, 16 }
 0x42c   : > { %v3136_v29 = vcombine.low %v18747_v46, %v18755_v36  ;;  %v5964_v42 = vcombine.low %v5941_v30, %v5956_v31  ;;  %v5965_v61 = vcombine.high %v5941_v30, %v5956_v31 }
 0x42d   : > { %v6015_v35 = vcombine.high %v5588_v54, %v16876_v24  ;;  %v6022_v37 = vrot.slane %v5588_v54, %v16881_v34  ;;  %v5980_v47 = vcombine.low %v5948_v17, %v5963_v5  ;;  %v5981_v39 = vcombine.high %v5948_v17, %v5963_v5 }
 0x42e   : > { %v3312_v62 = vpack.i.b16 %v3136_v29, %v3086_v13  ;;  %v3314_v40 = vshrl.u32 %v3136_v29, 16  ;;  %v18772_v57 = vrot.slane %v5964_v42, %v16884_v21  ;;  %v18775_v26 = vrot.slane %v5965_v61, %v16884_v21 }
 0x42f   : > { %v6029_v11 = vrot.slane %v6015_v35, %v16881_v34  ;;  %v6030_v41 = vcombine.low %v6007_v52, %v6022_v37  ;;  %v18780_v8 = vrot.slane %v5980_v47, %v16884_v21  ;;  %v18783_v13 = vrot.slane %v5981_v39, %v16884_v21  ;;  %v5501_v35 = vpop.permute.xlu1 %5500 }
 0x430   : > { %15073 = vmatprep.mubr.msk.bf16.mxu1 %vm7654_vm0, %v3312_v62  ;;  %v3315_v30 = vpack.i.b16 %v3314_v40, %v3313_v18  ;;  %v6031_v54 = vcombine.high %v6007_v52, %v6022_v37  ;;  %v18792_v62 = vrot.slane %v18643_v59, %v16881_v34  ;;  %v23233_v18 = vcombine.high %v18643_v59, %v16876_v24 }
 0x431   : > { %v18788_v17 = vrot.slane %v6030_v41, %v16884_v21  ;;  %v6046_v61 = vcombine.low %v6014_v38, %v6029_v11  ;;  %v6047_v31 = vcombine.high %v6014_v38, %v6029_v11  ;;  %v23234_v59 = vshrl.u32 %v23232_v1, 16 }
 0x432   : > { %v18798_v29 = vrot.slane %v23233_v18, %v16881_v34  ;;  %15089 = vmatprep.mubr.msk.bf16.mxu0 %vm7654_vm0, %v3315_v30  ;;  %v18802_v52 = vrot.slane %v6031_v54, %v16884_v21  ;;  %v6462_v41 = vcombine.high %v5640_v56, %v16876_v24  ;;  %v23235_v30 = vcombine.low %v18428_v63, %v18431_v12 }
 0x433   : > { %v5644_v40 = vpack.i.b16 %v5643_v6, %v23234_v59  ;;  %v18815_v47 = vrot.slane %v6046_v61, %v16884_v21  ;;  %v18818_v39 = vrot.slane %v6047_v31, %v16884_v21  ;;  %v23236_v61 = vcombine.high %v18428_v63, %v18431_v12 }
 0x434   : > { %v3161_v54 = vrot.slane %v23235_v30, %v16881_v34  ;;  %v3170_v59 = vcombine.low %v18440_v22, %v18457_v0  ;;  %v23237_v30 = vcombine.low %v18434_v50, %v18437_v15  ;;  %v23238_v18 = vcombine.high %v18434_v50, %v18437_v15 }
 0x435   : > { %v6528_v6 = vcombine.high %v5644_v40, %v16876_v24  ;;  %v3169_v31 = vrot.slane %v23236_v61, %v16881_v34  ;;  %v23239_v38 = vcombine.low %v18451_v7, %v18454_v9  ;;  %v18849_v12 = vrot.slane %v5640_v56, %v16881_v34 }
 0x436   : > { %v3195_v37 = vrot.slane %v23237_v30, %v16881_v34  ;;  %v3203_v1 = vrot.slane %v23238_v18, %v16881_v34  ;;  %v23241_v22 = vcombine.high %v18451_v7, %v18454_v9  ;;  %v2887_v61 = vcombine.high %v18533_v23, %v18536_v55  ;;  %v5533_v30 = vpop.permute.xlu1 %5532  ;;  %v23243_v18 = vld [vmem:[#allocation25_spill] sm:$0xff] }
 0x437   : > { %v3211_v11 = vrot.slane %v23239_v38, %v16881_v34  ;;  %23240 = vst [vmem:[#allocation47_spill] sm:$0xff] %v18849_v12  ;;  %v3178_v63 = vcombine.low %v3161_v54, %v3169_v31  ;;  %v18858_v50 = vrot.slane %v6462_v41, %v16881_v34  ;;  %v2937_v38 = vcombine.high %v18543_v16, %v18550_v3 }
 0x438   : > { %v3219_v0 = vrot.slane %v23241_v22, %v16881_v34  ;;  %v3220_v15 = vcombine.low %v3195_v37, %v3203_v1  ;;  %v5592_v56 = vpack.i.b16 %v5501_v35, %v23243_v18  ;;  %v18864_v54 = vrot.slane %v3170_v59, %v16884_v21 }
 0x439   : > { %23242 = vst [vmem:[#allocation23_spill] sm:$0xff] %v18858_v50  ;;  %v18867_v31 = vrot.slane %v3178_v63, %v16884_v21  ;;  %v5595_v9 = vshrl.u32 %v5501_v35, 16  ;;  %v18870_v23 = vrot.slane %v5644_v40, %v16881_v34  ;;  %v18873_v55 = vrot.slane %v6528_v6, %v16881_v34 }
 0x43a   : > { %v3228_v7 = vcombine.low %v3211_v11, %v3219_v0  ;;  %v6066_v37 = vcombine.high %v5592_v56, %v16876_v24  ;;  %v3295_v41 = vshrl.u32 %v2887_v61, 16  ;;  %v18879_v3 = vrot.slane %v3220_v15, %v16884_v21  ;;  %v18894_v5 = vpop.permute.xlu1 %5518 }
 0x43b   : > { %23244 = vst [vmem:[#allocation24_spill] sm:$0xff] %v18870_v23  ;;  %23245 = vst [vmem:[#allocation30_spill] sm:$0xff] %v18873_v55  ;;  %v3186_v16 = vcombine.low %v18864_v54, %v18867_v31  ;;  %v23246_v35 = vshrl.u32 %v23243_v18, 16  ;;  %v3294_v40 = vpack.i.b16 %v2937_v38, %v2887_v61  ;;  %v6073_v59 = vrot.slane %v5592_v56, %v16881_v34  ;;  %v23247_v18 = vld [vmem:[#allocation51_spill] sm:$0xff]  ;;  %v23248_v56 = vld [vmem:[#allocation50_spill] sm:$0xff] }
 0x43c   : > { %v18882_v1 = vrot.slane %v3228_v7, %v16884_v21  ;;  %v3296_v6 = vshrl.u32 %v2937_v38, 16  ;;  %v8208_v63 = vsel %vm7654_vm0, %v23229_v10, 0  ;;  %v6080_v15 = vrot.slane %v6066_v37, %v16881_v34 }
 0x43d   : > { %v5596_v11 = vpack.i.b16 %v5595_v9, %v23246_v35  ;;  %v3325_v0 = vshrl.u32 %v3186_v16, 16  ;;  %15098 = vmatpush3.bf16.xpose.msra.mxu1 %v8208_v63  ;;  %v5331_v7 = vcombine.high %v18487_v49, %v18490_v58  ;;  %v5381_v38 = vcombine.high %v23248_v56, %v23247_v18 }
 0x43e   : > { %v3236_v22 = vcombine.low %v18879_v3, %v18882_v1  ;;  %v8297_v10 = vsel %vm7654_vm0, %v23230_v28, 0  ;;  %v5600_v9 = vpack.i.b16 %v5533_v30, %v18568_v2  ;;  %v5603_v63 = vshrl.u32 %v5533_v30, 16 }
 0x43f   : > { %v6132_v61 = vcombine.high %v5596_v11, %v16876_v24  ;;  %v6139_v37 = vrot.slane %v5596_v11, %v16881_v34  ;;  %15114 = vmatpush3.bf16.xpose.msra.mxu0 %v8297_v10  ;;  %v3297_v55 = vpack.i.b16 %v3296_v6, %v3295_v41  ;;  %v5474_v49 = vpack.i.b16 %v5381_v38, %v5331_v7  ;;  %v23250_v11 = vld [vmem:[#allocation45_spill] sm:$0xff] }
 0x440   : > { %v3324_v35 = vpack.i.b16 %v3236_v22, %v3186_v16  ;;  %v3326_v42 = vshrl.u32 %v3236_v22, 16  ;;  %v6081_v58 = vcombine.high %v5600_v9, %v16876_v24  ;;  %v6088_v23 = vrot.slane %v5600_v9, %v16881_v34 }
 0x441   : > { %v23249_v56 = vshrl.u32 %v18568_v2, 16  ;;  %v5475_v50 = vshrl.u32 %v5331_v7, 16  ;;  %v5476_v12 = vshrl.u32 %v5381_v38, 16  ;;  %15312 = vmatprep.subr.msk.bf16.mxu1 %vm7654_vm0, %v5474_v49  ;;  %v5535_v7 = vpop.permute.xlu1 %5534  ;;  %v3137_v9 = vcombine.high %v18747_v46, %v18755_v36 }
 0x442   : > { %15074 = vmatmul.mubr.msk.bf16.gmra.mrb[36].mxu1 %vm7654_vm0, %v3324_v35  ;;  %v3327_v18 = vpack.i.b16 %v3326_v42, %v3325_v0  ;;  %v6095_v30 = vrot.slane %v6081_v58, %v16881_v34  ;;  %v6096_v41 = vcombine.low %v6073_v59, %v6088_v23  ;;  %v6097_v16 = vcombine.high %v6073_v59, %v6088_v23 }
 0x443   : > { %v5604_v28 = vpack.i.b16 %v5603_v63, %v23249_v56  ;;  %15101 = vmatprep.mubr.msk.bf16.mxu1 %vm7654_vm0, %v3294_v40  ;;  %v5477_v2 = vpack.i.b16 %v5476_v12, %v5475_v50  ;;  %v8211_v0 = vsel %vm7654_vm0, %v5474_v49, 0  ;;  %v18917_v40 = vpop.permute.xlu0 %5524 }
 0x444   : > { %15090 = vmatmul.mubr.msk.bf16.gmra.mrb[52].mxu0 %vm7654_vm0, %v3327_v18  ;;  %v18920_v38 = vrot.slane %v6096_v41, %v16884_v21  ;;  %v18923_v23 = vrot.slane %v6097_v16, %v16884_v21  ;;  %v6112_v59 = vcombine.low %v6080_v15, %v6095_v30  ;;  %v6113_v10 = vcombine.high %v6080_v15, %v6095_v30 }
 0x445   : > { %v6147_v22 = vcombine.high %v5604_v28, %v16876_v24  ;;  %v6154_v42 = vrot.slane %v5604_v28, %v16881_v34  ;;  %15117 = vmatprep.mubr.msk.bf16.mxu0 %vm7654_vm0, %v3297_v55  ;;  %15316 = vmatprep.subr.msk.bf16.mxu0 %vm7654_vm0, %v5477_v2  ;;  %v23251_v15 = vcombine.low %v18561_v14, %v18564_v32  ;;  %v8300_v58 = vsel %vm7654_vm0, %v5477_v2, 0 }
 0x446   : > { %15100 = vmatpush3.bf16.xpose.msra.mxu1 %v8211_v0  ;;  %v18931_v55 = vrot.slane %v6112_v59, %v16884_v21  ;;  %v18934_v63 = vrot.slane %v6113_v10, %v16884_v21  ;;  %v6146_v18 = vrot.slane %v6132_v61, %v16881_v34  ;;  %v5618_v28 = vshrl.u32 %v18894_v5, 16 }
 0x447   : > { %v18927_v35 = vrot.slane %v6147_v22, %v16881_v34  ;;  %v6162_v12 = vcombine.low %v6139_v37, %v6154_v42  ;;  %v6163_v50 = vcombine.high %v6139_v37, %v6154_v42  ;;  %v6733_v49 = vrot.slane %v23251_v15, %v16881_v34  ;;  %15116 = vmatpush3.bf16.xpose.msra.mxu0 %v8300_v58 }
 0x448   : > { %v23252_v16 = vcombine.high %v18561_v14, %v18564_v32  ;;  %v23253_v61 = vcombine.low %v18576_v20, %v18579_v53  ;;  %v23254_v14 = vcombine.high %v18576_v20, %v18579_v53  ;;  %v23255_v58 = vcombine.low %v18598_v51, %v18601_v60 }
 0x449   : > { %v18947_v30 = vrot.slane %v6162_v12, %v16884_v21  ;;  %v18960_v2 = vrot.slane %v6163_v50, %v16884_v21  ;;  %v6178_v0 = vcombine.low %v6146_v18, %v18927_v35  ;;  %v6179_v59 = vcombine.high %v6146_v18, %v18927_v35  ;;  %v5505_v12 = vpop.permute.xlu1 %5504  ;;  %v23257_v18 = vld [vmem:[#allocation40_spill] sm:$0xff] }
 0x44a   : > { %v6741_v22 = vrot.slane %v23252_v16, %v16881_v34  ;;  %v6749_v42 = vrot.slane %v23253_v61, %v16881_v34  ;;  %v6757_v32 = vrot.slane %v23254_v14, %v16881_v34  ;;  %v6783_v50 = vrot.slane %v23255_v58, %v16881_v34  ;;  %v23258_v61 = vld [vmem:[#allocation36_spill] sm:$0xff] }
 0x44b   : > { %v23256_v16 = vcombine.high %v18598_v51, %v18601_v60  ;;  %v6792_v37 = vcombine.low %v23258_v61, %v23257_v18  ;;  %v14465_v6 = vcombine.high %v23258_v61, %v23257_v18  ;;  %v5616_v20 = vpack.i.b16 %v5535_v7, %v18894_v5  ;;  %v23260_v58 = vld [vmem:[#allocation28_spill] sm:$0xff] }
 0x44c   : > { %v6758_v15 = vcombine.low %v6733_v49, %v6741_v22  ;;  %v5619_v53 = vshrl.u32 %v5535_v7, 16  ;;  %v6766_v22 = vcombine.low %v6749_v42, %v6757_v32  ;;  %v5624_v10 = vpack.i.b16 %v5505_v12, %v23260_v58 }
 0x44d   : > { %v6791_v35 = vrot.slane %v23256_v16, %v16881_v34  ;;  %v6799_v41 = vrot.slane %v6792_v37, %v16881_v34  ;;  %v6807_v51 = vrot.slane %v14465_v6, %v16881_v34  ;;  %v6213_v16 = vcombine.high %v5616_v20, %v16876_v24 }
 0x44e   : > { %v18984_v49 = vrot.slane %v6758_v15, %v16884_v21  ;;  %v5620_v60 = vpack.i.b16 %v5619_v53, %v5618_v28  ;;  %v18991_v56 = vrot.slane %v6766_v22, %v16884_v21  ;;  %v6220_v7 = vrot.slane %v5616_v20, %v16881_v34 }
 0x44f   : > { %v6808_v14 = vcombine.low %v6783_v50, %v6791_v35  ;;  %v5627_v15 = vshrl.u32 %v5505_v12, 16  ;;  %v6816_v42 = vcombine.low %v6799_v41, %v6807_v51  ;;  %v6227_v32 = vrot.slane %v6213_v16, %v16881_v34 }
 0x450   : > { %23259 = vst [vmem:[#allocation32_spill] sm:$0xff] %v18984_v49  ;;  %23261 = vst [vmem:[#allocation48_spill] sm:$0xff] %v18991_v56  ;;  %v6279_v50 = vcombine.high %v5620_v60, %v16876_v24  ;;  %v6286_v37 = vrot.slane %v5620_v60, %v16881_v34  ;;  %v19002_v6 = vcombine.low %v18984_v49, %v18991_v56  ;;  %v23263_v18 = vshrl.u32 %v23260_v58, 16 }
 0x451   : > { %v18994_v5 = vrot.slane %v6808_v14, %v16884_v21  ;;  %v6228_v28 = vcombine.low %v18672_v19, %v6220_v7  ;;  %v6229_v35 = vcombine.high %v18672_v19, %v6220_v7  ;;  %v19009_v12 = vrot.slane %v6816_v42, %v16884_v21 }
 0x452   : > { %v5628_v61 = vpack.i.b16 %v5627_v15, %v23263_v18  ;;  %v6244_v41 = vcombine.low %v18675_v48, %v6227_v32  ;;  %v6245_v20 = vcombine.high %v18675_v48, %v6227_v32  ;;  %v19014_v53 = vrot.slane %v6279_v50, %v16881_v34  ;;  %v23267_v32 = vld [vmem:[#allocation37_spill] sm:$0xff] }
 0x453   : > { %23262 = vst [vmem:[#allocation41_spill] sm:$0xff] %v18994_v5  ;;  %23264 = vst [vmem:[#allocation44_spill] sm:$0xff] %v19009_v12  ;;  %v19017_v22 = vrot.slane %v6228_v28, %v16884_v21  ;;  %v19020_v14 = vrot.slane %v6229_v35, %v16884_v21  ;;  %v6294_v19 = vcombine.low %v18792_v62, %v6286_v37 }
 0x454   : > { %v6295_v58 = vcombine.high %v18792_v62, %v6286_v37  ;;  %v19026_v51 = vcombine.low %v18994_v5, %v19009_v12  ;;  %v19029_v60 = vrot.slane %v6244_v41, %v16884_v21  ;;  %v19032_v48 = vrot.slane %v6245_v20, %v16884_v21  ;;  %v23269_v62 = vld [vmem:[#allocation52_spill] sm:$0xff]  ;;  %v23277_v5 = vld [vmem:[#allocation46_spill] sm:$0xff] }
 0x455   : > { %23265 = vst [vmem:[#allocation26_spill] sm:$0xff] %v19020_v14  ;;  %v6310_v16 = vcombine.low %v18798_v29, %v19014_v53  ;;  %v19037_v7 = vrot.slane %v6178_v0, %v16884_v21  ;;  %v19040_v15 = vrot.slane %v6179_v59, %v16884_v21  ;;  %v19051_v37 = vrot.slane %v6294_v19, %v16884_v21  ;;  %v23270_v59 = vld [vmem:[#allocation38_spill] sm:$0xff]  ;;  %v23282_v14 = vld [vmem:[#allocation31_spill] sm:$0xff] }
 0x456   : > { %v7528_v50 = vpack.i.b16 %v19026_v51, %v19002_v6  ;;  %v19054_v0 = vrot.slane %v6295_v58, %v16884_v21  ;;  %v6330_v20 = vcombine.high %v5624_v10, %v16876_v24  ;;  %v19069_v19 = vrot.slane %v5624_v10, %v16881_v34 }
 0x457   : > { %v19059_v28 = vrot.slane %v6310_v16, %v16884_v21  ;;  %v6396_v58 = vcombine.high %v5628_v61, %v16876_v24  ;;  %v23268_v16 = vld [vmem:[#allocation39_spill] sm:$0xff]  ;;  %v3037_v35 = vcombine.high %v23270_v59, %v23269_v62  ;;  %v3087_v18 = vcombine.high %v18735_v44, %v18740_v43 }
 0x458   : > { %15125 = vmatprep.subr.bf16.mxu1 %v7528_v50  ;;  %v2987_v42 = vcombine.high %v23268_v16, %v23267_v32  ;;  %v19080_v41 = vpop.f32.mrb[16].mxu1  ;;  %v19083_v49 = vrot.slane %v6330_v20, %v16881_v34  ;;  %v19086_v10 = vrot.slane %v5628_v61, %v16881_v34  ;;  %v23272_v32 = vcombine.low %v18651_v27, %v18655_v45  ;;  %v23276_v61 = vld [vmem:[#allocation27_spill] sm:$0xff] }
 0x459   : > { %23266 = vst [vmem:[#allocation43_spill] sm:$0xff] %v19059_v28  ;;  %23271 = vst [vmem:[#allocation33_spill] sm:$0xff] %v19080_v41  ;;  %v23273_v44 = vcombine.high %v18651_v27, %v18655_v45  ;;  %v19096_v62 = vpop.f32.mrb[17].mxu1  ;;  %v3318_v36 = vpack.i.b16 %v3137_v9, %v3087_v18  ;;  %v3308_v20 = vshrl.u32 %v3037_v35, 16  ;;  %v23278_v12 = vcombine.low %v23276_v61, %v23277_v5 }
 0x45a   : > { %v6833_v16 = vrot.slane %v23272_v32, %v16881_v34  ;;  %23274 = vst [vmem:[#allocation29_spill] sm:$0xff] %v19096_v62  ;;  %v3306_v46 = vpack.i.b16 %v3037_v35, %v2987_v42  ;;  %v3307_v59 = vshrl.u32 %v2987_v42, 16  ;;  %v19098_v56 = vpop.f32.mrb[18].mxu1  ;;  %v23279_v32 = vcombine.high %v23276_v61, %v23277_v5  ;;  %v5537_v42 = vpop.permute.xlu1 %5536  ;;  %v23283_v5 = vld [vmem:[#allocation42_spill] sm:$0xff] }
 0x45b   : > { %v6841_v43 = vrot.slane %v23273_v44, %v16881_v34  ;;  %23275 = vst [vmem:[#allocation49_spill] sm:$0xff] %v19098_v56  ;;  %v6849_v41 = vrot.slane %v23278_v12, %v16881_v34  ;;  %v23280_v45 = vcombine.low %v18678_v33, %v18681_v4  ;;  %v19112_v35 = vpop.f32.mrb[19].mxu1  ;;  %v23281_v12 = vcombine.high %v18678_v33, %v18681_v4 }
 0x45c   : > { %v6857_v28 = vrot.slane %v23279_v32, %v16881_v34  ;;  %15102 = vmatmul.mubr.msk.bf16.vlgmr.msra.gmra.mrb[40].mxu1 %vm7654_vm0, %v3306_v46  ;;  %v3309_v56 = vpack.i.b16 %v3308_v20, %v3307_v59  ;;  %v6892_v61 = vcombine.low %v23283_v5, %v23282_v14  ;;  %v3319_v46 = vshrl.u32 %v3087_v18, 16 }
 0x45d   : > { %v6858_v27 = vcombine.low %v6833_v16, %v6841_v43  ;;  %v6883_v44 = vrot.slane %v23280_v45, %v16881_v34  ;;  %v6891_v62 = vrot.slane %v23281_v12, %v16881_v34  ;;  %v14469_v16 = vcombine.high %v23283_v5, %v23282_v14  ;;  %15105 = vmatprep.mubr.msk.bf16.mxu1 %vm7654_vm0, %v3318_v36 }
 0x45e   : > { %v19124_v43 = vrot.slane %v6396_v58, %v16881_v34  ;;  %15126 = vmatpush3.bf16.msra.mxu1 %v7528_v50  ;;  %v6866_v32 = vcombine.low %v6849_v41, %v6857_v28  ;;  %v3320_v59 = vshrl.u32 %v3137_v9, 16  ;;  %15118 = vmatmul.mubr.msk.bf16.vlgmr.msra.gmra.mrb[56].mxu0 %vm7654_vm0, %v3309_v56  ;;  %v6899_v33 = vrot.slane %v6892_v61, %v16881_v34  ;;  %v19157_v61 = vpop.f32.mrb[32].mxu0 }
 0x45f   : > { %v6907_v4 = vrot.slane %v14469_v16, %v16881_v34  ;;  %v6908_v20 = vcombine.low %v6883_v44, %v6891_v62  ;;  %v5632_v45 = vpack.i.b16 %v5537_v42, %v18687_v25  ;;  %v19132_v14 = vrot.slane %v6858_v27, %v16884_v21 }
 0x460   : > { %v19135_v58 = vrot.slane %v6866_v32, %v16884_v21  ;;  %v3321_v36 = vpack.i.b16 %v3320_v59, %v3319_v46  ;;  %v5635_v50 = vshrl.u32 %v5537_v42, 16  ;;  %v23286_v18 = vcombine.low %v18772_v57, %v18775_v26 }
 0x461   : > { %23284 = vst [vmem:[#allocation25_spill] sm:$0xff] %v19132_v14  ;;  %v6916_v28 = vcombine.low %v6899_v33, %v6907_v4  ;;  %v6345_v9 = vcombine.high %v5632_v45, %v16876_v24  ;;  %v6352_v56 = vrot.slane %v5632_v45, %v16881_v34  ;;  %v19148_v27 = vrot.slane %v6908_v20, %v16884_v21  ;;  %v19165_v33 = vpop.f32.mrb[33].mxu0 }
 0x462   : > { %23285 = vst [vmem:[#allocation51_spill] sm:$0xff] %v19135_v58  ;;  %v6933_v41 = vrot.slane %v23286_v18, %v16881_v34  ;;  %v19145_v62 = vcombine.low %v19132_v14, %v19135_v58  ;;  %15121 = vmatprep.mubr.msk.bf16.mxu0 %vm7654_vm0, %v3321_v36  ;;  %v23289_v44 = vshrl.u32 %v18687_v25, 16  ;;  %v23290_v12 = vcombine.high %v18772_v57, %v18775_v26  ;;  %v5523_v36 = vpop.permute.xlu1 %5522 }
 0x463   : > { %23288 = vst [vmem:[#allocation45_spill] sm:$0xff] %v19148_v27  ;;  %v19160_v16 = vrot.slane %v6916_v28, %v16884_v21  ;;  %v6359_v32 = vrot.slane %v6345_v9, %v16881_v34  ;;  %v6360_v46 = vcombine.low %v19069_v19, %v6352_v56  ;;  %v6361_v59 = vcombine.high %v19069_v19, %v6352_v56 }
 0x464   : > { %23287 = vst [vmem:[#allocation50_spill] sm:$0xff] %v19145_v62  ;;  %v5636_v42 = vpack.i.b16 %v5635_v50, %v23289_v44  ;;  %v6941_v5 = vrot.slane %v23290_v12, %v16881_v34  ;;  %v23292_v26 = vcombine.low %v18780_v8, %v18783_v13  ;;  %v23293_v20 = vcombine.high %v18780_v8, %v18783_v13  ;;  %v19177_v50 = vpop.f32.mrb[34].mxu0 }
 0x465   : > { %23291 = vst [vmem:[#allocation40_spill] sm:$0xff] %v19160_v16  ;;  %v19181_v19 = vcombine.low %v19148_v27, %v19160_v16  ;;  %v19184_v28 = vrot.slane %v6360_v46, %v16884_v21  ;;  %v19187_v9 = vrot.slane %v6361_v59, %v16884_v21  ;;  %v6376_v56 = vcombine.low %v19083_v49, %v6359_v32  ;;  %v19190_v18 = vpop.f32.mrb[35].mxu0 }
 0x466   : > { %v6411_v25 = vcombine.high %v5636_v42, %v16876_v24  ;;  %v6418_v4 = vrot.slane %v5636_v42, %v16881_v34  ;;  %v6949_v57 = vrot.slane %v23292_v26, %v16881_v34  ;;  %v6957_v45 = vrot.slane %v23293_v20, %v16881_v34 }
 0x467   : > { %23294 = vst [vmem:[#allocation36_spill] sm:$0xff] %v19181_v19  ;;  %v6377_v8 = vcombine.high %v19083_v49, %v6359_v32  ;;  %v23295_v12 = vcombine.high %v18798_v29, %v19014_v53  ;;  %v7544_v26 = vpack.i.b16 %v19181_v19, %v19145_v62  ;;  %v6958_v49 = vcombine.low %v6933_v41, %v6941_v5 }
 0x468   : > { %v19194_v13 = vrot.slane %v6411_v25, %v16881_v34  ;;  %v6426_v44 = vcombine.low %v19086_v10, %v6418_v4  ;;  %v6427_v42 = vcombine.high %v19086_v10, %v6418_v4  ;;  %v19213_v10 = vrot.slane %v6376_v56, %v16884_v21  ;;  %v5539_v4 = vpop.permute.xlu1 %5538 }
 0x469   : > { %v19202_v46 = vrot.slane %v23295_v12, %v16884_v21  ;;  %15127 = vmatprep.subr.bf16.mxu1 %v7544_v26  ;;  %v6966_v41 = vcombine.low %v6949_v57, %v6957_v45  ;;  %v23296_v5 = vcombine.low %v18788_v17, %v18802_v52  ;;  %v19226_v12 = vrot.slane %v6377_v8, %v16884_v21 }
 0x46a   : > { %v6442_v29 = vcombine.low %v19124_v43, %v19194_v13  ;;  %v19229_v56 = vrot.slane %v6426_v44, %v16884_v21  ;;  %v19232_v25 = vrot.slane %v6427_v42, %v16884_v21  ;;  %v6443_v53 = vcombine.high %v19124_v43, %v19194_v13  ;;  %15128 = vmatpush3.bf16.msra.mxu1 %v7544_v26 }
 0x46b   : > { %v6983_v20 = vrot.slane %v23296_v5, %v16881_v34  ;;  %v19240_v45 = vrot.slane %v6958_v49, %v16884_v21  ;;  %v19243_v8 = vrot.slane %v6966_v41, %v16884_v21  ;;  %v23299_v44 = vcombine.high %v18788_v17, %v18802_v52 }
 0x46c   : > { %v19237_v57 = vrot.slane %v6442_v29, %v16884_v21  ;;  %v6992_v5 = vcombine.low %v18815_v47, %v18818_v39  ;;  %v14473_v43 = vcombine.high %v18815_v47, %v18818_v39  ;;  %v5650_v13 = vshrl.u32 %v5523_v36, 16 }
 0x46d   : > { %23297 = vst [vmem:[#allocation28_spill] sm:$0xff] %v19240_v45  ;;  %23298 = vst [vmem:[#allocation37_spill] sm:$0xff] %v19243_v8  ;;  %v6991_v42 = vrot.slane %v23299_v44, %v16881_v34  ;;  %v3187_v26 = vcombine.high %v18864_v54, %v18867_v31  ;;  %v19257_v49 = vcombine.low %v19240_v45, %v19243_v8  ;;  %v5651_v59 = vshrl.u32 %v5539_v4, 16 }
 0x46e   : > { %v3237_v41 = vcombine.high %v18879_v3, %v18882_v1  ;;  %v5648_v17 = vpack.i.b16 %v5539_v4, %v5523_v36  ;;  %v6999_v52 = vrot.slane %v6992_v5, %v16881_v34  ;;  %v7007_v44 = vrot.slane %v14473_v43, %v16881_v34 }
 0x46f   : > { %v7008_v29 = vcombine.low %v6983_v20, %v6991_v42  ;;  %v3331_v32 = vshrl.u32 %v3187_v26, 16  ;;  %v5652_v8 = vpack.i.b16 %v5651_v59, %v5650_v13  ;;  %v23301_v3 = vcombine.low %v18920_v38, %v18923_v23 }
 0x470   : > { %v3330_v39 = vpack.i.b16 %v3237_v41, %v3187_v26  ;;  %v3332_v54 = vshrl.u32 %v3237_v41, 16  ;;  %v6477_v31 = vcombine.high %v5648_v17, %v16876_v24  ;;  %v7016_v45 = vcombine.low %v6999_v52, %v7007_v44  ;;  %v23305_v26 = vld [vmem:[#allocation47_spill] sm:$0xff] }
 0x471   : > { %v19264_v47 = vrot.slane %v7008_v29, %v16884_v21  ;;  %v6484_v20 = vrot.slane %v5648_v17, %v16881_v34  ;;  %v7033_v1 = vrot.slane %v23301_v3, %v16881_v34  ;;  %v23302_v42 = vcombine.high %v18920_v38, %v18923_v23  ;;  %v23306_v17 = vld [vmem:[#allocation23_spill] sm:$0xff] }
 0x472   : > { %15106 = vmatmul.mubr.msk.bf16.gmra.mrb[44].mxu1 %vm7654_vm0, %v3330_v39  ;;  %v3333_v36 = vpack.i.b16 %v3332_v54, %v3331_v32  ;;  %v6491_v4 = vrot.slane %v6477_v31, %v16881_v34  ;;  %v23303_v59 = vcombine.low %v18931_v55, %v18934_v63  ;;  %v19283_v13 = vrot.slane %v7016_v45, %v16884_v21 }
 0x473   : > { %23300 = vst [vmem:[#allocation39_spill] sm:$0xff] %v19264_v47  ;;  %v7041_v5 = vrot.slane %v23302_v42, %v16881_v34  ;;  %v6492_v29 = vcombine.low %v23305_v26, %v6484_v20  ;;  %v6493_v41 = vcombine.high %v23305_v26, %v6484_v20  ;;  %v6543_v32 = vcombine.high %v5652_v8, %v16876_v24  ;;  %v19296_v39 = vpop.f32.mrb[20].mxu1 }
 0x474   : > { %v7049_v43 = vrot.slane %v23303_v59, %v16881_v34  ;;  %23304 = vst [vmem:[#allocation52_spill] sm:$0xff] %v19283_v13  ;;  %15122 = vmatmul.mubr.msk.bf16.gmra.mrb[60].mxu0 %vm7654_vm0, %v3333_v36  ;;  %v6508_v52 = vcombine.low %v23306_v17, %v6491_v4  ;;  %v6509_v38 = vcombine.high %v23306_v17, %v6491_v4  ;;  %v19309_v36 = vpop.f32.mrb[21].mxu1  ;;  %v23308_v4 = vld [vmem:[#allocation24_spill] sm:$0xff] }
 0x475   : > { %v6550_v23 = vrot.slane %v5652_v8, %v16881_v34  ;;  %v23307_v44 = vcombine.high %v18931_v55, %v18934_v63  ;;  %v19300_v54 = vcombine.low %v19264_v47, %v19283_v13  ;;  %v19303_v31 = vrot.slane %v6492_v29, %v16884_v21  ;;  %v5509_v8 = vpop.permute.xlu1 %5508  ;;  %v19319_v26 = vpop.f32.mrb[22].mxu1 }
 0x476   : > { %v19306_v20 = vrot.slane %v6493_v41, %v16884_v21  ;;  %v6557_v3 = vrot.slane %v6543_v32, %v16881_v34  ;;  %v19312_v55 = vrot.slane %v6508_v52, %v16884_v21  ;;  %v19315_v63 = vrot.slane %v6509_v38, %v16884_v21  ;;  %v19321_v29 = vpop.f32.mrb[36].mxu0  ;;  %v23310_v52 = vld [vmem:[#allocation30_spill] sm:$0xff] }
 0x477   : > { %v7057_v45 = vrot.slane %v23307_v44, %v16881_v34  ;;  %v6558_v42 = vcombine.low %v23308_v4, %v6550_v23  ;;  %v6559_v59 = vcombine.high %v23308_v4, %v6550_v23  ;;  %23309 = vst [vmem:[#allocation38_spill] sm:$0xff] %v19321_v29  ;;  %v7560_v17 = vpack.i.b16 %v19300_v54, %v19257_v49  ;;  %v19330_v44 = vpop.f32.mrb[23].mxu1  ;;  %v19332_v14 = vpop.f32.mrb[37].mxu0 }
 0x478   : > { %v6574_v38 = vcombine.low %v23310_v52, %v6557_v3  ;;  %23311 = vst [vmem:[#allocation27_spill] sm:$0xff] %v19332_v14  ;;  %v19335_v23 = vrot.slane %v6443_v53, %v16884_v21  ;;  %v6575_v32 = vcombine.high %v23310_v52, %v6557_v3  ;;  %v19342_v58 = vpop.f32.mrb[38].mxu0  ;;  %v7058_v62 = vcombine.low %v7033_v1, %v7041_v5 }
 0x479   : > { %15129 = vmatprep.subr.bf16.mxu1 %v7560_v17  ;;  %v19345_v27 = vrot.slane %v6558_v42, %v16884_v21  ;;  %v19348_v16 = vrot.slane %v6559_v59, %v16884_v21  ;;  %v19352_v19 = vpop.f32.mrb[39].mxu0  ;;  %v7066_v52 = vcombine.low %v7049_v43, %v7057_v45  ;;  %v23312_v42 = vcombine.low %v18947_v30, %v18960_v2  ;;  %v5541_v41 = vpop.permute.xlu1 %5540 }
 0x47a   : > { %15130 = vmatpush3.bf16.msra.mxu1 %v7560_v17  ;;  %v19363_v4 = vrot.slane %v6574_v38, %v16884_v21  ;;  %v23313_v1 = vcombine.high %v18947_v30, %v18960_v2  ;;  %v7092_v17 = vcombine.low %v19037_v7, %v19040_v15  ;;  %v14477_v3 = vcombine.high %v19037_v7, %v19040_v15 }
 0x47b   : > { %v7083_v59 = vrot.slane %v23312_v42, %v16881_v34  ;;  %v19374_v43 = vrot.slane %v6575_v32, %v16884_v21  ;;  %v19377_v45 = vrot.slane %v7058_v62, %v16884_v21  ;;  %v19380_v38 = vrot.slane %v7066_v52, %v16884_v21  ;;  %v19385_v14 = vpop.f32.mrb[24].mxu1 }
 0x47c   : > { %v7091_v5 = vrot.slane %v23313_v1, %v16881_v34  ;;  %v5656_v42 = vpack.i.b16 %v5509_v8, %v23250_v11  ;;  %v7099_v30 = vrot.slane %v7092_v17, %v16881_v34  ;;  %v7107_v2 = vrot.slane %v14477_v3, %v16881_v34  ;;  %23316 = vst [vmem:[#allocation42_spill] sm:$0xff] %v19385_v14  ;;  %v19394_v52 = vpop.f32.mrb[25].mxu1 }
 0x47d   : > { %23314 = vst [vmem:[#allocation46_spill] sm:$0xff] %v19377_v45  ;;  %23315 = vst [vmem:[#allocation31_spill] sm:$0xff] %v19380_v38  ;;  %v5659_v53 = vshrl.u32 %v5509_v8, 16  ;;  %v19389_v7 = vcombine.low %v19377_v45, %v19380_v38  ;;  %v7530_v15 = vshrl.u32 %v19002_v6, 16  ;;  %v7531_v62 = vshrl.u32 %v19026_v51, 16  ;;  %v23321_v45 = vld [vmem:[#allocation26_spill] sm:$0xff] }
 0x47e   : > { %v7108_v1 = vcombine.low %v7083_v59, %v7091_v5  ;;  %v6594_v32 = vcombine.high %v5656_v42, %v16876_v24  ;;  %23317 = vst [vmem:[#allocation47_spill] sm:$0xff] %v19394_v52  ;;  %v7116_v47 = vcombine.low %v7099_v30, %v7107_v2  ;;  %v23318_v17 = vshrl.u32 %v23250_v11, 16  ;;  %v19400_v5 = vpop.f32.mrb[26].mxu1 }
 0x47f   : > { %v6601_v8 = vrot.slane %v5656_v42, %v16881_v34  ;;  %v5664_v59 = vpack.i.b16 %v5541_v41, %v18917_v40  ;;  %23319 = vst [vmem:[#allocation23_spill] sm:$0xff] %v19400_v5  ;;  %v5667_v51 = vshrl.u32 %v5541_v41, 16  ;;  %v23322_v52 = vcombine.low %v19017_v22, %v23321_v45  ;;  %v19410_v2 = vpop.f32.mrb[27].mxu1 }
 0x480   : > { %v5660_v3 = vpack.i.b16 %v5659_v53, %v23318_v17  ;;  %v19403_v14 = vrot.slane %v7108_v1, %v16884_v21  ;;  %v6608_v6 = vrot.slane %v6594_v32, %v16881_v34  ;;  %23323 = vst [vmem:[#allocation30_spill] sm:$0xff] %v19410_v2  ;;  %v19413_v11 = vrot.slane %v7116_v47, %v16884_v21 }
 0x481   : > { %v7133_v30 = vrot.slane %v23322_v52, %v16881_v34  ;;  %v6609_v42 = vcombine.high %v5664_v59, %v16876_v24  ;;  %v23325_v1 = vcombine.high %v19017_v22, %v23321_v45  ;;  %v23326_v17 = vshrl.u32 %v18917_v40, 16 }
 0x482   : > { %23320 = vst [vmem:[#allocation24_spill] sm:$0xff] %v19403_v14  ;;  %23324 = vst [vmem:[#allocation26_spill] sm:$0xff] %v19413_v11  ;;  %v6660_v53 = vcombine.high %v5660_v3, %v16876_v24  ;;  %v6667_v41 = vrot.slane %v5660_v3, %v16881_v34  ;;  %v6616_v52 = vrot.slane %v5664_v59, %v16881_v34  ;;  %v19441_v59 = vpop.f32.mrb[40].mxu0 }
 0x483   : > { %v7141_v32 = vrot.slane %v23325_v1, %v16881_v34  ;;  %v5668_v38 = vpack.i.b16 %v5667_v51, %v23326_v17  ;;  %v23327_v47 = vcombine.low %v19029_v60, %v19032_v48  ;;  %v19433_v5 = vcombine.low %v19403_v14, %v19413_v11  ;;  %v19445_v13 = vpop.f32.mrb[41].mxu0 }
 0x484   : > { %v6674_v22 = vrot.slane %v6660_v53, %v16881_v34  ;;  %v6623_v45 = vrot.slane %v6609_v42, %v16881_v34  ;;  %v23328_v40 = vcombine.high %v19029_v60, %v19032_v48  ;;  %v6624_v51 = vcombine.low %v6601_v8, %v6616_v52  ;;  %23329 = vst [vmem:[#allocation53_spill] sm:$0xff] %v19445_v13  ;;  %v19449_v29 = vpop.f32.mrb[42].mxu0  ;;  %v19451_v60 = vpop.f32.mrb[28].mxu1 }
 0x485   : > { %v19429_v2 = vrot.slane %v23327_v47, %v16881_v34  ;;  %v6625_v1 = vcombine.high %v6601_v8, %v6616_v52  ;;  %v6675_v17 = vcombine.high %v5668_v38, %v16876_v24  ;;  %v6682_v47 = vrot.slane %v5668_v38, %v16881_v34  ;;  %23330 = vst [vmem:[#allocation54_spill] sm:$0xff] %v19451_v60  ;;  %v19460_v52 = vpop.f32.mrb[43].mxu0 }
 0x486   : > { %v7157_v3 = vrot.slane %v23328_v40, %v16881_v34  ;;  %v7576_v53 = vpack.i.b16 %v19433_v5, %v19389_v7  ;;  %v6640_v14 = vcombine.low %v6608_v6, %v6623_v45  ;;  %v6641_v42 = vcombine.high %v6608_v6, %v6623_v45  ;;  %v19462_v40 = vpop.f32.mrb[29].mxu1 }
 0x487   : > { %v7158_v11 = vcombine.low %v7133_v30, %v7141_v32  ;;  %v19454_v48 = vrot.slane %v6624_v51, %v16884_v21  ;;  %v19457_v8 = vrot.slane %v6625_v1, %v16884_v21  ;;  %v6689_v24 = vrot.slane %v6675_v17, %v16881_v34  ;;  %23331 = vst [vmem:[#allocation55_spill] sm:$0xff] %v19462_v40  ;;  %v19472_v51 = vpop.f32.mrb[30].mxu1 }
 0x488   : > { %v6690_v38 = vcombine.low %v6667_v41, %v6682_v47  ;;  %15131 = vmatprep.subr.bf16.mxu1 %v7576_v53  ;;  %v19464_v6 = vpack.i.b16 %v7531_v62, %v7530_v15  ;;  %v19467_v30 = vrot.slane %v6640_v14, %v16884_v21  ;;  %v19470_v32 = vrot.slane %v6641_v42, %v16884_v21  ;;  %v19480_v62 = vpop.f32.mrb[31].mxu1 }
 0x489   : > { %v6691_v45 = vcombine.high %v6667_v41, %v6682_v47  ;;  %v14487_v1 = vcombine.high %v19312_v55, %v19315_v63  ;;  %v7376_v17 = vcombine.low %v19345_v27, %v19348_v16  ;;  %v14488_v40 = vcombine.high %v19345_v27, %v19348_v16  ;;  %15132 = vmatpush3.bf16.msra.mxu1 %v7576_v53 }
 0x48a   : > { %23332 = vst [vmem:[#allocation56_spill] sm:$0xff] %v19464_v6  ;;  %v6706_v15 = vcombine.low %v6674_v22, %v6689_v24  ;;  %23333 = vst [vmem:[#allocation57_spill] sm:$0xff] %v19480_v62  ;;  %15141 = vmatprep.subr.bf16.mxu1 %v19464_v6  ;;  %v19484_v14 = vrot.slane %v6690_v38, %v16884_v21  ;;  %v6707_v41 = vcombine.high %v6674_v22, %v6689_v24  ;;  %v23336_v24 = vld [vmem:[#allocation43_spill] sm:$0xff] }
 0x48b   : > { %v19487_v47 = vrot.slane %v7158_v11, %v16884_v21  ;;  %v7166_v42 = vcombine.low %v19429_v2, %v7157_v3  ;;  %v19491_v60 = vrot.slane %v6691_v45, %v16884_v21  ;;  %v7426_v27 = vcombine.low %v19454_v48, %v19457_v8 }
 0x48c   : > { %v14490_v16 = vcombine.high %v19454_v48, %v19457_v8  ;;  %v23334_v53 = vcombine.low %v19051_v37, %v19054_v0  ;;  %v7442_v11 = vcombine.low %v19467_v30, %v19470_v32  ;;  %v23335_v22 = vcombine.high %v19051_v37, %v19054_v0  ;;  %v19511_v48 = vpop.f32.mrb[44].mxu0 }
 0x48d   : > { %v7192_v45 = vcombine.low %v23336_v24, %v19202_v46  ;;  %23337 = vst [vmem:[#allocation43_spill] sm:$0xff] %v19511_v48  ;;  %v19514_v8 = vrot.slane %v6706_v15, %v16884_v21  ;;  %v23338_v2 = vcombine.low %v19184_v28, %v19187_v9  ;;  %v23339_v37 = vcombine.high %v19184_v28, %v19187_v9 }
 0x48e   : > { %v7183_v38 = vrot.slane %v23334_v53, %v16881_v34  ;;  %v7191_v3 = vrot.slane %v23335_v22, %v16881_v34  ;;  %v14481_v53 = vcombine.high %v23336_v24, %v19202_v46  ;;  %v19526_v22 = vpop.f32.mrb[45].mxu0  ;;  %v23340_v15 = vcombine.low %v19213_v10, %v19226_v12 }
 0x48f   : > { %v7233_v6 = vrot.slane %v23338_v2, %v16881_v34  ;;  %v7241_v0 = vrot.slane %v23339_v37, %v16881_v34  ;;  %v7199_v48 = vrot.slane %v7192_v45, %v16881_v34  ;;  %v23341_v24 = vcombine.high %v19213_v10, %v19226_v12  ;;  %v19537_v13 = vpop.f32.mrb[46].mxu0 }
 0x490   : > { %v7208_v62 = vcombine.low %v7183_v38, %v7191_v3  ;;  %v7249_v46 = vrot.slane %v23340_v15, %v16881_v34  ;;  %v19540_v28 = vrot.slane %v6707_v41, %v16884_v21  ;;  %v7207_v9 = vrot.slane %v14481_v53, %v16881_v34  ;;  %v19551_v15 = vpop.f32.mrb[47].mxu0 }
 0x491   : > { %v7257_v2 = vrot.slane %v23341_v24, %v16881_v34  ;;  %v23342_v38 = vcombine.low %v19229_v56, %v19232_v25  ;;  %v23343_v45 = vcombine.high %v19229_v56, %v19232_v25  ;;  %23344 = vst [vmem:[#allocation58_spill] sm:$0xff] %v19551_v15  ;;  %v19554_v10 = vrot.slane %v7166_v42, %v16884_v21 }
 0x492   : > { %v7292_v41 = vcombine.low %v19237_v57, %v19335_v23  ;;  %v14485_v53 = vcombine.high %v19237_v57, %v19335_v23  ;;  %v7476_v24 = vcombine.low %v19484_v14, %v19491_v60  ;;  %v7216_v25 = vcombine.low %v7199_v48, %v7207_v9 }
 0x493   : > { %v7283_v3 = vrot.slane %v23342_v38, %v16881_v34  ;;  %v7291_v37 = vrot.slane %v23343_v45, %v16881_v34  ;;  %v7266_v12 = vcombine.low %v7249_v46, %v7257_v2  ;;  %v19563_v38 = vrot.slane %v7208_v62, %v16884_v21 }
 0x494   : > { %v7258_v56 = vcombine.low %v7233_v6, %v7241_v0  ;;  %v7299_v45 = vrot.slane %v7292_v41, %v16881_v34  ;;  %v7307_v42 = vrot.slane %v14485_v53, %v16881_v34  ;;  %v23345_v46 = vcombine.low %v19303_v31, %v19306_v20 }
 0x495   : > { %v7308_v15 = vcombine.low %v7283_v3, %v7291_v37  ;;  %v19572_v57 = vrot.slane %v7216_v25, %v16884_v21  ;;  %v23346_v23 = vcombine.high %v19303_v31, %v19306_v20  ;;  %v23347_v6 = vcombine.low %v19312_v55, %v19315_v63 }
 0x496   : > { %v7333_v2 = vrot.slane %v23345_v46, %v16881_v34  ;;  %v7357_v0 = vrot.slane %v14487_v1, %v16881_v34  ;;  %v19585_v9 = vcombine.low %v19487_v47, %v19554_v10  ;;  %v19588_v3 = vrot.slane %v7266_v12, %v16884_v21 }
 0x497   : > { %v7341_v62 = vrot.slane %v23346_v23, %v16881_v34  ;;  %v7349_v48 = vrot.slane %v23347_v6, %v16881_v34  ;;  %v7316_v37 = vcombine.low %v7299_v45, %v7307_v42  ;;  %v7383_v41 = vrot.slane %v7376_v17, %v16881_v34 }
 0x498   : > { %v19593_v31 = vcombine.low %v19563_v38, %v19572_v57  ;;  %v7391_v55 = vrot.slane %v14488_v40, %v16881_v34  ;;  %v7392_v63 = vcombine.low %v19363_v4, %v19374_v43  ;;  %v19599_v1 = vrot.slane %v7258_v56, %v16884_v21 }
 0x499   : > { %v7366_v20 = vcombine.low %v7349_v48, %v7357_v0  ;;  %v19602_v12 = vrot.slane %v7308_v15, %v16884_v21  ;;  %v19605_v53 = vrot.slane %v7316_v37, %v16884_v21  ;;  %v14489_v17 = vcombine.high %v19363_v4, %v19374_v43 }
 0x49a   : > { %v14492_v25 = vcombine.high %v19484_v14, %v19491_v60  ;;  %v7592_v40 = vpack.i.b16 %v19593_v31, %v19585_v9  ;;  %v7358_v45 = vcombine.low %v7333_v2, %v7341_v62  ;;  %v7399_v42 = vrot.slane %v7392_v63, %v16881_v34  ;;  %v19627_v60 = vld [vmem:[%s16446_s17] ss:$0 sm:$0xff] }
 0x49b   : > { %v19616_v56 = vcombine.low %v19599_v1, %v19588_v3  ;;  %v19620_v15 = vcombine.low %v19602_v12, %v19605_v53  ;;  %v7407_v46 = vrot.slane %v14489_v17, %v16881_v34  ;;  %v7408_v4 = vcombine.low %v7383_v41, %v7391_v55 }
 0x49c   : > { %15189 = vmatprep.subr.bf16.mxu0 %v7592_v40  ;;  %v19624_v43 = vrot.slane %v7366_v20, %v16884_v21  ;;  %v7433_v14 = vrot.slane %v7426_v27, %v16881_v34  ;;  %v7441_v2 = vrot.slane %v14490_v16, %v16881_v34  ;;  %v7449_v23 = vrot.slane %v7442_v11, %v16881_v34 }
 0x49d   : > { %15190 = vmatpush3.bf16.msra.mxu0 %v7592_v40  ;;  %v7608_v62 = vpack.i.b16 %v19620_v15, %v19616_v56  ;;  %v7416_v6 = vcombine.low %v7399_v42, %v7407_v46  ;;  %v23348_v48 = vcombine.high %v19467_v30, %v19470_v32  ;;  %v7483_v37 = vrot.slane %v7476_v24, %v16881_v34  ;;  %v23349_v32 = vld [vmem:[#allocation33_spill] sm:$0xff] }
 0x49e   : > { %v19640_v41 = vrot.slane %v7358_v45, %v16884_v21  ;;  %v7491_v27 = vrot.slane %v14492_v25, %v16881_v34  ;;  %v7492_v16 = vcombine.low %v19514_v8, %v19540_v28  ;;  %v14493_v11 = vcombine.high %v19514_v8, %v19540_v28 }
 0x49f   : > { %v7457_v0 = vrot.slane %v23348_v48, %v16881_v34  ;;  %15191 = vmatprep.subr.bf16.mxu0 %v7608_v62  ;;  %v19648_v20 = vrot.slane %v7408_v4, %v16884_v21  ;;  %v19651_v30 = vrot.slane %v7416_v6, %v16884_v21  ;;  %v19655_v24 = vadd.f32 %v23349_v32, %v19627_v60 }
 0x4a0   : > { %v7458_v63 = vcombine.low %v7433_v14, %v7441_v2  ;;  %v7499_v17 = vrot.slane %v7492_v16, %v16881_v34  ;;  %v7507_v25 = vrot.slane %v14493_v11, %v16881_v34  ;;  %v7508_v40 = vcombine.low %v7483_v37, %v7491_v27  ;;  %v23350_v14 = vld [vmem:[#allocation29_spill] sm:$0xff]  ;;  %v23364_v34 = vld [vmem:[#allocation27_spill] sm:$0xff] }
 0x4a1   : > { %v7466_v55 = vcombine.low %v7449_v23, %v7457_v0  ;;  %15192 = vmatpush3.bf16.msra.mxu0 %v7608_v62  ;;  %v19661_v8 = vcombine.low %v19640_v41, %v19624_v43  ;;  %v19665_v28 = vcombine.low %v19648_v20, %v19651_v30  ;;  %v19669_v45 = vadd.f32 %v19627_v60, %v19112_v35  ;;  %v23351_v11 = vld [vmem:[#allocation49_spill] sm:$0xff] }
 0x4a2   : > { %v7516_v46 = vcombine.low %v7499_v17, %v7507_v25  ;;  %v19678_v2 = vadd.f32 %v19627_v60, %v23350_v14  ;;  %v19681_v23 = vrot.slane %v7458_v63, %v16884_v21  ;;  %v19684_v62 = vrot.slane %v7508_v40, %v16884_v21 }
 0x4a3   : > { %v19672_v42 = vrot.slane %v7466_v55, %v16884_v21  ;;  %v7624_v4 = vpack.i.b16 %v19665_v28, %v19661_v8  ;;  %v8450_v6 = vsel %vm8443_vm1, %v19655_v24, -inf  ;;  %v19693_v48 = vadd.f32 %v19177_v50, %v19627_v60 }
 0x4a4   : > { %v19687_v35 = vrot.slane %v7516_v46, %v16884_v21  ;;  %8451 = vmax.xlane.f32.xlu0 %v8450_v6  ;;  %v8447_v0 = vsel %vm8443_vm1, %v19669_v45, -inf  ;;  %v19707_v16 = vcombine.high %v19563_v38, %v19572_v57  ;;  %v19713_v32 = vadd.f32 %v23351_v11, %v19627_v60  ;;  %v23363_v21 = vld [vmem:[#allocation24_spill] sm:$0xff] }
 0x4a5   : > { %15193 = vmatprep.subr.bf16.mxu0 %v7624_v4  ;;  %v19699_v37 = vcombine.low %v19681_v23, %v19672_v42  ;;  %8448 = vmax.xlane.f32.xlu1 %v8447_v0  ;;  %v19717_v55 = vcombine.high %v19487_v47, %v19554_v10  ;;  %v8444_v63 = vsel %vm8443_vm1, %v19678_v2, -inf  ;;  %v19723_v17 = vadd.f32 %v19627_v60, %v19190_v18 }
 0x4a6   : > { %15194 = vmatpush3.bf16.msra.mxu0 %v7624_v4  ;;  %v19703_v27 = vcombine.low %v19684_v62, %v19687_v35  ;;  %v8477_v38 = vsel %vm8443_vm1, %v19693_v48, -inf  ;;  %v19733_v47 = vadd.f32 %v19319_v26, %v19627_v60  ;;  %v19737_v10 = vadd.f32 %v19157_v61, %v19627_v60 }
 0x4a7   : > { %v19729_v57 = vpack.i.b16 %v19707_v16, %v19717_v55  ;;  %v8453_v18 = vsel %vm8443_vm1, %v19713_v32, -inf  ;;  %v8471_v25 = vsel %vm8443_vm1, %v19723_v17, -inf  ;;  %v19746_v40 = vadd.f32 %v19627_v60, %v19165_v33 }
 0x4a8   : > { %v7640_v50 = vpack.i.b16 %v19703_v27, %v19699_v37  ;;  %8445 = vmax.xlane.f32.xlu0 %v8444_v63  ;;  %v8465_v26 = vsel %vm8443_vm1, %v19733_v47, -inf  ;;  %v19752_v61 = vadd.f32 %v19627_v60, %v19526_v22  ;;  %v8474_v46 = vsel %vm8443_vm1, %v19737_v10, -inf  ;;  %v23356_v63 = vld [vmem:[#allocation52_spill] sm:$0xff] }
 0x4a9   : > { %23352 = vst [vmem:[#allocation33_spill] sm:$0xff] %v19729_v57  ;;  %8478 = vmax.xlane.f32.xlu1 %v8477_v38  ;;  %v19758_v4 = vadd.f32 %v19627_v60, %v19330_v44  ;;  %v19762_v33 = vadd.f32 %v19296_v39, %v19627_v60  ;;  %v8468_v14 = vsel %vm8443_vm1, %v19746_v40, -inf  ;;  %v7562_v6 = vshrl.u32 %v19257_v49, 16 }
 0x4aa   : > { %15195 = vmatprep.subr.bf16.mxu0 %v7640_v50  ;;  %v7563_v22 = vshrl.u32 %v19300_v54, 16  ;;  %v7578_v0 = vshrl.u32 %v19389_v7, 16  ;;  %v19772_v44 = vadd.f32 %v19627_v60, %v19309_v36  ;;  %v19776_v11 = vadd.f32 %v19342_v58, %v19627_v60  ;;  %v23353_v54 = vld [vmem:[#allocation38_spill] sm:$0xff]  ;;  %v23357_v58 = vld [vmem:[#allocation39_spill] sm:$0xff] }
 0x4ab   : > { %15196 = vmatpush3.bf16.msra.mxu0 %v7640_v50  ;;  %v7579_v50 = vshrl.u32 %v19433_v5, 16  ;;  %v19780_v39 = vadd.f32 %v19627_v60, %v19352_v19  ;;  %v8459_v49 = vsel %vm8443_vm1, %v19758_v4, -inf  ;;  %v19786_v7 = vadd.f32 %v23353_v54, %v19627_v60  ;;  %v23359_v19 = vld [vmem:[#allocation23_spill] sm:$0xff] }
 0x4ac   : > { %15221 = vmatprep.subr.bf16.mxu0 %v19729_v57  ;;  %8454 = vmax.xlane.f32.xlu0 %v8453_v18  ;;  %v19788_v5 = vpack.i.b16 %v7563_v22, %v7562_v6  ;;  %v19794_v38 = vcombine.high %v23357_v58, %v23356_v63  ;;  %v19798_v18 = vadd.f32 %v23359_v19, %v19627_v60  ;;  %v8462_v22 = vsel %vm8443_vm1, %v19762_v33, -inf }
 0x4ad   : > { %8472 = vmax.xlane.f32.xlu1 %v8471_v25  ;;  %v19790_v36 = vpack.i.b16 %v7579_v50, %v7578_v0  ;;  %v23360_v25 = vld [vmem:[#allocation31_spill] sm:$0xff]  ;;  %v19806_v6 = vadd.f32 %v19627_v60, %v23364_v34  ;;  %v8489_v0 = vsel %vm8443_vm1, %v19776_v11, -inf  ;;  %v8456_v50 = vsel %vm8443_vm1, %v19772_v44, -inf }
 0x4ae   : > { %23354 = vst [vmem:[#allocation29_spill] sm:$0xff] %v19788_v5  ;;  %23358 = vst [vmem:[#allocation38_spill] sm:$0xff] %v19794_v38  ;;  %v8486_v34 = vsel %vm8443_vm1, %v19786_v7, -inf  ;;  %v7610_v57 = vshrl.u32 %v19616_v56, 16  ;;  %v7626_v38 = vshrl.u32 %v19661_v8, 16  ;;  %v7275_v8 = vcombine.high %v19599_v1, %v19588_v3 }
 0x4af   : > { %23355 = vst [vmem:[#allocation49_spill] sm:$0xff] %v19790_v36  ;;  %v7643_v36 = vshrl.u32 %v19703_v27, 16  ;;  %v7425_v27 = vcombine.high %v19648_v20, %v19651_v30 }
 0x4b0   : > { %8475 = vmax.xlane.f32.xlu0 %v8474_v46  ;;  %v7618_v3 = vshrl.u32 %v7275_v8, 16 }
 0x4b1   : > { %8466 = vmax.xlane.f32.xlu1 %v8465_v26  ;;  %v23361_v26 = vld [vmem:[#allocation46_spill] sm:$0xff] }
 0x4b2   : > { %v7075_v46 = vcombine.high %v23361_v26, %v23360_v25  ;;  %v8501_v26 = vsel %vm8443_vm1, %v19798_v18, -inf }
 0x4b4   : > { %8469 = vmax.xlane.f32.xlu0 %v8468_v14  ;;  %v23362_v14 = vld [vmem:[#allocation26_spill] sm:$0xff]  ;;  %v7586_v19 = vshrl.u32 %v7075_v46, 16 }
 0x4b5   : > { %8460 = vmax.xlane.f32.xlu1 %v8459_v49  ;;  %v7125_v54 = vcombine.high %v23363_v21, %v23362_v14  ;;  %v8483_v49 = vsel %vm8443_vm1, %v19780_v39, -inf  ;;  %v23366_v21 = vld [vmem:[#allocation30_spill] sm:$0xff]  ;;  %v7594_v14 = vshrl.u32 %v19585_v9, 16  ;;  %v7602_v9 = vshrl.u32 %v19717_v55, 16 }
 0x4b6   : > { %v19822_v58 = vadd.f32 %v19627_v60, %v23366_v21  ;;  %v7627_v21 = vshrl.u32 %v19665_v28, 16 }
 0x4b7   : > { %v19816_v63 = vpack.i.b16 %v7125_v54, %v7075_v46  ;;  %v7587_v25 = vshrl.u32 %v7125_v54, 16  ;;  %v7642_v54 = vshrl.u32 %v19699_v37, 16  ;;  %v7375_v37 = vcombine.high %v19640_v41, %v19624_v43 }
 0x4b8   : > { %8463 = vmax.xlane.f32.xlu0 %v8462_v22  ;;  %v7595_v22 = vshrl.u32 %v19593_v31, 16  ;;  %v19841_v56 = vpack.i.b16 %v7627_v21, %v7626_v38  ;;  %v7635_v41 = vshrl.u32 %v7425_v27, 16 }
 0x4b9   : > { %23365 = vst [vmem:[#allocation52_spill] sm:$0xff] %v19816_v63  ;;  %8490 = vmax.xlane.f32.xlu1 %v8489_v0  ;;  %v19829_v63 = vpack.i.b16 %v7587_v25, %v7586_v19  ;;  %v7611_v0 = vshrl.u32 %v19620_v15, 16  ;;  %v7603_v15 = vshrl.u32 %v19707_v16, 16  ;;  %v19846_v28 = vpack.i.b16 %v7643_v36, %v7642_v54  ;;  %v23380_v25 = vld [vmem:[#allocation47_spill] sm:$0xff] }
 0x4ba   : > { %v19834_v46 = vpack.i.b16 %v7595_v22, %v7594_v14  ;;  %23370 = vst [vmem:[#allocation46_spill] sm:$0xff] %v19841_v56  ;;  %v7525_v16 = vcombine.high %v19684_v62, %v19687_v35  ;;  %v19862_v36 = vpack.i.b16 %v7425_v27, %v7375_v37  ;;  %v8480_v62 = vsel %vm8443_vm1, %v19806_v6, -inf }
 0x4bb   : > { %23367 = vst [vmem:[#allocation39_spill] sm:$0xff] %v19829_v63  ;;  %v19839_v31 = vpack.i.b16 %v7611_v0, %v7610_v57  ;;  %23371 = vst [vmem:[#allocation26_spill] sm:$0xff] %v19846_v28  ;;  %v19854_v55 = vpack.i.b16 %v7603_v15, %v7602_v9  ;;  %v7475_v57 = vcombine.high %v19681_v23, %v19672_v42  ;;  %v23377_v42 = vld [vmem:[#allocation42_spill] sm:$0xff]  ;;  %v8495_v19 = vsel %vm8443_vm1, %v19822_v58, -inf  ;;  %v23381_v9 = vld [vmem:[#allocation53_spill] sm:$0xff] }
 0x4bc   : > { %8457 = vmax.xlane.f32.xlu0 %v8456_v50  ;;  %23368 = vst [vmem:[#allocation23_spill] sm:$0xff] %v19834_v46  ;;  %v7325_v50 = vcombine.high %v19602_v12, %v19605_v53  ;;  %23374 = vst [vmem:[#allocation30_spill] sm:$0xff] %v19862_v36  ;;  %v7634_v53 = vshrl.u32 %v7375_v37, 16  ;;  %v7651_v30 = vshrl.u32 %v7525_v16, 16  ;;  %v19870_v23 = vadd.f32 %v23377_v42, %v19627_v60  ;;  %v23383_v37 = vld [vmem:[#allocation54_spill] sm:$0xff]  ;;  %v23386_v42 = vld [vmem:[#allocation43_spill] sm:$0xff] }
 0x4bd   : > { %8484 = vmax.xlane.f32.xlu1 %v8483_v49  ;;  %23369 = vst [vmem:[#allocation31_spill] sm:$0xff] %v19839_v31  ;;  %23372 = vst [vmem:[#allocation24_spill] sm:$0xff] %v19854_v55  ;;  %v19864_v43 = vpack.i.b16 %v7525_v16, %v7475_v57  ;;  %v7650_v20 = vshrl.u32 %v7475_v57, 16  ;;  %v19892_v22 = vadd.f32 %v19627_v60, %v19460_v52 }
 0x4be   : > { %v19860_v1 = vpack.i.b16 %v7325_v50, %v7275_v8  ;;  %v7619_v12 = vshrl.u32 %v7325_v50, 16  ;;  %v19874_v35 = vpack.i.b16 %v7635_v41, %v7634_v53  ;;  %v8498_v14 = vsel %vm8443_vm1, %v19870_v23, -inf  ;;  %v23382_v8 = vld [vmem:[#allocation57_spill] sm:$0xff] }
 0x4bf   : > { %23375 = vst [vmem:[#allocation59_spill] sm:$0xff] %v19864_v43  ;;  %v19876_v49 = vpack.i.b16 %v7651_v30, %v7650_v20  ;;  %v19898_v0 = vadd.f32 %v19441_v59, %v19627_v60  ;;  %v19904_v54 = vadd.f32 %v19472_v51, %v19627_v60  ;;  %v8519_v52 = vsel %vm8443_vm1, %v19892_v22, -inf  ;;  %v23385_v20 = vld [vmem:[#allocation58_spill] sm:$0xff] }
 0x4c0   : > { %8487 = vmax.xlane.f32.xlu0 %v8486_v34  ;;  %23373 = vst [vmem:[#allocation27_spill] sm:$0xff] %v19860_v1  ;;  %v19866_v38 = vpack.i.b16 %v7619_v12, %v7618_v3  ;;  %23378 = vst [vmem:[#allocation42_spill] sm:$0xff] %v19874_v35  ;;  %v19880_v34 = vadd.f32 %v19449_v29, %v19627_v60  ;;  %v19910_v15 = vadd.f32 %v19627_v60, %v23381_v9  ;;  %v23384_v12 = vld [vmem:[#allocation55_spill] sm:$0xff] }
 0x4c1   : > { %8502 = vmax.xlane.f32.xlu1 %v8501_v26  ;;  %23379 = vst [vmem:[#allocation61_spill] sm:$0xff] %v19876_v49  ;;  %v19886_v26 = vadd.f32 %v19627_v60, %v23380_v25  ;;  %v8522_v59 = vsel %vm8443_vm1, %v19898_v0, -inf  ;;  %v19916_v50 = vadd.f32 %v19627_v60, %v23382_v8  ;;  %v8513_v51 = vsel %vm8443_vm1, %v19904_v54, -inf }
 0x4c2   : > { %23376 = vst [vmem:[#allocation60_spill] sm:$0xff] %v19866_v38  ;;  %v8525_v29 = vsel %vm8443_vm1, %v19880_v34, -inf  ;;  %v19922_v27 = vadd.f32 %v23383_v37, %v19627_v60  ;;  %v8516_v57 = vsel %vm8443_vm1, %v19910_v15, -inf  ;;  %v19928_v16 = vadd.f32 %v19537_v13, %v19627_v60 }
 0x4c3   : > { %v8492_v21 = vsel %vm8443_vm1, %v19886_v26, -inf  ;;  %v8507_v3 = vsel %vm8443_vm1, %v19916_v50, -inf  ;;  %v19934_v53 = vadd.f32 %v19627_v60, %v23384_v12  ;;  %v19940_v30 = vadd.f32 %v19627_v60, %v23385_v20 }
 0x4c4   : > { %8481 = vmax.xlane.f32.xlu0 %v8480_v62  ;;  %v8510_v41 = vsel %vm8443_vm1, %v19922_v27, -inf  ;;  %v8537_v13 = vsel %vm8443_vm1, %v19928_v16, -inf  ;;  %v19946_v62 = vadd.f32 %v23386_v42, %v19627_v60 }
 0x4c5   : > { %8496 = vmax.xlane.f32.xlu1 %v8495_v19  ;;  %v8504_v19 = vsel %vm8443_vm1, %v19934_v53, -inf  ;;  %v8531_v25 = vsel %vm8443_vm1, %v19940_v30, -inf }
 0x4c8   : > { %8499 = vmax.xlane.f32.xlu0 %v8498_v14  ;;  %v8534_v14 = vsel %vm8443_vm1, %v19946_v62, -inf }
 0x4c9   : > { %8526 = vmax.xlane.f32.xlu1 %v8525_v29  ;;  %v8528_v29 = vsel %vm8443_vm1, %v19752_v61, -inf }
 0x4cc   : > { %8493 = vmax.xlane.f32.xlu0 %v8492_v21  ;;  %v19957_v21 = vld [vmem:[%s16446_s17 + $0x1] ss:$0 sm:$0xff]  ;;  %s23611_s17 = smov %s23610_s14 }
 0x4cd   : > { %8520 = vmax.xlane.f32.xlu1 %v8519_v52 }
 0x4d0   : > { %8523 = vmax.xlane.f32.xlu0 %v8522_v59 }
 0x4d1   : > { %8514 = vmax.xlane.f32.xlu1 %v8513_v51 }
 0x4d4   : > { %8517 = vmax.xlane.f32.xlu0 %v8516_v57 }
 0x4d5   : > { %8508 = vmax.xlane.f32.xlu1 %v8507_v3 }
 0x4d8   : > { %8511 = vmax.xlane.f32.xlu0 %v8510_v41 }
 0x4d9   : > { %8538 = vmax.xlane.f32.xlu1 %v8537_v13 }
 0x4dc   : > { %8505 = vmax.xlane.f32.xlu0 %v8504_v19 }
 0x4dd   : > { %8532 = vmax.xlane.f32.xlu1 %v8531_v25 }
 0x4e0   : > { %8535 = vmax.xlane.f32.xlu0 %v8534_v14 }
 0x4e4   : > { %8529 = vmax.xlane.f32.xlu0 %v8528_v29 }
 0x4f0   : > { %v15071_v60 = vpop.f32.mrb[32].mxu1 }
 0x4f1   : > { %v19960_v52 = vadd.f32 %v15071_v60, %v19957_v21  ;;  %v8069_v9 = vpop.f32.mrb[33].mxu1 }
 0x4f2   : > { %v15072_v59 = vpop.f32.mrb[34].mxu1  ;;  %v15087_v8 = vpop.f32.mrb[48].mxu0  ;;  %v19963_v51 = vadd.f32 %v19957_v21, %v8069_v9 }
 0x4f3   : > { %v19966_v37 = vadd.f32 %v15072_v59, %v19957_v21  ;;  %v8072_v57 = vpop.f32.mrb[35].mxu1  ;;  %v8158_v3 = vpop.f32.mrb[49].mxu0  ;;  %v8546_v12 = vsel %vm8443_vm1, %v19960_v52, -inf  ;;  %v19976_v19 = vadd.f32 %v15087_v8, %v19957_v21 }
 0x4f4   : > { %v15088_v41 = vpop.f32.mrb[50].mxu0  ;;  %8547 = vmax.xlane.f32.xlu0 %v8546_v12  ;;  %v19971_v20 = vadd.f32 %v19957_v21, %v8072_v57  ;;  %v8540_v25 = vsel %vm8443_vm1, %v19963_v51, -inf  ;;  %v19986_v60 = vadd.f32 %v19957_v21, %v8158_v3 }
 0x4f5   : > { %v8161_v13 = vpop.f32.mrb[51].mxu0  ;;  %v8549_v42 = vsel %vm8443_vm1, %v19966_v37, -inf  ;;  %23387 = vst [vmem:[#allocation47_spill] sm:$0xff] %v19976_v19  ;;  %v19981_v14 = vadd.f32 %v15088_v41, %v19957_v21  ;;  %v8570_v9 = vsel %vm8443_vm1, %v19976_v19, -inf }
 0x4f6   : > { %8550 = vmax.xlane.f32.xlu1 %v8549_v42  ;;  %v8543_v29 = vsel %vm8443_vm1, %v19971_v20, -inf  ;;  %23388 = vst [vmem:[#allocation53_spill] sm:$0xff] %v19986_v60  ;;  %v19991_v59 = vadd.f32 %v19957_v21, %v8161_v13  ;;  %v8564_v57 = vsel %vm8443_vm1, %v19986_v60, -inf }
 0x4f7   : > { %v8573_v8 = vsel %vm8443_vm1, %v19981_v14, -inf }
 0x4f8   : > { %8541 = vmax.xlane.f32.xlu0 %v8540_v25  ;;  %23389 = vst [vmem:[#allocation57_spill] sm:$0xff] %v19991_v59  ;;  %v8567_v12 = vsel %vm8443_vm1, %v19991_v59, -inf }
 0x4fa   : > { %8544 = vmax.xlane.f32.xlu1 %v8543_v29 }
 0x4fc   : > { %8571 = vmax.xlane.f32.xlu0 %v8570_v9 }
 0x4fe   : > { %8574 = vmax.xlane.f32.xlu1 %v8573_v8 }
 0x500   : > { %8565 = vmax.xlane.f32.xlu0 %v8564_v57 }
 0x502   : > { %8568 = vmax.xlane.f32.xlu1 %v8567_v12 }
 0x515   : > { %v15075_v3 = vpop.f32.mrb[36].mxu1 }
 0x516   : > { %v20000_v41 = vadd.f32 %v15075_v3, %v19957_v21  ;;  %v8085_v42 = vpop.f32.mrb[37].mxu1 }
 0x517   : > { %v15076_v25 = vpop.f32.mrb[38].mxu1  ;;  %v15091_v13 = vpop.f32.mrb[52].mxu0  ;;  %v20003_v29 = vadd.f32 %v19957_v21, %v8085_v42 }
 0x518   : > { %23390 = vst [vmem:[#allocation54_spill] sm:$0xff] %v20000_v41  ;;  %v20006_v9 = vadd.f32 %v15076_v25, %v19957_v21  ;;  %v8088_v8 = vpop.f32.mrb[39].mxu1  ;;  %v8174_v49 = vpop.f32.mrb[53].mxu0  ;;  %v8558_v57 = vsel %vm8443_vm1, %v20000_v41, -inf  ;;  %v20016_v42 = vadd.f32 %v15091_v13, %v19957_v21 }
 0x519   : > { %23391 = vst [vmem:[#allocation55_spill] sm:$0xff] %v20003_v29  ;;  %v15092_v35 = vpop.f32.mrb[54].mxu0  ;;  %8559 = vmax.xlane.f32.xlu0 %v8558_v57  ;;  %v20011_v12 = vadd.f32 %v19957_v21, %v8088_v8  ;;  %v8552_v25 = vsel %vm8443_vm1, %v20003_v29, -inf  ;;  %v20026_v8 = vadd.f32 %v19957_v21, %v8174_v49 }
 0x51a   : > { %23392 = vst [vmem:[#allocation58_spill] sm:$0xff] %v20006_v9  ;;  %v8177_v3 = vpop.f32.mrb[55].mxu0  ;;  %v8561_v38 = vsel %vm8443_vm1, %v20006_v9, -inf  ;;  %23394 = vst [vmem:[#allocation62_spill] sm:$0xff] %v20016_v42  ;;  %v20021_v43 = vadd.f32 %v15092_v35, %v19957_v21 }
 0x51b   : > { %23393 = vst [vmem:[#allocation43_spill] sm:$0xff] %v20011_v12  ;;  %8562 = vmax.xlane.f32.xlu1 %v8561_v38  ;;  %v8555_v57 = vsel %vm8443_vm1, %v20011_v12, -inf  ;;  %23396 = vst [vmem:[#allocation64_spill] sm:$0xff] %v20026_v8  ;;  %v8582_v38 = vsel %vm8443_vm1, %v20016_v42, -inf  ;;  %v20031_v13 = vadd.f32 %v19957_v21, %v8177_v3  ;;  %v8576_v35 = vsel %vm8443_vm1, %v20026_v8, -inf }
 0x51c   : > { %23395 = vst [vmem:[#allocation63_spill] sm:$0xff] %v20021_v43 }
 0x51d   : > { %8553 = vmax.xlane.f32.xlu0 %v8552_v25  ;;  %23397 = vst [vmem:[#allocation65_spill] sm:$0xff] %v20031_v13  ;;  %v8585_v25 = vsel %vm8443_vm1, %v20021_v43, -inf }
 0x51f   : > { %8556 = vmax.xlane.f32.xlu1 %v8555_v57  ;;  %v8579_v57 = vsel %vm8443_vm1, %v20031_v13, -inf }
 0x521   : > { %8583 = vmax.xlane.f32.xlu0 %v8582_v38 }
 0x523   : > { %8586 = vmax.xlane.f32.xlu1 %v8585_v25 }
 0x525   : > { %8577 = vmax.xlane.f32.xlu0 %v8576_v35 }
 0x527   : > { %8580 = vmax.xlane.f32.xlu1 %v8579_v57 }
 0x52f   : > { %v15103_v1 = vpop.f32.mrb[40].mxu1 }
 0x530   : > { %v20042_v3 = vadd.f32 %v15103_v1, %v19957_v21  ;;  %v8247_v55 = vpop.f32.mrb[41].mxu1 }
 0x531   : > { %v8452_v49 = vpop.xlane.xlu0 %8451  ;;  %v15104_v25 = vpop.f32.mrb[42].mxu1  ;;  %v20047_v56 = vadd.f32 %v19957_v21, %v8247_v55 }
 0x532   : > { %v20039_v36 = vpop.xlane.xlu1 %8448  ;;  %23398 = vst [vmem:[#allocation66_spill] sm:$0xff] %v20042_v3  ;;  %v20050_v35 = vadd.f32 %v15104_v25, %v19957_v21  ;;  %v15119_v31 = vpop.f32.mrb[56].mxu0  ;;  %v8594_v46 = vsel %vm8443_vm1, %v20042_v3, -inf }
 0x533   : > { %23399 = vst [vmem:[#allocation67_spill] sm:$0xff] %v20047_v56  ;;  %v8250_v57 = vpop.f32.mrb[43].mxu1  ;;  %v8336_v63 = vpop.f32.mrb[57].mxu0  ;;  %8595 = vmax.xlane.f32.xlu1 %v8594_v46  ;;  %v20062_v25 = vadd.f32 %v15119_v31, %v19957_v21  ;;  %v8588_v3 = vsel %vm8443_vm1, %v20047_v56, -inf }
 0x534   : > { %23400 = vst [vmem:[#allocation68_spill] sm:$0xff] %v20050_v35  ;;  %v20055_v1 = vadd.f32 %v19957_v21, %v8250_v57  ;;  %v15120_v13 = vpop.f32.mrb[58].mxu0  ;;  %v8597_v8 = vsel %vm8443_vm1, %v20050_v35, -inf  ;;  %v20069_v57 = vadd.f32 %v19957_v21, %v8336_v63 }
 0x535   : > { %v8446_v38 = vpop.xlane.xlu0 %8445  ;;  %v8339_v43 = vpop.f32.mrb[59].mxu0  ;;  %8598 = vmax.xlane.f32.xlu0 %v8597_v8  ;;  %23402 = vst [vmem:[#allocation70_spill] sm:$0xff] %v20062_v25  ;;  %v8618_v8 = vsel %vm8443_vm1, %v20062_v25, -inf  ;;  %v20080_v56 = vadd.f32 %v15120_v13, %v19957_v21 }
 0x536   : > { %v20044_v28 = vpop.xlane.xlu1 %8478  ;;  %23401 = vst [vmem:[#allocation69_spill] sm:$0xff] %v20055_v1  ;;  %23403 = vst [vmem:[#allocation71_spill] sm:$0xff] %v20069_v57  ;;  %v8591_v42 = vsel %vm8443_vm1, %v20055_v1, -inf  ;;  %v20089_v1 = vadd.f32 %v19957_v21, %v8339_v43  ;;  %v8636_v13 = vsub.f32 %v19678_v2, %v8446_v38 }
 0x537   : > { %8589 = vmax.xlane.f32.xlu1 %v8588_v3  ;;  %23404 = vst [vmem:[#allocation72_spill] sm:$0xff] %v20080_v56  ;;  %v8612_v3 = vsel %vm8443_vm1, %v20069_v57, -inf  ;;  %v8647_v2 = vsub.f32 %v19693_v48, %v20044_v28 }
 0x538   : > { %23405 = vst [vmem:[#allocation73_spill] sm:$0xff] %v20089_v1  ;;  %v8615_v43 = vsel %vm8443_vm1, %v20089_v1, -inf }
 0x539   : > { %v8455_v5 = vpop.xlane.xlu0 %8454  ;;  %8592 = vmax.xlane.f32.xlu0 %v8591_v42  ;;  %v8621_v42 = vsel %vm8443_vm1, %v20080_v56, -inf }
 0x53a   : > { %v20059_v55 = vpop.xlane.xlu1 %8472 }
 0x53b   : > { %8619 = vmax.xlane.f32.xlu1 %v8618_v8  ;;  %v8638_v8 = vsub.f32 %v19655_v24, %v8452_v49  ;;  %v8645_v28 = vsub.f32 %v19723_v17, %v20059_v55  ;;  %v8637_v17 = vsub.f32 %v19669_v45, %v20039_v36 }
 0x53d   : > { %v20066_v46 = vpop.xlane.xlu0 %8475  ;;  %8613 = vmax.xlane.f32.xlu0 %v8612_v3  ;;  %v8704_v41 = vmul.f32 1.442695, %v8638_v8  ;;  %v8718_v55 = vmul.f32 1.442695, %v8645_v28 }
 0x53e   : > { %v20073_v35 = vpop.xlane.xlu1 %8466 }
 0x53f   : > { %15679 = vpow2.f32 %v8704_v41 }
 0x541   : > { %v20077_v31 = vpop.xlane.xlu0 %8469  ;;  %8622 = vmax.xlane.f32.xlu0 %v8621_v42  ;;  %v8700_v42 = vmul.f32 1.442695, %v8636_v13 }
 0x542   : > { %v20084_v63 = vpop.xlane.xlu1 %8460 }
 0x543   : > { %15681 = vpow2.f32 %v8700_v42  ;;  %v8641_v36 = vsub.f32 %v19758_v4, %v20084_v63 }
 0x545   : > { %v20086_v12 = vpop.xlane.xlu0 %8463  ;;  %v15107_v29 = vpop.f32.mrb[44].mxu1  ;;  %8616 = vmax.xlane.f32.xlu0 %v8615_v43  ;;  %v8710_v4 = vmul.f32 1.442695, %v8641_v36 }
 0x546   : > { %v20094_v25 = vpop.xlane.xlu1 %8490  ;;  %v20100_v3 = vadd.f32 %v15107_v29, %v19957_v21  ;;  %v8263_v9 = vpop.f32.mrb[45].mxu1  ;;  %v8639_v29 = vsub.f32 %v19713_v32, %v8455_v5  ;;  %v8722_v5 = vmul.f32 1.442695, %v8647_v2 }
 0x547   : > { %v20107_v24 = vadd.f32 %v19957_v21, %v8263_v9  ;;  %v15123_v49 = vpop.f32.mrb[60].mxu0  ;;  %v15108_v38 = vpop.f32.mrb[46].mxu1  ;;  %v8651_v63 = vsub.f32 %v19776_v11, %v20094_v25 }
 0x548   : > { %v8352_v56 = vpop.f32.mrb[61].mxu0  ;;  %v20113_v60 = vadd.f32 %v15108_v38, %v19957_v21  ;;  %v8266_v1 = vpop.f32.mrb[47].mxu1  ;;  %v20120_v43 = vadd.f32 %v15123_v49, %v19957_v21  ;;  %v8606_v48 = vsel %vm8443_vm1, %v20100_v3, -inf  ;;  %v8706_v38 = vmul.f32 1.442695, %v8639_v29 }
 0x549   : > { %v20097_v57 = vpop.xlane.xlu0 %8457  ;;  %23406 = vst [vmem:[#allocation74_spill] sm:$0xff] %v20107_v24  ;;  %v15124_v8 = vpop.f32.mrb[62].mxu0  ;;  %v8600_v19 = vsel %vm8443_vm1, %v20107_v24, -inf  ;;  %8607 = vmax.xlane.f32.xlu0 %v8606_v48  ;;  %v8646_v24 = vsub.f32 %v19737_v10, %v20066_v46  ;;  %v20136_v41 = vadd.f32 %v19957_v21, %v8266_v1  ;;  %15683 = vpow2.f32 %v8722_v5 }
 0x54a   : > { %v20104_v59 = vpop.xlane.xlu1 %8484  ;;  %v8355_v13 = vpop.f32.mrb[63].mxu0  ;;  %8601 = vmax.xlane.f32.xlu1 %v8600_v19  ;;  %v20131_v49 = vadd.f32 %v15124_v8, %v19957_v21  ;;  %v8609_v19 = vsel %vm8443_vm1, %v20113_v60, -inf  ;;  %v8630_v42 = vsel %vm8443_vm1, %v20120_v43, -inf  ;;  %v8643_v10 = vsub.f32 %v19733_v47, %v20073_v35 }
 0x54b   : > { %15685 = vpow2.f32 %v8706_v38  ;;  %v8720_v2 = vmul.f32 1.442695, %v8646_v24  ;;  %v20147_v1 = vadd.f32 %v19957_v21, %v8355_v13  ;;  %v20154_v48 = vadd.f32 %v19957_v21, %v8352_v56  ;;  %v20160_v35 = vpop.eup %15679 }
 0x54c   : > { %v8633_v8 = vsel %vm8443_vm1, %v20131_v49, -inf  ;;  %v8603_v45 = vsel %vm8443_vm1, %v20136_v41, -inf  ;;  %15687 = vpow2.f32 %v8718_v55  ;;  %v8714_v47 = vmul.f32 1.442695, %v8643_v10 }
 0x54d   : > { %v20117_v9 = vpop.xlane.xlu0 %8487  ;;  %8631 = vmax.xlane.f32.xlu0 %v8630_v42  ;;  %v8702_v24 = vmul.f32 1.442695, %v8637_v17  ;;  %15689 = vpow2.f32 %v8720_v2  ;;  %v8644_v13 = vsub.f32 %v19746_v40, %v20077_v31  ;;  %v8627_v56 = vsel %vm8443_vm1, %v20147_v1, -inf  ;;  %v20166_v21 = vpop.eup %15681 }
 0x54e   : > { %v20124_v32 = vpop.xlane.xlu1 %8502  ;;  %8610 = vmax.xlane.f32.xlu1 %v8609_v19  ;;  %v8624_v28 = vsel %vm8443_vm1, %v20154_v48, -inf  ;;  %15691 = vpow2.f32 %v8714_v47  ;;  %v8642_v31 = vsub.f32 %v19762_v33, %v20086_v12  ;;  %v8828_v19 = vsel %vm8443_vm1, %v20166_v21, 0.0 }
 0x54f   : > { %15693 = vpow2.f32 %v8702_v24  ;;  %v8716_v40 = vmul.f32 1.442695, %v8644_v13  ;;  %v8834_v17 = vsel %vm8443_vm1, %v20160_v35, 0.0  ;;  %v8730_v10 = vmul.f32 1.442695, %v8651_v63 }
 0x550   : > { %15695 = vpow2.f32 %v8710_v4  ;;  %v8649_v11 = vsub.f32 %v19780_v39, %v20104_v59  ;;  %v8712_v33 = vmul.f32 1.442695, %v8642_v31  ;;  %v8640_v12 = vsub.f32 %v19772_v44, %v20097_v57 }
 0x551   : > { %v20144_v46 = vpop.xlane.xlu0 %8481  ;;  %8604 = vmax.xlane.f32.xlu0 %v8603_v45  ;;  %15697 = vpow2.f32 %v8716_v40  ;;  %v8655_v59 = vsub.f32 %v19798_v18, %v20124_v32  ;;  %v8650_v57 = vsub.f32 %v19786_v7, %v20117_v9 }
 0x552   : > { %v20149_v29 = vpop.xlane.xlu1 %8496  ;;  %8634 = vmax.xlane.f32.xlu1 %v8633_v8  ;;  %15699 = vpow2.f32 %v8730_v10  ;;  %v8726_v39 = vmul.f32 1.442695, %v8649_v11  ;;  %v8708_v44 = vmul.f32 1.442695, %v8640_v12  ;;  %v8648_v32 = vsub.f32 %v19806_v6, %v20144_v46 }
 0x553   : > { %v20180_v42 = vpop.eup %15683  ;;  %15701 = vpow2.f32 %v8712_v33  ;;  %v8738_v18 = vmul.f32 1.442695, %v8655_v59  ;;  %v8653_v7 = vsub.f32 %v19822_v58, %v20149_v29  ;;  %v8728_v9 = vmul.f32 1.442695, %v8650_v57 }
 0x554   : > { %v8861_v8 = vsel %vm8443_vm1, %v20180_v42, 0.0  ;;  %15703 = vpow2.f32 %v8726_v39  ;;  %v8724_v6 = vmul.f32 1.442695, %v8648_v32 }
 0x555   : > { %v20168_v5 = vpop.xlane.xlu0 %8499  ;;  %8625 = vmax.xlane.f32.xlu0 %v8624_v28  ;;  %v20184_v55 = vpop.eup %15685  ;;  %15705 = vpow2.f32 %v8708_v44  ;;  %v8734_v10 = vmul.f32 1.442695, %v8653_v7 }
 0x556   : > { %8628 = vmax.xlane.f32.xlu1 %v8627_v56  ;;  %v20172_v38 = vpop.xlane.xlu1 %8526  ;;  %v20194_v45 = vpop.eup %15687  ;;  %v8837_v47 = vsel %vm8443_vm1, %v20184_v55, 0.0  ;;  %15707 = vpow2.f32 %v8738_v18  ;;  %v8654_v46 = vsub.f32 %v19870_v23, %v20168_v5 }
 0x557   : > { %v20198_v36 = vpop.eup %15689  ;;  %v8855_v24 = vsel %vm8443_vm1, %v20194_v45, 0.0  ;;  %v8663_v58 = vsub.f32 %v19880_v34, %v20172_v38  ;;  %15709 = vpow2.f32 %v8728_v9 }
 0x558   : > { %v20206_v13 = vpop.eup %15691  ;;  %v8858_v28 = vsel %vm8443_vm1, %v20198_v36, 0.0  ;;  %15711 = vpow2.f32 %v8734_v10  ;;  %v8736_v39 = vmul.f32 1.442695, %v8654_v46 }
 0x559   : > { %8835 = vadd.xlane.f32.xlu0 %v8834_v17  ;;  %v20188_v25 = vpop.xlane.xlu0 %8493  ;;  %v20212_v4 = vpop.eup %15693  ;;  %v8849_v40 = vsel %vm8443_vm1, %v20206_v13, 0.0  ;;  %v8754_v34 = vmul.f32 1.442695, %v8663_v58  ;;  %15713 = vpow2.f32 %v8724_v6 }
 0x55a   : > { %8829 = vadd.xlane.f32.xlu1 %v8828_v19  ;;  %v8521_v2 = vpop.xlane.xlu1 %8520  ;;  %v20220_v31 = vpop.eup %15695  ;;  %v8831_v19 = vsel %vm8443_vm1, %v20212_v4, 0.0  ;;  %v8652_v23 = vsub.f32 %v19886_v26, %v20188_v25 }
 0x55b   : > { %v20224_v17 = vpop.eup %15697  ;;  %v8843_v33 = vsel %vm8443_vm1, %v20220_v31, 0.0  ;;  %v8661_v38 = vsub.f32 %v19892_v22, %v8521_v2  ;;  %15715 = vpow2.f32 %v8754_v34 }
 0x55c   : > { %v20232_v12 = vpop.eup %15699  ;;  %15717 = vpow2.f32 %v8736_v39  ;;  %v8732_v26 = vmul.f32 1.442695, %v8652_v23 }
 0x55d   : > { %8838 = vadd.xlane.f32.xlu0 %v8837_v47  ;;  %v20208_v56 = vpop.xlane.xlu0 %8523  ;;  %v20236_v47 = vpop.eup %15701  ;;  %v8873_v5 = vsel %vm8443_vm1, %v20232_v12, 0.0  ;;  %v8750_v22 = vmul.f32 1.442695, %v8661_v38 }
 0x55e   : > { %8862 = vadd.xlane.f32.xlu1 %v8861_v8  ;;  %v8515_v63 = vpop.xlane.xlu1 %8514  ;;  %v8852_v8 = vsel %vm8443_vm1, %v20224_v17, 0.0  ;;  %v20243_v59 = vpop.eup %15703  ;;  %v8846_v57 = vsel %vm8443_vm1, %v20236_v47, 0.0  ;;  %v8662_v25 = vsub.f32 %v19898_v0, %v20208_v56 }
 0x55f   : > { %v8659_v2 = vsub.f32 %v19904_v54, %v8515_v63  ;;  %v8867_v18 = vsel %vm8443_vm1, %v20243_v59, 0.0  ;;  %15719 = vpow2.f32 %v8750_v22 }
 0x560   : > { %15721 = vpow2.f32 %v8732_v26 }
 0x561   : > { %8859 = vadd.xlane.f32.xlu0 %v8858_v28  ;;  %v8518_v29 = vpop.xlane.xlu0 %8517 }
 0x562   : > { %8856 = vadd.xlane.f32.xlu1 %v8855_v24  ;;  %v8509_v11 = vpop.xlane.xlu1 %8508  ;;  %v20247_v24 = vpop.eup %15705  ;;  %v8660_v0 = vsub.f32 %v19910_v15, %v8518_v29 }
 0x563   : > { %v20256_v7 = vpop.eup %15707  ;;  %v8840_v9 = vsel %vm8443_vm1, %v20247_v24, 0.0  ;;  %v8657_v54 = vsub.f32 %v19916_v50, %v8509_v11 }
 0x564   : > { %v20260_v32 = vpop.eup %15709  ;;  %v8885_v10 = vsel %vm8443_vm1, %v20256_v7, 0.0 }
 0x565   : > { %8832 = vadd.xlane.f32.xlu0 %v8831_v19  ;;  %v8512_v44 = vpop.xlane.xlu0 %8511  ;;  %v8752_v19 = vmul.f32 1.442695, %v8662_v25  ;;  %v20266_v58 = vpop.eup %15711  ;;  %v8870_v6 = vsel %vm8443_vm1, %v20260_v32, 0.0  ;;  %v8742_v50 = vmul.f32 1.442695, %v8657_v54 }
 0x566   : > { %8850 = vadd.xlane.f32.xlu1 %v8849_v40  ;;  %v20249_v28 = vpop.xlane.xlu1 %8538  ;;  %v8746_v40 = vmul.f32 1.442695, %v8659_v2  ;;  %v20270_v46 = vpop.eup %15713  ;;  %v8658_v15 = vsub.f32 %v19922_v27, %v8512_v44  ;;  %v8879_v29 = vsel %vm8443_vm1, %v20266_v58, 0.0 }
 0x567   : > { %v8864_v38 = vsel %vm8443_vm1, %v20270_v46, 0.0 }
 0x568   : > { %15723 = vpow2.f32 %v8746_v40 }
 0x569   : > { %8853 = vadd.xlane.f32.xlu0 %v8852_v8  ;;  %v8506_v63 = vpop.xlane.xlu0 %8505  ;;  %15725 = vpow2.f32 %v8752_v19  ;;  %v20276_v8 = vpop.eup %15715 }
 0x56a   : > { %8844 = vadd.xlane.f32.xlu1 %v8843_v33  ;;  %v8533_v56 = vpop.xlane.xlu1 %8532  ;;  %v8748_v33 = vmul.f32 1.442695, %v8660_v0  ;;  %v20280_v39 = vpop.eup %15717  ;;  %15727 = vpow2.f32 %v8742_v50  ;;  %v8909_v27 = vsel %vm8443_vm1, %v20276_v8, 0.0 }
 0x56b   : > { %v8665_v11 = vsub.f32 %v19940_v30, %v8533_v56  ;;  %v8744_v30 = vmul.f32 1.442695, %v8658_v15  ;;  %v20285_v44 = vpop.eup %15719 }
 0x56c   : > { %15729 = vpow2.f32 %v8748_v33  ;;  %v20289_v22 = vpop.eup %15721 }
 0x56d   : > { %8847 = vadd.xlane.f32.xlu0 %v8846_v57  ;;  %v8536_v34 = vpop.xlane.xlu0 %8535  ;;  %v8758_v23 = vmul.f32 1.442695, %v8665_v11  ;;  %v8882_v57 = vsel %vm8443_vm1, %v20280_v39, 0.0  ;;  %v8667_v11 = vsub.f32 %v19928_v16, %v20249_v28 }
 0x56e   : > { %8874 = vadd.xlane.f32.xlu1 %v8873_v5  ;;  %v8656_v5 = vsub.f32 %v19934_v53, %v8506_v63  ;;  %v8666_v25 = vsub.f32 %v19946_v62, %v8536_v34  ;;  %v8903_v53 = vsel %vm8443_vm1, %v20285_v44, 0.0 }
 0x56f   : > { %15731 = vpow2.f32 %v8758_v23  ;;  %v8762_v28 = vmul.f32 1.442695, %v8667_v11 }
 0x570   : > { %15733 = vpow2.f32 %v8744_v30  ;;  %v8740_v26 = vmul.f32 1.442695, %v8656_v5  ;;  %v8760_v63 = vmul.f32 1.442695, %v8666_v25 }
 0x571   : > { %8841 = vadd.xlane.f32.xlu0 %v8840_v9  ;;  %v8530_v2 = vpop.xlane.xlu0 %8529  ;;  %v8876_v9 = vsel %vm8443_vm1, %v20289_v22, 0.0 }
 0x572   : > { %8868 = vadd.xlane.f32.xlu1 %v8867_v18  ;;  %v20294_v18 = vpop.eup %15723  ;;  %15735 = vpow2.f32 %v8740_v26  ;;  %v8664_v19 = vsub.f32 %v19752_v61, %v8530_v2 }
 0x573   : > { %v20298_v40 = vpop.eup %15725  ;;  %v8897_v62 = vsel %vm8443_vm1, %v20294_v18, 0.0  ;;  %15737 = vpow2.f32 %v8760_v63 }
 0x574   : > { %v20303_v0 = vpop.eup %15727  ;;  %v8906_v56 = vsel %vm8443_vm1, %v20298_v40, 0.0  ;;  %v8756_v61 = vmul.f32 1.442695, %v8664_v19 }
 0x575   : > { %8871 = vadd.xlane.f32.xlu0 %v8870_v6  ;;  %v8891_v15 = vsel %vm8443_vm1, %v20303_v0, 0.0 }
 0x576   : > { %8886 = vadd.xlane.f32.xlu1 %v8885_v10  ;;  %v20307_v6 = vpop.eup %15729 }
 0x579   : > { %8865 = vadd.xlane.f32.xlu0 %v8864_v38  ;;  %v20314_v34 = vpop.eup %15731  ;;  %v8900_v38 = vsel %vm8443_vm1, %v20307_v6, 0.0 }
 0x57a   : > { %8880 = vadd.xlane.f32.xlu1 %v8879_v29  ;;  %v8915_v5 = vsel %vm8443_vm1, %v20314_v34, 0.0 }
 0x57d   : > { %8883 = vadd.xlane.f32.xlu0 %v8882_v57 }
 0x57e   : > { %8910 = vadd.xlane.f32.xlu1 %v8909_v27 }
 0x581   : > { %8877 = vadd.xlane.f32.xlu0 %v8876_v9  ;;  %v8548_v54 = vpop.xlane.xlu0 %8547 }
 0x582   : > { %8904 = vadd.xlane.f32.xlu1 %v8903_v53  ;;  %v8670_v23 = vsub.f32 %v19960_v52, %v8548_v54 }
 0x583   : > { %v8551_v10 = vpop.xlane.xlu1 %8550 }
 0x584   : > { %v8671_v50 = vsub.f32 %v19966_v37, %v8551_v10  ;;  %v20319_v37 = vpop.eup %15733  ;;  %v8768_v2 = vmul.f32 1.442695, %v8670_v23 }
 0x585   : > { %8907 = vadd.xlane.f32.xlu0 %v8906_v56  ;;  %v8542_v33 = vpop.xlane.xlu0 %8541  ;;  %v8894_v57 = vsel %vm8443_vm1, %v20319_v37, 0.0  ;;  %v20326_v25 = vpop.eup %15735 }
 0x586   : > { %8898 = vadd.xlane.f32.xlu1 %v8897_v62  ;;  %v8770_v29 = vmul.f32 1.442695, %v8671_v50  ;;  %v8668_v53 = vsub.f32 %v19963_v51, %v8542_v33  ;;  %v8888_v54 = vsel %vm8443_vm1, %v20326_v25, 0.0  ;;  %v20332_v63 = vpop.eup %15737  ;;  %v23407_v62 = vld [vmem:[#allocation47_spill] sm:$0xff] }
 0x587   : > { %v8545_v30 = vpop.xlane.xlu1 %8544  ;;  %v8918_v51 = vsel %vm8443_vm1, %v20332_v63, 0.0 }
 0x588   : > { %15739 = vpow2.f32 %v8770_v29  ;;  %v8669_v16 = vsub.f32 %v19971_v20, %v8545_v30  ;;  %v8764_v19 = vmul.f32 1.442695, %v8668_v53 }
 0x589   : > { %8901 = vadd.xlane.f32.xlu0 %v8900_v38  ;;  %15741 = vpow2.f32 %v8756_v61  ;;  %v8572_v26 = vpop.xlane.xlu0 %8571  ;;  %v23408_v61 = vld [vmem:[#allocation53_spill] sm:$0xff] }
 0x58a   : > { %8892 = vadd.xlane.f32.xlu1 %v8891_v15  ;;  %v8766_v27 = vmul.f32 1.442695, %v8669_v16  ;;  %v8678_v56 = vsub.f32 %v23407_v62, %v8572_v26 }
 0x58b   : > { %v8575_v52 = vpop.xlane.xlu1 %8574 }
 0x58c   : > { %15743 = vpow2.f32 %v8766_v27  ;;  %v8679_v20 = vsub.f32 %v19981_v14, %v8575_v52  ;;  %v8784_v33 = vmul.f32 1.442695, %v8678_v56  ;;  %v23411_v56 = vld [vmem:[#allocation54_spill] sm:$0xff] }
 0x58d   : > { %8895 = vadd.xlane.f32.xlu0 %v8894_v57  ;;  %15745 = vpow2.f32 %v8762_v28  ;;  %v8566_v10 = vpop.xlane.xlu0 %8565  ;;  %v23409_v57 = vld [vmem:[#allocation57_spill] sm:$0xff] }
 0x58e   : > { %8916 = vadd.xlane.f32.xlu1 %v8915_v5  ;;  %v8786_v9 = vmul.f32 1.442695, %v8679_v20  ;;  %15747 = vpow2.f32 %v8768_v2  ;;  %v8676_v15 = vsub.f32 %v23408_v61, %v8566_v10 }
 0x58f   : > { %v8569_v23 = vpop.xlane.xlu1 %8568 }
 0x590   : > { %15749 = vpow2.f32 %v8786_v9  ;;  %v8780_v28 = vmul.f32 1.442695, %v8676_v15  ;;  %v8677_v2 = vsub.f32 %v23409_v57, %v8569_v23  ;;  %v23412_v15 = vld [vmem:[#allocation58_spill] sm:$0xff] }
 0x591   : > { %8889 = vadd.xlane.f32.xlu0 %v8888_v54  ;;  %15751 = vpow2.f32 %v8764_v19 }
 0x592   : > { %v20335_v50 = vpop.eup %15739  ;;  %15753 = vpow2.f32 %v8784_v33  ;;  %v8782_v9 = vmul.f32 1.442695, %v8677_v2 }
 0x593   : > { %v8933_v14 = vsel %vm8443_vm1, %v20335_v50, 0.0  ;;  %v20341_v11 = vpop.eup %15741  ;;  %15755 = vpow2.f32 %v8780_v28  ;;  %v23413_v28 = vld [vmem:[#allocation55_spill] sm:$0xff] }
 0x594   : > { %8934 = vadd.xlane.f32.xlu1 %v8933_v14  ;;  %v8912_v38 = vsel %vm8443_vm1, %v20341_v11, 0.0  ;;  %15757 = vpow2.f32 %v8782_v9 }
 0x595   : > { %8919 = vadd.xlane.f32.xlu0 %v8918_v51 }
 0x596   : > { %v20344_v29 = vpop.eup %15743 }
 0x597   : > { %v8927_v30 = vsel %vm8443_vm1, %v20344_v29, 0.0  ;;  %v20350_v16 = vpop.eup %15745 }
 0x598   : > { %8928 = vadd.xlane.f32.xlu1 %v8927_v30  ;;  %v20352_v5 = vpop.eup %15747  ;;  %v8921_v26 = vsel %vm8443_vm1, %v20350_v16, 0.0 }
 0x599   : > { %8913 = vadd.xlane.f32.xlu0 %v8912_v38  ;;  %v8930_v53 = vsel %vm8443_vm1, %v20352_v5, 0.0 }
 0x59a   : > { %v20354_v27 = vpop.eup %15749 }
 0x59b   : > { %v8957_v52 = vsel %vm8443_vm1, %v20354_v27, 0.0  ;;  %v20363_v20 = vpop.eup %15751 }
 0x59c   : > { %8958 = vadd.xlane.f32.xlu1 %v8957_v52  ;;  %v8924_v54 = vsel %vm8443_vm1, %v20363_v20, 0.0  ;;  %v20367_v19 = vpop.eup %15753 }
 0x59d   : > { %8922 = vadd.xlane.f32.xlu0 %v8921_v26  ;;  %23410 = vst [vmem:[#allocation47_spill] sm:$0xff] %v20367_v19  ;;  %v8954_v51 = vsel %vm8443_vm1, %v20367_v19, 0.0  ;;  %v20372_v14 = vpop.eup %15755 }
 0x59e   : > { %v8948_v2 = vsel %vm8443_vm1, %v20372_v14, 0.0 }
 0x5a1   : > { %8931 = vadd.xlane.f32.xlu0 %v8930_v53  ;;  %v23414_v53 = vld [vmem:[#allocation43_spill] sm:$0xff] }
 0x5a5   : > { %8925 = vadd.xlane.f32.xlu0 %v8924_v54  ;;  %v20379_v54 = vpop.eup %15757 }
 0x5a6   : > { %v8560_v62 = vpop.xlane.xlu0 %8559  ;;  %23415 = vst [vmem:[#allocation53_spill] sm:$0xff] %v20379_v54 }
 0x5a7   : > { %v8674_v10 = vsub.f32 %v23411_v56, %v8560_v62 }
 0x5a8   : > { %v8563_v33 = vpop.xlane.xlu1 %8562 }
 0x5a9   : > { %v8776_v61 = vmul.f32 1.442695, %v8674_v10  ;;  %v8675_v38 = vsub.f32 %v23412_v15, %v8563_v33  ;;  %8955 = vadd.xlane.f32.xlu0 %v8954_v51  ;;  %v23416_v10 = vld [vmem:[#allocation62_spill] sm:$0xff]  ;;  %v23417_v15 = vld [vmem:[#allocation63_spill] sm:$0xff] }
 0x5aa   : > { %v8554_v23 = vpop.xlane.xlu0 %8553 }
 0x5ab   : > { %15759 = vpow2.f32 %v8776_v61  ;;  %v8778_v30 = vmul.f32 1.442695, %v8675_v38  ;;  %v8672_v57 = vsub.f32 %v23413_v28, %v8554_v23  ;;  %v8951_v23 = vsel %vm8443_vm1, %v20379_v54, 0.0 }
 0x5ac   : > { %v8557_v26 = vpop.xlane.xlu1 %8556 }
 0x5ad   : > { %15761 = vpow2.f32 %v8778_v30  ;;  %v8772_v52 = vmul.f32 1.442695, %v8672_v57  ;;  %v8673_v9 = vsub.f32 %v23414_v53, %v8557_v26  ;;  %8949 = vadd.xlane.f32.xlu0 %v8948_v2  ;;  %v23418_v57 = vld [vmem:[#allocation64_spill] sm:$0xff] }
 0x5ae   : > { %v8584_v62 = vpop.xlane.xlu0 %8583 }
 0x5af   : > { %15763 = vpow2.f32 %v8772_v52  ;;  %v8774_v56 = vmul.f32 1.442695, %v8673_v9  ;;  %v8682_v51 = vsub.f32 %v23416_v10, %v8584_v62  ;;  %v23420_v9 = vld [vmem:[#allocation65_spill] sm:$0xff] }
 0x5b0   : > { %v8587_v33 = vpop.xlane.xlu1 %8586 }
 0x5b1   : > { %15765 = vpow2.f32 %v8774_v56  ;;  %v8792_v61 = vmul.f32 1.442695, %v8682_v51  ;;  %v8683_v38 = vsub.f32 %v23417_v15, %v8587_v33  ;;  %8952 = vadd.xlane.f32.xlu0 %v8951_v23 }
 0x5b2   : > { %v8578_v30 = vpop.xlane.xlu0 %8577 }
 0x5b3   : > { %15767 = vpow2.f32 %v8792_v61  ;;  %v8794_v28 = vmul.f32 1.442695, %v8683_v38  ;;  %v8680_v26 = vsub.f32 %v23418_v57, %v8578_v30 }
 0x5b4   : > { %v8581_v53 = vpop.xlane.xlu1 %8580 }
 0x5b5   : > { %v20386_v2 = vpop.eup %15759  ;;  %15769 = vpow2.f32 %v8794_v28  ;;  %v8788_v52 = vmul.f32 1.442695, %v8680_v26  ;;  %v8681_v62 = vsub.f32 %v23420_v9, %v8581_v53  ;;  %v23427_v9 = vld [vmem:[#allocation66_spill] sm:$0xff] }
 0x5b6   : > { %23419 = vst [vmem:[#allocation57_spill] sm:$0xff] %v20386_v2  ;;  %v8942_v56 = vsel %vm8443_vm1, %v20386_v2, 0.0 }
 0x5b7   : > { %v20391_v10 = vpop.eup %15761  ;;  %15771 = vpow2.f32 %v8788_v52  ;;  %v8790_v51 = vmul.f32 1.442695, %v8681_v62  ;;  %8943 = vadd.xlane.f32.xlu0 %v8942_v56 }
 0x5b8   : > { %23421 = vst [vmem:[#allocation54_spill] sm:$0xff] %v20391_v10  ;;  %v8945_v33 = vsel %vm8443_vm1, %v20391_v10, 0.0 }
 0x5b9   : > { %v20395_v61 = vpop.eup %15763  ;;  %15773 = vpow2.f32 %v8790_v51  ;;  %8946 = vadd.xlane.f32.xlu1 %v8945_v33 }
 0x5ba   : > { %23422 = vst [vmem:[#allocation58_spill] sm:$0xff] %v20395_v61  ;;  %v8936_v15 = vsel %vm8443_vm1, %v20395_v61, 0.0 }
 0x5bb   : > { %v20399_v38 = vpop.eup %15765  ;;  %8937 = vadd.xlane.f32.xlu0 %v8936_v15  ;;  %v23429_v15 = vld [vmem:[#allocation68_spill] sm:$0xff] }
 0x5bc   : > { %23423 = vst [vmem:[#allocation55_spill] sm:$0xff] %v20399_v38  ;;  %v8939_v23 = vsel %vm8443_vm1, %v20399_v38, 0.0 }
 0x5bd   : > { %v20403_v30 = vpop.eup %15767  ;;  %8940 = vadd.xlane.f32.xlu1 %v8939_v23 }
 0x5be   : > { %23424 = vst [vmem:[#allocation43_spill] sm:$0xff] %v20403_v30  ;;  %v8966_v28 = vsel %vm8443_vm1, %v20403_v30, 0.0 }
 0x5bf   : > { %v20407_v57 = vpop.eup %15769  ;;  %8967 = vadd.xlane.f32.xlu0 %v8966_v28 }
 0x5c0   : > { %23425 = vst [vmem:[#allocation62_spill] sm:$0xff] %v20407_v57  ;;  %v8969_v26 = vsel %vm8443_vm1, %v20407_v57, 0.0  ;;  %v8596_v52 = vpop.xlane.xlu1 %8595 }
 0x5c1   : > { %v20411_v53 = vpop.eup %15771  ;;  %8970 = vadd.xlane.f32.xlu1 %v8969_v26  ;;  %v8686_v62 = vsub.f32 %v23427_v9, %v8596_v52  ;;  %v23430_v26 = vld [vmem:[#allocation67_spill] sm:$0xff]  ;;  %v23431_v9 = vld [vmem:[#allocation69_spill] sm:$0xff] }
 0x5c2   : > { %23426 = vst [vmem:[#allocation63_spill] sm:$0xff] %v20411_v53  ;;  %v8960_v56 = vsel %vm8443_vm1, %v20411_v53, 0.0  ;;  %v8599_v33 = vpop.xlane.xlu0 %8598 }
 0x5c3   : > { %v20416_v51 = vpop.eup %15773  ;;  %8961 = vadd.xlane.f32.xlu0 %v8960_v56  ;;  %v8687_v23 = vsub.f32 %v23429_v15, %v8599_v33  ;;  %v8800_v30 = vmul.f32 1.442695, %v8686_v62  ;;  %v23432_v56 = vld [vmem:[#allocation70_spill] sm:$0xff]  ;;  %v23433_v15 = vld [vmem:[#allocation71_spill] sm:$0xff] }
 0x5c4   : > { %23428 = vst [vmem:[#allocation64_spill] sm:$0xff] %v20416_v51  ;;  %v8963_v28 = vsel %vm8443_vm1, %v20416_v51, 0.0  ;;  %v8590_v57 = vpop.xlane.xlu1 %8589 }
 0x5c5   : > { %8964 = vadd.xlane.f32.xlu1 %v8963_v28  ;;  %v8802_v10 = vmul.f32 1.442695, %v8687_v23  ;;  %15775 = vpow2.f32 %v8800_v30  ;;  %v8684_v38 = vsub.f32 %v23430_v26, %v8590_v57 }
 0x5c6   : > { %v8593_v52 = vpop.xlane.xlu0 %8592 }
 0x5c7   : > { %15777 = vpow2.f32 %v8802_v10  ;;  %v8685_v53 = vsub.f32 %v23431_v9, %v8593_v52  ;;  %v8796_v2 = vmul.f32 1.442695, %v8684_v38  ;;  %v23434_v38 = vld [vmem:[#allocation72_spill] sm:$0xff] }
 0x5c8   : > { %v8620_v61 = vpop.xlane.xlu1 %8619 }
 0x5c9   : > { %v8798_v19 = vmul.f32 1.442695, %v8685_v53  ;;  %15779 = vpow2.f32 %v8796_v2  ;;  %v8694_v33 = vsub.f32 %v23432_v56, %v8620_v61 }
 0x5ca   : > { %v8614_v62 = vpop.xlane.xlu0 %8613 }
 0x5cb   : > { %15781 = vpow2.f32 %v8798_v19  ;;  %v8692_v51 = vsub.f32 %v23433_v15, %v8614_v62  ;;  %v8816_v28 = vmul.f32 1.442695, %v8694_v33  ;;  %v23436_v62 = vld [vmem:[#allocation74_spill] sm:$0xff] }
 0x5cd   : > { %v8812_v54 = vmul.f32 1.442695, %v8692_v51  ;;  %v23435_v51 = vld [vmem:[#allocation73_spill] sm:$0xff] }
 0x5ce   : > { %v8623_v23 = vpop.xlane.xlu0 %8622 }
 0x5cf   : > { %v20425_v30 = vpop.eup %15775  ;;  %15783 = vpow2.f32 %v8812_v54  ;;  %v8695_v2 = vsub.f32 %v23434_v38, %v8623_v23 }
 0x5d0   : > { %v8978_v10 = vsel %vm8443_vm1, %v20425_v30, 0.0  ;;  %15785 = vpow2.f32 %v8816_v28 }
 0x5d1   : > { %v20429_v57 = vpop.eup %15777  ;;  %8979 = vadd.xlane.f32.xlu0 %v8978_v10  ;;  %v8818_v9 = vmul.f32 1.442695, %v8695_v2 }
 0x5d2   : > { %v8617_v61 = vpop.xlane.xlu0 %8616  ;;  %v8981_v19 = vsel %vm8443_vm1, %v20429_v57, 0.0 }
 0x5d3   : > { %v20434_v53 = vpop.eup %15779  ;;  %v8693_v26 = vsub.f32 %v23435_v51, %v8617_v61  ;;  %8982 = vadd.xlane.f32.xlu1 %v8981_v19 }
 0x5d4   : > { %v8972_v54 = vsel %vm8443_vm1, %v20434_v53, 0.0 }
 0x5d5   : > { %v20439_v52 = vpop.eup %15781  ;;  %v8814_v33 = vmul.f32 1.442695, %v8693_v26  ;;  %8973 = vadd.xlane.f32.xlu0 %v8972_v54 }
 0x5d6   : > { %v8608_v28 = vpop.xlane.xlu0 %8607  ;;  %v8975_v23 = vsel %vm8443_vm1, %v20439_v52, 0.0 }
 0x5d7   : > { %v8602_v56 = vpop.xlane.xlu1 %8601  ;;  %15787 = vpow2.f32 %v8814_v33  ;;  %v8690_v10 = vsub.f32 %v20100_v3, %v8608_v28  ;;  %8976 = vadd.xlane.f32.xlu1 %v8975_v23 }
 0x5d8   : > { %v8688_v15 = vsub.f32 %v23436_v62, %v8602_v56  ;;  %15789 = vpow2.f32 %v8818_v9 }
 0x5d9   : > { %v20445_v38 = vpop.eup %15783  ;;  %v8808_v51 = vmul.f32 1.442695, %v8690_v10 }
 0x5da   : > { %23437 = vst [vmem:[#allocation65_spill] sm:$0xff] %v20445_v38  ;;  %v8804_v61 = vmul.f32 1.442695, %v8688_v15  ;;  %v8632_v26 = vpop.xlane.xlu0 %8631  ;;  %v8996_v54 = vsel %vm8443_vm1, %v20445_v38, 0.0  ;;  %v20450_v56 = vpop.eup %15785 }
 0x5db   : > { %v8611_v19 = vpop.xlane.xlu1 %8610  ;;  %23438 = vst [vmem:[#allocation66_spill] sm:$0xff] %v20450_v56  ;;  %15791 = vpow2.f32 %v8808_v51  ;;  %8997 = vadd.xlane.f32.xlu0 %v8996_v54  ;;  %v9002_v9 = vsel %vm8443_vm1, %v20450_v56, 0.0 }
 0x5dc   : > { %v8691_v2 = vsub.f32 %v20113_v60, %v8611_v19  ;;  %15793 = vpow2.f32 %v8804_v61  ;;  %v8698_v19 = vsub.f32 %v20120_v43, %v8632_v26 }
 0x5de   : > { %v8810_v33 = vmul.f32 1.442695, %v8691_v2  ;;  %v8605_v62 = vpop.xlane.xlu0 %8604 }
 0x5df   : > { %v8635_v3 = vpop.xlane.xlu1 %8634  ;;  %v8689_v15 = vsub.f32 %v20136_v41, %v8605_v62  ;;  %9003 = vadd.xlane.f32.xlu0 %v9002_v9 }
 0x5e0   : > { %15795 = vpow2.f32 %v8810_v33  ;;  %v8699_v28 = vsub.f32 %v20131_v49, %v8635_v3 }
 0x5e1   : > { %v20455_v60 = vpop.eup %15787  ;;  %v8806_v10 = vmul.f32 1.442695, %v8689_v15  ;;  %v8824_v15 = vmul.f32 1.442695, %v8698_v19 }
 0x5e2   : > { %23439 = vst [vmem:[#allocation68_spill] sm:$0xff] %v20455_v60  ;;  %v8626_v61 = vpop.xlane.xlu0 %8625  ;;  %v8999_v2 = vsel %vm8443_vm1, %v20455_v60, 0.0  ;;  %v20462_v54 = vpop.eup %15789  ;;  %v8826_v49 = vmul.f32 1.442695, %v8699_v28 }
 0x5e3   : > { %v8629_v23 = vpop.xlane.xlu1 %8628  ;;  %23440 = vst [vmem:[#allocation67_spill] sm:$0xff] %v20462_v54  ;;  %15797 = vpow2.f32 %v8806_v10  ;;  %v8696_v41 = vsub.f32 %v20154_v48, %v8626_v61  ;;  %9000 = vadd.xlane.f32.xlu1 %v8999_v2 }
 0x5e4   : > { %v8697_v51 = vsub.f32 %v20147_v1, %v8629_v23  ;;  %v9005_v1 = vsel %vm8443_vm1, %v20462_v54, 0.0 }
 0x5e5   : > { %v20465_v62 = vpop.eup %15791  ;;  %v8820_v9 = vmul.f32 1.442695, %v8696_v41 }
 0x5e6   : > { %v8822_v33 = vmul.f32 1.442695, %v8697_v51  ;;  %23441 = vst [vmem:[#allocation69_spill] sm:$0xff] %v20465_v62  ;;  %v8836_v43 = vpop.xlane.xlu0 %8835  ;;  %v8990_v26 = vsel %vm8443_vm1, %v20465_v62, 0.0  ;;  %v20471_v23 = vpop.eup %15793 }
 0x5e7   : > { %v8830_v3 = vpop.xlane.xlu1 %8829  ;;  %23442 = vst [vmem:[#allocation70_spill] sm:$0xff] %v20471_v23  ;;  %9006 = vadd.xlane.f32.xlu1 %v9005_v1  ;;  %8991 = vadd.xlane.f32.xlu0 %v8990_v26  ;;  %v8984_v51 = vsel %vm8443_vm1, %v20471_v23, 0.0 }
 0x5e8   : > { %15799 = vpow2.f32 %v8822_v33 }
 0x5e9   : > { %15801 = vpow2.f32 %v8820_v9 }
 0x5ea   : > { %v20473_v48 = vpop.eup %15795  ;;  %15803 = vpow2.f32 %v8826_v49  ;;  %v8839_v10 = vpop.xlane.xlu0 %8838 }
 0x5eb   : > { %23443 = vst [vmem:[#allocation71_spill] sm:$0xff] %v20473_v48  ;;  %v8863_v28 = vpop.xlane.xlu1 %8862  ;;  %15805 = vpow2.f32 %v8824_v15  ;;  %v8993_v19 = vsel %vm8443_vm1, %v20473_v48, 0.0  ;;  %8985 = vadd.xlane.f32.xlu0 %v8984_v51 }
 0x5ec   : > { %8994 = vadd.xlane.f32.xlu1 %v8993_v19  ;;  %15807 = vrcp.f32 %v8839_v10 }
 0x5ed   : > { %v20479_v61 = vpop.eup %15797  ;;  %15809 = vrcp.f32 %v8830_v3 }
 0x5ee   : > { %23444 = vst [vmem:[#allocation72_spill] sm:$0xff] %v20479_v61  ;;  %v8860_v41 = vpop.xlane.xlu0 %8859  ;;  %v8987_v33 = vsel %vm8443_vm1, %v20479_v61, 0.0  ;;  %15811 = vrcp.f32 %v8836_v43 }
 0x5ef   : > { %v8857_v2 = vpop.xlane.xlu1 %8856 }
 0x5f0   : > { %8988 = vadd.xlane.f32.xlu1 %v8987_v33 }
 0x5f2   : > { %v20483_v49 = vpop.eup %15799  ;;  %v8833_v1 = vpop.xlane.xlu0 %8832 }
 0x5f3   : > { %23445 = vst [vmem:[#allocation73_spill] sm:$0xff] %v20483_v49  ;;  %v8851_v9 = vpop.xlane.xlu1 %8850  ;;  %v20485_v15 = vpop.eup %15801  ;;  %v9011_v26 = vsel %vm8443_vm1, %v20483_v49, 0.0  ;;  %15813 = vrcp.f32 %v8833_v1 }
 0x5f4   : > { %23446 = vst [vmem:[#allocation74_spill] sm:$0xff] %v20485_v15  ;;  %v20489_v19 = vpop.eup %15803  ;;  %9012 = vadd.xlane.f32.xlu1 %v9011_v26  ;;  %v9008_v51 = vsel %vm8443_vm1, %v20485_v15, 0.0  ;;  %15815 = vrcp.f32 %v8857_v2  ;;  %v23449_v2 = vld [vmem:[#allocation36_spill] sm:$0xff] }
 0x5f5   : > { %23447 = vst [vmem:[#allocation75_spill] sm:$0xff] %v20489_v19  ;;  %v20493_v33 = vpop.eup %15805  ;;  %9009 = vadd.xlane.f32.xlu0 %v9008_v51  ;;  %v9017_v62 = vsel %vm8443_vm1, %v20489_v19, 0.0  ;;  %v7547_v54 = vshrl.u32 %v23449_v2, 16 }
 0x5f6   : > { %23448 = vst [vmem:[#allocation76_spill] sm:$0xff] %v20493_v33  ;;  %v8854_v3 = vpop.xlane.xlu0 %8853  ;;  %v9014_v43 = vsel %vm8443_vm1, %v20493_v33, 0.0  ;;  %v15808_v61 = vpop.eup %15807 }
 0x5f7   : > { %v8845_v10 = vpop.xlane.xlu1 %8844  ;;  %v15810_v26 = vpop.eup %15809  ;;  %v9087_v51 = vmul.f32 %v15808_v61, %v20184_v55 }
 0x5f8   : > { %9018 = vadd.xlane.f32.xlu1 %v9017_v62  ;;  %15817 = vrcp.f32 %v8845_v10  ;;  %v15812_v15 = vpop.eup %15811  ;;  %v9084_v62 = vmul.f32 %v15810_v26, %v20166_v21  ;;  %v23452_v26 = vld [vmem:[#allocation29_spill] sm:$0xff] }
 0x5f9   : > { %9015 = vadd.xlane.f32.xlu0 %v9014_v43  ;;  %v9086_v43 = vmul.f32 %v15812_v15, %v20160_v35 }
 0x5fa   : > { %v8848_v1 = vpop.xlane.xlu0 %8847 }
 0x5fb   : > { %v8875_v49 = vpop.xlane.xlu1 %8874  ;;  %15819 = vrcp.f32 %v8848_v1  ;;  %v9149_v10 = vpack.c.bf16 %v9087_v51, %v9086_v43  ;;  %v23450_v1 = vld [vmem:[#allocation50_spill] sm:$0xff]  ;;  %v23454_v43 = vld [vmem:[#allocation41_spill] sm:$0xff] }
 0x5fc   : > { %15821 = vrcp.f32 %v8854_v3  ;;  %v7546_v38 = vshrl.u32 %v23450_v1, 16 }
 0x5fd   : > { %v15814_v23 = vpop.eup %15813  ;;  %15823 = vrcp.f32 %v8851_v9 }
 0x5fe   : > { %v8842_v19 = vpop.xlane.xlu0 %8841  ;;  %v9085_v33 = vmul.f32 %v15814_v23, %v20212_v4  ;;  %v7548_v61 = vpack.i.b16 %v7547_v54, %v7546_v38  ;;  %v15816_v21 = vpop.eup %15815  ;;  %v23451_v4 = vld [vmem:[#allocation56_spill] sm:$0xff] }
 0x5ff   : > { %v8869_v48 = vpop.xlane.xlu1 %8868  ;;  %15825 = vrcp.f32 %v8842_v19  ;;  %v9093_v1 = vmul.f32 %v15816_v21, %v20194_v45 }
 0x600   : > { %v9148_v56 = vpack.c.bf16 %v9085_v33, %v9084_v62  ;;  %15827 = vrcp.f32 %v8860_v41  ;;  %v23453_v62 = vld [vmem:[#allocation44_spill] sm:$0xff] }
 0x601   : > { %15829 = vrcp.f32 %v8863_v28  ;;  %v20520_v2 = vcombine.high %v23454_v43, %v23453_v62  ;;  %v23461_v62 = vld [vmem:[#allocation25_spill] sm:$0xff] }
 0x602   : > { %15133 = vmatprep.mubr.msk.bf16.mxu1 %vm8443_vm1, %v9148_v56  ;;  %v8872_v55 = vpop.xlane.xlu0 %8871  ;;  %v15818_v35 = vpop.eup %15817  ;;  %15831 = vrcp.f32 %v8869_v48 }
 0x603   : > { %v20504_v60 = vpop.xlane.xlu1 %8886  ;;  %15134 = vmatmul.mubr.msk.bf16.vlgmr.msra.gmra.mrb[48].mxu1 %vm8443_vm1, %v9149_v10  ;;  %v9089_v28 = vmul.f32 %v15818_v35, %v20220_v31  ;;  %v23456_v31 = vld [vmem:[#allocation48_spill] sm:$0xff] }
 0x604   : > { %15142 = vmatpush3.bf16.msra.mxu1 %v23451_v4  ;;  %v23457_v4 = vld [vmem:[#allocation32_spill] sm:$0xff] }
 0x605   : > { %15143 = vmatprep.subr.bf16.mxu1 %v7548_v61  ;;  %v15820_v9 = vpop.eup %15819 }
 0x606   : > { %v8866_v15 = vpop.xlane.xlu0 %8865  ;;  %v15822_v19 = vpop.eup %15821  ;;  %v9090_v38 = vmul.f32 %v15820_v9, %v20236_v47 }
 0x607   : > { %v8881_v23 = vpop.xlane.xlu1 %8880  ;;  %15833 = vrcp.f32 %v8866_v15  ;;  %v15824_v33 = vpop.eup %15823  ;;  %v9092_v51 = vmul.f32 %v15822_v19, %v20224_v17  ;;  %v20527_v17 = vcombine.high %v23457_v4, %v23456_v31  ;;  %v23463_v31 = vld [vmem:[#allocation28_spill] sm:$0xff] }
 0x608   : > { %15144 = vmatpush3.bf16.msra.mxu1 %v7548_v61  ;;  %v9091_v48 = vmul.f32 %v15824_v33, %v20206_v13  ;;  %15835 = vrcp.f32 %v8872_v55  ;;  %v23455_v61 = vld [vmem:[#allocation49_spill] sm:$0xff] }
 0x609   : > { %v15826_v56 = vpop.eup %15825  ;;  %15145 = vmatprep.subr.bf16.mxu1 %v23452_v26  ;;  %15837 = vrcp.f32 %v8875_v49  ;;  %v9152_v55 = vpack.c.bf16 %v9093_v1, %v9092_v51  ;;  %v7536_v45 = vpack.i.b16 %v20520_v2, %v20527_v17 }
 0x60a   : > { %v8884_v54 = vpop.xlane.xlu0 %8883  ;;  %v9088_v41 = vmul.f32 %v15826_v56, %v20247_v24  ;;  %v9151_v24 = vpack.c.bf16 %v9091_v48, %v9090_v38  ;;  %v15828_v13 = vpop.eup %15827  ;;  %15839 = vrcp.f32 %v8881_v23  ;;  %v23459_v38 = vld [vmem:[#allocation45_spill] sm:$0xff]  ;;  %v23460_v48 = vld [vmem:[#allocation51_spill] sm:$0xff] }
 0x60b   : > { %v20510_v3 = vpop.xlane.xlu1 %8910  ;;  %v15830_v9 = vpop.eup %15829  ;;  %v9094_v15 = vmul.f32 %v15828_v13, %v20198_v36  ;;  %v6875_v43 = vcombine.high %v23461_v62, %v23460_v48 }
 0x60c   : > { %15146 = vmatpush3.bf16.msra.mxu1 %v23452_v26  ;;  %v9150_v10 = vpack.c.bf16 %v9089_v28, %v9088_v41  ;;  %v15832_v49 = vpop.eup %15831  ;;  %v9095_v56 = vmul.f32 %v15830_v9, %v20180_v42  ;;  %v23458_v26 = vld [vmem:[#allocation40_spill] sm:$0xff] }
 0x60d   : > { %15147 = vmatprep.subr.bf16.mxu1 %v23455_v61  ;;  %v20540_v41 = vcombine.high %v23459_v38, %v23458_v26  ;;  %v9097_v28 = vmul.f32 %v15832_v49, %v20243_v59 }
 0x60e   : > { %15137 = vmatprep.mubr.msk.bf16.mxu1 %vm8443_vm1, %v9150_v10  ;;  %v8878_v35 = vpop.xlane.xlu0 %8877  ;;  %v9153_v51 = vpack.c.bf16 %v9095_v56, %v9094_v15  ;;  %v23465_v56 = vld [vmem:[#allocation52_spill] sm:$0xff] }
 0x60f   : > { %v8905_v47 = vpop.xlane.xlu1 %8904  ;;  %15841 = vrcp.f32 %v8878_v35  ;;  %15138 = vmatmul.mubr.msk.bf16.gmra.mrb[52].mxu1 %vm8443_vm1, %v9151_v24  ;;  %v7552_v42 = vpack.i.b16 %v20540_v41, %v6875_v43 }
 0x610   : > { %15148 = vmatpush3.bf16.msra.mxu1 %v23455_v61  ;;  %15149 = vmatprep.mubr.msk.bf16.mxu1 %vm8443_vm1, %v9152_v55  ;;  %15843 = vrcp.f32 %v8884_v54  ;;  %v23462_v54 = vld [vmem:[#allocation37_spill] sm:$0xff]  ;;  %v23464_v55 = vld [vmem:[#allocation38_spill] sm:$0xff] }
 0x611   : > { %v15834_v21 = vpop.eup %15833  ;;  %15157 = vmatprep.subr.bf16.mxu1 %v7536_v45  ;;  %15845 = vrcp.f32 %v20504_v60  ;;  %v6975_v4 = vcombine.high %v23463_v31, %v23462_v54 }
 0x612   : > { %v8908_v19 = vpop.xlane.xlu0 %8907  ;;  %v9096_v33 = vmul.f32 %v15834_v21, %v20270_v46  ;;  %v15836_v10 = vpop.eup %15835  ;;  %15847 = vrcp.f32 %v8905_v47 }
 0x613   : > { %v8899_v23 = vpop.xlane.xlu1 %8898  ;;  %v15838_v61 = vpop.eup %15837  ;;  %v9098_v13 = vmul.f32 %v15836_v10, %v20260_v32  ;;  %v7568_v9 = vpack.i.b16 %v23464_v55, %v6975_v4 }
 0x614   : > { %v9154_v1 = vpack.c.bf16 %v9097_v28, %v9096_v33  ;;  %v15840_v46 = vpop.eup %15839  ;;  %v9099_v49 = vmul.f32 %v15838_v61, %v20232_v12 }
 0x616   : > { %v8902_v36 = vpop.xlane.xlu0 %8901  ;;  %v9155_v21 = vpack.c.bf16 %v9099_v49, %v9098_v13 }
 0x617   : > { %15150 = vmatmul.mubr.msk.bf16.vlgmr.msra.gmra.mrb[56].mxu1 %vm8443_vm1, %v9153_v51  ;;  %v8893_v24 = vpop.xlane.xlu1 %8892  ;;  %v7555_v51 = vshrl.u32 %v20540_v41, 16  ;;  %v7571_v41 = vshrl.u32 %v23464_v55, 16 }
 0x618   : > { %15158 = vmatpush3.bf16.msra.mxu1 %v7536_v45  ;;  %15153 = vmatprep.mubr.msk.bf16.mxu1 %vm8443_vm1, %v9154_v1  ;;  %15849 = vrcp.f32 %v8893_v24  ;;  %v9101_v45 = vmul.f32 %v15840_v46, %v20266_v58  ;;  %v7538_v58 = vshrl.u32 %v20527_v17, 16 }
 0x619   : > { %v15842_v59 = vpop.eup %15841  ;;  %15159 = vmatprep.subr.bf16.mxu1 %v7552_v42 }
 0x61a   : > { %v8896_v60 = vpop.xlane.xlu0 %8895  ;;  %v9100_v35 = vmul.f32 %v15842_v59, %v20289_v22  ;;  %v15844_v15 = vpop.eup %15843  ;;  %v7539_v22 = vshrl.u32 %v20520_v2, 16 }
 0x61b   : > { %15851 = vrcp.f32 %v8896_v60  ;;  %v15846_v47 = vpop.eup %15845  ;;  %v9102_v12 = vmul.f32 %v15844_v15, %v20280_v39  ;;  %v8917_v26 = vpop.xlane.xlu1 %8916  ;;  %v7554_v39 = vshrl.u32 %v6875_v43, 16 }
 0x61c   : > { %15160 = vmatpush3.bf16.msra.mxu1 %v7552_v42  ;;  %15853 = vrcp.f32 %v8902_v36  ;;  %v9156_v32 = vpack.c.bf16 %v9101_v45, %v9100_v35  ;;  %v7540_v28 = vpack.i.b16 %v7539_v22, %v7538_v58  ;;  %v15848_v48 = vpop.eup %15847  ;;  %v7570_v42 = vshrl.u32 %v6975_v4, 16 }
 0x61d   : > { %15161 = vmatprep.subr.bf16.mxu1 %v7568_v9  ;;  %15855 = vrcp.f32 %v8899_v23  ;;  %v9103_v23 = vmul.f32 %v15846_v47, %v20256_v7  ;;  %v7556_v7 = vpack.i.b16 %v7555_v51, %v7554_v39  ;;  %v9109_v60 = vmul.f32 %v15848_v48, %v20285_v44  ;;  %v23469_v48 = vld [vmem:[#allocation46_spill] sm:$0xff] }
 0x61e   : > { %v8890_v33 = vpop.xlane.xlu0 %8889  ;;  %v7572_v54 = vpack.i.b16 %v7571_v41, %v7570_v42 }
 0x61f   : > { %15857 = vrcp.f32 %v8890_v33  ;;  %15154 = vmatmul.mubr.msk.bf16.gmra.mrb[60].mxu1 %vm8443_vm1, %v9155_v21  ;;  %v9157_v62 = vpack.c.bf16 %v9103_v23, %v9102_v12 }
 0x620   : > { %15162 = vmatpush3.bf16.msra.mxu1 %v7568_v9  ;;  %15165 = vmatprep.mubr.msk.bf16.mxu1 %vm8443_vm1, %v9156_v32  ;;  %15859 = vrcp.f32 %v8908_v19  ;;  %v23466_v9 = vld [vmem:[#allocation39_spill] sm:$0xff] }
 0x621   : > { %15163 = vmatprep.subr.bf16.mxu1 %v23465_v56  ;;  %15861 = vrcp.f32 %v20510_v3  ;;  %v8935_v36 = vpop.xlane.xlu1 %8934  ;;  %v23467_v32 = vld [vmem:[#allocation23_spill] sm:$0xff] }
 0x622   : > { %v8920_v38 = vpop.xlane.xlu0 %8919  ;;  %v15850_v2 = vpop.eup %15849  ;;  %15863 = vrcp.f32 %v8917_v26 }
 0x623   : > { %v9105_v24 = vmul.f32 %v15850_v2, %v20303_v0 }
 0x624   : > { %15164 = vmatpush3.bf16.msra.mxu1 %v23465_v56 }
 0x625   : > { %15173 = vmatprep.subr.bf16.mxu1 %v7540_v28  ;;  %v15852_v10 = vpop.eup %15851  ;;  %v8929_v35 = vpop.xlane.xlu1 %8928 }
 0x626   : > { %v8914_v17 = vpop.xlane.xlu0 %8913  ;;  %v15854_v1 = vpop.eup %15853  ;;  %v9106_v3 = vmul.f32 %v15852_v10, %v20319_v37 }
 0x627   : > { %15865 = vrcp.f32 %v8914_v17  ;;  %15166 = vmatmul.mubr.msk.bf16.vlgmr.msra.gmra.mrb[64].mxu1 %vm8443_vm1, %v9157_v62  ;;  %v15856_v19 = vpop.eup %15855  ;;  %v9108_v59 = vmul.f32 %v15854_v1, %v20307_v6 }
 0x628   : > { %15174 = vmatpush3.bf16.msra.mxu1 %v7540_v28  ;;  %v9107_v31 = vmul.f32 %v15856_v19, %v20294_v18 }
 0x629   : > { %v15858_v61 = vpop.eup %15857  ;;  %15175 = vmatprep.subr.bf16.mxu1 %v7556_v7  ;;  %v9160_v37 = vpack.c.bf16 %v9109_v60, %v9108_v59  ;;  %v8959_v58 = vpop.xlane.xlu1 %8958  ;;  %v23475_v59 = vld [vmem:[#allocation53_spill] sm:$0xff] }
 0x62a   : > { %v8923_v46 = vpop.xlane.xlu0 %8922  ;;  %v9104_v43 = vmul.f32 %v15858_v61, %v20326_v25  ;;  %v9159_v4 = vpack.c.bf16 %v9107_v31, %v9106_v3  ;;  %v15860_v55 = vpop.eup %15859  ;;  %v23476_v31 = vld [vmem:[#allocation47_spill] sm:$0xff] }
 0x62b   : > { %15867 = vrcp.f32 %v8923_v46  ;;  %v15862_v0 = vpop.eup %15861  ;;  %v9110_v44 = vmul.f32 %v15860_v55, %v20298_v40 }
 0x62c   : > { %15176 = vmatpush3.bf16.msra.mxu1 %v7556_v7  ;;  %v9158_v13 = vpack.c.bf16 %v9105_v24, %v9104_v43  ;;  %15869 = vrcp.f32 %v8920_v38  ;;  %v15864_v6 = vpop.eup %15863  ;;  %v9111_v21 = vmul.f32 %v15862_v0, %v20276_v8  ;;  %v23468_v8 = vld [vmem:[#allocation31_spill] sm:$0xff]  ;;  %v23474_v43 = vld [vmem:[#allocation30_spill] sm:$0xff]  ;;  %v23478_v0 = vld [vmem:[#allocation60_spill] sm:$0xff] }
 0x62d   : > { %15177 = vmatprep.subr.bf16.mxu1 %v7572_v54  ;;  %15871 = vrcp.f32 %v8929_v35  ;;  %v9113_v15 = vmul.f32 %v15864_v6, %v20314_v34 }
 0x62e   : > { %15169 = vmatprep.mubr.msk.bf16.mxu1 %vm8443_vm1, %v9158_v13  ;;  %v8932_v25 = vpop.xlane.xlu0 %8931  ;;  %15873 = vrcp.f32 %v8935_v36  ;;  %v9161_v33 = vpack.c.bf16 %v9111_v21, %v9110_v44  ;;  %v23479_v44 = vld [vmem:[#allocation58_spill] sm:$0xff] }
 0x62f   : > { %15170 = vmatmul.mubr.msk.bf16.gmra.mrb[68].mxu1 %vm8443_vm1, %v9159_v4  ;;  %15875 = vrcp.f32 %v8932_v25 }
 0x630   : > { %15178 = vmatpush3.bf16.msra.mxu1 %v7572_v54  ;;  %15181 = vmatprep.mubr.msk.bf16.mxu1 %vm8443_vm1, %v9160_v37  ;;  %v23477_v37 = vld [vmem:[#allocation59_spill] sm:$0xff] }
 0x631   : > { %v15866_v18 = vpop.eup %15865  ;;  %15179 = vmatprep.subr.bf16.mxu1 %v23466_v9 }
 0x632   : > { %v9112_v49 = vmul.f32 %v15866_v18, %v20341_v11  ;;  %v8926_v45 = vpop.xlane.xlu0 %8925 }
 0x633   : > { %15877 = vrcp.f32 %v8926_v45  ;;  %v23480_v45 = vld [vmem:[#allocation57_spill] sm:$0xff] }
 0x634   : > { %15180 = vmatpush3.bf16.msra.mxu1 %v23466_v9  ;;  %v9162_v47 = vpack.c.bf16 %v9113_v15, %v9112_v49  ;;  %15879 = vrcp.f32 %v8959_v58  ;;  %v23481_v15 = vld [vmem:[#allocation42_spill] sm:$0xff] }
 0x635   : > { %15205 = vmatprep.subr.bf16.mxu1 %v23467_v32  ;;  %v15868_v22 = vpop.eup %15867 }
 0x636   : > { %v8956_v12 = vpop.xlane.xlu0 %8955  ;;  %v15870_v40 = vpop.eup %15869  ;;  %v9115_v56 = vmul.f32 %v15868_v22, %v20350_v16  ;;  %v23483_v22 = vld [vmem:[#allocation54_spill] sm:$0xff] }
 0x637   : > { %15182 = vmatmul.mubr.msk.bf16.vlgmr.msra.gmra.mrb[72].mxu1 %vm8443_vm1, %v9161_v33  ;;  %v15872_v11 = vpop.eup %15871  ;;  %v9114_v38 = vmul.f32 %v15870_v40, %v20332_v63  ;;  %v23482_v33 = vld [vmem:[#allocation55_spill] sm:$0xff] }
 0x638   : > { %15206 = vmatpush3.bf16.msra.mxu1 %v23467_v32  ;;  %15185 = vmatprep.mubr.msk.bf16.mxu1 %vm8443_vm1, %v9162_v47  ;;  %v15874_v34 = vpop.eup %15873  ;;  %v9117_v28 = vmul.f32 %v15872_v11, %v20344_v29  ;;  %v23470_v29 = vld [vmem:[#allocation26_spill] sm:$0xff] }
 0x639   : > { %15207 = vmatprep.subr.bf16.mxu1 %v23468_v8  ;;  %v15876_v23 = vpop.eup %15875  ;;  %v9163_v2 = vpack.c.bf16 %v9115_v56, %v9114_v38  ;;  %v9119_v62 = vmul.f32 %v15874_v34, %v20335_v50  ;;  %v23471_v50 = vld [vmem:[#allocation33_spill] sm:$0xff]  ;;  %v23485_v34 = vld [vmem:[#allocation63_spill] sm:$0xff] }
 0x63a   : > { %v8950_v26 = vpop.xlane.xlu0 %8949  ;;  %v9118_v63 = vmul.f32 %v15876_v23, %v20352_v5  ;;  %v23473_v5 = vld [vmem:[#allocation27_spill] sm:$0xff] }
 0x63b   : > { %15881 = vrcp.f32 %v8950_v26  ;;  %v23486_v23 = vld [vmem:[#allocation43_spill] sm:$0xff] }
 0x63c   : > { %15208 = vmatpush3.bf16.msra.mxu1 %v23468_v8  ;;  %15883 = vrcp.f32 %v8956_v12  ;;  %v9165_v17 = vpack.c.bf16 %v9119_v62, %v9118_v63  ;;  %v23484_v8 = vld [vmem:[#allocation61_spill] sm:$0xff]  ;;  %v23488_v62 = vld [vmem:[#allocation62_spill] sm:$0xff] }
 0x63d   : > { %v15878_v51 = vpop.eup %15877  ;;  %15209 = vmatprep.subr.bf16.mxu1 %v23469_v48 }
 0x63e   : > { %v8953_v16 = vpop.xlane.xlu0 %8952  ;;  %v9116_v39 = vmul.f32 %v15878_v51, %v20363_v20  ;;  %v23472_v20 = vld [vmem:[#allocation24_spill] sm:$0xff]  ;;  %v15880_v7 = vpop.eup %15879 }
 0x63f   : > { %15186 = vmatmul.mubr.msk.bf16.gmra.mrb[76].mxu1 %vm8443_vm1, %v9163_v2  ;;  %15885 = vrcp.f32 %v8953_v16  ;;  %v9127_v3 = vmul.f32 %v15880_v7, %v20354_v27  ;;  %v23487_v51 = vld [vmem:[#allocation64_spill] sm:$0xff] }
 0x640   : > { %15210 = vmatpush3.bf16.msra.mxu1 %v23469_v48  ;;  %v9164_v10 = vpack.c.bf16 %v9117_v28, %v9116_v39 }
 0x641   : > { %15211 = vmatprep.subr.bf16.mxu1 %v23470_v29 }
 0x642   : > { %15197 = vmatprep.mubr.msk.bf16.mxu0 %vm8443_vm1, %v9164_v10 }
 0x643   : > { %15198 = vmatmul.mubr.msk.bf16.vlgmr.msra.gmra.mrb[64].mxu0 %vm8443_vm1, %v9165_v17 }
 0x644   : > { %v8944_v36 = vpop.xlane.xlu0 %8943  ;;  %15212 = vmatpush3.bf16.msra.mxu1 %v23470_v29  ;;  %15222 = vmatpush3.bf16.msra.mxu0 %v23471_v50 }
 0x645   : > { %15237 = vmatprep.subr.bf16.mxu1 %v23472_v20  ;;  %15223 = vmatprep.subr.bf16.mxu0 %v23473_v5  ;;  %v15882_v41 = vpop.eup %15881  ;;  %15887 = vrcp.f32 %v8944_v36 }
 0x646   : > { %v8947_v1 = vpop.xlane.xlu1 %8946  ;;  %v15884_v61 = vpop.eup %15883  ;;  %v9124_v24 = vmul.f32 %v15882_v41, %v20372_v14 }
 0x647   : > { %v9126_v13 = vmul.f32 %v15884_v61, %v23476_v31 }
 0x648   : > { %v8938_v19 = vpop.xlane.xlu0 %8937  ;;  %15224 = vmatpush3.bf16.msra.mxu0 %v23473_v5 }
 0x649   : > { %15889 = vrcp.f32 %v8938_v19  ;;  %v15886_v42 = vpop.eup %15885  ;;  %15225 = vmatprep.subr.bf16.mxu0 %v23474_v43  ;;  %v9169_v4 = vpack.c.bf16 %v9127_v3, %v9126_v13 }
 0x64a   : > { %15891 = vrcp.f32 %v8947_v1  ;;  %v8941_v46 = vpop.xlane.xlu1 %8940  ;;  %v9125_v54 = vmul.f32 %v15886_v42, %v23475_v59 }
 0x64b   : > { %15893 = vrcp.f32 %v8941_v46 }
 0x64c   : > { %v8968_v60 = vpop.xlane.xlu0 %8967  ;;  %15226 = vmatpush3.bf16.msra.mxu0 %v23474_v43  ;;  %v9168_v35 = vpack.c.bf16 %v9125_v54, %v9124_v24 }
 0x64d   : > { %15227 = vmatprep.subr.bf16.mxu0 %v23477_v37  ;;  %15895 = vrcp.f32 %v8968_v60  ;;  %v23490_v60 = vld [vmem:[#allocation68_spill] sm:$0xff] }
 0x64e   : > { %v8971_v55 = vpop.xlane.xlu1 %8970  ;;  %15213 = vmatprep.mubr.msk.bf16.mxu1 %vm8443_vm1, %v9168_v35 }
 0x64f   : > { %15214 = vmatmul.mubr.msk.bf16.vlgmr.msra.gmra.mrb[80].mxu1 %vm8443_vm1, %v9169_v4  ;;  %v15888_v14 = vpop.eup %15887 }
 0x650   : > { %v8962_v27 = vpop.xlane.xlu0 %8961  ;;  %15238 = vmatpush3.bf16.msra.mxu1 %v23472_v20  ;;  %15228 = vmatpush3.bf16.msra.mxu0 %v23477_v37  ;;  %v9122_v21 = vmul.f32 %v15888_v14, %v23480_v45 }
 0x651   : > { %15897 = vrcp.f32 %v8962_v27  ;;  %15239 = vmatprep.subr.bf16.mxu1 %v23478_v0  ;;  %v23491_v27 = vld [vmem:[#allocation66_spill] sm:$0xff] }
 0x652   : > { %15899 = vrcp.f32 %v8971_v55  ;;  %v8965_v25 = vpop.xlane.xlu1 %8964 }
 0x653   : > { %v15890_v6 = vpop.eup %15889  ;;  %15901 = vrcp.f32 %v8965_v25  ;;  %v23492_v25 = vld [vmem:[#allocation67_spill] sm:$0xff] }
 0x654   : > { %v15892_v18 = vpop.eup %15891  ;;  %v9120_v9 = vmul.f32 %v15890_v6, %v23479_v44  ;;  %15240 = vmatpush3.bf16.msra.mxu1 %v23478_v0 }
 0x655   : > { %v15894_v49 = vpop.eup %15893  ;;  %15241 = vmatprep.subr.bf16.mxu1 %v23481_v15  ;;  %v9123_v47 = vmul.f32 %v15892_v18, %v23483_v22 }
 0x656   : > { %v9121_v32 = vmul.f32 %v15894_v49, %v23482_v33 }
 0x657   : > { %v9167_v40 = vpack.c.bf16 %v9123_v47, %v9122_v21  ;;  %v15896_v11 = vpop.eup %15895  ;;  %v23494_v47 = vld [vmem:[#allocation70_spill] sm:$0xff] }
 0x658   : > { %v9166_v12 = vpack.c.bf16 %v9121_v32, %v9120_v9  ;;  %15242 = vmatpush3.bf16.msra.mxu1 %v23481_v15  ;;  %v9130_v28 = vmul.f32 %v15896_v11, %v23486_v23  ;;  %v23493_v32 = vld [vmem:[#allocation71_spill] sm:$0xff]  ;;  %v23497_v23 = vld [vmem:[#allocation73_spill] sm:$0xff] }
 0x659   : > { %15243 = vmatprep.subr.bf16.mxu1 %v23484_v8 }
 0x65a   : > { %15201 = vmatprep.mubr.msk.bf16.mxu0 %vm8443_vm1, %v9166_v12 }
 0x65b   : > { %v15898_v56 = vpop.eup %15897  ;;  %15202 = vmatmul.mubr.msk.bf16.gmra.mrb[68].mxu0 %vm8443_vm1, %v9167_v40  ;;  %v23495_v40 = vld [vmem:[#allocation72_spill] sm:$0xff] }
 0x65c   : > { %v15900_v58 = vpop.eup %15899  ;;  %v9128_v26 = vmul.f32 %v15898_v56, %v23485_v34  ;;  %15244 = vmatpush3.bf16.msra.mxu1 %v23484_v8  ;;  %v23496_v8 = vld [vmem:[#allocation69_spill] sm:$0xff] }
 0x65d   : > { %v15902_v38 = vpop.eup %15901  ;;  %v9131_v16 = vmul.f32 %v15900_v58, %v23488_v62 }
 0x65e   : > { %v9129_v48 = vmul.f32 %v15902_v38, %v23487_v51  ;;  %v8980_v2 = vpop.xlane.xlu0 %8979  ;;  %v23498_v51 = vld [vmem:[#allocation74_spill] sm:$0xff] }
 0x65f   : > { %v9171_v10 = vpack.c.bf16 %v9131_v16, %v9130_v28  ;;  %15903 = vrcp.f32 %v8980_v2 }
 0x660   : > { %v9170_v39 = vpack.c.bf16 %v9129_v48, %v9128_v26  ;;  %v8983_v63 = vpop.xlane.xlu1 %8982 }
 0x662   : > { %15217 = vmatprep.mubr.msk.bf16.mxu1 %vm8443_vm1, %v9170_v39  ;;  %v8974_v29 = vpop.xlane.xlu0 %8973  ;;  %v23499_v39 = vld [vmem:[#allocation75_spill] sm:$0xff] }
 0x663   : > { %15218 = vmatmul.mubr.msk.bf16.gmra.mrb[84].mxu1 %vm8443_vm1, %v9171_v10  ;;  %15905 = vrcp.f32 %v8974_v29  ;;  %v23500_v10 = vld [vmem:[#allocation76_spill] sm:$0xff] }
 0x664   : > { %15907 = vrcp.f32 %v8983_v63  ;;  %v8977_v17 = vpop.xlane.xlu1 %8976 }
 0x665   : > { %15909 = vrcp.f32 %v8977_v17 }
 0x668   : > { %v8998_v36 = vpop.xlane.xlu0 %8997 }
 0x669   : > { %v15904_v50 = vpop.eup %15903  ;;  %15911 = vrcp.f32 %v8998_v36  ;;  %v23501_v36 = vmov 0  }
 0x66a   : > { %v9134_v19 = vmul.f32 %v15904_v50, %v20425_v30 }
 0x66c   : > { %v9004_v5 = vpop.xlane.xlu0 %9003 }
 0x66d   : > { %v15906_v20 = vpop.eup %15905 }
 0x66e   : > { %v15908_v1 = vpop.eup %15907  ;;  %v9132_v7 = vmul.f32 %v15906_v20, %v20434_v53 }
 0x66f   : > { %v15910_v41 = vpop.eup %15909  ;;  %v9135_v3 = vmul.f32 %v15908_v1, %v20429_v57  ;;  %v23489_v57 = vld [vmem:[#allocation65_spill] sm:$0xff] }
 0x670   : > { %v9001_v61 = vpop.xlane.xlu1 %9000  ;;  %v9133_v42 = vmul.f32 %v15910_v41, %v20439_v52 }
 0x671   : > { %15913 = vrcp.f32 %v9001_v61  ;;  %v9173_v43 = vpack.c.bf16 %v9135_v3, %v9134_v19 }
 0x672   : > { %v9172_v46 = vpack.c.bf16 %v9133_v42, %v9132_v7  ;;  %15915 = vrcp.f32 %v9004_v5 }
 0x673   : > { %v15912_v30 = vpop.eup %15911 }
 0x674   : > { %v9007_v24 = vpop.xlane.xlu1 %9006  ;;  %v8992_v59 = vpop.xlane.xlu0 %8991  ;;  %15229 = vmatprep.mubr.msk.bf16.mxu0 %vm8443_vm1, %v9172_v46  ;;  %v9140_v13 = vmul.f32 %v15912_v30, %v23489_v57 }
 0x675   : > { %15917 = vrcp.f32 %v9007_v24  ;;  %15230 = vmatmul.mubr.msk.bf16.vlgmr.msra.gmra.mrb[72].mxu0 %vm8443_vm1, %v9173_v43 }
 0x678   : > { %v8986_v54 = vpop.xlane.xlu0 %8985 }
 0x679   : > { %v8995_v53 = vpop.xlane.xlu1 %8994 }
 0x67a   : > { %15919 = vrcp.f32 %v8995_v53 }
 0x67b   : > { %v15914_v31 = vpop.eup %15913  ;;  %15921 = vrcp.f32 %v8986_v54 }
 0x67c   : > { %15923 = vrcp.f32 %v8992_v59  ;;  %v9141_v35 = vmul.f32 %v15914_v31, %v23490_v60  ;;  %v15916_v4 = vpop.eup %15915 }
 0x67d   : > { %v8989_v52 = vpop.xlane.xlu1 %8988  ;;  %v9142_v14 = vmul.f32 %v15916_v4, %v23491_v27 }
 0x67e   : > { %15925 = vrcp.f32 %v8989_v52  ;;  %v9176_v55 = vpack.c.bf16 %v9141_v35, %v9140_v13 }
 0x67f   : > { %v15918_v37 = vpop.eup %15917 }
 0x680   : > { %v9143_v0 = vmul.f32 %v15918_v37, %v23492_v25  ;;  %15245 = vmatprep.mubr.msk.bf16.mxu1 %vm8443_vm1, %v9176_v55 }
 0x681   : > { %v9013_v6 = vpop.xlane.xlu1 %9012 }
 0x682   : > { %15927 = vrcp.f32 %v9013_v6  ;;  %v9010_v18 = vpop.xlane.xlu0 %9009  ;;  %v9177_v44 = vpack.c.bf16 %v9143_v0, %v9142_v14 }
 0x683   : > { %15929 = vrcp.f32 %v9010_v18 }
 0x684   : > { %v15920_v9 = vpop.eup %15919  ;;  %15246 = vmatmul.mubr.msk.bf16.vlgmr.msra.gmra.mrb[88].mxu1 %vm8443_vm1, %v9177_v44 }
 0x685   : > { %v9019_v49 = vpop.xlane.xlu1 %9018  ;;  %v15922_v45 = vpop.eup %15921  ;;  %v9139_v22 = vmul.f32 %v15920_v9, %v23493_v32 }
 0x686   : > { %15931 = vrcp.f32 %v9019_v49  ;;  %v9016_v21 = vpop.xlane.xlu0 %9015  ;;  %v15924_v15 = vpop.eup %15923  ;;  %v9136_v12 = vmul.f32 %v15922_v45, %v23494_v47 }
 0x687   : > { %15933 = vrcp.f32 %v9016_v21  ;;  %v9138_v56 = vmul.f32 %v15924_v15, %v23496_v8 }
 0x688   : > { %v15926_v33 = vpop.eup %15925 }
 0x689   : > { %v9137_v11 = vmul.f32 %v15926_v33, %v23495_v40  ;;  %v9175_v26 = vpack.c.bf16 %v9139_v22, %v9138_v56  ;;  %v23502_v22 = vld [vmem:[#allocation34_spill] sm:$0xff] }
 0x68b   : > { %v9174_v58 = vpack.c.bf16 %v9137_v11, %v9136_v12 }
 0x68c   : > { %v15928_v34 = vpop.eup %15927 }
 0x68d   : > { %v15930_v38 = vpop.eup %15929  ;;  %15233 = vmatprep.mubr.msk.bf16.mxu0 %vm8443_vm1, %v9174_v58  ;;  %v9145_v28 = vmul.f32 %v15928_v34, %v23497_v23 }
 0x68e   : > { %15234 = vmatmul.mubr.msk.bf16.gmra.mrb[76].mxu0 %vm8443_vm1, %v9175_v26  ;;  %v9144_v48 = vmul.f32 %v15930_v38, %v23498_v51 }
 0x690   : > { %v15932_v2 = vpop.eup %15931  ;;  %v9178_v62 = vpack.c.bf16 %v9145_v28, %v9144_v48 }
 0x691   : > { %v15934_v16 = vpop.eup %15933  ;;  %v9147_v63 = vmul.f32 %v15932_v2, %v23499_v39 }
 0x692   : > { %15249 = vmatprep.mubr.msk.bf16.mxu1 %vm8443_vm1, %v9178_v62  ;;  %v9146_v29 = vmul.f32 %v15934_v16, %v23500_v10 }
 0x694   : > { %v9179_v17 = vpack.c.bf16 %v9147_v63, %v9146_v29 }
 0x696   : > { %15250 = vmatmul.mubr.msk.bf16.gmra.mrb[92].mxu1 %vm8443_vm1, %v9179_v17 }
 0x697   : > { %12872 = vmatprep.mubr.bf16.mxu1 %v23501_v36 }
 0x6d6   : > { %v15135_v50 = vpop.f32.mrb[48].mxu1 }
 0x6d7   : > { %v9226_v20 = vpop.f32.mrb[49].mxu1 }
 0x6d8   : > { %v15136_v1 = vpop.f32.mrb[50].mxu1 }
 0x6d9   : > { %v9229_v5 = vpop.f32.mrb[51].mxu1 }
 0x6e2   : > { %v15139_v7 = vpop.f32.mrb[52].mxu1 }
 0x6e3   : > { %v9242_v41 = vpop.f32.mrb[53].mxu1 }
 0x6e4   : > { %v15140_v19 = vpop.f32.mrb[54].mxu1 }
 0x6e5   : > { %v9245_v61 = vpop.f32.mrb[55].mxu1 }
 0x6ea   : > { %v15151_v42 = vpop.f32.mrb[56].mxu1 }
 0x6eb   : > { %v9303_v3 = vpop.f32.mrb[57].mxu1 }
 0x6ec   : > { %v20660_v46 = vpop.f32.mrb[58].mxu1 }
 0x6ed   : > { %v20662_v43 = vpop.f32.mrb[59].mxu1 }
 0x6f2   : > { %v20664_v24 = vpop.f32.mrb[60].mxu1 }
 0x6f3   : > { %v20666_v59 = vpop.f32.mrb[61].mxu1 }
 0x6f4   : > { %v20668_v53 = vpop.f32.mrb[62].mxu1 }
 0x6f5   : > { %v20670_v54 = vpop.f32.mrb[63].mxu1 }
 0x6fa   : > { %v15167_v30 = vpop.f32.mrb[64].mxu1 }
 0x6fb   : > { %v9932_v31 = vcombine.low %v15135_v50, %v15167_v30  ;;  %v9933_v52 = vcombine.high %v15135_v50, %v15167_v30  ;;  %v9380_v57 = vpop.f32.mrb[65].mxu1 }
 0x6fc   : > { %v9796_v13 = vcombine.low %v9226_v20, %v9380_v57  ;;  %v9797_v60 = vcombine.high %v9226_v20, %v9380_v57  ;;  %v15168_v35 = vpop.f32.mrb[66].mxu1 }
 0x6fd   : > { %v10000_v4 = vcombine.low %v15136_v1, %v15168_v35  ;;  %v10001_v55 = vcombine.high %v15136_v1, %v15168_v35  ;;  %v9383_v37 = vpop.f32.mrb[67].mxu1  ;;  %v9940_v47 = vrot.slane %v9932_v31, %v23502_v22  ;;  %v9947_v12 = vrot.slane %v9933_v52, %v23502_v22 }
 0x6fe   : > { %v9864_v27 = vcombine.low %v9229_v5, %v9383_v37  ;;  %v9865_v14 = vcombine.high %v9229_v5, %v9383_v37  ;;  %v9804_v40 = vrot.slane %v9796_v13, %v23502_v22  ;;  %v9811_v11 = vrot.slane %v9797_v60, %v23502_v22 }
 0x6ff   : > { %v20677_v8 = vrot.slane %v10000_v4, %v23502_v22  ;;  %v20680_v56 = vrot.slane %v10001_v55, %v23502_v22  ;;  %v23503_v55 = vld [vmem:[#allocation35_spill] sm:$0xff] }
 0x700   : > { %v20683_v58 = vrot.slane %v9864_v27, %v23502_v22  ;;  %v20686_v34 = vrot.slane %v9865_v14, %v23502_v22 }
 0x702   : > { %v15171_v25 = vpop.f32.mrb[68].mxu1 }
 0x703   : > { %v10204_v0 = vcombine.low %v15139_v7, %v15171_v25  ;;  %v10205_v6 = vcombine.high %v15139_v7, %v15171_v25  ;;  %v9396_v18 = vpop.f32.mrb[69].mxu1 }
 0x704   : > { %v10068_v44 = vcombine.low %v9242_v41, %v9396_v18  ;;  %v10069_v9 = vcombine.high %v9242_v41, %v9396_v18  ;;  %v15172_v49 = vpop.f32.mrb[70].mxu1 }
 0x705   : > { %v10272_v45 = vcombine.low %v15140_v19, %v15172_v49  ;;  %v10273_v21 = vcombine.high %v15140_v19, %v15172_v49  ;;  %v9399_v15 = vpop.f32.mrb[71].mxu1  ;;  %v20689_v26 = vrot.slane %v10204_v0, %v23502_v22  ;;  %v20692_v38 = vrot.slane %v10205_v6, %v23502_v22 }
 0x706   : > { %v10136_v33 = vcombine.low %v9245_v61, %v9399_v15  ;;  %v10137_v32 = vcombine.high %v9245_v61, %v9399_v15  ;;  %v20695_v23 = vrot.slane %v10068_v44, %v23502_v22  ;;  %v20698_v28 = vrot.slane %v10069_v9, %v23502_v22 }
 0x707   : > { %v20701_v48 = vrot.slane %v10272_v45, %v23502_v22  ;;  %v20704_v2 = vrot.slane %v10273_v21, %v23502_v22 }
 0x708   : > { %v20707_v63 = vrot.slane %v10136_v33, %v23502_v22  ;;  %v20710_v10 = vrot.slane %v10137_v32, %v23502_v22 }
 0x70a   : > { %v15183_v51 = vpop.f32.mrb[72].mxu1 }
 0x70b   : > { %v9948_v62 = vcombine.low %v15151_v42, %v15183_v51  ;;  %v9949_v16 = vcombine.high %v15151_v42, %v15183_v51  ;;  %v9457_v39 = vpop.f32.mrb[73].mxu1 }
 0x70c   : > { %v9812_v29 = vcombine.low %v9303_v3, %v9457_v39  ;;  %v9813_v17 = vcombine.high %v9303_v3, %v9457_v39  ;;  %v15184_v50 = vpop.f32.mrb[74].mxu1 }
 0x70d   : > { %v9956_v20 = vrot.slane %v9948_v62, %v23502_v22  ;;  %v9963_v1 = vrot.slane %v9949_v16, %v23502_v22  ;;  %v10016_v5 = vcombine.low %v20660_v46, %v15184_v50  ;;  %v10017_v7 = vcombine.high %v20660_v46, %v15184_v50  ;;  %v9460_v41 = vpop.f32.mrb[75].mxu1 }
 0x70e   : > { %v9820_v19 = vrot.slane %v9812_v29, %v23502_v22  ;;  %v9827_v61 = vrot.slane %v9813_v17, %v23502_v22  ;;  %v9880_v42 = vcombine.low %v20662_v43, %v9460_v41  ;;  %v9881_v30 = vcombine.high %v20662_v43, %v9460_v41 }
 0x70f   : > { %v9964_v31 = vcombine.low %v9940_v47, %v9956_v20  ;;  %v9965_v3 = vcombine.high %v9940_v47, %v9956_v20  ;;  %v9980_v52 = vcombine.low %v9947_v12, %v9963_v1  ;;  %v9981_v57 = vcombine.high %v9947_v12, %v9963_v1 }
 0x710   : > { %v9828_v13 = vcombine.low %v9804_v40, %v9820_v19  ;;  %v9829_v60 = vcombine.high %v9804_v40, %v9820_v19  ;;  %v9844_v35 = vcombine.low %v9811_v11, %v9827_v61  ;;  %v9845_v4 = vcombine.high %v9811_v11, %v9827_v61 }
 0x711   : > { %v9972_v37 = vrot.slane %v9964_v31, %v23503_v55  ;;  %v9979_v46 = vrot.slane %v9965_v3, %v23503_v55  ;;  %v9988_v27 = vrot.slane %v9980_v52, %v23503_v55  ;;  %v9995_v14 = vrot.slane %v9981_v57, %v23503_v55 }
 0x712   : > { %v9836_v25 = vrot.slane %v9828_v13, %v23503_v55  ;;  %v9843_v43 = vrot.slane %v9829_v60, %v23503_v55  ;;  %v9852_v0 = vrot.slane %v9844_v35, %v23503_v55  ;;  %v9859_v6 = vrot.slane %v9845_v4, %v23503_v55  ;;  %v20728_v18 = vpop.f32.mrb[76].mxu1 }
 0x713   : > { %v11020_v44 = vcombine.low %v9972_v37, %v9979_v46  ;;  %v14564_v9 = vcombine.high %v9972_v37, %v9979_v46  ;;  %v11036_v49 = vcombine.low %v9988_v27, %v9995_v14  ;;  %v14565_v45 = vcombine.high %v9988_v27, %v9995_v14  ;;  %v20730_v21 = vpop.f32.mrb[77].mxu1 }
 0x714   : > { %v10884_v15 = vcombine.low %v9836_v25, %v9843_v43  ;;  %v14560_v33 = vcombine.high %v9836_v25, %v9843_v43  ;;  %v10900_v32 = vcombine.low %v9852_v0, %v9859_v6  ;;  %v14561_v47 = vcombine.high %v9852_v0, %v9859_v6  ;;  %v20732_v12 = vpop.f32.mrb[78].mxu1 }
 0x715   : > { %v20735_v40 = vrot.slane %v11020_v44, %v23502_v22  ;;  %v20738_v11 = vrot.slane %v14564_v9, %v23502_v22  ;;  %v20741_v51 = vrot.slane %v11036_v49, %v23502_v22  ;;  %v20744_v62 = vrot.slane %v14565_v45, %v23502_v22  ;;  %v20746_v16 = vpop.f32.mrb[79].mxu1 }
 0x716   : > { %v20749_v39 = vrot.slane %v10884_v15, %v23502_v22  ;;  %v20752_v29 = vrot.slane %v14560_v33, %v23502_v22  ;;  %v20755_v17 = vrot.slane %v10900_v32, %v23502_v22  ;;  %v20758_v50 = vrot.slane %v14561_v47, %v23502_v22  ;;  %v20760_v20 = vpop.f32.mrb[64].mxu0 }
 0x717   : > { %v10024_v1 = vrot.slane %v10016_v5, %v23502_v22  ;;  %v10031_v41 = vrot.slane %v10017_v7, %v23502_v22  ;;  %v9888_v19 = vrot.slane %v9880_v42, %v23502_v22  ;;  %v9895_v61 = vrot.slane %v9881_v30, %v23502_v22  ;;  %v20766_v31 = vpop.f32.mrb[65].mxu0 }
 0x718   : > { %v10220_v3 = vcombine.low %v20664_v24, %v20728_v18  ;;  %v10221_v52 = vcombine.high %v20664_v24, %v20728_v18  ;;  %v10084_v57 = vcombine.low %v20666_v59, %v20730_v21  ;;  %v10085_v5 = vcombine.high %v20666_v59, %v20730_v21  ;;  %v20776_v13 = vpop.f32.mrb[66].mxu0 }
 0x719   : > { %v10032_v7 = vcombine.low %v20677_v8, %v10024_v1  ;;  %v10033_v42 = vcombine.high %v20677_v8, %v10024_v1  ;;  %v10048_v30 = vcombine.low %v20680_v56, %v10031_v41  ;;  %v10049_v60 = vcombine.high %v20680_v56, %v10031_v41  ;;  %v20782_v35 = vpop.f32.mrb[67].mxu0 }
 0x71a   : > { %v9896_v24 = vcombine.low %v20683_v58, %v9888_v19  ;;  %v9897_v4 = vcombine.high %v20683_v58, %v9888_v19  ;;  %v9912_v37 = vcombine.low %v20686_v34, %v9895_v61  ;;  %v9913_v59 = vcombine.high %v20686_v34, %v9895_v61 }
 0x71b   : > { %v10040_v46 = vrot.slane %v10032_v7, %v23503_v55  ;;  %v10047_v27 = vrot.slane %v10033_v42, %v23503_v55  ;;  %v10056_v8 = vrot.slane %v10048_v30, %v23503_v55  ;;  %v10063_v14 = vrot.slane %v10049_v60, %v23503_v55 }
 0x71c   : > { %v9904_v56 = vrot.slane %v9896_v24, %v23503_v55  ;;  %v9911_v25 = vrot.slane %v9897_v4, %v23503_v55  ;;  %v9920_v43 = vrot.slane %v9912_v37, %v23503_v55  ;;  %v9927_v58 = vrot.slane %v9913_v59, %v23503_v55 }
 0x71d   : > { %v11088_v0 = vcombine.low %v10040_v46, %v10047_v27  ;;  %v14566_v6 = vcombine.high %v10040_v46, %v10047_v27  ;;  %v11104_v18 = vcombine.low %v10056_v8, %v10063_v14  ;;  %v14567_v34 = vcombine.high %v10056_v8, %v10063_v14 }
 0x71e   : > { %v10952_v44 = vcombine.low %v9904_v56, %v9911_v25  ;;  %v14562_v9 = vcombine.high %v9904_v56, %v9911_v25  ;;  %v10968_v49 = vcombine.low %v9920_v43, %v9927_v58  ;;  %v14563_v45 = vcombine.high %v9920_v43, %v9927_v58 }
 0x71f   : > { %v20797_v21 = vrot.slane %v11088_v0, %v23502_v22  ;;  %v20800_v15 = vrot.slane %v14566_v6, %v23502_v22  ;;  %v20803_v33 = vrot.slane %v11104_v18, %v23502_v22  ;;  %v20806_v32 = vrot.slane %v14567_v34, %v23502_v22  ;;  %v15560_v0 = vld [vmem:[%s16451_s23 + $0x8] sm:$0xff]   ;;  %v15561_v6 = vld [vmem:[%s16451_s23 + $0x10] sm:$0xff]  }
 0x720   : > { %v20809_v47 = vrot.slane %v10952_v44, %v23502_v22  ;;  %v20812_v1 = vrot.slane %v14562_v9, %v23502_v22  ;;  %v20815_v41 = vrot.slane %v10968_v49, %v23502_v22  ;;  %v20818_v19 = vrot.slane %v14563_v45, %v23502_v22 }
 0x721   : > { %v10228_v61 = vrot.slane %v10220_v3, %v23502_v22  ;;  %v10235_v7 = vrot.slane %v10221_v52, %v23502_v22  ;;  %v10092_v42 = vrot.slane %v10084_v57, %v23502_v22  ;;  %v10099_v30 = vrot.slane %v10085_v5, %v23502_v22  ;;  %v15559_v3 = vld [vmem:[%s16451_s23] sm:$0xff]  }
 0x722   : > { %v10288_v60 = vcombine.low %v20668_v53, %v20732_v12  ;;  %v10289_v24 = vcombine.high %v20668_v53, %v20732_v12  ;;  %v10152_v4 = vcombine.low %v20670_v54, %v20746_v16  ;;  %v10153_v37 = vcombine.high %v20670_v54, %v20746_v16  ;;  %v20832_v59 = vpop.f32.mrb[80].mxu1  ;;  %15253 = vmatprep.subr.bf16.mxu0 %v15559_v3 }
 0x723   : > { %v10236_v52 = vcombine.low %v20689_v26, %v10228_v61  ;;  %v10237_v57 = vcombine.high %v20689_v26, %v10228_v61  ;;  %v10252_v5 = vcombine.low %v20692_v38, %v10235_v7  ;;  %v10253_v46 = vcombine.high %v20692_v38, %v10235_v7  ;;  %v20839_v27 = vpop.f32.mrb[81].mxu1  ;;  %15254 = vmatpush3.bf16.msra.mxu0 %v15559_v3 }
 0x724   : > { %v10100_v53 = vcombine.low %v20695_v23, %v10092_v42  ;;  %v10101_v12 = vcombine.high %v20695_v23, %v10092_v42  ;;  %v10116_v54 = vcombine.low %v20698_v28, %v10099_v30  ;;  %v10117_v16 = vcombine.high %v20698_v28, %v10099_v30  ;;  %v20845_v8 = vpop.f32.mrb[82].mxu1  ;;  %15255 = vmatprep.subr.bf16.mxu0 %v15560_v0 }
 0x725   : > { %v10244_v26 = vrot.slane %v10236_v52, %v23503_v55  ;;  %v10251_v14 = vrot.slane %v10237_v57, %v23503_v55  ;;  %v10260_v38 = vrot.slane %v10252_v5, %v23503_v55  ;;  %v10267_v56 = vrot.slane %v10253_v46, %v23503_v55  ;;  %v20851_v25 = vpop.f32.mrb[83].mxu1 }
 0x726   : > { %v10108_v23 = vrot.slane %v10100_v53, %v23503_v55  ;;  %v10115_v43 = vrot.slane %v10101_v12, %v23503_v55  ;;  %v10124_v28 = vrot.slane %v10116_v54, %v23503_v55  ;;  %v10131_v58 = vrot.slane %v10117_v16, %v23503_v55  ;;  %v15562_v12 = vld [vmem:[%s16451_s23 + $0x18] sm:$0xff]  }
 0x727   : > { %v11292_v18 = vcombine.low %v10244_v26, %v10251_v14  ;;  %v14572_v34 = vcombine.high %v10244_v26, %v10251_v14  ;;  %v11308_v44 = vcombine.low %v10260_v38, %v10267_v56  ;;  %v14573_v9 = vcombine.high %v10260_v38, %v10267_v56  ;;  %15256 = vmatpush3.bf16.msra.mxu0 %v15560_v0 }
 0x728   : > { %v11156_v49 = vcombine.low %v10108_v23, %v10115_v43  ;;  %v14568_v45 = vcombine.high %v10108_v23, %v10115_v43  ;;  %v11172_v61 = vcombine.low %v10124_v28, %v10131_v58  ;;  %v14569_v7 = vcombine.high %v10124_v28, %v10131_v58  ;;  %15257 = vmatprep.subr.bf16.mxu0 %v15561_v6 }
 0x729   : > { %v20860_v42 = vrot.slane %v11292_v18, %v23502_v22  ;;  %v20863_v30 = vrot.slane %v14572_v34, %v23502_v22  ;;  %v20866_v3 = vrot.slane %v11308_v44, %v23502_v22  ;;  %v20869_v52 = vrot.slane %v14573_v9, %v23502_v22 }
 0x72a   : > { %v20872_v57 = vrot.slane %v11156_v49, %v23502_v22  ;;  %v20875_v5 = vrot.slane %v14568_v45, %v23502_v22  ;;  %v20878_v46 = vrot.slane %v11172_v61, %v23502_v22  ;;  %v20881_v53 = vrot.slane %v14569_v7, %v23502_v22 }
 0x72b   : > { %v10296_v54 = vrot.slane %v10288_v60, %v23502_v22  ;;  %v10303_v16 = vrot.slane %v10289_v24, %v23502_v22  ;;  %v10160_v26 = vrot.slane %v10152_v4, %v23502_v22  ;;  %v10167_v14 = vrot.slane %v10153_v37, %v23502_v22  ;;  %15258 = vmatpush3.bf16.msra.mxu0 %v15561_v6 }
 0x72c   : > { %v11052_v38 = vcombine.low %v20735_v40, %v20738_v11  ;;  %v11068_v56 = vcombine.low %v20741_v51, %v20744_v62  ;;  %v11120_v23 = vcombine.low %v20797_v21, %v20800_v15  ;;  %v11136_v43 = vcombine.low %v20803_v33, %v20806_v32  ;;  %15259 = vmatprep.subr.bf16.mxu0 %v15562_v12 }
 0x72d   : > { %v10304_v60 = vcombine.low %v20701_v48, %v10296_v54  ;;  %v10305_v24 = vcombine.high %v20701_v48, %v10296_v54  ;;  %v10320_v4 = vcombine.low %v20704_v2, %v10303_v16  ;;  %v10321_v37 = vcombine.high %v20704_v2, %v10303_v16 }
 0x72e   : > { %v20900_v28 = vpop.f32.mrb[68].mxu0  ;;  %v10168_v58 = vcombine.low %v20707_v63, %v10160_v26  ;;  %v10169_v0 = vcombine.high %v20707_v63, %v10160_v26  ;;  %v10184_v18 = vcombine.low %v20710_v10, %v10167_v14  ;;  %v10185_v34 = vcombine.high %v20710_v10, %v10167_v14 }
 0x72f   : > { %v20906_v44 = vpop.f32.mrb[69].mxu0  ;;  %v10312_v48 = vrot.slane %v10304_v60, %v23503_v55  ;;  %v10319_v9 = vrot.slane %v10305_v24, %v23503_v55  ;;  %v10328_v2 = vrot.slane %v10320_v4, %v23503_v55  ;;  %v10335_v49 = vrot.slane %v10321_v37, %v23503_v55  ;;  %15260 = vmatpush3.bf16.msra.mxu0 %v15562_v12 }
 0x730   : > { %v20912_v6 = vpop.f32.mrb[70].mxu0  ;;  %v10176_v45 = vrot.slane %v10168_v58, %v23503_v55  ;;  %v10183_v63 = vrot.slane %v10169_v0, %v23503_v55  ;;  %v10192_v61 = vrot.slane %v10184_v18, %v23503_v55  ;;  %v10199_v10 = vrot.slane %v10185_v34, %v23503_v55 }
 0x731   : > { %v20918_v7 = vpop.f32.mrb[71].mxu0  ;;  %v11360_v54 = vcombine.low %v10312_v48, %v10319_v9  ;;  %v14574_v16 = vcombine.high %v10312_v48, %v10319_v9  ;;  %v11376_v26 = vcombine.low %v10328_v2, %v10335_v49  ;;  %v14575_v14 = vcombine.high %v10328_v2, %v10335_v49  ;;  %v15563_v48 = vld [vmem:[%s16451_s23 + $0x20] sm:$0xff]  }
 0x732   : > { %23504 = vst [vmem:[#allocation36_spill] sm:$0xff] %v20918_v7  ;;  %v11224_v60 = vcombine.low %v10176_v45, %v10183_v63  ;;  %v14570_v24 = vcombine.high %v10176_v45, %v10183_v63  ;;  %v11240_v4 = vcombine.low %v10192_v61, %v10199_v10  ;;  %v14571_v37 = vcombine.high %v10192_v61, %v10199_v10 }
 0x733   : > { %v20921_v58 = vrot.slane %v11360_v54, %v23502_v22  ;;  %v20924_v0 = vrot.slane %v14574_v16, %v23502_v22  ;;  %v20927_v18 = vrot.slane %v11376_v26, %v23502_v22  ;;  %v20930_v34 = vrot.slane %v14575_v14, %v23502_v22  ;;  %15261 = vmatprep.subr.bf16.mxu0 %v15563_v48 }
 0x734   : > { %v20934_v9 = vrot.slane %v11224_v60, %v23502_v22  ;;  %v20937_v12 = vrot.slane %v14570_v24, %v23502_v22  ;;  %v20940_v2 = vrot.slane %v11240_v4, %v23502_v22  ;;  %v20943_v49 = vrot.slane %v14571_v37, %v23502_v22  ;;  %15262 = vmatpush3.bf16.msra.mxu0 %v15563_v48  ;;  %v15564_v37 = vld [vmem:[%s16451_s23 + $0x28] sm:$0xff]  }
 0x735   : > { %v20946_v45 = vrot.slane %v11052_v38, %v23503_v55  ;;  %v20949_v63 = vrot.slane %v11068_v56, %v23503_v55  ;;  %v20952_v61 = vrot.slane %v11120_v23, %v23503_v55  ;;  %v20955_v10 = vrot.slane %v11136_v43, %v23503_v55  ;;  %15263 = vmatprep.subr.bf16.mxu0 %v15564_v37 }
 0x736   : > { %v20957_v54 = vpop.f32.mrb[84].mxu1  ;;  %v10916_v16 = vcombine.low %v20749_v39, %v20752_v29  ;;  %v10932_v38 = vcombine.low %v20755_v17, %v20758_v50  ;;  %v10984_v56 = vcombine.low %v20809_v47, %v20812_v1  ;;  %v11000_v26 = vcombine.low %v20815_v41, %v20818_v19 }
 0x737   : > { %23505 = vst [vmem:[#allocation50_spill] sm:$0xff] %v20957_v54  ;;  %v20967_v23 = vpop.f32.mrb[85].mxu1  ;;  %v11085_v43 = vcombine.high %v20946_v45, %v20949_v63  ;;  %v11153_v14 = vcombine.high %v20952_v61, %v20955_v10  ;;  %v11053_v60 = vcombine.high %v20735_v40, %v20738_v11  ;;  %v11069_v24 = vcombine.high %v20741_v51, %v20744_v62 }
 0x738   : > { %23506 = vst [vmem:[#allocation56_spill] sm:$0xff] %v20967_v23  ;;  %v20977_v4 = vpop.f32.mrb[86].mxu1  ;;  %v20981_v36 = vrot.slane %v10916_v16, %v23503_v55  ;;  %v20984_v48 = vrot.slane %v10932_v38, %v23503_v55  ;;  %v20987_v23 = vrot.slane %v10984_v56, %v23503_v55  ;;  %v20990_v54 = vrot.slane %v11000_v26, %v23503_v55 }
 0x739   : > { %v20992_v7 = vpop.f32.mrb[87].mxu1  ;;  %v15407_v40 = vpack.i.bf16 %v11153_v14, %v11085_v43  ;;  %v11067_v11 = vrot.slane %v11053_v60, %v23503_v55  ;;  %v11083_v51 = vrot.slane %v11069_v24, %v23503_v55  ;;  %v11121_v62 = vcombine.high %v20797_v21, %v20800_v15  ;;  %15264 = vmatpush3.bf16.msra.mxu0 %v15564_v37 }
 0x73a   : > { %23507 = vst [vmem:[#allocation29_spill] sm:$0xff] %v20992_v7  ;;  %v10949_v16 = vcombine.high %v20981_v36, %v20984_v48  ;;  %v11017_v38 = vcombine.high %v20987_v23, %v20990_v54  ;;  %v11137_v56 = vcombine.high %v20803_v33, %v20806_v32  ;;  %v10917_v26 = vcombine.high %v20749_v39, %v20752_v29 }
 0x73b   : > { %15408 = vrot.lane.b32.xlu1 %v15407_v40, %s16249_s12  ;;  %v11086_v43 = vcombine.low %v11067_v11, %v11083_v51  ;;  %v11135_v21 = vrot.slane %v11121_v62, %v23503_v55  ;;  %v10933_v15 = vcombine.high %v20755_v17, %v20758_v50  ;;  %v10985_v14 = vcombine.high %v20809_v47, %v20812_v1  ;;  %v15565_v50 = vld [vmem:[%s16451_s23 + $0x30] sm:$0xff]  }
 0x73c   : > { %v15417_v60 = vpack.i.bf16 %v11017_v38, %v10949_v16  ;;  %v11151_v24 = vrot.slane %v11137_v56, %v23503_v55  ;;  %v10931_v33 = vrot.slane %v10917_v26, %v23503_v55  ;;  %v11001_v39 = vcombine.high %v20815_v41, %v20818_v19  ;;  %15265 = vmatprep.subr.bf16.mxu0 %v15565_v50 }
 0x73d   : > { %v10947_v29 = vrot.slane %v10933_v15, %v23503_v55  ;;  %v10999_v32 = vrot.slane %v10985_v14, %v23503_v55  ;;  %v11188_v37 = vcombine.low %v20872_v57, %v20875_v5  ;;  %v11204_v17 = vcombine.low %v20878_v46, %v20881_v53  ;;  %15266 = vmatpush3.bf16.msra.mxu0 %v15565_v50 }
 0x73e   : > { %15418 = vrot.lane.b32.xlu0 %v15417_v60, %s16249_s12  ;;  %v11154_v47 = vcombine.low %v11135_v21, %v11151_v24  ;;  %v11015_v1 = vrot.slane %v11001_v39, %v23503_v55  ;;  %v11256_v40 = vcombine.low %v20934_v9, %v20937_v12  ;;  %v11272_v41 = vcombine.low %v20940_v2, %v20943_v49 }
 0x73f   : > { %v10951_v19 = vcombine.high %v10931_v33, %v10947_v29  ;;  %v10950_v62 = vcombine.low %v10931_v33, %v10947_v29  ;;  %v21030_v16 = vrot.slane %v11188_v37, %v23503_v55  ;;  %v21033_v38 = vrot.slane %v11204_v17, %v23503_v55  ;;  %v15566_v37 = vld [vmem:[%s16451_s23 + $0x38] sm:$0xff]   ;;  %s22725_s23 = scalar_lea.hbm %s23610_s14, %s14676_s24 }
 0x740   : > { %v15412_v56 = vpack.i.bf16 %v11154_v47, %v11086_v43  ;;  %v11019_v26 = vcombine.high %v10999_v32, %v11015_v1  ;;  %v11018_v15 = vcombine.low %v10999_v32, %v11015_v1  ;;  %v21036_v14 = vrot.slane %v11256_v40, %v23503_v55  ;;  %15267 = vmatprep.subr.bf16.mxu0 %v15566_v37 }
 0x741   : > { %v11221_v60 = vcombine.high %v21030_v16, %v21033_v38  ;;  %v21041_v39 = vrot.slane %v11272_v41, %v23503_v55  ;;  %v11087_v33 = vcombine.high %v11067_v11, %v11083_v51  ;;  %v11155_v29 = vcombine.high %v11135_v21, %v11151_v24  ;;  %15268 = vmatpush3.bf16.msra.mxu0 %v15566_v37 }
 0x742   : > { %15413 = vrot.lane.b32.xlu1 %v15412_v56, %s16247_s2  ;;  %v15427_v17 = vpack.i.bf16 %v11019_v26, %v10951_v19  ;;  %v15422_v7 = vpack.i.bf16 %v11018_v15, %v10950_v62  ;;  %v11189_v43 = vcombine.high %v20872_v57, %v20875_v5  ;;  %v11205_v32 = vcombine.high %v20878_v46, %v20881_v53 }
 0x743   : > { %v11289_v50 = vcombine.high %v21036_v14, %v21041_v39  ;;  %v15432_v47 = vpack.i.bf16 %v11155_v29, %v11087_v33  ;;  %v11257_v1 = vcombine.high %v20934_v9, %v20937_v12  ;;  %v11273_v11 = vcombine.high %v20940_v2, %v20943_v49 }
 0x744   : > { %15428 = vrot.lane.b32.xlu0 %v15427_v17, %s16248_s10  ;;  %v11203_v51 = vrot.slane %v11189_v43, %v23503_v55  ;;  %v11219_v57 = vrot.slane %v11205_v32, %v23503_v55  ;;  %v11324_v5 = vcombine.low %v20860_v42, %v20863_v30  ;;  %v11340_v46 = vcombine.low %v20866_v3, %v20869_v52 }
 0x745   : > { %v15447_v53 = vpack.i.bf16 %v11289_v50, %v11221_v60  ;;  %v11271_v21 = vrot.slane %v11257_v1, %v23503_v55  ;;  %v11287_v9 = vrot.slane %v11273_v11, %v23503_v55  ;;  %v11392_v12 = vcombine.low %v20921_v58, %v20924_v0 }
 0x746   : > { %15423 = vrot.lane.b32.xlu1 %v15422_v7, %s16247_s2  ;;  %v11222_v2 = vcombine.low %v11203_v51, %v11219_v57  ;;  %v21068_v49 = vrot.slane %v11324_v5, %v23503_v55  ;;  %v21071_v24 = vrot.slane %v11340_v46, %v23503_v55  ;;  %v11408_v40 = vcombine.low %v20927_v18, %v20930_v34 }
 0x747   : > { %v11290_v41 = vcombine.low %v11271_v21, %v11287_v9  ;;  %v21076_v19 = vrot.slane %v11392_v12, %v23503_v55  ;;  %v11223_v62 = vcombine.high %v11203_v51, %v11219_v57  ;;  %v11291_v56 = vcombine.high %v11271_v21, %v11287_v9 }
 0x748   : > { %23508 = vst [vmem:[#allocation44_spill] sm:$0xff] %v21068_v49  ;;  %23509 = vst [vmem:[#allocation41_spill] sm:$0xff] %v21071_v24  ;;  %15448 = vrot.lane.b32.xlu0 %v15447_v53, %s16249_s12  ;;  %v11357_v7 = vcombine.high %v21068_v49, %v21071_v24  ;;  %v21082_v26 = vrot.slane %v11408_v40, %v23503_v55  ;;  %v11325_v15 = vcombine.high %v20860_v42, %v20863_v30  ;;  %v15231_v33 = vpop.f32.mrb[72].mxu0 }
 0x749   : > { %23510 = vst [vmem:[#allocation49_spill] sm:$0xff] %v21076_v19  ;;  %v11341_v60 = vcombine.high %v20866_v3, %v20869_v52  ;;  %v15452_v29 = vpack.i.bf16 %v11290_v41, %v11222_v2  ;;  %v15457_v37 = vpack.i.bf16 %v11291_v56, %v11223_v62  ;;  %v11393_v17 = vcombine.high %v20921_v58, %v20924_v0  ;;  %v9688_v32 = vpop.f32.mrb[73].mxu0 }
 0x74a   : > { %23511 = vst [vmem:[#allocation48_spill] sm:$0xff] %v21082_v26  ;;  %v11409_v43 = vcombine.high %v20927_v18, %v20930_v34  ;;  %15433 = vrot.lane.b32.xlu1 %v15432_v47, %s16248_s10  ;;  %v11425_v50 = vcombine.high %v21076_v19, %v21082_v26  ;;  %v11339_v42 = vrot.slane %v11325_v15, %v23503_v55  ;;  %v15232_v52 = vpop.f32.mrb[74].mxu0 }
 0x74b   : > { %v11355_v30 = vrot.slane %v11341_v60, %v23503_v55  ;;  %v10476_v3 = vcombine.low %v20760_v20, %v15231_v33  ;;  %v11407_v1 = vrot.slane %v11393_v17, %v23503_v55  ;;  %v10477_v0 = vcombine.high %v20760_v20, %v15231_v33  ;;  %v9691_v34 = vpop.f32.mrb[75].mxu0 }
 0x74c   : > { %v11423_v58 = vrot.slane %v11409_v43, %v23503_v55  ;;  %v10340_v18 = vcombine.low %v20766_v31, %v9688_v32  ;;  %15453 = vrot.lane.b32.xlu0 %v15452_v29, %s16247_s2  ;;  %v15437_v47 = vpack.i.bf16 %v11425_v50, %v11357_v7  ;;  %v10341_v46 = vcombine.high %v20766_v31, %v9688_v32 }
 0x74d   : > { %v11358_v11 = vcombine.low %v11339_v42, %v11355_v30  ;;  %v11359_v51 = vcombine.high %v11339_v42, %v11355_v30  ;;  %v10544_v53 = vcombine.low %v20776_v13, %v15232_v52  ;;  %v10545_v21 = vcombine.high %v20776_v13, %v15232_v52 }
 0x74e   : > { %v11426_v57 = vcombine.low %v11407_v1, %v11423_v58  ;;  %v11427_v5 = vcombine.high %v11407_v1, %v11423_v58  ;;  %15438 = vrot.lane.b32.xlu1 %v15437_v47, %s16249_s12  ;;  %v10408_v20 = vcombine.low %v20782_v35, %v9691_v34  ;;  %v10409_v2 = vcombine.high %v20782_v35, %v9691_v34 }
 0x74f   : > { %v10484_v15 = vrot.slane %v10476_v3, %v23502_v22  ;;  %v10491_v60 = vrot.slane %v10477_v0, %v23502_v22  ;;  %v10348_v33 = vrot.slane %v10340_v18, %v23502_v22  ;;  %v10355_v29 = vrot.slane %v10341_v46, %v23502_v22 }
 0x750   : > { %v15442_v9 = vpack.i.bf16 %v11426_v57, %v11358_v11  ;;  %v15462_v12 = vpack.i.bf16 %v11427_v5, %v11359_v51  ;;  %15458 = vrot.lane.b32.xlu0 %v15457_v37, %s16248_s10  ;;  %v21133_v17 = vrot.slane %v10544_v53, %v23502_v22  ;;  %v21136_v43 = vrot.slane %v10545_v21, %v23502_v22 }
 0x751   : > { %v21141_v30 = vrot.slane %v10408_v20, %v23502_v22  ;;  %v21144_v3 = vrot.slane %v10409_v2, %v23502_v22 }
 0x752   : > { %15443 = vrot.lane.b32.xlu1 %v15442_v9, %s16247_s2 }
 0x756   : > { %15463 = vrot.lane.b32.xlu1 %v15462_v12, %s16248_s10 }
 0x757   : > { %v15247_v37 = vpop.f32.mrb[88].mxu1 }
 0x758   : > { %v10492_v32 = vcombine.low %v20832_v59, %v15247_v37  ;;  %v10493_v50 = vcombine.high %v20832_v59, %v15247_v37  ;;  %v9765_v42 = vpop.f32.mrb[89].mxu1 }
 0x759   : > { %v10356_v52 = vcombine.low %v20839_v27, %v9765_v42  ;;  %v10357_v1 = vcombine.high %v20839_v27, %v9765_v42  ;;  %v15248_v58 = vpop.f32.mrb[90].mxu1 }
 0x75a   : > { %v10500_v0 = vrot.slane %v10492_v32, %v23502_v22  ;;  %v10507_v18 = vrot.slane %v10493_v50, %v23502_v22  ;;  %v10560_v34 = vcombine.low %v20845_v8, %v15248_v58  ;;  %v10561_v59 = vcombine.high %v20845_v8, %v15248_v58  ;;  %v9768_v47 = vpop.f32.mrb[91].mxu1 }
 0x75b   : > { %v10364_v11 = vrot.slane %v10356_v52, %v23502_v22  ;;  %v10371_v51 = vrot.slane %v10357_v1, %v23502_v22  ;;  %v10424_v57 = vcombine.low %v20851_v25, %v9768_v47  ;;  %v10425_v5 = vcombine.high %v20851_v25, %v9768_v47 }
 0x75c   : > { %v10508_v46 = vcombine.low %v10484_v15, %v10500_v0  ;;  %v10509_v27 = vcombine.high %v10484_v15, %v10500_v0  ;;  %v10524_v53 = vcombine.low %v10491_v60, %v10507_v18  ;;  %v10525_v21 = vcombine.high %v10491_v60, %v10507_v18 }
 0x75d   : > { %v10372_v20 = vcombine.low %v10348_v33, %v10364_v11  ;;  %v10373_v9 = vcombine.high %v10348_v33, %v10364_v11  ;;  %v10388_v12 = vcombine.low %v10355_v29, %v10371_v51  ;;  %v10389_v2 = vcombine.high %v10355_v29, %v10371_v51 }
 0x75e   : > { %v10516_v37 = vrot.slane %v10508_v46, %v23503_v55  ;;  %v10523_v8 = vrot.slane %v10509_v27, %v23503_v55  ;;  %v10532_v32 = vrot.slane %v10524_v53, %v23503_v55  ;;  %v10539_v50 = vrot.slane %v10525_v21, %v23503_v55 }
 0x75f   : > { %v10380_v42 = vrot.slane %v10372_v20, %v23503_v55  ;;  %v10387_v25 = vrot.slane %v10373_v9, %v23503_v55  ;;  %v10396_v15 = vrot.slane %v10388_v12, %v23503_v55  ;;  %v10403_v60 = vrot.slane %v10389_v2, %v23503_v55 }
 0x760   : > { %v11564_v52 = vcombine.low %v10516_v37, %v10523_v8  ;;  %v14580_v33 = vcombine.high %v10516_v37, %v10523_v8  ;;  %v11580_v1 = vcombine.low %v10532_v32, %v10539_v50  ;;  %v14581_v29 = vcombine.high %v10532_v32, %v10539_v50 }
 0x761   : > { %v15235_v58 = vpop.f32.mrb[76].mxu0  ;;  %v11428_v0 = vcombine.low %v10380_v42, %v10387_v25  ;;  %v14576_v18 = vcombine.high %v10380_v42, %v10387_v25  ;;  %v11444_v47 = vcombine.low %v10396_v15, %v10403_v60  ;;  %v14577_v11 = vcombine.high %v10396_v15, %v10403_v60 }
 0x762   : > { %v9704_v51 = vpop.f32.mrb[77].mxu0  ;;  %v21165_v46 = vrot.slane %v11564_v52, %v23502_v22  ;;  %v21168_v27 = vrot.slane %v14580_v33, %v23502_v22  ;;  %v21171_v53 = vrot.slane %v11580_v1, %v23502_v22  ;;  %v21174_v21 = vrot.slane %v14581_v29, %v23502_v22 }
 0x763   : > { %v21176_v20 = vpop.f32.mrb[78].mxu0  ;;  %v21179_v9 = vrot.slane %v11428_v0, %v23502_v22  ;;  %v21182_v12 = vrot.slane %v14576_v18, %v23502_v22  ;;  %v21185_v2 = vrot.slane %v11444_v47, %v23502_v22  ;;  %v21188_v37 = vrot.slane %v14577_v11, %v23502_v22 }
 0x764   : > { %v9707_v8 = vpop.f32.mrb[79].mxu0  ;;  %v10568_v32 = vrot.slane %v10560_v34, %v23502_v22  ;;  %v10575_v50 = vrot.slane %v10561_v59, %v23502_v22  ;;  %v10432_v42 = vrot.slane %v10424_v57, %v23502_v22  ;;  %v10439_v25 = vrot.slane %v10425_v5, %v23502_v22 }
 0x765   : > { %v10748_v15 = vcombine.low %v20900_v28, %v15235_v58  ;;  %v10749_v60 = vcombine.high %v20900_v28, %v15235_v58  ;;  %v10612_v52 = vcombine.low %v20906_v44, %v9704_v51  ;;  %v10613_v33 = vcombine.high %v20906_v44, %v9704_v51 }
 0x766   : > { %v10576_v1 = vcombine.low %v21133_v17, %v10568_v32  ;;  %v10577_v29 = vcombine.high %v21133_v17, %v10568_v32  ;;  %v10592_v34 = vcombine.low %v21136_v43, %v10575_v50  ;;  %v10593_v59 = vcombine.high %v21136_v43, %v10575_v50 }
 0x767   : > { %v10440_v57 = vcombine.low %v21141_v30, %v10432_v42  ;;  %v10441_v5 = vcombine.high %v21141_v30, %v10432_v42  ;;  %v10456_v0 = vcombine.low %v21144_v3, %v10439_v25  ;;  %v10457_v28 = vcombine.high %v21144_v3, %v10439_v25 }
 0x768   : > { %v10584_v58 = vrot.slane %v10576_v1, %v23503_v55  ;;  %v10591_v44 = vrot.slane %v10577_v29, %v23503_v55  ;;  %v10600_v18 = vrot.slane %v10592_v34, %v23503_v55  ;;  %v10607_v17 = vrot.slane %v10593_v59, %v23503_v55 }
 0x769   : > { %v15251_v47 = vpop.f32.mrb[92].mxu1  ;;  %v10448_v11 = vrot.slane %v10440_v57, %v23503_v55  ;;  %v10455_v43 = vrot.slane %v10441_v5, %v23503_v55  ;;  %v10464_v51 = vrot.slane %v10456_v0, %v23503_v55  ;;  %v10471_v30 = vrot.slane %v10457_v28, %v23503_v55 }
 0x76a   : > { %v9781_v32 = vpop.f32.mrb[93].mxu1  ;;  %v11632_v50 = vcombine.low %v10584_v58, %v10591_v44  ;;  %v14582_v3 = vcombine.high %v10584_v58, %v10591_v44  ;;  %v11648_v42 = vcombine.low %v10600_v18, %v10607_v17  ;;  %v14583_v25 = vcombine.high %v10600_v18, %v10607_v17 }
 0x76b   : > { %v21214_v1 = vpop.f32.mrb[94].mxu1  ;;  %v11496_v29 = vcombine.low %v10448_v11, %v10455_v43  ;;  %v14578_v34 = vcombine.high %v10448_v11, %v10455_v43  ;;  %v11512_v7 = vcombine.low %v10464_v51, %v10471_v30  ;;  %v14579_v59 = vcombine.high %v10464_v51, %v10471_v30 }
 0x76c   : > { %v21216_v56 = vpop.f32.mrb[95].mxu1  ;;  %v21219_v57 = vrot.slane %v11632_v50, %v23502_v22  ;;  %v21222_v5 = vrot.slane %v14582_v3, %v23502_v22  ;;  %v21225_v0 = vrot.slane %v11648_v42, %v23502_v22  ;;  %v21228_v28 = vrot.slane %v14583_v25, %v23502_v22  ;;  %v23512_v42 = vld [vmem:[#allocation36_spill] sm:$0xff] }
 0x76d   : > { %v21231_v58 = vrot.slane %v11496_v29, %v23502_v22  ;;  %v21234_v44 = vrot.slane %v14578_v34, %v23502_v22  ;;  %v21237_v18 = vrot.slane %v11512_v7, %v23502_v22  ;;  %v21240_v17 = vrot.slane %v14579_v59, %v23502_v22  ;;  %v23513_v29 = vld [vmem:[#allocation50_spill] sm:$0xff]  ;;  %v23514_v59 = vld [vmem:[#allocation56_spill] sm:$0xff] }
 0x76e   : > { %v10756_v11 = vrot.slane %v10748_v15, %v23502_v22  ;;  %v10763_v43 = vrot.slane %v10749_v60, %v23502_v22  ;;  %v10620_v51 = vrot.slane %v10612_v52, %v23502_v22  ;;  %v10627_v30 = vrot.slane %v10613_v33, %v23502_v22 }
 0x76f   : > { %v10816_v50 = vcombine.low %v20912_v6, %v21176_v20  ;;  %v10817_v3 = vcombine.high %v20912_v6, %v21176_v20  ;;  %v10680_v7 = vcombine.low %v23512_v42, %v9707_v8  ;;  %v10681_v25 = vcombine.high %v23512_v42, %v9707_v8 }
 0x770   : > { %v10764_v34 = vcombine.low %v23513_v29, %v15251_v47  ;;  %v10765_v15 = vcombine.high %v23513_v29, %v15251_v47  ;;  %v10628_v60 = vcombine.low %v23514_v59, %v9781_v32  ;;  %v10629_v52 = vcombine.high %v23514_v59, %v9781_v32 }
 0x771   : > { %v10824_v33 = vrot.slane %v10816_v50, %v23502_v22  ;;  %v21258_v62 = vrot.slane %v10817_v3, %v23502_v22  ;;  %v21261_v35 = vrot.slane %v10680_v7, %v23502_v22  ;;  %v21264_v6 = vrot.slane %v10681_v25, %v23502_v22  ;;  %v23515_v3 = vld [vmem:[#allocation29_spill] sm:$0xff] }
 0x772   : > { %v10772_v20 = vrot.slane %v10764_v34, %v23502_v22  ;;  %v10779_v8 = vrot.slane %v10765_v15, %v23502_v22  ;;  %v10636_v47 = vrot.slane %v10628_v60, %v23502_v22  ;;  %v10643_v42 = vrot.slane %v10629_v52, %v23502_v22 }
 0x773   : > { %v10832_v32 = vcombine.low %v20977_v4, %v21214_v1  ;;  %v10833_v50 = vcombine.high %v20977_v4, %v21214_v1  ;;  %v10696_v7 = vcombine.low %v23515_v3, %v21216_v56  ;;  %v10697_v25 = vcombine.high %v23515_v3, %v21216_v56 }
 0x774   : > { %v10780_v29 = vcombine.low %v10756_v11, %v10772_v20  ;;  %v10781_v34 = vcombine.high %v10756_v11, %v10772_v20  ;;  %v10796_v59 = vcombine.low %v10763_v43, %v10779_v8  ;;  %v10797_v15 = vcombine.high %v10763_v43, %v10779_v8 }
 0x775   : > { %v10644_v31 = vcombine.low %v10620_v51, %v10636_v47  ;;  %v10645_v60 = vcombine.high %v10620_v51, %v10636_v47  ;;  %v10660_v40 = vcombine.low %v10627_v30, %v10643_v42  ;;  %v10661_v52 = vcombine.high %v10627_v30, %v10643_v42 }
 0x776   : > { %v10788_v41 = vrot.slane %v10780_v29, %v23503_v55  ;;  %v10795_v13 = vrot.slane %v10781_v34, %v23503_v55  ;;  %v10804_v4 = vrot.slane %v10796_v59, %v23503_v55  ;;  %v10811_v1 = vrot.slane %v10797_v15, %v23503_v55 }
 0x777   : > { %v10652_v26 = vrot.slane %v10644_v31, %v23503_v55  ;;  %v10659_v56 = vrot.slane %v10645_v60, %v23503_v55  ;;  %v10668_v11 = vrot.slane %v10660_v40, %v23503_v55  ;;  %v10675_v43 = vrot.slane %v10661_v52, %v23503_v55 }
 0x778   : > { %v11836_v20 = vcombine.low %v10788_v41, %v10795_v13  ;;  %v14588_v51 = vcombine.high %v10788_v41, %v10795_v13  ;;  %v11852_v8 = vcombine.low %v10804_v4, %v10811_v1  ;;  %v14589_v30 = vcombine.high %v10804_v4, %v10811_v1 }
 0x779   : > { %v11700_v47 = vcombine.low %v10652_v26, %v10659_v56  ;;  %v14584_v42 = vcombine.high %v10652_v26, %v10659_v56  ;;  %v11716_v3 = vcombine.low %v10668_v11, %v10675_v43  ;;  %v14585_v29 = vcombine.high %v10668_v11, %v10675_v43 }
 0x77a   : > { %v21287_v34 = vrot.slane %v11836_v20, %v23502_v22  ;;  %v21290_v59 = vrot.slane %v14588_v51, %v23502_v22  ;;  %v21293_v31 = vrot.slane %v11852_v8, %v23502_v22  ;;  %v21296_v40 = vrot.slane %v14589_v30, %v23502_v22 }
 0x77b   : > { %v21299_v41 = vrot.slane %v11700_v47, %v23502_v22  ;;  %v21302_v13 = vrot.slane %v14584_v42, %v23502_v22  ;;  %v21305_v26 = vrot.slane %v11716_v3, %v23502_v22  ;;  %v21308_v15 = vrot.slane %v14585_v29, %v23502_v22 }
 0x77c   : > { %v10840_v60 = vrot.slane %v10832_v32, %v23502_v22  ;;  %v10847_v52 = vrot.slane %v10833_v50, %v23502_v22  ;;  %v10704_v4 = vrot.slane %v10696_v7, %v23502_v22  ;;  %v10711_v1 = vrot.slane %v10697_v25, %v23502_v22 }
 0x77d   : > { %v11596_v56 = vcombine.low %v21165_v46, %v21168_v27  ;;  %v11612_v11 = vcombine.low %v21171_v53, %v21174_v21  ;;  %v11664_v43 = vcombine.low %v21219_v57, %v21222_v5  ;;  %v11680_v20 = vcombine.low %v21225_v0, %v21228_v28 }
 0x77e   : > { %v10848_v51 = vcombine.low %v10824_v33, %v10840_v60  ;;  %v10849_v32 = vcombine.high %v10824_v33, %v10840_v60  ;;  %v10864_v50 = vcombine.low %v21258_v62, %v10847_v52  ;;  %v10865_v7 = vcombine.high %v21258_v62, %v10847_v52 }
 0x77f   : > { %v10712_v25 = vcombine.low %v21261_v35, %v10704_v4  ;;  %v10713_v8 = vcombine.high %v21261_v35, %v10704_v4  ;;  %v10728_v30 = vcombine.low %v21264_v6, %v10711_v1  ;;  %v10729_v47 = vcombine.high %v21264_v6, %v10711_v1 }
 0x780   : > { %v10856_v42 = vrot.slane %v10848_v51, %v23503_v55  ;;  %v10863_v3 = vrot.slane %v10849_v32, %v23503_v55  ;;  %v10872_v29 = vrot.slane %v10864_v50, %v23503_v55  ;;  %v10879_v33 = vrot.slane %v10865_v7, %v23503_v55 }
 0x781   : > { %v10720_v60 = vrot.slane %v10712_v25, %v23503_v55  ;;  %v10727_v62 = vrot.slane %v10713_v8, %v23503_v55  ;;  %v10736_v52 = vrot.slane %v10728_v30, %v23503_v55  ;;  %v10743_v35 = vrot.slane %v10729_v47, %v23503_v55 }
 0x782   : > { %v11904_v4 = vcombine.low %v10856_v42, %v10863_v3  ;;  %v14590_v19 = vcombine.high %v10856_v42, %v10863_v3  ;;  %v11920_v24 = vcombine.low %v10872_v29, %v10879_v33  ;;  %v14591_v6 = vcombine.high %v10872_v29, %v10879_v33 }
 0x783   : > { %v11768_v1 = vcombine.low %v10720_v60, %v10727_v62  ;;  %v14586_v51 = vcombine.high %v10720_v60, %v10727_v62  ;;  %v11784_v49 = vcombine.low %v10736_v52, %v10743_v35  ;;  %v14587_v32 = vcombine.high %v10736_v52, %v10743_v35 }
 0x784   : > { %v21337_v50 = vrot.slane %v11904_v4, %v23502_v22  ;;  %v21340_v7 = vrot.slane %v14590_v19, %v23502_v22  ;;  %v21343_v25 = vrot.slane %v11920_v24, %v23502_v22  ;;  %v21346_v8 = vrot.slane %v14591_v6, %v23502_v22 }
 0x785   : > { %v21349_v30 = vrot.slane %v11768_v1, %v23502_v22  ;;  %v21352_v47 = vrot.slane %v14586_v51, %v23502_v22  ;;  %v21355_v42 = vrot.slane %v11784_v49, %v23502_v22  ;;  %v21358_v3 = vrot.slane %v14587_v32, %v23502_v22 }
 0x786   : > { %v21361_v19 = vrot.slane %v11596_v56, %v23503_v55  ;;  %v21364_v24 = vrot.slane %v11612_v11, %v23503_v55  ;;  %v21367_v29 = vrot.slane %v11664_v43, %v23503_v55  ;;  %v21370_v33 = vrot.slane %v11680_v20, %v23503_v55 }
 0x787   : > { %v11460_v60 = vcombine.low %v21179_v9, %v21182_v12  ;;  %v11476_v49 = vcombine.low %v21185_v2, %v21188_v37  ;;  %v11528_v22 = vcombine.low %v21231_v58, %v21234_v44  ;;  %v11544_v56 = vcombine.low %v21237_v18, %v21240_v17 }
 0x788   : > { %v11629_v11 = vcombine.high %v21361_v19, %v21364_v24  ;;  %v11697_v43 = vcombine.high %v21367_v29, %v21370_v33  ;;  %v11597_v20 = vcombine.high %v21165_v46, %v21168_v27  ;;  %v11613_v62 = vcombine.high %v21171_v53, %v21174_v21 }
 0x789   : > { %v21389_v52 = vrot.slane %v11460_v60, %v23503_v55  ;;  %v21392_v35 = vrot.slane %v11476_v49, %v23503_v55  ;;  %v21395_v4 = vrot.slane %v11528_v22, %v23503_v55  ;;  %v21398_v6 = vrot.slane %v11544_v56, %v23503_v55 }
 0x78a   : > { %v15467_v1 = vpack.i.bf16 %v11697_v43, %v11629_v11  ;;  %v11611_v51 = vrot.slane %v11597_v20, %v23503_v55  ;;  %v11627_v46 = vrot.slane %v11613_v62, %v23503_v55  ;;  %v11665_v27 = vcombine.high %v21219_v57, %v21222_v5 }
 0x78b   : > { %v11493_v53 = vcombine.high %v21389_v52, %v21392_v35  ;;  %v11561_v21 = vcombine.high %v21395_v4, %v21398_v6  ;;  %v11681_v32 = vcombine.high %v21225_v0, %v21228_v28  ;;  %v11461_v60 = vcombine.high %v21179_v9, %v21182_v12 }
 0x78c   : > { %15468 = vrot.lane.b32.xlu1 %v15467_v1, %s16249_s12  ;;  %v11630_v49 = vcombine.low %v11611_v51, %v11627_v46  ;;  %v11679_v22 = vrot.slane %v11665_v27, %v23503_v55  ;;  %v11477_v57 = vcombine.high %v21185_v2, %v21188_v37  ;;  %v11529_v5 = vcombine.high %v21231_v58, %v21234_v44 }
 0x78d   : > { %v15477_v56 = vpack.i.bf16 %v11561_v21, %v11493_v53  ;;  %v11695_v11 = vrot.slane %v11681_v32, %v23503_v55  ;;  %v11475_v43 = vrot.slane %v11461_v60, %v23503_v55  ;;  %v11545_v0 = vcombine.high %v21237_v18, %v21240_v17 }
 0x78e   : > { %v11491_v9 = vrot.slane %v11477_v57, %v23503_v55  ;;  %v11543_v12 = vrot.slane %v11529_v5, %v23503_v55  ;;  %v11631_v28 = vcombine.high %v11611_v51, %v11627_v46  ;;  %v11868_v20 = vcombine.low %v21287_v34, %v21290_v59 }
 0x78f   : > { %15478 = vrot.lane.b32.xlu0 %v15477_v56, %s16249_s12  ;;  %v11698_v2 = vcombine.low %v11679_v22, %v11695_v11  ;;  %v11559_v37 = vrot.slane %v11545_v0, %v23503_v55  ;;  %v11699_v58 = vcombine.high %v11679_v22, %v11695_v11  ;;  %v11884_v44 = vcombine.low %v21293_v31, %v21296_v40 }
 0x790   : > { %v11494_v62 = vcombine.low %v11475_v43, %v11491_v9  ;;  %v11495_v1 = vcombine.high %v11475_v43, %v11491_v9  ;;  %v21431_v18 = vrot.slane %v11868_v20, %v23503_v55  ;;  %v11936_v17 = vcombine.low %v21337_v50, %v21340_v7 }
 0x791   : > { %v15472_v51 = vpack.i.bf16 %v11698_v2, %v11630_v49  ;;  %v11562_v46 = vcombine.low %v11543_v12, %v11559_v37  ;;  %v15492_v27 = vpack.i.bf16 %v11699_v58, %v11631_v28  ;;  %v11563_v53 = vcombine.high %v11543_v12, %v11559_v37 }
 0x792   : > { %v21436_v21 = vrot.slane %v11884_v44, %v23503_v55  ;;  %v21439_v32 = vrot.slane %v11936_v17, %v23503_v55  ;;  %v11952_v60 = vcombine.low %v21343_v25, %v21346_v8  ;;  %v11732_v22 = vcombine.low %v21299_v41, %v21302_v13 }
 0x793   : > { %15473 = vrot.lane.b32.xlu1 %v15472_v51, %s16247_s2  ;;  %v15482_v57 = vpack.i.bf16 %v11562_v46, %v11494_v62  ;;  %v15487_v5 = vpack.i.bf16 %v11563_v53, %v11495_v1  ;;  %v11748_v49 = vcombine.low %v21305_v26, %v21308_v15  ;;  %v11800_v56 = vcombine.low %v21349_v30, %v21352_v47 }
 0x794   : > { %v11901_v11 = vcombine.high %v21431_v18, %v21436_v21  ;;  %v21453_v43 = vrot.slane %v11952_v60, %v23503_v55  ;;  %v21456_v0 = vrot.slane %v11732_v22, %v23503_v55  ;;  %v11816_v9 = vcombine.low %v21355_v42, %v21358_v3 }
 0x795   : > { %15483 = vrot.lane.b32.xlu0 %v15482_v57, %s16247_s2  ;;  %v21462_v12 = vrot.slane %v11748_v49, %v23503_v55  ;;  %v21465_v28 = vrot.slane %v11800_v56, %v23503_v55  ;;  %v11869_v20 = vcombine.high %v21287_v34, %v21290_v59  ;;  %v11885_v2 = vcombine.high %v21293_v31, %v21296_v40 }
 0x796   : > { %v11969_v37 = vcombine.high %v21439_v32, %v21453_v43  ;;  %v21474_v58 = vrot.slane %v11816_v9, %v23503_v55  ;;  %v11937_v44 = vcombine.high %v21337_v50, %v21340_v7  ;;  %v11953_v62 = vcombine.high %v21343_v25, %v21346_v8 }
 0x797   : > { %15493 = vrot.lane.b32.xlu1 %v15492_v27, %s16248_s10  ;;  %v11765_v34 = vcombine.high %v21456_v0, %v21462_v12  ;;  %v11883_v59 = vrot.slane %v11869_v20, %v23503_v55  ;;  %v11899_v31 = vrot.slane %v11885_v2, %v23503_v55  ;;  %v11733_v40 = vcombine.high %v21299_v41, %v21302_v13 }
 0x798   : > { %v15497_v1 = vpack.i.bf16 %v11969_v37, %v11901_v11  ;;  %v11833_v17 = vcombine.high %v21465_v28, %v21474_v58  ;;  %v11951_v50 = vrot.slane %v11937_v44, %v23503_v55  ;;  %v11967_v7 = vrot.slane %v11953_v62, %v23503_v55 }
 0x799   : > { %15488 = vrot.lane.b32.xlu0 %v15487_v5, %s16248_s10  ;;  %v11902_v25 = vcombine.low %v11883_v59, %v11899_v31  ;;  %v11747_v8 = vrot.slane %v11733_v40, %v23503_v55  ;;  %v11749_v51 = vcombine.high %v21305_v26, %v21308_v15  ;;  %v11801_v46 = vcombine.high %v21349_v30, %v21352_v47 }
 0x79a   : > { %v15507_v41 = vpack.i.bf16 %v11833_v17, %v11765_v34  ;;  %v11970_v13 = vcombine.low %v11951_v50, %v11967_v7  ;;  %v11817_v27 = vcombine.high %v21355_v42, %v21358_v3  ;;  %v11903_v53 = vcombine.high %v11883_v59, %v11899_v31 }
 0x79b   : > { %15498 = vrot.lane.b32.xlu1 %v15497_v1, %s16249_s12  ;;  %v11763_v60 = vrot.slane %v11749_v51, %v23503_v55  ;;  %v11815_v22 = vrot.slane %v11801_v46, %v23503_v55  ;;  %v11971_v57 = vcombine.high %v11951_v50, %v11967_v7  ;;  %v11628_v5 = vcombine.low %v21361_v19, %v21364_v24 }
 0x79c   : > { %v15502_v26 = vpack.i.bf16 %v11970_v13, %v11902_v25  ;;  %v11831_v15 = vrot.slane %v11817_v27, %v23503_v55  ;;  %v11696_v30 = vcombine.low %v21367_v29, %v21370_v33  ;;  %v11492_v47 = vcombine.low %v21389_v52, %v21392_v35 }
 0x79d   : > { %15508 = vrot.lane.b32.xlu0 %v15507_v41, %s16249_s12  ;;  %v11766_v42 = vcombine.low %v11747_v8, %v11763_v60  ;;  %v15522_v3 = vpack.i.bf16 %v11971_v57, %v11903_v53  ;;  %v11767_v49 = vcombine.high %v11747_v8, %v11763_v60  ;;  %v11560_v56 = vcombine.low %v21395_v4, %v21398_v6 }
 0x79e   : > { %v11834_v11 = vcombine.low %v11815_v22, %v11831_v15  ;;  %v11835_v9 = vcombine.high %v11815_v22, %v11831_v15  ;;  %v11900_v20 = vcombine.low %v21431_v18, %v21436_v21  ;;  %v11968_v55 = vcombine.low %v21439_v32, %v21453_v43 }
 0x79f   : > { %15503 = vrot.lane.b32.xlu1 %v15502_v26, %s16247_s2  ;;  %v11764_v2 = vcombine.low %v21456_v0, %v21462_v12  ;;  %v11832_v37 = vcombine.low %v21465_v28, %v21474_v58  ;;  %v23516_v8 = vcombine.low %v20987_v23, %v20990_v54  ;;  %v23517_v46 = vcombine.low %v20981_v36, %v20984_v48  ;;  %v23529_v0 = vld [vmem:[#allocation19_spill] sm:$0xff] }
 0x7a0   : > { %v15512_v44 = vpack.i.bf16 %v11834_v11, %v11766_v42  ;;  %v15517_v62 = vpack.i.bf16 %v11835_v9, %v11767_v49  ;;  %v23518_v36 = vcombine.low %v20946_v45, %v20949_v63  ;;  %v23519_v49 = vcombine.low %v20952_v61, %v20955_v10 }
 0x7a1   : > { %v12239_v12 = vsub.s32 4, %v23529_v0 }
 0x7a2   : > { %15513 = vrot.lane.b32.xlu0 %v15512_v44, %s16247_s2 }
 0x7a3   : > { %15523 = vrot.lane.b32.xlu1 %v15522_v3, %s16248_s10 }
 0x7a6   : > { %15518 = vrot.lane.b32.xlu0 %v15517_v62, %s16248_s10 }
 0x7ad   : > { %v15409_v34 = vpop.permute.xlu1 %15408 }
 0x7ae   : > { %v15411_v50 = vunpack.i.h.bf16 %v15409_v34  ;;  %v15410_v7 = vunpack.i.l.bf16 %v15409_v34 }
 0x7b0   : > { %v15419_v59 = vpop.permute.xlu0 %15418  ;;  %v12166_v48 = vsel %vm7654_vm0, %v23518_v36, %v15410_v7  ;;  %v12167_v11 = vsel %vm7654_vm0, %v23519_v49, %v15411_v50  ;;  %v23520_v50 = vcombine.low %v21036_v14, %v21041_v39  ;;  %v23525_v36 = vld [vmem:[#allocation49_spill] sm:$0xff] }
 0x7b1   : > { %v15421_v40 = vunpack.i.h.bf16 %v15419_v59  ;;  %v15420_v1 = vunpack.i.l.bf16 %v15419_v59 }
 0x7b3   : > { %v12165_v51 = vsel %vm7654_vm0, %v23516_v8, %v15421_v40  ;;  %v12164_v41 = vsel %vm7654_vm0, %v23517_v46, %v15420_v1 }
 0x7b4   : > { %v15414_v31 = vpop.permute.xlu1 %15413 }
 0x7b5   : > { %v15416_v53 = vunpack.i.h.bf16 %v15414_v31  ;;  %v15415_v60 = vunpack.i.l.bf16 %v15414_v31 }
 0x7b6   : > { %v15429_v17 = vpop.permute.xlu0 %15428 }
 0x7b7   : > { %v15431_v22 = vunpack.i.h.bf16 %v15429_v17  ;;  %v15430_v57 = vunpack.i.l.bf16 %v15429_v17  ;;  %v12182_v62 = vsel %vm8443_vm1, %v12166_v48, %v15415_v60  ;;  %v12183_v34 = vsel %vm8443_vm1, %v12167_v11, %v15416_v53  ;;  %v23526_v48 = vld [vmem:[#allocation48_spill] sm:$0xff] }
 0x7b8   : > { %v15424_v25 = vpop.permute.xlu1 %15423  ;;  %v23527_v49 = vcombine.low %v23525_v36, %v23526_v48 }
 0x7b9   : > { %v15426_v13 = vunpack.i.h.bf16 %v15424_v25  ;;  %v15425_v27 = vunpack.i.l.bf16 %v15424_v25 }
 0x7ba   : > { %v15449_v26 = vpop.permute.xlu0 %15448 }
 0x7bb   : > { %v12180_v15 = vsel %vm8443_vm1, %v12164_v41, %v15425_v27  ;;  %v12181_v42 = vsel %vm8443_vm1, %v12165_v51, %v15426_v13  ;;  %v15451_v40 = vunpack.i.h.bf16 %v15449_v26  ;;  %v15450_v1 = vunpack.i.l.bf16 %v15449_v26 }
 0x7bc   : > { %v15434_v3 = vpop.permute.xlu1 %15433  ;;  %v12197_v54 = vsel %vm12196_vm2, %v12180_v15, %v15430_v57  ;;  %v12198_v23 = vsel %vm12196_vm2, %v12181_v42, %v15431_v22  ;;  %v23521_v51 = vcombine.low %v21030_v16, %v21033_v38  ;;  %v23522_v38 = vld [vmem:[#allocation44_spill] sm:$0xff] }
 0x7bd   : > { %v15436_v9 = vunpack.i.h.bf16 %v15434_v3  ;;  %v15435_v44 = vunpack.i.l.bf16 %v15434_v3  ;;  %v12213_v31 = vpack.c.bf16 %v12198_v23, %v12197_v54  ;;  %v12169_v8 = vsel %vm7654_vm0, %v23520_v50, %v15451_v40  ;;  %v23523_v3 = vld [vmem:[#allocation41_spill] sm:$0xff] }
 0x7be   : > { %v15454_v59 = vpop.permute.xlu0 %15453  ;;  %v12168_v46 = vsel %vm7654_vm0, %v23521_v51, %v15450_v1  ;;  %v23524_v54 = vcombine.low %v23522_v38, %v23523_v3 }
 0x7bf   : > { %v12200_v17 = vsel %vm12196_vm2, %v12183_v34, %v15436_v9  ;;  %v12199_v45 = vsel %vm12196_vm2, %v12182_v62, %v15435_v44  ;;  %v15456_v7 = vunpack.i.h.bf16 %v15454_v59  ;;  %v15455_v25 = vunpack.i.l.bf16 %v15454_v59  ;;  %15269 = vmatprep.mubr.bf16.mxu0 %v12213_v31 }
 0x7c0   : > { %v12214_v63 = vpack.c.bf16 %v12200_v17, %v12199_v45  ;;  %v15439_v61 = vpop.permute.xlu1 %15438 }
 0x7c1   : > { %v12184_v27 = vsel %vm8443_vm1, %v12168_v46, %v15455_v25  ;;  %v12185_v53 = vsel %vm8443_vm1, %v12169_v8, %v15456_v7  ;;  %v15441_v22 = vunpack.i.h.bf16 %v15439_v61  ;;  %v15440_v57 = vunpack.i.l.bf16 %v15439_v61 }
 0x7c2   : > { %v15459_v10 = vpop.permute.xlu0 %15458  ;;  %15270 = vmatmul.mubr.bf16.vlgmr.msra.gmra.mrb[80].mxu0 %v12214_v63 }
 0x7c3   : > { %v15461_v41 = vunpack.i.h.bf16 %v15459_v10  ;;  %v15460_v13 = vunpack.i.l.bf16 %v15459_v10  ;;  %v12170_v23 = vsel %vm7654_vm0, %v23524_v54, %v15440_v57  ;;  %v12171_v11 = vsel %vm7654_vm0, %v23527_v49, %v15441_v22 }
 0x7c4   : > { %v15444_v60 = vpop.permute.xlu1 %15443 }
 0x7c5   : > { %v12201_v26 = vsel %vm12196_vm2, %v12184_v27, %v15460_v13  ;;  %v12202_v14 = vsel %vm12196_vm2, %v12185_v53, %v15461_v41  ;;  %v15446_v39 = vunpack.i.h.bf16 %v15444_v60  ;;  %v15445_v15 = vunpack.i.l.bf16 %v15444_v60 }
 0x7c6   : > { %v12215_v42 = vpack.c.bf16 %v12202_v14, %v12201_v26 }
 0x7c7   : > { %v12186_v62 = vsel %vm8443_vm1, %v12170_v23, %v15445_v15  ;;  %v12187_v34 = vsel %vm8443_vm1, %v12171_v11, %v15446_v39 }
 0x7c8   : > { %15273 = vmatprep.mubr.bf16.mxu0 %v12215_v42  ;;  %v15464_v16 = vpop.permute.xlu1 %15463 }
 0x7c9   : > { %v15466_v9 = vunpack.i.h.bf16 %v15464_v16  ;;  %v15465_v44 = vunpack.i.l.bf16 %v15464_v16 }
 0x7cb   : > { %v12203_v59 = vsel %vm12196_vm2, %v12186_v62, %v15465_v44  ;;  %v12204_v31 = vsel %vm12196_vm2, %v12187_v34, %v15466_v9 }
 0x7cc   : > { %v12216_v40 = vpack.c.bf16 %v12204_v31, %v12203_v59 }
 0x7ce   : > { %15274 = vmatmul.mubr.bf16.gmra.mrb[84].mxu0 %v12216_v40 }
 0x7fe   : > { %v15469_v1 = vpop.permute.xlu1 %15468 }
 0x7ff   : > { %v15471_v63 = vunpack.i.h.bf16 %v15469_v1  ;;  %v15470_v7 = vunpack.i.l.bf16 %v15469_v1 }
 0x801   : > { %v15479_v17 = vpop.permute.xlu0 %15478  ;;  %v12174_v13 = vsel %vm7654_vm0, %v11628_v5, %v15470_v7  ;;  %v12175_v27 = vsel %vm7654_vm0, %v11696_v30, %v15471_v63  ;;  %v23528_v63 = vmov 0  }
 0x802   : > { %v15481_v25 = vunpack.i.h.bf16 %v15479_v17  ;;  %v15480_v61 = vunpack.i.l.bf16 %v15479_v17 }
 0x804   : > { %v12173_v22 = vsel %vm7654_vm0, %v11560_v56, %v15481_v25  ;;  %v12172_v57 = vsel %vm7654_vm0, %v11492_v47, %v15480_v61 }
 0x805   : > { %v15474_v45 = vpop.permute.xlu1 %15473 }
 0x806   : > { %v15476_v10 = vunpack.i.h.bf16 %v15474_v45  ;;  %v15475_v50 = vunpack.i.l.bf16 %v15474_v45 }
 0x807   : > { %v15484_v8 = vpop.permute.xlu0 %15483 }
 0x808   : > { %v15486_v51 = vunpack.i.h.bf16 %v15484_v8  ;;  %v15485_v46 = vunpack.i.l.bf16 %v15484_v8  ;;  %v12190_v19 = vsel %vm8443_vm1, %v12174_v13, %v15475_v50  ;;  %v12191_v24 = vsel %vm8443_vm1, %v12175_v27, %v15476_v10  ;;  %v16097_v27 = vld [vmem:[%s16483_s30 + $0x8] sm:$0xff] }
 0x809   : > { %v15494_v41 = vpop.permute.xlu1 %15493 }
 0x80a   : > { %v15496_v53 = vunpack.i.h.bf16 %v15494_v41  ;;  %v15495_v60 = vunpack.i.l.bf16 %v15494_v41  ;;  %v12188_v4 = vsel %vm8443_vm1, %v12172_v57, %v15485_v46  ;;  %v12189_v6 = vsel %vm8443_vm1, %v12173_v22, %v15486_v51  ;;  %v16096_v46 = vld [vmem:[%s16483_s30] sm:$0xff] }
 0x80b   : > { %v15489_v5 = vpop.permute.xlu0 %15488 }
 0x80c   : > { %v15491_v29 = vunpack.i.h.bf16 %v15489_v5  ;;  %v15490_v33 = vunpack.i.l.bf16 %v15489_v5  ;;  %v12207_v30 = vsel %vm12196_vm2, %v12190_v19, %v15495_v60  ;;  %v12208_v26 = vsel %vm12196_vm2, %v12191_v24, %v15496_v53  ;;  %v16098_v60 = vld [vmem:[%s16483_s30 + $0x10] sm:$0xff]  ;;  %v16099_v19 = vld [vmem:[%s16483_s30 + $0x18] sm:$0xff] }
 0x80d   : > { %v15499_v56 = vpop.permute.xlu1 %15498  ;;  %v12218_v14 = vpack.c.bf16 %v12208_v26, %v12207_v30 }
 0x80e   : > { %v12205_v52 = vsel %vm12196_vm2, %v12188_v4, %v15490_v33  ;;  %v12206_v35 = vsel %vm12196_vm2, %v12189_v6, %v15491_v29  ;;  %v15501_v15 = vunpack.i.h.bf16 %v15499_v56  ;;  %v15500_v42 = vunpack.i.l.bf16 %v15499_v56  ;;  %v16100_v6 = vld [vmem:[%s16483_s30 + $0x20] sm:$0xff] }
 0x80f   : > { %v12217_v47 = vpack.c.bf16 %v12206_v35, %v12205_v52  ;;  %v15509_v39 = vpop.permute.xlu0 %15508  ;;  %v16101_v35 = vld [vmem:[%s16483_s30 + $0x28] sm:$0xff] }
 0x810   : > { %v15511_v54 = vunpack.i.h.bf16 %v15509_v39  ;;  %v12178_v36 = vsel %vm7654_vm0, %v11900_v20, %v15500_v42  ;;  %v12179_v48 = vsel %vm7654_vm0, %v11968_v55, %v15501_v15  ;;  %v15510_v49 = vunpack.i.l.bf16 %v15509_v39  ;;  %v16102_v39 = vld [vmem:[%s16483_s30 + $0x30] sm:$0xff]  ;;  %v16103_v42 = vld [vmem:[%s16483_s30 + $0x38] sm:$0xff] }
 0x811   : > { %15277 = vmatprep.mubr.bf16.mxu0 %v12217_v47  ;;  %v15504_v16 = vpop.permute.xlu1 %15503 }
 0x812   : > { %15278 = vmatmul.mubr.bf16.gmra.mrb[88].mxu0 %v12218_v14  ;;  %v15506_v38 = vunpack.i.h.bf16 %v15504_v16  ;;  %v15505_v3 = vunpack.i.l.bf16 %v15504_v16  ;;  %v12177_v18 = vsel %vm7654_vm0, %v11832_v37, %v15511_v54  ;;  %v12176_v20 = vsel %vm7654_vm0, %v11764_v2, %v15510_v49  ;;  %v21623_v2 = vld [vmem:[%s16481_s16] sm:$0x3f] }
 0x813   : > { %v21626_v7 = vrot.slane %v21623_v2, %v12239_v12  ;;  %v16104_v49 = vld [vmem:[%s16483_s30 + $0x40] sm:$0xff] }
 0x814   : > { %v15514_v23 = vpop.permute.xlu0 %15513  ;;  %v12194_v59 = vsel %vm8443_vm1, %v12178_v36, %v15505_v3  ;;  %v12195_v31 = vsel %vm8443_vm1, %v12179_v48, %v15506_v38 }
 0x815   : > { %v15524_v11 = vpop.permute.xlu1 %15523  ;;  %v15516_v9 = vunpack.i.h.bf16 %v15514_v23  ;;  %v15515_v44 = vunpack.i.l.bf16 %v15514_v23 }
 0x816   : > { %v15526_v62 = vunpack.i.h.bf16 %v15524_v11  ;;  %v15525_v34 = vunpack.i.l.bf16 %v15524_v11 }
 0x817   : > { %v12192_v17 = vsel %vm8443_vm1, %v12176_v20, %v15515_v44  ;;  %v12193_v28 = vsel %vm8443_vm1, %v12177_v18, %v15516_v9  ;;  %v16107_v18 = vld [vmem:[%s16483_s30 + $0x58] sm:$0xff] }
 0x818   : > { %v15519_v21 = vpop.permute.xlu0 %15518  ;;  %v12211_v32 = vsel %vm12196_vm2, %v12194_v59, %v15525_v34  ;;  %v12212_v43 = vsel %vm12196_vm2, %v12195_v31, %v15526_v62  ;;  %v16105_v62 = vld [vmem:[%s16483_s30 + $0x48] sm:$0xff]  ;;  %v16106_v59 = vld [vmem:[%s16483_s30 + $0x50] sm:$0xff] }
 0x819   : > { %v15521_v55 = vunpack.i.h.bf16 %v15519_v21  ;;  %v15520_v40 = vunpack.i.l.bf16 %v15519_v21  ;;  %v12220_v1 = vpack.c.bf16 %v12212_v43, %v12211_v32 }
 0x81b   : > { %v12209_v58 = vsel %vm12196_vm2, %v12192_v17, %v15520_v40  ;;  %v12210_v37 = vsel %vm12196_vm2, %v12193_v28, %v15521_v55  ;;  %v16108_v17 = vld [vmem:[%s16483_s30 + $0x60] sm:$0xff] }
 0x81c   : > { %v12219_v45 = vpack.c.bf16 %v12210_v37, %v12209_v58 }
 0x81e   : > { %15281 = vmatprep.mubr.bf16.mxu0 %v12219_v45  ;;  %v16109_v45 = vld [vmem:[%s16483_s30 + $0x68] sm:$0xff] }
 0x81f   : > { %15282 = vmatmul.mubr.bf16.gmra.mrb[92].mxu0 %v12220_v1 }
 0x820   : > { %12985 = vmatprep.mubr.bf16.mxu0 %v23528_v63 }
 0x895   : > { %v15271_v25 = vpop.f32.mrb[80].mxu0 }
 0x896   : > { %v12323_v61 = vpop.f32.mrb[81].mxu0  ;;  %v12332_v51 = vadd.f32 %v15271_v25, %v21626_v7  ;;  %v16110_v25 = vld [vmem:[%s16483_s30 + $0x70] sm:$0xff] }
 0x897   : > { %v12324_v10 = vadd.f32 %v12323_v61, %v21626_v7  ;;  %v15272_v50 = vpop.f32.mrb[82].mxu0 }
 0x898   : > { %v12326_v8 = vpop.f32.mrb[83].mxu0  ;;  %v21639_v22 = vadd.f32 %v16098_v60, %v12332_v51  ;;  %v12335_v57 = vadd.f32 %v15272_v50, %v21626_v7  ;;  %v15570_v51 = vld [vmem:[%s16466_s1 + $0x8] ss:$16 sps:$4 sm:$0xff]   ;;  %v15573_v60 = vld [vmem:[%s16466_s1 + $0x20] ss:$16 sps:$4 sm:$0xff]  }
 0x899   : > { %v21631_v41 = vadd.f32 %v16096_v46, %v12324_v10  ;;  %v12327_v13 = vadd.f32 %v12326_v8, %v21626_v7  ;;  %v16111_v10 = vld [vmem:[%s16483_s30 + $0x78] sm:$0xff]  ;;  %v15569_v8 = vld [vmem:[%s16466_s1 + $0x4] ss:$16 sps:$4 sm:$0xff]  }
 0x89a   : > { %23532 = vst [vmem:[#allocation45_spill] sm:$0xff] %v21639_v22  ;;  %v21645_v24 = vadd.f32 %v16099_v19, %v12335_v57  ;;  %v15572_v46 = vld [vmem:[%s16466_s1 + $0xc] ss:$16 sps:$4 sm:$0xff]   ;;  %12840 = vmatprep.subr.bf16.mxu1 %v15569_v8  ;;  %v15576_v57 = vld [vmem:[%s16466_s1 + $0x28] ss:$16 sps:$4 sm:$0xff]  }
 0x89b   : > { %23530 = vst [vmem:[#allocation32_spill] sm:$0xff] %v21631_v41  ;;  %v21635_v53 = vadd.f32 %v16097_v27, %v12327_v13  ;;  %12402 = vadd.xlane.f32.xlu0 %v21631_v41  ;;  %v15575_v13 = vld [vmem:[%s16466_s1 + $0x24] ss:$16 sps:$4 sm:$0xff]   ;;  %v15578_v27 = vld [vmem:[%s16466_s1 + $0x2c] ss:$16 sps:$4 sm:$0xff]   ;;  %12953 = vmatprep.subr.bf16.mxu0 %v15572_v46 }
 0x89c   : > { %23533 = vst [vmem:[#allocation51_spill] sm:$0xff] %v21645_v24  ;;  %12954 = vmatpush1.bf16.msra.mxu0 %v15570_v51  ;;  %v15590_v8 = vld [vmem:[%s16466_s1 + $0x6c] ss:$16 sps:$4 sm:$0xff]   ;;  %v15588_v51 = vld [vmem:[%s16466_s1 + $0x68] ss:$16 sps:$4 sm:$0xff]  }
 0x89d   : > { %23531 = vst [vmem:[#allocation40_spill] sm:$0xff] %v21635_v53  ;;  %12404 = vadd.xlane.f32.xlu1 %v21635_v53  ;;  %12955 = vmatprep.subr.bf16.mxu0 %v15578_v27  ;;  %v15593_v46 = vld [vmem:[%s16466_s1 + $0x84] ss:$16 sps:$4 sm:$0xff]   ;;  %v15591_v27 = vld [vmem:[%s16466_s1 + $0x80] ss:$16 sps:$4 sm:$0xff]  }
 0x89f   : > { %12406 = vadd.xlane.f32.xlu0 %v21639_v22 }
 0x8a0   : > { %12956 = vmatpush1.bf16.msra.mxu0 %v15576_v57  ;;  %v15599_v57 = vld [vmem:[%s16466_s1 + $0xa4] ss:$16 sps:$4 sm:$0xff]  }
 0x8a1   : > { %v15275_v5 = vpop.f32.mrb[84].mxu0 }
 0x8a2   : > { %v12339_v29 = vpop.f32.mrb[85].mxu0  ;;  %v12348_v4 = vadd.f32 %v15275_v5, %v21626_v7 }
 0x8a3   : > { %v12340_v33 = vadd.f32 %v12339_v29, %v21626_v7  ;;  %v15276_v30 = vpop.f32.mrb[86].mxu0  ;;  %12408 = vadd.xlane.f32.xlu0 %v21645_v24 }
 0x8a4   : > { %v12342_v26 = vpop.f32.mrb[87].mxu0  ;;  %v12351_v52 = vadd.f32 %v15276_v30, %v21626_v7  ;;  %v21660_v15 = vadd.f32 %v16102_v39, %v12348_v4 }
 0x8a5   : > { %v21651_v56 = vadd.f32 %v16100_v6, %v12340_v33  ;;  %v12343_v14 = vadd.f32 %v12342_v26, %v21626_v7 }
 0x8a6   : > { %23536 = vst [vmem:[#allocation28_spill] sm:$0xff] %v21660_v15  ;;  %v21664_v16 = vadd.f32 %v16103_v42, %v12351_v52 }
 0x8a7   : > { %23534 = vst [vmem:[#allocation25_spill] sm:$0xff] %v21651_v56  ;;  %v21656_v47 = vadd.f32 %v16101_v35, %v12343_v14  ;;  %12410 = vadd.xlane.f32.xlu0 %v21651_v56 }
 0x8a8   : > { %23537 = vst [vmem:[#allocation38_spill] sm:$0xff] %v21664_v16 }
 0x8a9   : > { %23535 = vst [vmem:[#allocation37_spill] sm:$0xff] %v21656_v47  ;;  %12412 = vadd.xlane.f32.xlu1 %v21656_v47 }
 0x8ab   : > { %12414 = vadd.xlane.f32.xlu0 %v21660_v15 }
 0x8ad   : > { %12416 = vadd.xlane.f32.xlu1 %v21664_v16 }
 0x8e5   : > { %v15279_v38 = vpop.f32.mrb[88].mxu0 }
 0x8e6   : > { %v12355_v3 = vpop.f32.mrb[89].mxu0  ;;  %v12364_v48 = vadd.f32 %v15279_v38, %v21626_v7 }
 0x8e7   : > { %v12356_v54 = vadd.f32 %v12355_v3, %v21626_v7  ;;  %v15280_v23 = vpop.f32.mrb[90].mxu0 }
 0x8e8   : > { %v12358_v36 = vpop.f32.mrb[91].mxu0  ;;  %v12367_v44 = vadd.f32 %v15280_v23, %v21626_v7  ;;  %v21680_v31 = vadd.f32 %v16106_v59, %v12364_v48 }
 0x8e9   : > { %v21671_v11 = vadd.f32 %v16104_v49, %v12356_v54  ;;  %v12359_v9 = vadd.f32 %v12358_v36, %v21626_v7 }
 0x8ea   : > { %23540 = vst [vmem:[#allocation23_spill] sm:$0xff] %v21680_v31  ;;  %v21684_v21 = vadd.f32 %v16107_v18, %v12367_v44 }
 0x8eb   : > { %23538 = vst [vmem:[#allocation52_spill] sm:$0xff] %v21671_v11  ;;  %v21676_v34 = vadd.f32 %v16105_v62, %v12359_v9  ;;  %12418 = vadd.xlane.f32.xlu0 %v21671_v11 }
 0x8ec   : > { %23541 = vst [vmem:[#allocation31_spill] sm:$0xff] %v21684_v21 }
 0x8ed   : > { %23539 = vst [vmem:[#allocation39_spill] sm:$0xff] %v21676_v34  ;;  %12420 = vadd.xlane.f32.xlu1 %v21676_v34 }
 0x8ef   : > { %12422 = vadd.xlane.f32.xlu0 %v21680_v31 }
 0x8f1   : > { %12424 = vadd.xlane.f32.xlu1 %v21684_v21 }
 0x8f2   : > { %v15283_v32 = vpop.f32.mrb[92].mxu0 }
 0x8f3   : > { %v12371_v43 = vpop.f32.mrb[93].mxu0  ;;  %v12380_v1 = vadd.f32 %v15283_v32, %v21626_v7 }
 0x8f4   : > { %v12372_v20 = vadd.f32 %v12371_v43, %v21626_v7  ;;  %v15284_v55 = vpop.f32.mrb[94].mxu0 }
 0x8f5   : > { %v12374_v40 = vpop.f32.mrb[95].mxu0  ;;  %v12383_v37 = vadd.f32 %v15284_v55, %v21626_v7  ;;  %v21700_v61 = vadd.f32 %v16110_v25, %v12380_v1  ;;  %v15584_v25 = vld [vmem:[%s16466_s1 + $0x4c] ss:$16 sps:$4 sm:$0xff]  }
 0x8f6   : > { %v21691_v28 = vadd.f32 %v16108_v17, %v12372_v20  ;;  %v12375_v58 = vadd.f32 %v12374_v40, %v21626_v7  ;;  %v15567_v7 = vld [vmem:[%s16466_s1] ss:$16 sps:$4 sm:$0xff]   ;;  %12957 = vmatprep.subr.bf16.mxu0 %v15584_v25 }
 0x8f7   : > { %23544 = vst [vmem:[#allocation33_spill] sm:$0xff] %v21700_v61  ;;  %v21704_v50 = vadd.f32 %v16111_v10, %v12383_v37  ;;  %12841 = vmatpush1.bf16.msra.mxu1 %v15567_v7  ;;  %v15581_v37 = vld [vmem:[%s16466_s1 + $0x44] ss:$16 sps:$4 sm:$0xff]   ;;  %v15585_v7 = vld [vmem:[%s16466_s1 + $0x60] ss:$16 sps:$4 sm:$0xff]  }
 0x8f8   : > { %23542 = vst [vmem:[#allocation46_spill] sm:$0xff] %v21691_v28  ;;  %v21696_v12 = vadd.f32 %v16109_v45, %v12375_v58  ;;  %12426 = vadd.xlane.f32.xlu0 %v21691_v28  ;;  %12842 = vmatprep.subr.bf16.mxu1 %v15575_v13  ;;  %v15579_v58 = vld [vmem:[%s16466_s1 + $0x40] ss:$16 sps:$4 sm:$0xff]   ;;  %v15582_v45 = vld [vmem:[%s16466_s1 + $0x48] ss:$16 sps:$4 sm:$0xff]  }
 0x8f9   : > { %23545 = vst [vmem:[#allocation24_spill] sm:$0xff] %v21704_v50  ;;  %v15587_v10 = vld [vmem:[%s16466_s1 + $0x64] ss:$16 sps:$4 sm:$0xff]   ;;  %12958 = vmatpush1.bf16.msra.mxu0 %v15582_v45  ;;  %v15596_v13 = vld [vmem:[%s16466_s1 + $0x8c] ss:$16 sps:$4 sm:$0xff]  }
 0x8fa   : > { %23543 = vst [vmem:[#allocation26_spill] sm:$0xff] %v21696_v12  ;;  %12428 = vadd.xlane.f32.xlu1 %v21696_v12  ;;  %12959 = vmatprep.subr.bf16.mxu0 %v15590_v8 }
 0x8fb   : > { %12843 = vmatpush1.bf16.msra.mxu1 %v15573_v60  ;;  %v15594_v60 = vld [vmem:[%s16466_s1 + $0x88] ss:$16 sps:$4 sm:$0xff]  }
 0x8fc   : > { %12430 = vadd.xlane.f32.xlu0 %v21700_v61  ;;  %12844 = vmatprep.subr.bf16.mxu1 %v15581_v37 }
 0x8fd   : > { %12960 = vmatpush1.bf16.msra.mxu0 %v15588_v51 }
 0x8fe   : > { %12432 = vadd.xlane.f32.xlu1 %v21704_v50  ;;  %12961 = vmatprep.subr.bf16.mxu0 %v15596_v13 }
 0x8ff   : > { %12845 = vmatpush1.bf16.msra.mxu1 %v15579_v58 }
 0x900   : > { %12846 = vmatprep.subr.bf16.mxu1 %v15587_v10 }
 0x901   : > { %12962 = vmatpush1.bf16.msra.mxu0 %v15594_v60 }
 0x903   : > { %12847 = vmatpush1.bf16.msra.mxu1 %v15585_v7 }
 0x904   : > { %12848 = vmatprep.subr.bf16.mxu1 %v15593_v46 }
 0x907   : > { %12849 = vmatpush1.bf16.msra.mxu1 %v15591_v27 }
 0x908   : > { %12850 = vmatprep.subr.bf16.mxu1 %v15599_v57 }
 0x928   : > { %v12403_v19 = vpop.xlane.xlu0 %12402 }
 0x929   : > { %v12434_v5 = vmul.f32 0.0078125, %v12403_v19  ;;  %v15602_v19 = vld [vmem:[%s16466_s1 + $0xac] ss:$16 sps:$4 sm:$0xff]  }
 0x92a   : > { %v12405_v29 = vpop.xlane.xlu1 %12404  ;;  %12963 = vmatprep.subr.bf16.mxu0 %v15602_v19 }
 0x92b   : > { %v21717_v33 = vsub.f32 %v21631_v41, %v12434_v5  ;;  %v12435_v30 = vmul.f32 0.0078125, %v12405_v29  ;;  %v15597_v5 = vld [vmem:[%s16466_s1 + $0xa0] ss:$16 sps:$4 sm:$0xff]   ;;  %v15600_v29 = vld [vmem:[%s16466_s1 + $0xa8] ss:$16 sps:$4 sm:$0xff]  }
 0x92c   : > { %v12407_v26 = vpop.xlane.xlu0 %12406  ;;  %12851 = vmatpush1.bf16.msra.mxu1 %v15597_v5  ;;  %12964 = vmatpush1.bf16.msra.mxu0 %v15600_v29 }
 0x92d   : > { %v21720_v4 = vsub.f32 %v21635_v53, %v12435_v30  ;;  %v12436_v6 = vmul.f32 0.0078125, %v12407_v26  ;;  %v12466_v14 = vmul.f32 %v21717_v33, %v21717_v33  ;;  %v15605_v30 = vld [vmem:[%s16466_s1 + $0xc4] ss:$16 sps:$4 sm:$0xff]   ;;  %v15608_v26 = vld [vmem:[%s16466_s1 + $0xcc] ss:$16 sps:$4 sm:$0xff]  }
 0x92e   : > { %12852 = vmatprep.subr.bf16.mxu1 %v15605_v30  ;;  %12965 = vmatprep.subr.bf16.mxu0 %v15608_v26 }
 0x92f   : > { %v21725_v52 = vsub.f32 %v21639_v22, %v12436_v6  ;;  %12482 = vadd.xlane.f32.xlu0 %v12466_v14  ;;  %v12467_v35 = vmul.f32 %v21720_v4, %v21720_v4  ;;  %v15603_v6 = vld [vmem:[%s16466_s1 + $0xc0] ss:$16 sps:$4 sm:$0xff]   ;;  %v15606_v14 = vld [vmem:[%s16466_s1 + $0xc8] ss:$16 sps:$4 sm:$0xff]  }
 0x930   : > { %v12409_v39 = vpop.xlane.xlu0 %12408  ;;  %12853 = vmatpush1.bf16.msra.mxu1 %v15603_v6  ;;  %12966 = vmatpush1.bf16.msra.mxu0 %v15606_v14 }
 0x931   : > { %v12437_v42 = vmul.f32 0.0078125, %v12409_v39  ;;  %12484 = vadd.xlane.f32.xlu1 %v12467_v35  ;;  %v12468_v38 = vmul.f32 %v21725_v52, %v21725_v52  ;;  %v15611_v35 = vld [vmem:[%s16466_s1 + $0xe4] ss:$16 sps:$4 sm:$0xff]   ;;  %v15614_v39 = vld [vmem:[%s16466_s1 + $0xec] ss:$16 sps:$4 sm:$0xff]  }
 0x932   : > { %12854 = vmatprep.subr.bf16.mxu1 %v15611_v35  ;;  %12967 = vmatprep.subr.bf16.mxu0 %v15614_v39 }
 0x933   : > { %v21732_v3 = vsub.f32 %v21645_v24, %v12437_v42  ;;  %12486 = vadd.xlane.f32.xlu0 %v12468_v38  ;;  %v15609_v42 = vld [vmem:[%s16466_s1 + $0xe0] ss:$16 sps:$4 sm:$0xff]   ;;  %v15612_v38 = vld [vmem:[%s16466_s1 + $0xe8] ss:$16 sps:$4 sm:$0xff]   ;;  %s23608_s1 = sld [smem:[#allocation16_spill]] }
 0x934   : > { %v12411_v54 = vpop.xlane.xlu0 %12410  ;;  %12855 = vmatpush1.bf16.msra.mxu1 %v15609_v42  ;;  %12968 = vmatpush1.bf16.msra.mxu0 %v15612_v38 }
 0x935   : > { %v12438_v23 = vmul.f32 0.0078125, %v12411_v54  ;;  %v12469_v36 = vmul.f32 %v21732_v3, %v21732_v3 }
 0x936   : > { %v12413_v48 = vpop.xlane.xlu1 %12412 }
 0x937   : > { %v21737_v49 = vsub.f32 %v21651_v56, %v12438_v23  ;;  %v12439_v9 = vmul.f32 0.0078125, %v12413_v48  ;;  %12488 = vadd.xlane.f32.xlu1 %v12469_v36 }
 0x938   : > { %v12415_v44 = vpop.xlane.xlu0 %12414 }
 0x939   : > { %v21740_v62 = vsub.f32 %v21656_v47, %v12439_v9  ;;  %v12440_v59 = vmul.f32 0.0078125, %v12415_v44  ;;  %v12470_v18 = vmul.f32 %v21737_v49, %v21737_v49  ;;  %p23613_p12 = scmp.ne.s32.totalorder %s23608_s1, 0 }
 0x93a   : > { %v12417_v32 = vpop.xlane.xlu1 %12416 }
 0x93b   : > { %v21745_v43 = vsub.f32 %v21660_v15, %v12440_v59  ;;  %v12441_v20 = vmul.f32 0.0078125, %v12417_v32  ;;  %12490 = vadd.xlane.f32.xlu0 %v12470_v18  ;;  %v12471_v55 = vmul.f32 %v21740_v62, %v21740_v62  ;;  %p16145_p13 = pnand %p16144_p0, %p23613_p12 }
 0x93d   : > { %v21750_v40 = vsub.f32 %v21664_v16, %v12441_v20  ;;  %12492 = vadd.xlane.f32.xlu1 %v12471_v55  ;;  %v12472_v1 = vmul.f32 %v21745_v43, %v21745_v43  ;;  %p16146_p2 = pneg %p16145_p13 }
 0x93f   : > { %12494 = vadd.xlane.f32.xlu0 %v12472_v1  ;;  %v12473_v17 = vmul.f32 %v21750_v40, %v21750_v40  ;;  %p16153_p8 = pnand %p16152_p7, %p16146_p2 }
 0x941   : > { %12496 = vadd.xlane.f32.xlu1 %v12473_v17 }
 0x978   : > { %v12419_v54 = vpop.xlane.xlu0 %12418 }
 0x979   : > { %v12442_v23 = vmul.f32 0.0078125, %v12419_v54 }
 0x97a   : > { %v12421_v36 = vpop.xlane.xlu1 %12420 }
 0x97b   : > { %v21781_v48 = vsub.f32 %v21671_v11, %v12442_v23  ;;  %v12443_v9 = vmul.f32 0.0078125, %v12421_v36 }
 0x97c   : > { %v12423_v44 = vpop.xlane.xlu0 %12422 }
 0x97d   : > { %v21784_v59 = vsub.f32 %v21676_v34, %v12443_v9  ;;  %v12444_v18 = vmul.f32 0.0078125, %v12423_v44  ;;  %v12474_v32 = vmul.f32 %v21781_v48, %v21781_v48 }
 0x97e   : > { %v12425_v20 = vpop.xlane.xlu1 %12424 }
 0x97f   : > { %v21789_v55 = vsub.f32 %v21680_v31, %v12444_v18  ;;  %v12445_v1 = vmul.f32 0.0078125, %v12425_v20  ;;  %12498 = vadd.xlane.f32.xlu0 %v12474_v32  ;;  %v12475_v17 = vmul.f32 %v21784_v59, %v21784_v59 }
 0x981   : > { %v21794_v58 = vsub.f32 %v21684_v21, %v12445_v1  ;;  %12500 = vadd.xlane.f32.xlu1 %v12475_v17  ;;  %v12476_v37 = vmul.f32 %v21789_v55, %v21789_v55  ;;  %v23546_v17 = vld [vmem:[#allocation22_spill] sm:$0xff] }
 0x983   : > { %12502 = vadd.xlane.f32.xlu0 %v12476_v37  ;;  %v12477_v45 = vmul.f32 %v21794_v58, %v21794_v58  ;;  %v21822_v37 = vrot.slane %v21623_v2, %v23546_v17 }
 0x985   : > { %12504 = vadd.xlane.f32.xlu1 %v12477_v45  ;;  %v12427_v25 = vpop.xlane.xlu0 %12426 }
 0x986   : > { %v12446_v10 = vmul.f32 0.0078125, %v12427_v25  ;;  %v12600_v25 = vsub.s32 3, %v23529_v0 }
 0x987   : > { %v12429_v7 = vpop.xlane.xlu1 %12428 }
 0x988   : > { %v21801_v8 = vsub.f32 %v21691_v28, %v12446_v10  ;;  %v12447_v51 = vmul.f32 0.0078125, %v12429_v7 }
 0x989   : > { %v12431_v46 = vpop.xlane.xlu0 %12430 }
 0x98a   : > { %v21804_v13 = vsub.f32 %v21696_v12, %v12447_v51  ;;  %v12448_v27 = vmul.f32 0.0078125, %v12431_v46  ;;  %v12478_v60 = vmul.f32 %v21801_v8, %v21801_v8 }
 0x98b   : > { %v12433_v57 = vpop.xlane.xlu1 %12432 }
 0x98c   : > { %v21809_v19 = vsub.f32 %v21700_v61, %v12448_v27  ;;  %v12449_v5 = vmul.f32 0.0078125, %v12433_v57  ;;  %12506 = vadd.xlane.f32.xlu0 %v12478_v60  ;;  %v12479_v29 = vmul.f32 %v21804_v13, %v21804_v13 }
 0x98e   : > { %v21814_v30 = vsub.f32 %v21704_v50, %v12449_v5  ;;  %12508 = vadd.xlane.f32.xlu1 %v12479_v29  ;;  %v12480_v26 = vmul.f32 %v21809_v19, %v21809_v19 }
 0x990   : > { %12510 = vadd.xlane.f32.xlu0 %v12480_v26  ;;  %v12481_v6 = vmul.f32 %v21814_v30, %v21814_v30 }
 0x992   : > { %12512 = vadd.xlane.f32.xlu1 %v12481_v6 }
 0x9bc   : > { %v12483_v14 = vpop.xlane.xlu0 %12482 }
 0x9bd   : > { %v12514_v35 = vmul.f32 0.0078125, %v12483_v14  ;;  %v21831_v14 = vrot.slane %v21623_v2, %v12600_v25 }
 0x9be   : > { %v12485_v39 = vpop.xlane.xlu1 %12484 }
 0x9bf   : > { %v12530_v42 = vadd.f32 1e-05, %v12514_v35  ;;  %v12515_v38 = vmul.f32 0.0078125, %v12485_v39 }
 0x9c0   : > { %v12487_v54 = vpop.xlane.xlu0 %12486 }
 0x9c1   : > { %15935 = vrsqrt.f32 %v12530_v42  ;;  %v12531_v23 = vadd.f32 1e-05, %v12515_v38  ;;  %v12516_v36 = vmul.f32 0.0078125, %v12487_v54 }
 0x9c3   : > { %15937 = vrsqrt.f32 %v12531_v23  ;;  %v12532_v9 = vadd.f32 1e-05, %v12516_v36 }
 0x9c4   : > { %v12489_v44 = vpop.xlane.xlu1 %12488 }
 0x9c5   : > { %15939 = vrsqrt.f32 %v12532_v9  ;;  %v12517_v18 = vmul.f32 0.0078125, %v12489_v44 }
 0x9c7   : > { %v12533_v32 = vadd.f32 1e-05, %v12517_v18 }
 0x9c8   : > { %v12491_v20 = vpop.xlane.xlu0 %12490 }
 0x9c9   : > { %15941 = vrsqrt.f32 %v12533_v32  ;;  %v12518_v1 = vmul.f32 0.0078125, %v12491_v20 }
 0x9ca   : > { %v12493_v45 = vpop.xlane.xlu1 %12492 }
 0x9cb   : > { %v15936_v10 = vpop.eup %15935  ;;  %v12534_v7 = vadd.f32 1e-05, %v12518_v1  ;;  %v12519_v51 = vmul.f32 0.0078125, %v12493_v45 }
 0x9cc   : > { %v12562_v46 = vmul.f32 %v15936_v10, %v21717_v33  ;;  %v12495_v27 = vpop.xlane.xlu0 %12494 }
 0x9cd   : > { %v15938_v60 = vpop.eup %15937  ;;  %15943 = vrsqrt.f32 %v12534_v7  ;;  %v12535_v57 = vadd.f32 1e-05, %v12519_v51  ;;  %v12520_v5 = vmul.f32 0.0078125, %v12495_v27 }
 0x9ce   : > { %v12582_v29 = vmul.f32 %v21822_v37, %v12562_v46  ;;  %v12563_v26 = vmul.f32 %v15938_v60, %v21720_v4  ;;  %v12497_v6 = vpop.xlane.xlu1 %12496 }
 0x9cf   : > { %v15940_v35 = vpop.eup %15939  ;;  %15945 = vrsqrt.f32 %v12535_v57  ;;  %v12521_v39 = vmul.f32 0.0078125, %v12497_v6  ;;  %v12536_v42 = vadd.f32 1e-05, %v12520_v5 }
 0x9d0   : > { %v12583_v33 = vmul.f32 %v21822_v37, %v12563_v26  ;;  %v12602_v54 = vadd.f32 %v21831_v14, %v12582_v29  ;;  %v12564_v36 = vmul.f32 %v15940_v35, %v21725_v52 }
 0x9d1   : > { %v12537_v38 = vadd.f32 1e-05, %v12521_v39 }
 0x9d2   : > { %v12603_v23 = vadd.f32 %v21831_v14, %v12583_v33  ;;  %v12584_v2 = vmul.f32 %v21822_v37, %v12564_v36 }
 0x9d3   : > { %v15942_v4 = vpop.eup %15941  ;;  %15947 = vrsqrt.f32 %v12537_v38 }
 0x9d4   : > { %v12618_v9 = vpack.c.bf16 %v12603_v23, %v12602_v54  ;;  %v12565_v44 = vmul.f32 %v15942_v4, %v21732_v3  ;;  %15949 = vrsqrt.f32 %v12536_v42  ;;  %v12604_v1 = vadd.f32 %v21831_v14, %v12584_v2 }
 0x9d6   : > { %12873 = vmatmul.mubr.bf16.vlgmr.msra.gmra.mrb[96].mxu1 %v12618_v9  ;;  %12986 = vmatmul.mubr.bf16.vlgmr.msra.gmra.mrb[96].mxu0 %v12618_v9  ;;  %v12585_v18 = vmul.f32 %v21822_v37, %v12565_v44 }
 0x9d7   : > { %v15944_v32 = vpop.eup %15943  ;;  %12882 = vmatprep.mubr.bf16.mxu1 %v23528_v63  ;;  %12995 = vmatprep.mubr.bf16.mxu0 %v23528_v63 }
 0x9d8   : > { %v12605_v20 = vadd.f32 %v21831_v14, %v12585_v18  ;;  %v12566_v45 = vmul.f32 %v15944_v32, %v21737_v49 }
 0x9d9   : > { %v15946_v52 = vpop.eup %15945 }
 0x9da   : > { %v12567_v3 = vmul.f32 %v15946_v52, %v21740_v62  ;;  %v12619_v10 = vpack.c.bf16 %v12605_v20, %v12604_v1  ;;  %v12586_v46 = vmul.f32 %v21822_v37, %v12566_v45 }
 0x9dc   : > { %v12587_v7 = vmul.f32 %v21822_v37, %v12567_v3  ;;  %v12606_v49 = vadd.f32 %v21831_v14, %v12586_v46 }
 0x9dd   : > { %v15948_v51 = vpop.eup %15947 }
 0x9de   : > { %12883 = vmatmul.mubr.bf16.gmra.mrb[100].mxu1 %v12619_v10  ;;  %12996 = vmatmul.mubr.bf16.gmra.mrb[100].mxu0 %v12619_v10  ;;  %v15950_v27 = vpop.eup %15949  ;;  %v12607_v60 = vadd.f32 %v21831_v14, %v12587_v7  ;;  %v12569_v57 = vmul.f32 %v15948_v51, %v21750_v40 }
 0x9df   : > { %12892 = vmatprep.mubr.bf16.mxu1 %v23528_v63  ;;  %13005 = vmatprep.mubr.bf16.mxu0 %v23528_v63  ;;  %v12568_v62 = vmul.f32 %v15950_v27, %v21745_v43 }
 0x9e0   : > { %v12620_v5 = vpack.c.bf16 %v12607_v60, %v12606_v49  ;;  %v12589_v29 = vmul.f32 %v21822_v37, %v12569_v57 }
 0x9e1   : > { %v12588_v26 = vmul.f32 %v21822_v37, %v12568_v62 }
 0x9e2   : > { %v12609_v6 = vadd.f32 %v21831_v14, %v12589_v29 }
 0x9e3   : > { %v12608_v35 = vadd.f32 %v21831_v14, %v12588_v26 }
 0x9e5   : > { %v12621_v40 = vpack.c.bf16 %v12609_v6, %v12608_v35 }
 0x9e6   : > { %12893 = vmatmul.mubr.bf16.gmra.mrb[104].mxu1 %v12620_v5  ;;  %13006 = vmatmul.mubr.bf16.gmra.mrb[104].mxu0 %v12620_v5 }
 0x9e7   : > { %12902 = vmatprep.mubr.bf16.mxu1 %v23528_v63  ;;  %13015 = vmatprep.mubr.bf16.mxu0 %v23528_v63 }
 0x9ee   : > { %12903 = vmatmul.mubr.bf16.gmra.mrb[108].mxu1 %v12621_v40  ;;  %13016 = vmatmul.mubr.bf16.gmra.mrb[108].mxu0 %v12621_v40 }
 0x9ef   : > { %12912 = vmatprep.mubr.bf16.mxu1 %v23528_v63  ;;  %13025 = vmatprep.mubr.bf16.mxu0 %v23528_v63 }
 0xa0c   : > { %v12499_v43 = vpop.xlane.xlu0 %12498 }
 0xa0d   : > { %v12522_v39 = vmul.f32 0.0078125, %v12499_v43 }
 0xa0e   : > { %v12501_v33 = vpop.xlane.xlu1 %12500 }
 0xa0f   : > { %v12538_v42 = vadd.f32 1e-05, %v12522_v39  ;;  %v12523_v38 = vmul.f32 0.0078125, %v12501_v33 }
 0xa10   : > { %v12503_v54 = vpop.xlane.xlu0 %12502 }
 0xa11   : > { %15951 = vrsqrt.f32 %v12538_v42  ;;  %v12539_v23 = vadd.f32 1e-05, %v12523_v38  ;;  %v12524_v36 = vmul.f32 0.0078125, %v12503_v54 }
 0xa12   : > { %v12505_v4 = vpop.xlane.xlu1 %12504 }
 0xa13   : > { %15953 = vrsqrt.f32 %v12539_v23  ;;  %v12540_v9 = vadd.f32 1e-05, %v12524_v36  ;;  %v12525_v44 = vmul.f32 0.0078125, %v12505_v4 }
 0xa15   : > { %15955 = vrsqrt.f32 %v12540_v9  ;;  %v12541_v2 = vadd.f32 1e-05, %v12525_v44 }
 0xa17   : > { %15957 = vrsqrt.f32 %v12541_v2 }
 0xa19   : > { %v12507_v18 = vpop.xlane.xlu0 %12506 }
 0xa1a   : > { %v12526_v32 = vmul.f32 0.0078125, %v12507_v18 }
 0xa1b   : > { %v15952_v20 = vpop.eup %15951  ;;  %v12509_v52 = vpop.xlane.xlu1 %12508 }
 0xa1c   : > { %v12542_v1 = vadd.f32 1e-05, %v12526_v32  ;;  %v12527_v45 = vmul.f32 0.0078125, %v12509_v52  ;;  %v12570_v3 = vmul.f32 %v15952_v20, %v21781_v48 }
 0xa1d   : > { %v15954_v10 = vpop.eup %15953  ;;  %v12511_v7 = vpop.xlane.xlu0 %12510 }
 0xa1e   : > { %15959 = vrsqrt.f32 %v12542_v1  ;;  %v12543_v51 = vadd.f32 1e-05, %v12527_v45  ;;  %v12528_v46 = vmul.f32 0.0078125, %v12511_v7  ;;  %v12571_v27 = vmul.f32 %v15954_v10, %v21784_v59  ;;  %v15616_v10 = vld [vmem:[%s16471_s22 + $0xc0] sm:$0xff]  }
 0xa1f   : > { %v15956_v60 = vpop.eup %15955  ;;  %v12513_v57 = vpop.xlane.xlu1 %12512  ;;  %v12590_v49 = vmul.f32 %v21822_v37, %v12570_v3  ;;  %v15615_v3 = vld [vmem:[%s16471_s22 + $0x40] sm:$0xff]   ;;  %14901 = vmatprep.subr.bf16.mxu0 %v15616_v10 }
 0xa20   : > { %15961 = vrsqrt.f32 %v12543_v51  ;;  %v12529_v62 = vmul.f32 0.0078125, %v12513_v57  ;;  %v12591_v5 = vmul.f32 %v21822_v37, %v12571_v27  ;;  %v12544_v26 = vadd.f32 1e-05, %v12528_v46  ;;  %v15618_v7 = vld [vmem:[%s16471_s22 + $0x80] sm:$0xff]   ;;  %v15619_v51 = vld [vmem:[%s16471_s22 + $0x48] sm:$0xff]   ;;  %14837 = vmatprep.subr.bf16.mxu1 %v15615_v3  ;;  %v15625_v57 = vld [vmem:[%s16471_s22 + $0x10] sm:$0xff]  }
 0xa21   : > { %v15958_v29 = vpop.eup %15957  ;;  %v12610_v6 = vadd.f32 %v21831_v14, %v12590_v49  ;;  %v12572_v40 = vmul.f32 %v15956_v60, %v21789_v55  ;;  %v15620_v46 = vld [vmem:[%s16471_s22 + $0xc8] sm:$0xff]   ;;  %14902 = vmatpush3.bf16.msra.mxu0 %v15618_v7  ;;  %v15624_v60 = vld [vmem:[%s16471_s22 + $0xd0] sm:$0xff]  }
 0xa22   : > { %v12545_v48 = vadd.f32 1e-05, %v12529_v62  ;;  %v12611_v35 = vadd.f32 %v21831_v14, %v12591_v5  ;;  %v12573_v43 = vmul.f32 %v15958_v29, %v21794_v58  ;;  %v15622_v27 = vld [vmem:[%s16471_s22 + $0x88] sm:$0xff]   ;;  %14903 = vmatprep.subr.bf16.mxu0 %v15620_v46  ;;  %v15626_v49 = vld [vmem:[%s16471_s22 + $0x90] sm:$0xff]   ;;  %v15627_v62 = vld [vmem:[%s16471_s22 + $0x58] sm:$0xff]  }
 0xa23   : > { %v12592_v33 = vmul.f32 %v21822_v37, %v12572_v40  ;;  %v15628_v5 = vld [vmem:[%s16471_s22 + $0xd8] sm:$0xff]   ;;  %v15634_v40 = vld [vmem:[%s16471_s22 + $0xa0] sm:$0xff]  }
 0xa24   : > { %15963 = vrsqrt.f32 %v12545_v48  ;;  %v12622_v59 = vpack.c.bf16 %v12611_v35, %v12610_v6  ;;  %v12593_v39 = vmul.f32 %v21822_v37, %v12573_v43  ;;  %v15629_v29 = vld [vmem:[%s16471_s22 + $0x18] sm:$0xff]   ;;  %v15631_v6 = vld [vmem:[%s16471_s22 + $0x60] sm:$0xff]   ;;  %v15635_v43 = vld [vmem:[%s16471_s22 + $0x68] sm:$0xff]  }
 0xa25   : > { %15965 = vrsqrt.f32 %v12544_v26  ;;  %v12612_v58 = vadd.f32 %v21831_v14, %v12592_v33  ;;  %14904 = vmatpush3.bf16.msra.mxu0 %v15622_v27  ;;  %v15630_v26 = vld [vmem:[%s16471_s22 + $0x98] sm:$0xff]   ;;  %v15632_v48 = vld [vmem:[%s16471_s22 + $0xe0] sm:$0xff]   ;;  %v15638_v33 = vld [vmem:[%s16471_s22 + $0xa8] sm:$0xff]  }
 0xa26   : > { %12913 = vmatmul.mubr.bf16.gmra.mrb[112].mxu1 %v12622_v59  ;;  %13026 = vmatmul.mubr.bf16.gmra.mrb[112].mxu0 %v12622_v59  ;;  %v12613_v38 = vadd.f32 %v21831_v14, %v12593_v39  ;;  %v15633_v35 = vld [vmem:[%s16471_s22 + $0x20] sm:$0xff]   ;;  %v15636_v59 = vld [vmem:[%s16471_s22 + $0xe8] sm:$0xff]  }
 0xa27   : > { %12922 = vmatprep.mubr.bf16.mxu1 %v23528_v63  ;;  %13035 = vmatprep.mubr.bf16.mxu0 %v23528_v63  ;;  %v15637_v39 = vld [vmem:[%s16471_s22 + $0x28] sm:$0xff]  }
 0xa28   : > { %v15960_v42 = vpop.eup %15959  ;;  %v12623_v36 = vpack.c.bf16 %v12613_v38, %v12612_v58  ;;  %14905 = vmatprep.subr.bf16.mxu0 %v15624_v60  ;;  %v15640_v38 = vld [vmem:[%s16471_s22 + $0xf0] sm:$0xff]   ;;  %v15643_v58 = vld [vmem:[%s16471_s22 + $0x78] sm:$0xff]  }
 0xa29   : > { %v12574_v55 = vmul.f32 %v15960_v42, %v21801_v8  ;;  %14906 = vmatpush3.bf16.msra.mxu0 %v15626_v49  ;;  %v15639_v42 = vld [vmem:[%s16471_s22 + $0x70] sm:$0xff]  }
 0xa2a   : > { %v15962_v54 = vpop.eup %15961  ;;  %14907 = vmatprep.subr.bf16.mxu0 %v15628_v5 }
 0xa2b   : > { %v12575_v23 = vmul.f32 %v15962_v54, %v21804_v13  ;;  %v12594_v4 = vmul.f32 %v21822_v37, %v12574_v55  ;;  %v15641_v55 = vld [vmem:[%s16471_s22 + $0x30] sm:$0xff]  }
 0xa2c   : > { %v15642_v54 = vld [vmem:[%s16471_s22 + $0xb0] sm:$0xff]  }
 0xa2d   : > { %v12595_v9 = vmul.f32 %v21822_v37, %v12575_v23  ;;  %v12614_v13 = vadd.f32 %v21831_v14, %v12594_v4  ;;  %14908 = vmatpush3.bf16.msra.mxu0 %v15630_v26  ;;  %v15644_v23 = vld [vmem:[%s16471_s22 + $0xf8] sm:$0xff]  }
 0xa2e   : > { %v15964_v44 = vpop.eup %15963  ;;  %12923 = vmatmul.mubr.bf16.gmra.mrb[116].mxu1 %v12623_v36  ;;  %13036 = vmatmul.mubr.bf16.gmra.mrb[116].mxu0 %v12623_v36  ;;  %v15645_v36 = vld [vmem:[%s16471_s22 + $0x38] sm:$0xff]  }
 0xa2f   : > { %v15966_v2 = vpop.eup %15965  ;;  %12932 = vmatprep.mubr.bf16.mxu1 %v23528_v63  ;;  %13045 = vmatprep.mubr.bf16.mxu0 %v23528_v63  ;;  %v12615_v8 = vadd.f32 %v21831_v14, %v12595_v9  ;;  %v12577_v18 = vmul.f32 %v15964_v44, %v21814_v30  ;;  %v15646_v4 = vld [vmem:[%s16471_s22 + $0xb8] sm:$0xff]   ;;  %v12658_v9 = vld [vmem:[%s16476_s20] sm:$0xf]  ;;  %v23547_v44 = vld [vmem:[#allocation20_spill] sm:$0xff] }
 0xa30   : > { %v12576_v20 = vmul.f32 %v15966_v2, %v21809_v19  ;;  %v15617_v19 = vld [vmem:[%s16471_s22] sm:$0xff]   ;;  %14909 = vmatprep.subr.bf16.mxu0 %v15632_v48  ;;  %v21926_v2 = vrot.slane %v12658_v9, %v23547_v44 }
 0xa31   : > { %v12624_v32 = vpack.c.bf16 %v12615_v8, %v12614_v13  ;;  %v12597_v52 = vmul.f32 %v21822_v37, %v12577_v18  ;;  %14838 = vmatpush3.bf16.msra.mxu1 %v15617_v19  ;;  %14910 = vmatpush3.bf16.msra.mxu0 %v15634_v40  ;;  %v21929_v8 = vrot.slane %v12658_v9, %v23546_v17  ;;  %v23550_v13 = vld [vmem:[#allocation21_spill] sm:$0xff] }
 0xa32   : > { %v12596_v1 = vmul.f32 %v21822_v37, %v12576_v20  ;;  %14839 = vmatprep.subr.bf16.mxu1 %v15619_v51  ;;  %14911 = vmatprep.subr.bf16.mxu0 %v15636_v59  ;;  %23548 = vst [vmem:[#allocation27_spill] sm:$0xff] %v21926_v2  ;;  %v21932_v18 = vrot.slane %v12658_v9, %v23550_v13 }
 0xa33   : > { %v12617_v45 = vadd.f32 %v21831_v14, %v12597_v52  ;;  %23549 = vst [vmem:[#allocation30_spill] sm:$0xff] %v21929_v8 }
 0xa34   : > { %v12616_v30 = vadd.f32 %v21831_v14, %v12596_v1  ;;  %v15623_v14 = vld [vmem:[%s16471_s22 + $0x50] sm:$0xff]   ;;  %23551 = vst [vmem:[#allocation53_spill] sm:$0xff] %v21932_v18 }
 0xa35   : > { %14912 = vmatpush3.bf16.msra.mxu0 %v15638_v33 }
 0xa36   : > { %12933 = vmatmul.mubr.bf16.gmra.mrb[120].mxu1 %v12624_v32  ;;  %13046 = vmatmul.mubr.bf16.gmra.mrb[120].mxu0 %v12624_v32  ;;  %v12625_v37 = vpack.c.bf16 %v12617_v45, %v12616_v30  ;;  %v21936_v32 = vrot.slane %v12658_v9, %v12600_v25 }
 0xa37   : > { %12942 = vmatprep.mubr.bf16.mxu1 %v23528_v63  ;;  %13055 = vmatprep.mubr.bf16.mxu0 %v23528_v63  ;;  %v15621_v63 = vld [vmem:[%s16471_s22 + $0x8] sm:$0xff]  }
 0xa38   : > { %14840 = vmatpush3.bf16.msra.mxu1 %v15621_v63  ;;  %14913 = vmatprep.subr.bf16.mxu0 %v15640_v38  ;;  %23552 = vst [vmem:[#allocation47_spill] sm:$0xff] %v21936_v32 }
 0xa39   : > { %14841 = vmatprep.subr.bf16.mxu1 %v15623_v14  ;;  %14914 = vmatpush3.bf16.msra.mxu0 %v15642_v54 }
 0xa3a   : > { %14915 = vmatprep.subr.bf16.mxu0 %v15644_v23 }
 0xa3c   : > { %14842 = vmatpush3.bf16.msra.mxu1 %v15625_v57 }
 0xa3d   : > { %14843 = vmatprep.subr.bf16.mxu1 %v15627_v62  ;;  %14916 = vmatpush3.bf16.msra.mxu0 %v15646_v4 }
 0xa3e   : > { %12943 = vmatmul.mubr.bf16.gmra.mrb[124].mxu1 %v12625_v37  ;;  %13056 = vmatmul.mubr.bf16.gmra.mrb[124].mxu0 %v12625_v37 }
 0xa40   : > { %14844 = vmatpush3.bf16.msra.mxu1 %v15629_v29 }
 0xa41   : > { %14845 = vmatprep.subr.bf16.mxu1 %v15631_v6 }
 0xa44   : > { %14846 = vmatpush3.bf16.msra.mxu1 %v15633_v35 }
 0xa45   : > { %14847 = vmatprep.subr.bf16.mxu1 %v15635_v43 }
 0xa48   : > { %14848 = vmatpush3.bf16.msra.mxu1 %v15637_v39 }
 0xa49   : > { %14849 = vmatprep.subr.bf16.mxu1 %v15639_v42 }
 0xa4c   : > { %14850 = vmatpush3.bf16.msra.mxu1 %v15641_v55 }
 0xa4d   : > { %14851 = vmatprep.subr.bf16.mxu1 %v15643_v58 }
 0xa50   : > { %14852 = vmatpush3.bf16.msra.mxu1 %v15645_v36 }
 0xaa9   : > { %v12874_v20 = vpop.f32.mrb[96].mxu1  ;;  %v12987_v52 = vpop.f32.mrb[96].mxu0 }
 0xaaa   : > { %v12875_v1 = vadd.f32 %v12874_v20, %v21926_v2  ;;  %v12988_v45 = vadd.f32 %v12987_v52, %v21929_v8  ;;  %v12876_v30 = vpop.f32.mrb[97].mxu1  ;;  %v12989_v3 = vpop.f32.mrb[97].mxu0 }
 0xaab   : > { %v21941_v10 = vadd.f32 %v12876_v30, %v21932_v18  ;;  %v21944_v17 = vadd.f32 %v12989_v3, %v21936_v32  ;;  %v12878_v19 = vpop.f32.mrb[98].mxu1  ;;  %v12991_v7 = vpop.f32.mrb[98].mxu0 }
 0xaac   : > { %v13130_v51 = vmul.f32 0.044715, %v12875_v1  ;;  %v13132_v46 = vmul.f32 0.044715, %v12988_v45  ;;  %v12879_v37 = vadd.f32 %v12878_v19, %v21926_v2  ;;  %v12992_v63 = vadd.f32 %v12991_v7, %v21929_v8  ;;  %v12880_v27 = vpop.f32.mrb[99].mxu1  ;;  %v12993_v14 = vpop.f32.mrb[99].mxu0 }
 0xaad   : > { %v13131_v25 = vmul.f32 0.044715, %v21941_v10  ;;  %v13133_v49 = vmul.f32 0.044715, %v21944_v17  ;;  %v21951_v62 = vadd.f32 %v12880_v27, %v21932_v18  ;;  %v21954_v48 = vadd.f32 %v12993_v14, %v21936_v32 }
 0xaae   : > { %v13194_v60 = vmul.f32 %v13130_v51, %v12875_v1  ;;  %v13196_v57 = vmul.f32 %v13132_v46, %v12988_v45  ;;  %v13134_v5 = vmul.f32 0.044715, %v12879_v37  ;;  %v13136_v6 = vmul.f32 0.044715, %v12992_v63 }
 0xaaf   : > { %v13195_v35 = vmul.f32 %v13131_v25, %v21941_v10  ;;  %v13197_v33 = vmul.f32 %v13133_v49, %v21944_v17  ;;  %v13135_v38 = vmul.f32 0.044715, %v21951_v62  ;;  %v21965_v13 = vmul.f32 0.5, %v12875_v1 }
 0xab0   : > { %v13258_v29 = vmul.f32 %v13194_v60, %v12875_v1  ;;  %v13260_v26 = vmul.f32 %v13196_v57, %v12988_v45  ;;  %v13198_v40 = vmul.f32 %v13134_v5, %v12879_v37  ;;  %v13200_v42 = vmul.f32 %v13136_v6, %v12992_v63 }
 0xab1   : > { %v12884_v43 = vpop.f32.mrb[100].mxu1  ;;  %v12997_v59 = vpop.f32.mrb[100].mxu0  ;;  %v21967_v20 = vmul.f32 0.5, %v12988_v45  ;;  %v13137_v30 = vmul.f32 0.044715, %v21954_v48  ;;  %v21970_v51 = vmul.f32 0.5, %v12879_v37  ;;  %v21980_v57 = vmul.f32 %v13195_v35, %v21941_v10 }
 0xab2   : > { %v13322_v39 = vadd.f32 %v13258_v29, %v12875_v1  ;;  %v12886_v55 = vpop.f32.mrb[101].mxu1  ;;  %v12999_v54 = vpop.f32.mrb[101].mxu0  ;;  %v13324_v58 = vadd.f32 %v13260_v26, %v12988_v45  ;;  %v13262_v23 = vmul.f32 %v13198_v40, %v12879_v37  ;;  %v21960_v36 = vadd.f32 %v12884_v43, %v21926_v2 }
 0xab3   : > { %v21963_v4 = vadd.f32 %v12997_v59, %v21929_v8  ;;  %v12888_v9 = vpop.f32.mrb[102].mxu1  ;;  %v13001_v44 = vpop.f32.mrb[102].mxu0  ;;  %v13264_v52 = vmul.f32 %v13200_v42, %v12992_v63  ;;  %v21972_v25 = vmul.f32 0.5, %v12992_v63  ;;  %v21977_v1 = vadd.f32 %v12886_v55, %v21932_v18 }
 0xab4   : > { %v12890_v3 = vpop.f32.mrb[103].mxu1  ;;  %v13003_v19 = vpop.f32.mrb[103].mxu0  ;;  %v13386_v7 = vmul.f32 0.7978846, %v13322_v39  ;;  %v13326_v46 = vadd.f32 %v13262_v23, %v12879_v37  ;;  %v13138_v14 = vmul.f32 0.044715, %v21960_v36  ;;  %v21983_v49 = vmul.f32 %v13197_v33, %v21944_v17 }
 0xab5   : > { %23553 = vst [vmem:[#allocation59_spill] sm:$0xff] %v21963_v4  ;;  %v13328_v27 = vadd.f32 %v13264_v52, %v12992_v63  ;;  %v13140_v60 = vmul.f32 0.044715, %v21963_v4  ;;  %v13388_v45 = vmul.f32 0.7978846, %v13324_v58  ;;  %v13199_v5 = vmul.f32 %v13135_v38, %v21951_v62 }
 0xab6   : > { %v13201_v37 = vmul.f32 %v13137_v30, %v21954_v48  ;;  %v13139_v63 = vmul.f32 0.044715, %v21977_v1  ;;  %v21989_v29 = vadd.f32 %v12999_v54, %v21936_v32  ;;  %v21992_v26 = vadd.f32 %v12888_v9, %v21926_v2 }
 0xab7   : > { %15967 = vtanh.f32 %v13386_v7  ;;  %v13390_v6 = vmul.f32 0.7978846, %v13326_v46  ;;  %v13392_v40 = vmul.f32 0.7978846, %v13328_v27  ;;  %v21995_v35 = vadd.f32 %v13001_v44, %v21929_v8 }
 0xab8   : > { %23554 = vst [vmem:[#allocation60_spill] sm:$0xff] %v21992_v26  ;;  %v13202_v39 = vmul.f32 %v13138_v14, %v21960_v36  ;;  %v13204_v33 = vmul.f32 %v13140_v60, %v21963_v4  ;;  %v13141_v42 = vmul.f32 0.044715, %v21989_v29  ;;  %v13142_v38 = vmul.f32 0.044715, %v21992_v26 }
 0xab9   : > { %23555 = vst [vmem:[#allocation58_spill] sm:$0xff] %v21995_v35  ;;  %v12894_v43 = vpop.f32.mrb[104].mxu1  ;;  %v13007_v59 = vpop.f32.mrb[104].mxu0  ;;  %v13203_v58 = vmul.f32 %v13139_v63, %v21977_v1  ;;  %v13144_v23 = vmul.f32 0.044715, %v21995_v35  ;;  %v22004_v9 = vadd.f32 %v12890_v3, %v21932_v18  ;;  %v22007_v44 = vadd.f32 %v13003_v19, %v21936_v32 }
 0xaba   : > { %v12896_v55 = vpop.f32.mrb[105].mxu1  ;;  %v13009_v54 = vpop.f32.mrb[105].mxu0  ;;  %15969 = vtanh.f32 %v13388_v45  ;;  %v22010_v7 = vmul.f32 %v13199_v5, %v21951_v62  ;;  %v22013_v46 = vadd.f32 %v12894_v43, %v21926_v2  ;;  %v22016_v27 = vadd.f32 %v13007_v59, %v21929_v8 }
 0xabb   : > { %v12898_v52 = vpop.f32.mrb[106].mxu1  ;;  %v13011_v30 = vpop.f32.mrb[106].mxu0  ;;  %15971 = vtanh.f32 %v13390_v6  ;;  %v22019_v3 = vmul.f32 %v13201_v37, %v21954_v48  ;;  %v13205_v19 = vmul.f32 %v13141_v42, %v21989_v29  ;;  %v13143_v63 = vmul.f32 0.044715, %v22004_v9 }
 0xabc   : > { %v12900_v14 = vpop.f32.mrb[107].mxu1  ;;  %v13013_v60 = vpop.f32.mrb[107].mxu0  ;;  %v22024_v45 = vmul.f32 %v13202_v39, %v21960_v36  ;;  %v13206_v5 = vmul.f32 %v13142_v38, %v21992_v26  ;;  %v13145_v43 = vmul.f32 0.044715, %v22007_v44  ;;  %v22029_v59 = vadd.f32 %v12896_v55, %v21932_v18 }
 0xabd   : > { %15973 = vtanh.f32 %v13392_v40  ;;  %v22032_v6 = vmul.f32 %v13204_v33, %v21963_v4  ;;  %v22035_v37 = vmul.f32 %v13203_v58, %v21977_v1  ;;  %v13208_v42 = vmul.f32 %v13144_v23, %v21995_v35 }
 0xabe   : > { %23556 = vst [vmem:[#allocation57_spill] sm:$0xff] %v22024_v45  ;;  %v13146_v50 = vmul.f32 0.044715, %v22013_v46  ;;  %v13148_v39 = vmul.f32 0.044715, %v22016_v27  ;;  %v22041_v38 = vadd.f32 %v13009_v54, %v21936_v32  ;;  %v22044_v61 = vadd.f32 %v12898_v52, %v21926_v2 }
 0xabf   : > { %23557 = vst [vmem:[#allocation42_spill] sm:$0xff] %v22032_v6  ;;  %v22047_v40 = vmul.f32 %v13205_v19, %v21989_v29  ;;  %v13207_v33 = vmul.f32 %v13143_v63, %v22004_v9  ;;  %v13147_v55 = vmul.f32 0.044715, %v22029_v59  ;;  %v22052_v58 = vadd.f32 %v13011_v30, %v21929_v8 }
 0xac0   : > { %v22055_v28 = vmul.f32 %v13206_v5, %v21992_v26  ;;  %v13209_v54 = vmul.f32 %v13145_v43, %v22007_v44  ;;  %v13149_v52 = vmul.f32 0.044715, %v22041_v38  ;;  %v13150_v21 = vmul.f32 0.044715, %v22044_v61 }
 0xac1   : > { %v12904_v23 = vpop.f32.mrb[108].mxu1  ;;  %v13017_v12 = vpop.f32.mrb[108].mxu0  ;;  %v13152_v63 = vmul.f32 0.044715, %v22052_v58  ;;  %v22064_v30 = vadd.f32 %v12900_v14, %v21932_v18  ;;  %v22067_v11 = vadd.f32 %v13013_v60, %v21936_v32  ;;  %v22073_v15 = vmul.f32 %v13208_v42, %v21995_v35 }
 0xac2   : > { %23558 = vst [vmem:[#allocation55_spill] sm:$0xff] %v22055_v28  ;;  %v12906_v19 = vpop.f32.mrb[109].mxu1  ;;  %v13019_v31 = vpop.f32.mrb[109].mxu0  ;;  %v22070_v5 = vadd.f32 %v12904_v23, %v21926_v2  ;;  %v13210_v47 = vmul.f32 %v13146_v50, %v22013_v46  ;;  %v13212_v56 = vmul.f32 %v13148_v39, %v22016_v27  ;;  %v22078_v24 = vadd.f32 %v13017_v12, %v21929_v8 }
 0xac3   : > { %v22060_v34 = vpop.eup %15967  ;;  %v12908_v43 = vpop.f32.mrb[110].mxu1  ;;  %23559 = vst [vmem:[#allocation54_spill] sm:$0xff] %v22073_v15  ;;  %v22081_v60 = vmul.f32 %v13207_v33, %v22004_v9  ;;  %v13151_v23 = vmul.f32 0.044715, %v22064_v30  ;;  %v13153_v53 = vmul.f32 0.044715, %v22067_v11  ;;  %v22087_v0 = vmul.f32 %v13209_v54, %v22007_v44 }
 0xac4   : > { %v13021_v16 = vpop.f32.mrb[110].mxu0  ;;  %23560 = vst [vmem:[#allocation61_spill] sm:$0xff] %v22078_v24  ;;  %v12910_v14 = vpop.f32.mrb[111].mxu1  ;;  %v13154_v41 = vmul.f32 0.044715, %v22070_v5  ;;  %v13211_v50 = vmul.f32 %v13147_v55, %v22029_v59  ;;  %v22092_v39 = vadd.f32 %v12906_v19, %v21932_v18  ;;  %v13213_v33 = vmul.f32 %v13149_v52, %v22041_v38 }
 0xac5   : > { %v13023_v22 = vpop.f32.mrb[111].mxu0  ;;  %v15970_v42 = vpop.eup %15969  ;;  %v13156_v12 = vmul.f32 0.044715, %v22078_v24  ;;  %v13214_v35 = vmul.f32 %v13150_v21, %v22044_v61  ;;  %v13216_v6 = vmul.f32 %v13152_v63, %v22052_v58  ;;  %v13215_v4 = vmul.f32 %v13151_v23, %v22064_v30 }
 0xac6   : > { %v15972_v15 = vpop.eup %15971  ;;  %v13217_v28 = vmul.f32 %v13153_v53, %v22067_v11  ;;  %v13155_v54 = vmul.f32 0.044715, %v22092_v39  ;;  %v22101_v55 = vadd.f32 %v13019_v31, %v21936_v32  ;;  %v22104_v26 = vadd.f32 %v12908_v43, %v21926_v2 }
 0xac7   : > { %v15974_v19 = vpop.eup %15973  ;;  %v22107_v45 = vmul.f32 %v13210_v47, %v22013_v46  ;;  %v22110_v21 = vmul.f32 %v13212_v56, %v22016_v27  ;;  %v13218_v52 = vmul.f32 %v13154_v41, %v22070_v5  ;;  %v22114_v63 = vadd.f32 %v13021_v16, %v21929_v8 }
 0xac8   : > { %v22117_v53 = vmul.f32 %v13211_v50, %v22029_v59  ;;  %v13220_v31 = vmul.f32 %v13156_v12, %v22078_v24  ;;  %v13219_v43 = vmul.f32 %v13155_v54, %v22092_v39  ;;  %v13157_v23 = vmul.f32 0.044715, %v22101_v55 }
 0xac9   : > { %v22123_v47 = vmul.f32 %v13213_v33, %v22041_v38  ;;  %v22126_v56 = vmul.f32 %v13214_v35, %v22044_v61  ;;  %v13158_v41 = vmul.f32 0.044715, %v22104_v26  ;;  %v13160_v16 = vmul.f32 0.044715, %v22114_v63 }
 0xaca   : > { %v22131_v8 = vmul.f32 %v13216_v6, %v22052_v58  ;;  %v22134_v50 = vmul.f32 %v13215_v4, %v22064_v30  ;;  %v22137_v12 = vmul.f32 %v13217_v28, %v22067_v11  ;;  %v22140_v54 = vadd.f32 %v12910_v14, %v21932_v18 }
 0xacb   : > { %v22143_v33 = vmul.f32 %v13218_v52, %v22070_v5  ;;  %v13221_v35 = vmul.f32 %v13157_v23, %v22101_v55  ;;  %v22147_v2 = vadd.f32 %v13023_v22, %v21936_v32  ;;  %v13323_v6 = vadd.f32 %v21980_v57, %v21941_v10 }
 0xacc   : > { %v22152_v4 = vmul.f32 %v13220_v31, %v22078_v24  ;;  %v22155_v28 = vmul.f32 %v13219_v43, %v22092_v39  ;;  %v22158_v14 = vmul.f32 0.5, %v21941_v10  ;;  %v13327_v52 = vadd.f32 %v22010_v7, %v21951_v62 }
 0xacd   : > { %v13222_v23 = vmul.f32 %v13158_v41, %v22104_v26  ;;  %v13224_v22 = vmul.f32 %v13160_v16, %v22114_v63  ;;  %v22165_v32 = vmul.f32 0.5, %v21951_v62  ;;  %v13387_v57 = vmul.f32 0.7978846, %v13323_v6 }
 0xace   : > { %23561 = vst [vmem:[#allocation63_spill] sm:$0xff] %v22152_v4  ;;  %v13159_v31 = vmul.f32 0.044715, %v22140_v54  ;;  %v13391_v18 = vmul.f32 0.7978846, %v13327_v52  ;;  %v13325_v43 = vadd.f32 %v21983_v49, %v21944_v17  ;;  %v13329_v10 = vadd.f32 %v22019_v3, %v21954_v48 }
 0xacf   : > { %v22173_v4 = vmul.f32 %v13221_v35, %v22101_v55  ;;  %v13161_v7 = vmul.f32 0.044715, %v22147_v2  ;;  %15975 = vtanh.f32 %v13387_v57  ;;  %v13514_v41 = vadd.f32 1.0, %v22060_v34 }
 0xad0   : > { %15977 = vtanh.f32 %v13391_v18  ;;  %v13389_v62 = vmul.f32 0.7978846, %v13325_v43  ;;  %v13393_v16 = vmul.f32 0.7978846, %v13329_v10  ;;  %v13518_v6 = vadd.f32 1.0, %v15972_v15 }
 0xad1   : > { %v22178_v52 = vmul.f32 %v13222_v23, %v22104_v26  ;;  %v22181_v49 = vmul.f32 0.5, %v21944_v17  ;;  %v13516_v24 = vadd.f32 1.0, %v15970_v42  ;;  %v13520_v3 = vadd.f32 1.0, %v15974_v19 }
 0xad2   : > { %15979 = vtanh.f32 %v13389_v62  ;;  %v22184_v35 = vmul.f32 %v13514_v41, %v21965_v13  ;;  %v22187_v57 = vmul.f32 %v13518_v6, %v21970_v51  ;;  %v13331_v34 = vadd.f32 %v22035_v37, %v21977_v1  ;;  %v23563_v41 = vld [vmem:[#allocation60_spill] sm:$0xff]  ;;  %v23564_v62 = vld [vmem:[#allocation55_spill] sm:$0xff] }
 0xad3   : > { %15981 = vtanh.f32 %v13393_v16  ;;  %v22192_v15 = vmul.f32 %v13516_v24, %v21967_v20  ;;  %v22195_v18 = vmul.f32 %v13520_v3, %v21972_v25  ;;  %v13335_v17 = vadd.f32 %v22081_v60, %v22004_v9  ;;  %v23565_v6 = vld [vmem:[#allocation59_spill] sm:$0xff]  ;;  %v23566_v3 = vld [vmem:[#allocation42_spill] sm:$0xff] }
 0xad4   : > { %v13223_v42 = vmul.f32 %v13159_v31, %v22140_v54  ;;  %v13225_v13 = vmul.f32 %v13161_v7, %v22147_v2  ;;  %v13642_v51 = vpack.c.bf16 %v22187_v57, %v22184_v35  ;;  %v13395_v19 = vmul.f32 0.7978846, %v13331_v34  ;;  %v23562_v31 = vld [vmem:[#allocation57_spill] sm:$0xff] }
 0xad5   : > { %v13644_v37 = vpack.c.bf16 %v22195_v18, %v22192_v15  ;;  %v13399_v23 = vmul.f32 0.7978846, %v13335_v17  ;;  %v13333_v24 = vadd.f32 %v22047_v40, %v21989_v29  ;;  %v13337_v20 = vadd.f32 %v22087_v0, %v22007_v44  ;;  %v23567_v17 = vld [vmem:[#allocation58_spill] sm:$0xff] }
 0xad6   : > { %v22210_v25 = vmul.f32 %v13224_v22, %v22114_v63  ;;  %v13073_v60 = vmul.f32 0.5, %v21954_v48  ;;  %15983 = vtanh.f32 %v13395_v19  ;;  %v13330_v43 = vadd.f32 %v23562_v31, %v21960_v36  ;;  %v23568_v19 = vld [vmem:[#allocation54_spill] sm:$0xff] }
 0xad7   : > { %15985 = vtanh.f32 %v13399_v23  ;;  %v13397_v10 = vmul.f32 0.7978846, %v13333_v24  ;;  %v13401_v7 = vmul.f32 0.7978846, %v13337_v20  ;;  %v13334_v16 = vadd.f32 %v23564_v62, %v23563_v41 }
 0xad8   : > { %v22218_v40 = vmul.f32 %v13223_v42, %v22140_v54  ;;  %v22221_v0 = vmul.f32 %v13225_v13, %v22147_v2  ;;  %v13394_v22 = vmul.f32 0.7978846, %v13330_v43  ;;  %v13332_v48 = vadd.f32 %v23566_v3, %v23565_v6 }
 0xad9   : > { %v15976_v35 = vpop.eup %15975  ;;  %v13075_v57 = vmul.f32 0.5, %v21977_v1  ;;  %15987 = vtanh.f32 %v13397_v10  ;;  %v13398_v34 = vmul.f32 0.7978846, %v13334_v16  ;;  %v13336_v23 = vadd.f32 %v23568_v19, %v23567_v17 }
 0xada   : > { %v15978_v24 = vpop.eup %15977  ;;  %v13515_v20 = vadd.f32 1.0, %v15976_v35  ;;  %v13079_v42 = vmul.f32 0.5, %v22004_v9  ;;  %15989 = vtanh.f32 %v13401_v7  ;;  %v13396_v31 = vmul.f32 0.7978846, %v13332_v48 }
 0xadb   : > { %v13519_v13 = vadd.f32 1.0, %v15978_v24  ;;  %15991 = vtanh.f32 %v13394_v22  ;;  %v13400_v43 = vmul.f32 0.7978846, %v13336_v23  ;;  %v13339_v62 = vadd.f32 %v22117_v53, %v22029_v59 }
 0xadc   : > { %v15980_v3 = vpop.eup %15979  ;;  %v13579_v1 = vmul.f32 %v13515_v20, %v22158_v14  ;;  %v13077_v10 = vmul.f32 0.5, %v21989_v29  ;;  %15993 = vtanh.f32 %v13398_v34  ;;  %v13343_v16 = vadd.f32 %v22134_v50, %v22064_v30 }
 0xadd   : > { %v15982_v35 = vpop.eup %15981  ;;  %v13583_v9 = vmul.f32 %v13519_v13, %v22165_v32  ;;  %v13517_v7 = vadd.f32 1.0, %v15980_v3  ;;  %15995 = vtanh.f32 %v13396_v31  ;;  %v13403_v48 = vmul.f32 0.7978846, %v13339_v62 }
 0xade   : > { %v13521_v22 = vadd.f32 1.0, %v15982_v35  ;;  %v13081_v19 = vmul.f32 0.5, %v22007_v44  ;;  %15997 = vtanh.f32 %v13400_v43  ;;  %v13407_v53 = vmul.f32 0.7978846, %v13343_v16 }
 0xadf   : > { %v13643_v23 = vpack.c.bf16 %v13583_v9, %v13579_v1  ;;  %v13074_v14 = vmul.f32 0.5, %v21960_v36  ;;  %15999 = vtanh.f32 %v13403_v48  ;;  %v13341_v29 = vadd.f32 %v22123_v47, %v22041_v38 }
 0xae0   : > { %v15984_v34 = vpop.eup %15983  ;;  %v13581_v50 = vmul.f32 %v13517_v7, %v22181_v49  ;;  %v13585_v24 = vmul.f32 %v13521_v22, %v13073_v60  ;;  %16001 = vtanh.f32 %v13407_v53  ;;  %v13345_v32 = vadd.f32 %v22137_v12, %v22067_v11 }
 0xae1   : > { %v15986_v20 = vpop.eup %15985  ;;  %13966 = vmatprep.mubr.bf16.mxu1 %v13643_v23  ;;  %v13523_v44 = vadd.f32 1.0, %v15984_v34  ;;  %v13078_v31 = vmul.f32 0.5, %v23563_v41  ;;  %v13405_v13 = vmul.f32 0.7978846, %v13341_v29  ;;  %v13338_v36 = vadd.f32 %v22107_v45, %v22013_v46 }
 0xae2   : > { %v13645_v43 = vpack.c.bf16 %v13585_v24, %v13581_v50  ;;  %13967 = vmatmul.mubr.bf16.vlgmr.msra.gmra.mrb[128].mxu1 %v13642_v51  ;;  %v13527_v47 = vadd.f32 1.0, %v15986_v20  ;;  %v13409_v62 = vmul.f32 0.7978846, %v13345_v32  ;;  %v13342_v49 = vadd.f32 %v22126_v56, %v22044_v61 }
 0xae3   : > { %v15988_v60 = vpop.eup %15987  ;;  %v13587_v3 = vmul.f32 %v13523_v44, %v13075_v57  ;;  %v13076_v12 = vmul.f32 0.5, %v23565_v6  ;;  %16003 = vtanh.f32 %v13405_v13  ;;  %v13402_v1 = vmul.f32 0.7978846, %v13338_v36 }
 0xae4   : > { %v15990_v16 = vpop.eup %15989  ;;  %14063 = vmatprep.mubr.bf16.mxu0 %v13645_v43  ;;  %v13591_v41 = vmul.f32 %v13527_v47, %v13079_v42  ;;  %v13525_v35 = vadd.f32 1.0, %v15988_v60  ;;  %16005 = vtanh.f32 %v13409_v62  ;;  %v13406_v9 = vmul.f32 0.7978846, %v13342_v49 }
 0xae5   : > { %v15992_v45 = vpop.eup %15991  ;;  %14064 = vmatmul.mubr.bf16.vlgmr.msra.gmra.mrb[128].mxu0 %v13644_v37  ;;  %v13529_v51 = vadd.f32 1.0, %v15990_v16  ;;  %v13080_v56 = vmul.f32 0.5, %v23567_v17  ;;  %16007 = vtanh.f32 %v13402_v1  ;;  %v13340_v6 = vadd.f32 %v22110_v21, %v22016_v27 }
 0xae6   : > { %v15994_v57 = vpop.eup %15993  ;;  %v13647_v7 = vpack.c.bf16 %v13591_v41, %v13587_v3  ;;  %v13589_v48 = vmul.f32 %v13525_v35, %v13077_v10  ;;  %v13522_v22 = vadd.f32 1.0, %v15992_v45  ;;  %16009 = vtanh.f32 %v13406_v9 }
 0xae7   : > { %v15996_v42 = vpop.eup %15995  ;;  %v13593_v53 = vmul.f32 %v13529_v51, %v13081_v19  ;;  %v13526_v23 = vadd.f32 1.0, %v15994_v57  ;;  %v13344_v29 = vadd.f32 %v22131_v8, %v22052_v58  ;;  %v13404_v15 = vmul.f32 0.7978846, %v13340_v6 }
 0xae8   : > { %v15998_v18 = vpop.eup %15997  ;;  %13974 = vmatprep.mubr.bf16.mxu1 %v13647_v7  ;;  %v13586_v37 = vmul.f32 %v13522_v22, %v13074_v14  ;;  %v13524_v17 = vadd.f32 1.0, %v15996_v42  ;;  %v13083_v34 = vmul.f32 0.5, %v22029_v59  ;;  %v13087_v21 = vmul.f32 0.5, %v22064_v30 }
 0xae9   : > { %v16000_v50 = vpop.eup %15999  ;;  %v13649_v24 = vpack.c.bf16 %v13593_v53, %v13589_v48  ;;  %v13590_v10 = vmul.f32 %v13526_v23, %v13078_v31  ;;  %v13528_v32 = vadd.f32 1.0, %v15998_v18  ;;  %v13408_v20 = vmul.f32 0.7978846, %v13344_v29  ;;  %v23569_v29 = vld [vmem:[#allocation61_spill] sm:$0xff] }
 0xaea   : > { %v16002_v44 = vpop.eup %16001  ;;  %v13588_v19 = vmul.f32 %v13524_v17, %v13076_v12  ;;  %v13531_v13 = vadd.f32 1.0, %v16000_v50  ;;  %16011 = vtanh.f32 %v13404_v15  ;;  %v13347_v8 = vadd.f32 %v22155_v28, %v22092_v39  ;;  %v23570_v15 = vld [vmem:[#allocation63_spill] sm:$0xff] }
 0xaeb   : > { %14071 = vmatprep.mubr.bf16.mxu0 %v13649_v24  ;;  %v13646_v36 = vpack.c.bf16 %v13590_v10, %v13586_v37  ;;  %v13592_v14 = vmul.f32 %v13528_v32, %v13080_v56  ;;  %v13535_v43 = vadd.f32 1.0, %v16002_v44  ;;  %16013 = vtanh.f32 %v13408_v20 }
 0xaec   : > { %v13085_v59 = vmul.f32 0.5, %v22041_v38  ;;  %v13089_v30 = vmul.f32 0.5, %v22067_v11  ;;  %v13351_v31 = vadd.f32 %v22218_v40, %v22140_v54  ;;  %v13411_v47 = vmul.f32 0.7978846, %v13347_v8 }
 0xaed   : > { %v16004_v62 = vpop.eup %16003  ;;  %13975 = vmatmul.mubr.bf16.gmra.mrb[132].mxu1 %v13646_v36  ;;  %v13648_v49 = vpack.c.bf16 %v13592_v14, %v13588_v19  ;;  %v13595_v60 = vmul.f32 %v13531_v13, %v13083_v34  ;;  %v13599_v3 = vmul.f32 %v13535_v43, %v13087_v21  ;;  %v13349_v28 = vadd.f32 %v22173_v4, %v22101_v55  ;;  %v23572_v36 = vld [vmem:[#allocation30_spill] sm:$0xff] }
 0xaee   : > { %v16006_v12 = vpop.eup %16005  ;;  %v13533_v1 = vadd.f32 1.0, %v16004_v62  ;;  %v13415_v16 = vmul.f32 0.7978846, %v13351_v31  ;;  %16015 = vtanh.f32 %v13411_v47  ;;  %v13353_v38 = vadd.f32 %v22221_v0, %v22147_v2 }
 0xaef   : > { %v16008_v11 = vpop.eup %16007  ;;  %14072 = vmatmul.mubr.bf16.gmra.mrb[132].mxu0 %v13648_v49  ;;  %v13651_v41 = vpack.c.bf16 %v13599_v3, %v13595_v60  ;;  %v13537_v40 = vadd.f32 1.0, %v16006_v12  ;;  %v13082_v35 = vmul.f32 0.5, %v22013_v46  ;;  %v13413_v9 = vmul.f32 0.7978846, %v13349_v28  ;;  %v23573_v60 = vld [vmem:[#allocation53_spill] sm:$0xff]  ;;  %v23574_v28 = vld [vmem:[#allocation47_spill] sm:$0xff] }
 0xaf0   : > { %v16010_v45 = vpop.eup %16009  ;;  %v13086_v51 = vmul.f32 0.5, %v22044_v61  ;;  %v13530_v56 = vadd.f32 1.0, %v16008_v11  ;;  %16017 = vtanh.f32 %v13415_v16  ;;  %v13417_v4 = vmul.f32 0.7978846, %v13353_v38 }
 0xaf1   : > { %13982 = vmatprep.mubr.bf16.mxu1 %v13651_v41  ;;  %v13597_v6 = vmul.f32 %v13533_v1, %v13085_v59  ;;  %v13601_v57 = vmul.f32 %v13537_v40, %v13089_v30  ;;  %v13534_v7 = vadd.f32 1.0, %v16010_v45  ;;  %16019 = vtanh.f32 %v13413_v9 }
 0xaf2   : > { %16021 = vtanh.f32 %v13417_v4  ;;  %v13346_v0 = vadd.f32 %v22143_v33, %v22070_v5  ;;  %v13350_v48 = vadd.f32 %v22178_v52, %v22104_v26  ;;  %v13594_v22 = vmul.f32 %v13530_v56, %v13082_v35 }
 0xaf3   : > { %v13653_v46 = vpack.c.bf16 %v13601_v57, %v13597_v6  ;;  %v13598_v42 = vmul.f32 %v13534_v7, %v13086_v51  ;;  %v13348_v18 = vadd.f32 %v23570_v15, %v23569_v29  ;;  %v13352_v37 = vadd.f32 %v22210_v25, %v22114_v63  ;;  %v23571_v25 = vld [vmem:[#allocation27_spill] sm:$0xff] }
 0xaf4   : > { %v16012_v53 = vpop.eup %16011  ;;  %v13410_v61 = vmul.f32 0.7978846, %v13346_v0  ;;  %v13414_v23 = vmul.f32 0.7978846, %v13350_v48  ;;  %v13084_v33 = vmul.f32 0.5, %v22016_v27  ;;  %v13088_v21 = vmul.f32 0.5, %v22052_v58 }
 0xaf5   : > { %v16014_v17 = vpop.eup %16013  ;;  %14079 = vmatprep.mubr.bf16.mxu0 %v13653_v46  ;;  %v13650_v34 = vpack.c.bf16 %v13598_v42, %v13594_v22  ;;  %v13532_v52 = vadd.f32 1.0, %v16012_v53  ;;  %v13412_v24 = vmul.f32 0.7978846, %v13348_v18  ;;  %v13416_v10 = vmul.f32 0.7978846, %v13352_v37 }
 0xaf6   : > { %v13536_v50 = vadd.f32 1.0, %v16014_v17  ;;  %16023 = vtanh.f32 %v13410_v61  ;;  %v13091_v43 = vmul.f32 0.5, %v22092_v39  ;;  %v13095_v49 = vmul.f32 0.5, %v22140_v54 }
 0xaf7   : > { %13983 = vmatmul.mubr.bf16.gmra.mrb[136].mxu1 %v13650_v34  ;;  %v13596_v32 = vmul.f32 %v13532_v52, %v13084_v33  ;;  %16025 = vtanh.f32 %v13414_v23  ;;  %v13093_v39 = vmul.f32 0.5, %v22101_v55  ;;  %v13097_v41 = vmul.f32 0.5, %v22147_v2 }
 0xaf8   : > { %v16016_v19 = vpop.eup %16015  ;;  %v13600_v13 = vmul.f32 %v13536_v50, %v13088_v21  ;;  %16027 = vtanh.f32 %v13412_v24  ;;  %v13090_v54 = vmul.f32 0.5, %v22070_v5  ;;  %v13094_v45 = vmul.f32 0.5, %v22104_v26 }
 0xaf9   : > { %v12914_v20 = vpop.f32.mrb[112].mxu1  ;;  %v13027_v44 = vpop.f32.mrb[112].mxu0  ;;  %v13539_v59 = vadd.f32 1.0, %v16016_v19  ;;  %16029 = vtanh.f32 %v13416_v10  ;;  %v13092_v57 = vmul.f32 0.5, %v23569_v29  ;;  %v13096_v55 = vmul.f32 0.5, %v22114_v63 }
 0xafa   : > { %v22282_v8 = vadd.f32 %v12914_v20, %v23571_v25  ;;  %v22285_v27 = vadd.f32 %v13027_v44, %v23572_v36  ;;  %v12916_v58 = vpop.f32.mrb[113].mxu1  ;;  %v13029_v14 = vpop.f32.mrb[113].mxu0  ;;  %v13652_v62 = vpack.c.bf16 %v13600_v13, %v13596_v32 }
 0xafb   : > { %v12918_v30 = vpop.f32.mrb[114].mxu1  ;;  %v13031_v31 = vpop.f32.mrb[114].mxu0  ;;  %v22290_v3 = vadd.f32 %v12916_v58, %v23573_v60  ;;  %v22293_v12 = vadd.f32 %v13029_v14, %v23574_v28  ;;  %v13603_v56 = vmul.f32 %v13539_v59, %v13091_v43 }
 0xafc   : > { %v16018_v47 = vpop.eup %16017  ;;  %v12920_v1 = vpop.f32.mrb[115].mxu1  ;;  %v13162_v40 = vmul.f32 0.044715, %v22282_v8  ;;  %14080 = vmatmul.mubr.bf16.gmra.mrb[136].mxu0 %v13652_v62  ;;  %v13164_v51 = vmul.f32 0.044715, %v22285_v27  ;;  %v22306_v0 = vadd.f32 %v12918_v30, %v23571_v25  ;;  %v22311_v23 = vadd.f32 %v13031_v31, %v23572_v36 }
 0xafd   : > { %v13033_v16 = vpop.f32.mrb[115].mxu0  ;;  %v16020_v38 = vpop.eup %16019  ;;  %v13543_v11 = vadd.f32 1.0, %v16018_v47  ;;  %v13163_v2 = vmul.f32 0.044715, %v22290_v3  ;;  %v13165_v7 = vmul.f32 0.044715, %v22293_v12  ;;  %v22314_v63 = vadd.f32 %v12920_v1, %v23573_v60 }
 0xafe   : > { %v16022_v35 = vpop.eup %16021  ;;  %v13541_v9 = vadd.f32 1.0, %v16020_v38  ;;  %v13226_v26 = vmul.f32 %v13162_v40, %v22282_v8  ;;  %v13228_v61 = vmul.f32 %v13164_v51, %v22285_v27  ;;  %v22317_v29 = vadd.f32 %v13033_v16, %v23574_v28 }
 0xaff   : > { %v13607_v4 = vmul.f32 %v13543_v11, %v13095_v49  ;;  %v13545_v6 = vadd.f32 1.0, %v16022_v35  ;;  %v13227_v32 = vmul.f32 %v13163_v2, %v22290_v3  ;;  %v13166_v20 = vmul.f32 0.044715, %v22306_v0 }
 0xb00   : > { %v13605_v5 = vmul.f32 %v13541_v9, %v13093_v39  ;;  %v16024_v53 = vpop.eup %16023  ;;  %v13168_v44 = vmul.f32 0.044715, %v22311_v23  ;;  %v13167_v14 = vmul.f32 0.044715, %v22314_v63  ;;  %v13169_v43 = vmul.f32 0.044715, %v22317_v29 }
 0xb01   : > { %v13655_v48 = vpack.c.bf16 %v13607_v4, %v13603_v56  ;;  %v13609_v46 = vmul.f32 %v13545_v6, %v13097_v41  ;;  %v12924_v22 = vpop.f32.mrb[116].mxu1  ;;  %v13037_v42 = vpop.f32.mrb[116].mxu0  ;;  %v13538_v34 = vadd.f32 1.0, %v16024_v53  ;;  %v13229_v49 = vmul.f32 %v13165_v7, %v22293_v12 }
 0xb02   : > { %v12926_v15 = vpop.f32.mrb[117].mxu1  ;;  %v13039_v18 = vpop.f32.mrb[117].mxu0  ;;  %v22320_v33 = vadd.f32 %v12924_v22, %v23571_v25  ;;  %v22323_v21 = vadd.f32 %v13037_v42, %v23572_v36  ;;  %v22335_v1 = vmul.f32 %v13226_v26, %v22282_v8  ;;  %v22338_v16 = vmul.f32 %v13228_v61, %v22285_v27 }
 0xb03   : > { %v16026_v37 = vpop.eup %16025  ;;  %13990 = vmatprep.mubr.bf16.mxu1 %v13655_v48  ;;  %v13657_v17 = vpack.c.bf16 %v13609_v46, %v13605_v5  ;;  %v12928_v52 = vpop.f32.mrb[118].mxu1  ;;  %v22331_v59 = vadd.f32 %v12926_v15, %v23573_v60  ;;  %v13602_v31 = vmul.f32 %v13538_v34, %v13090_v54  ;;  %v13230_v35 = vmul.f32 %v13166_v20, %v22306_v0 }
 0xb04   : > { %23575 = vst [vmem:[#allocation43_spill] sm:$0xff] %v22323_v21  ;;  %v13041_v50 = vpop.f32.mrb[118].mxu0  ;;  %v16028_v24 = vpop.eup %16027  ;;  %v13542_v10 = vadd.f32 1.0, %v16026_v37  ;;  %v13170_v38 = vmul.f32 0.044715, %v22320_v33  ;;  %v13232_v9 = vmul.f32 %v13168_v44, %v22311_v23  ;;  %v13231_v54 = vmul.f32 %v13167_v14, %v22314_v63 }
 0xb05   : > { %v12930_v19 = vpop.f32.mrb[119].mxu1  ;;  %v16030_v13 = vpop.eup %16029  ;;  %14087 = vmatprep.mubr.bf16.mxu0 %v13657_v17  ;;  %v13540_v58 = vadd.f32 1.0, %v16028_v24  ;;  %v13172_v11 = vmul.f32 0.044715, %v22323_v21  ;;  %v13171_v51 = vmul.f32 0.044715, %v22331_v59  ;;  %v22348_v2 = vadd.f32 %v13039_v18, %v23574_v28 }
 0xb06   : > { %v13043_v30 = vpop.f32.mrb[119].mxu0  ;;  %v13606_v47 = vmul.f32 %v13542_v10, %v13094_v45  ;;  %v13544_v62 = vadd.f32 1.0, %v16030_v13  ;;  %v13233_v45 = vmul.f32 %v13169_v43, %v22317_v29  ;;  %v13234_v5 = vmul.f32 %v13170_v38, %v22320_v33 }
 0xb07   : > { %v13604_v41 = vmul.f32 %v13540_v58, %v13092_v57  ;;  %v22351_v57 = vadd.f32 %v12928_v52, %v23571_v25  ;;  %v13236_v46 = vmul.f32 %v13172_v11, %v22323_v21  ;;  %v22359_v26 = vadd.f32 %v12930_v19, %v23573_v60 }
 0xb08   : > { %v13654_v39 = vpack.c.bf16 %v13606_v47, %v13602_v31  ;;  %v13608_v40 = vmul.f32 %v13544_v62, %v13096_v55  ;;  %v22354_v55 = vadd.f32 %v13041_v50, %v23572_v36  ;;  %v22362_v22 = vadd.f32 %v13043_v30, %v23574_v28 }
 0xb09   : > { %v12934_v56 = vpop.f32.mrb[120].mxu1  ;;  %v13047_v4 = vpop.f32.mrb[120].mxu0  ;;  %v13235_v61 = vmul.f32 %v13171_v51, %v22331_v59  ;;  %v13173_v15 = vmul.f32 0.044715, %v22348_v2  ;;  %v13174_v18 = vmul.f32 0.044715, %v22351_v57  ;;  %v22371_v17 = vmul.f32 %v13227_v32, %v22290_v3 }
 0xb0a   : > { %13991 = vmatmul.mubr.bf16.gmra.mrb[140].mxu1 %v13654_v39  ;;  %v13656_v6 = vpack.c.bf16 %v13608_v40, %v13604_v41  ;;  %23576 = vst [vmem:[#allocation64_spill] sm:$0xff] %v22354_v55  ;;  %v12936_v7 = vpop.f32.mrb[121].mxu1  ;;  %v13049_v48 = vpop.f32.mrb[121].mxu0  ;;  %v22368_v37 = vadd.f32 %v12934_v56, %v23571_v25  ;;  %v13176_v34 = vmul.f32 0.044715, %v22354_v55  ;;  %v22376_v50 = vadd.f32 %v13047_v4, %v23572_v36 }
 0xb0b   : > { %v12938_v42 = vpop.f32.mrb[122].mxu1  ;;  %v13051_v53 = vpop.f32.mrb[122].mxu0  ;;  %v13175_v52 = vmul.f32 0.044715, %v22359_v26  ;;  %v22379_v20 = vmul.f32 %v13229_v49, %v22293_v12  ;;  %v22382_v44 = vmul.f32 %v13230_v35, %v22306_v0  ;;  %v22385_v19 = vmul.f32 %v13232_v9, %v22311_v23 }
 0xb0c   : > { %14088 = vmatmul.mubr.bf16.gmra.mrb[140].mxu0 %v13656_v6  ;;  %v12940_v24 = vpop.f32.mrb[123].mxu1  ;;  %v13053_v10 = vpop.f32.mrb[123].mxu0  ;;  %v13177_v32 = vmul.f32 0.044715, %v22362_v22  ;;  %v22389_v13 = vmul.f32 %v13231_v54, %v22314_v63  ;;  %v22392_v58 = vmul.f32 %v13233_v45, %v22317_v29  ;;  %v13178_v14 = vmul.f32 0.044715, %v22368_v37 }
 0xb0d   : > { %v22396_v43 = vadd.f32 %v12936_v7, %v23573_v60  ;;  %v22399_v30 = vmul.f32 %v13234_v5, %v22320_v33  ;;  %v22402_v31 = vmul.f32 %v13236_v46, %v22323_v21  ;;  %v22405_v47 = vmul.f32 %v13235_v61, %v22331_v59 }
 0xb0e   : > { %v13180_v62 = vmul.f32 0.044715, %v22376_v50  ;;  %v13237_v49 = vmul.f32 %v13173_v15, %v22348_v2  ;;  %v13238_v38 = vmul.f32 %v13174_v18, %v22351_v57  ;;  %v13240_v11 = vmul.f32 %v13176_v34, %v22354_v55 }
 0xb0f   : > { %23577 = vst [vmem:[#allocation62_spill] sm:$0xff] %v22399_v30  ;;  %23578 = vst [vmem:[#allocation65_spill] sm:$0xff] %v22402_v31  ;;  %v13239_v39 = vmul.f32 %v13175_v52, %v22359_v26  ;;  %v13241_v35 = vmul.f32 %v13177_v32, %v22362_v22  ;;  %v22414_v9 = vadd.f32 %v13049_v48, %v23574_v28  ;;  %v13179_v6 = vmul.f32 0.044715, %v22396_v43 }
 0xb10   : > { %v22417_v54 = vadd.f32 %v12938_v42, %v23571_v25  ;;  %v22420_v45 = vadd.f32 %v13051_v53, %v23572_v36  ;;  %v13242_v4 = vmul.f32 %v13178_v14, %v22368_v37  ;;  %v22425_v7 = vadd.f32 %v12940_v24, %v23573_v60 }
 0xb11   : > { %v12944_v41 = vpop.f32.mrb[124].mxu1  ;;  %v13057_v40 = vpop.f32.mrb[124].mxu0  ;;  %v22428_v5 = vadd.f32 %v13053_v10, %v23574_v28  ;;  %v13244_v42 = vmul.f32 %v13180_v62, %v22376_v50  ;;  %v13181_v61 = vmul.f32 0.044715, %v22414_v9  ;;  %v22437_v18 = vmul.f32 %v13237_v49, %v22348_v2 }
 0xb12   : > { %v12946_v51 = vpop.f32.mrb[125].mxu1  ;;  %v13059_v56 = vpop.f32.mrb[125].mxu0  ;;  %v13182_v53 = vmul.f32 0.044715, %v22417_v54  ;;  %v22434_v15 = vadd.f32 %v12944_v41, %v23571_v25  ;;  %v13184_v34 = vmul.f32 0.044715, %v22420_v45  ;;  %v22442_v24 = vadd.f32 %v13057_v40, %v23572_v36 }
 0xb13   : > { %v12948_v48 = vpop.f32.mrb[126].mxu1  ;;  %v13061_v46 = vpop.f32.mrb[126].mxu0  ;;  %v13183_v52 = vmul.f32 0.044715, %v22425_v7  ;;  %v22445_v14 = vmul.f32 %v13238_v38, %v22351_v57  ;;  %v22448_v62 = vmul.f32 %v13240_v11, %v22354_v55  ;;  %v22451_v41 = vmul.f32 %v13239_v39, %v22359_v26 }
 0xb14   : > { %v12950_v10 = vpop.f32.mrb[127].mxu1  ;;  %v13063_v32 = vpop.f32.mrb[127].mxu0  ;;  %v13185_v49 = vmul.f32 0.044715, %v22428_v5  ;;  %v22455_v31 = vmul.f32 %v13241_v35, %v22362_v22  ;;  %v13243_v21 = vmul.f32 %v13179_v6, %v22396_v43  ;;  %v13186_v40 = vmul.f32 0.044715, %v22434_v15 }
 0xb15   : > { %23579 = vst [vmem:[#allocation68_spill] sm:$0xff] %v22445_v14  ;;  %23580 = vst [vmem:[#allocation66_spill] sm:$0xff] %v22448_v62  ;;  %v22460_v30 = vadd.f32 %v12946_v51, %v23573_v60  ;;  %v22463_v38 = vmul.f32 %v13242_v4, %v22368_v37  ;;  %v22466_v11 = vmul.f32 %v13244_v42, %v22376_v50  ;;  %v13188_v62 = vmul.f32 0.044715, %v22442_v24 }
 0xb16   : > { %v13245_v39 = vmul.f32 %v13181_v61, %v22414_v9  ;;  %v13246_v35 = vmul.f32 %v13182_v53, %v22417_v54  ;;  %v13248_v55 = vmul.f32 %v13184_v34, %v22420_v45  ;;  %v13247_v6 = vmul.f32 %v13183_v52, %v22425_v7 }
 0xb17   : > { %23581 = vst [vmem:[#allocation67_spill] sm:$0xff] %v22466_v11  ;;  %v13187_v14 = vmul.f32 0.044715, %v22460_v30  ;;  %v13249_v51 = vmul.f32 %v13185_v49, %v22428_v5  ;;  %v22476_v4 = vadd.f32 %v13059_v56, %v23574_v28  ;;  %v22479_v42 = vadd.f32 %v12948_v48, %v23571_v25 }
 0xb18   : > { %v22482_v61 = vadd.f32 %v13061_v46, %v23572_v36  ;;  %v22485_v11 = vmul.f32 %v13243_v21, %v22396_v43  ;;  %v13250_v53 = vmul.f32 %v13186_v40, %v22434_v15  ;;  %v22489_v34 = vadd.f32 %v12950_v10, %v23573_v60 }
 0xb19   : > { %v22492_v52 = vadd.f32 %v13063_v32, %v23574_v28  ;;  %v13252_v56 = vmul.f32 %v13188_v62, %v22442_v24  ;;  %v13251_v49 = vmul.f32 %v13187_v14, %v22460_v30  ;;  %v13189_v25 = vmul.f32 0.044715, %v22476_v4 }
 0xb1a   : > { %v13355_v36 = vadd.f32 %v22371_v17, %v22290_v3  ;;  %v22500_v21 = vmul.f32 %v13245_v39, %v22414_v9  ;;  %v22503_v48 = vmul.f32 %v13246_v35, %v22417_v54  ;;  %v13190_v60 = vmul.f32 0.044715, %v22479_v42 }
 0xb1b   : > { %v13192_v28 = vmul.f32 0.044715, %v22482_v61  ;;  %v22508_v46 = vmul.f32 %v13248_v55, %v22420_v45  ;;  %v22511_v10 = vmul.f32 %v13247_v6, %v22425_v7  ;;  %v22514_v32 = vmul.f32 %v13249_v51, %v22428_v5 }
 0xb1c   : > { %v13191_v17 = vmul.f32 0.044715, %v22489_v34  ;;  %v22518_v14 = vmul.f32 %v13250_v53, %v22434_v15  ;;  %v13193_v62 = vmul.f32 0.044715, %v22492_v52  ;;  %v13359_v40 = vadd.f32 %v22389_v13, %v22314_v63 }
 0xb1d   : > { %23582 = vst [vmem:[#allocation71_spill] sm:$0xff] %v22508_v46  ;;  %v13419_v39 = vmul.f32 0.7978846, %v13355_v36  ;;  %v22524_v55 = vmul.f32 %v13252_v56, %v22442_v24  ;;  %v22527_v35 = vmul.f32 %v13251_v49, %v22460_v30  ;;  %v13253_v6 = vmul.f32 %v13189_v25, %v22476_v4 }
 0xb1e   : > { %23583 = vst [vmem:[#allocation70_spill] sm:$0xff] %v22518_v14  ;;  %v13099_v51 = vmul.f32 0.5, %v22290_v3  ;;  %v22532_v46 = vmul.f32 %v13190_v60, %v22479_v42  ;;  %v22535_v53 = vmul.f32 %v13192_v28, %v22482_v61  ;;  %v13423_v14 = vmul.f32 0.7978846, %v13359_v40 }
 0xb1f   : > { %16031 = vtanh.f32 %v13419_v39  ;;  %v13255_v13 = vmul.f32 %v13191_v17, %v22489_v34  ;;  %v13103_v56 = vmul.f32 0.5, %v22314_v63  ;;  %v13357_v49 = vadd.f32 %v22379_v20, %v22293_v12 }
 0xb20   : > { %v13361_v25 = vadd.f32 %v22392_v58, %v22317_v29  ;;  %v22544_v3 = vmul.f32 %v13193_v62, %v22492_v52  ;;  %16033 = vtanh.f32 %v13423_v14  ;;  %v13354_v36 = vadd.f32 %v22335_v1, %v22282_v8 }
 0xb21   : > { %v13358_v60 = vadd.f32 %v22382_v44, %v22306_v0  ;;  %v22551_v28 = vmul.f32 %v13253_v6, %v22476_v4  ;;  %v22554_v63 = vmul.f32 0.5, %v22293_v12  ;;  %v13421_v20 = vmul.f32 0.7978846, %v13357_v49 }
 0xb22   : > { %v13425_v17 = vmul.f32 0.7978846, %v13361_v25  ;;  %v13418_v40 = vmul.f32 0.7978846, %v13354_v36  ;;  %v13356_v62 = vadd.f32 %v22338_v16, %v22285_v27  ;;  %v13360_v14 = vadd.f32 %v22385_v19, %v22311_v23 }
 0xb23   : > { %v13422_v58 = vmul.f32 0.7978846, %v13358_v60  ;;  %v22561_v1 = vmul.f32 %v13255_v13, %v22489_v34  ;;  %v22564_v44 = vmul.f32 0.5, %v22317_v29  ;;  %16035 = vtanh.f32 %v13421_v20 }
 0xb24   : > { %v13363_v12 = vadd.f32 %v22405_v47, %v22331_v59  ;;  %16037 = vtanh.f32 %v13425_v17  ;;  %v13420_v39 = vmul.f32 0.7978846, %v13356_v62  ;;  %v13424_v6 = vmul.f32 0.7978846, %v13360_v14 }
 0xb25   : > { %v13367_v49 = vadd.f32 %v22451_v41, %v22359_v26  ;;  %v13098_v16 = vmul.f32 0.5, %v22282_v8  ;;  %v22572_v19 = vmul.f32 0.5, %v22306_v0  ;;  %16039 = vtanh.f32 %v13418_v40  ;;  %v23584_v8 = vld [vmem:[#allocation62_spill] sm:$0xff]  ;;  %v23585_v40 = vld [vmem:[#allocation68_spill] sm:$0xff] }
 0xb26   : > { %v13427_v13 = vmul.f32 0.7978846, %v13363_v12  ;;  %16041 = vtanh.f32 %v13422_v58  ;;  %v13365_v25 = vadd.f32 %v22437_v18, %v22348_v2  ;;  %v13369_v47 = vadd.f32 %v22455_v31, %v22362_v22  ;;  %v23586_v12 = vld [vmem:[#allocation43_spill] sm:$0xff] }
 0xb27   : > { %v13431_v29 = vmul.f32 0.7978846, %v13367_v49  ;;  %v22579_v36 = vmul.f32 0.5, %v22285_v27  ;;  %v22582_v41 = vmul.f32 0.5, %v22311_v23  ;;  %16043 = vtanh.f32 %v13420_v39  ;;  %v23587_v39 = vld [vmem:[#allocation65_spill] sm:$0xff] }
 0xb28   : > { %v13362_v0 = vadd.f32 %v23584_v8, %v22320_v33  ;;  %16045 = vtanh.f32 %v13424_v6  ;;  %v13429_v20 = vmul.f32 0.7978846, %v13365_v25  ;;  %v13433_v17 = vmul.f32 0.7978846, %v13369_v47  ;;  %v23588_v47 = vld [vmem:[#allocation64_spill] sm:$0xff]  ;;  %v23589_v8 = vld [vmem:[#allocation66_spill] sm:$0xff] }
 0xb29   : > { %v16032_v60 = vpop.eup %16031  ;;  %v13366_v18 = vadd.f32 %v23585_v40, %v22351_v57  ;;  %v22589_v31 = vmul.f32 0.5, %v22331_v59  ;;  %16047 = vtanh.f32 %v13427_v13  ;;  %v22592_v23 = vmul.f32 0.5, %v22359_v26 }
 0xb2a   : > { %v13547_v58 = vadd.f32 1.0, %v16032_v60  ;;  %v13426_v27 = vmul.f32 0.7978846, %v13362_v0  ;;  %v16034_v62 = vpop.eup %16033  ;;  %16049 = vtanh.f32 %v13431_v29  ;;  %v13364_v6 = vadd.f32 %v23587_v39, %v23586_v12 }
 0xb2b   : > { %v13430_v14 = vmul.f32 0.7978846, %v13366_v18  ;;  %v13551_v49 = vadd.f32 1.0, %v16034_v62  ;;  %v22597_v25 = vmul.f32 0.5, %v22348_v2  ;;  %16051 = vtanh.f32 %v13429_v20 }
 0xb2c   : > { %v13368_v59 = vadd.f32 %v23589_v8, %v23588_v47  ;;  %v13611_v60 = vmul.f32 %v13547_v58, %v13099_v51  ;;  %v22602_v13 = vmul.f32 0.5, %v22362_v22  ;;  %16053 = vtanh.f32 %v13433_v17 }
 0xb2d   : > { %v13428_v26 = vmul.f32 0.7978846, %v13364_v6  ;;  %v16036_v0 = vpop.eup %16035  ;;  %v13615_v29 = vmul.f32 %v13551_v49, %v13103_v56  ;;  %16055 = vtanh.f32 %v13426_v27  ;;  %v13371_v18 = vadd.f32 %v22485_v11, %v22396_v43 }
 0xb2e   : > { %v13432_v40 = vmul.f32 0.7978846, %v13368_v59  ;;  %v16038_v62 = vpop.eup %16037  ;;  %v13549_v2 = vadd.f32 1.0, %v16036_v0  ;;  %v22607_v20 = vmul.f32 0.5, %v22320_v33  ;;  %16057 = vtanh.f32 %v13430_v14 }
 0xb2f   : > { %v13375_v51 = vadd.f32 %v22511_v10, %v22425_v7  ;;  %v16040_v22 = vpop.eup %16039  ;;  %v13659_v58 = vpack.c.bf16 %v13615_v29, %v13611_v60  ;;  %v13553_v17 = vadd.f32 1.0, %v16038_v62  ;;  %16059 = vtanh.f32 %v13428_v26 }
 0xb30   : > { %v13435_v39 = vmul.f32 0.7978846, %v13371_v18  ;;  %v16042_v56 = vpop.eup %16041  ;;  %v13546_v27 = vadd.f32 1.0, %v16040_v22  ;;  %v13110_v6 = vmul.f32 0.5, %v22351_v57  ;;  %16061 = vtanh.f32 %v13432_v40 }
 0xb31   : > { %v13439_v11 = vmul.f32 0.7978846, %v13375_v51  ;;  %v16044_v49 = vpop.eup %16043  ;;  %13998 = vmatprep.mubr.bf16.mxu1 %v13659_v58  ;;  %v13613_v33 = vmul.f32 %v13549_v2, %v22554_v63  ;;  %v13617_v14 = vmul.f32 %v13553_v17, %v22564_v44  ;;  %v13550_v8 = vadd.f32 1.0, %v16042_v56 }
 0xb32   : > { %16063 = vtanh.f32 %v13435_v39  ;;  %v16046_v10 = vpop.eup %16045  ;;  %v13610_v59 = vmul.f32 %v13546_v27, %v13098_v16  ;;  %v13548_v60 = vadd.f32 1.0, %v16044_v49  ;;  %v13373_v26 = vadd.f32 %v22500_v21, %v22414_v9 }
 0xb33   : > { %16065 = vtanh.f32 %v13439_v11  ;;  %v16048_v0 = vpop.eup %16047  ;;  %v13661_v29 = vpack.c.bf16 %v13617_v14, %v13613_v33  ;;  %v13614_v57 = vmul.f32 %v13550_v8, %v22572_v19  ;;  %v13552_v40 = vadd.f32 1.0, %v16046_v10 }
 0xb34   : > { %v13377_v18 = vadd.f32 %v22514_v32, %v22428_v5  ;;  %v16050_v63 = vpop.eup %16049  ;;  %v13612_v44 = vmul.f32 %v13548_v60, %v22579_v36  ;;  %v13555_v62 = vadd.f32 1.0, %v16048_v0  ;;  %v13108_v2 = vmul.f32 0.5, %v23586_v12 }
 0xb35   : > { %v13437_v16 = vmul.f32 0.7978846, %v13373_v26  ;;  %v16052_v51 = vpop.eup %16051  ;;  %14095 = vmatprep.mubr.bf16.mxu0 %v13661_v29  ;;  %v13658_v22 = vpack.c.bf16 %v13614_v57, %v13610_v59  ;;  %v13616_v21 = vmul.f32 %v13552_v40, %v22582_v41  ;;  %v13559_v58 = vadd.f32 1.0, %v16050_v63 }
 0xb36   : > { %v13441_v17 = vmul.f32 0.7978846, %v13377_v18  ;;  %v16054_v39 = vpop.eup %16053  ;;  %v13619_v19 = vmul.f32 %v13555_v62, %v22589_v31  ;;  %v13557_v56 = vadd.f32 1.0, %v16052_v51  ;;  %v13112_v32 = vmul.f32 0.5, %v23588_v47 }
 0xb37   : > { %16067 = vtanh.f32 %v13437_v16  ;;  %v16056_v27 = vpop.eup %16055  ;;  %13999 = vmatmul.mubr.bf16.gmra.mrb[144].mxu1 %v13658_v22  ;;  %v13660_v36 = vpack.c.bf16 %v13616_v21, %v13612_v44  ;;  %v13623_v12 = vmul.f32 %v13559_v58, %v22592_v23  ;;  %v13561_v11 = vadd.f32 1.0, %v16054_v39 }
 0xb38   : > { %16069 = vtanh.f32 %v13441_v17  ;;  %v16058_v49 = vpop.eup %16057  ;;  %v13554_v33 = vadd.f32 1.0, %v16056_v27  ;;  %v13115_v41 = vmul.f32 0.5, %v22396_v43  ;;  %v13370_v14 = vadd.f32 %v22463_v38, %v22368_v37 }
 0xb39   : > { %v13374_v31 = vadd.f32 %v22503_v48, %v22417_v54  ;;  %v16060_v8 = vpop.eup %16059  ;;  %14096 = vmatmul.mubr.bf16.gmra.mrb[144].mxu0 %v13660_v36  ;;  %v13663_v47 = vpack.c.bf16 %v13623_v12, %v13619_v19  ;;  %v13621_v10 = vmul.f32 %v13557_v56, %v22597_v25  ;;  %v13625_v59 = vmul.f32 %v13561_v11, %v22602_v13  ;;  %v23590_v25 = vld [vmem:[#allocation67_spill] sm:$0xff] }
 0xb3a   : > { %v13558_v23 = vadd.f32 1.0, %v16058_v49  ;;  %v16062_v60 = vpop.eup %16061  ;;  %v13556_v26 = vadd.f32 1.0, %v16060_v8  ;;  %v13119_v0 = vmul.f32 0.5, %v22425_v7  ;;  %v13434_v29 = vmul.f32 0.7978846, %v13370_v14 }
 0xb3b   : > { %v13438_v43 = vmul.f32 0.7978846, %v13374_v31  ;;  %14006 = vmatprep.mubr.bf16.mxu1 %v13663_v47  ;;  %v13665_v38 = vpack.c.bf16 %v13625_v59, %v13621_v10  ;;  %v13618_v40 = vmul.f32 %v13554_v33, %v22607_v20  ;;  %v13560_v18 = vadd.f32 1.0, %v16062_v60  ;;  %v23592_v47 = vld [vmem:[#allocation70_spill] sm:$0xff] }
 0xb3c   : > { %v16064_v57 = vpop.eup %16063  ;;  %v13622_v48 = vmul.f32 %v13558_v23, %v13110_v6  ;;  %v13620_v44 = vmul.f32 %v13556_v26, %v13108_v2  ;;  %16071 = vtanh.f32 %v13434_v29  ;;  %v13372_v13 = vadd.f32 %v23590_v25, %v22376_v50  ;;  %v23591_v6 = vld [vmem:[#allocation71_spill] sm:$0xff] }
 0xb3d   : > { %v16066_v63 = vpop.eup %16065  ;;  %v13563_v62 = vadd.f32 1.0, %v16064_v57  ;;  %14103 = vmatprep.mubr.bf16.mxu0 %v13665_v38  ;;  %v13624_v51 = vmul.f32 %v13560_v18, %v13112_v32  ;;  %16073 = vtanh.f32 %v13438_v43  ;;  %v13318_v22 = vmul.f32 %v22532_v46, %v22479_v42 }
 0xb3e   : > { %v13662_v16 = vpack.c.bf16 %v13622_v48, %v13618_v40  ;;  %v13567_v7 = vadd.f32 1.0, %v16066_v63  ;;  %v13321_v20 = vmul.f32 %v22544_v3, %v22492_v52  ;;  %v13376_v21 = vadd.f32 %v23591_v6, %v22420_v45 }
 0xb3f   : > { %v13436_v2 = vmul.f32 0.7978846, %v13372_v13  ;;  %v13664_v58 = vpack.c.bf16 %v13624_v51, %v13620_v44  ;;  %v13627_v17 = vmul.f32 %v13563_v62, %v13115_v41  ;;  %v13379_v19 = vadd.f32 %v22527_v35, %v22460_v30 }
 0xb40   : > { %14007 = vmatmul.mubr.bf16.gmra.mrb[148].mxu1 %v13662_v16  ;;  %v13631_v39 = vmul.f32 %v13567_v7, %v13119_v0  ;;  %v13117_v32 = vmul.f32 0.5, %v22414_v9  ;;  %v13440_v27 = vmul.f32 0.7978846, %v13376_v21  ;;  %v13383_v46 = vadd.f32 %v22561_v1, %v22489_v34 }
 0xb41   : > { %v16068_v56 = vpop.eup %16067  ;;  %16075 = vtanh.f32 %v13436_v2  ;;  %14104 = vmatmul.mubr.bf16.gmra.mrb[148].mxu0 %v13664_v58  ;;  %v13121_v12 = vmul.f32 0.5, %v22428_v5  ;;  %v13443_v49 = vmul.f32 0.7978846, %v13379_v19  ;;  %v13381_v35 = vadd.f32 %v22551_v28, %v22476_v4 }
 0xb42   : > { %v16070_v3 = vpop.eup %16069  ;;  %v13667_v36 = vpack.c.bf16 %v13631_v39, %v13627_v17  ;;  %v13565_v11 = vadd.f32 1.0, %v16068_v56  ;;  %16077 = vtanh.f32 %v13440_v27  ;;  %v13447_v41 = vmul.f32 0.7978846, %v13383_v46 }
 0xb43   : > { %v13569_v33 = vadd.f32 1.0, %v16070_v3  ;;  %v13320_v9 = vmul.f32 %v22535_v53, %v22482_v61  ;;  %16079 = vtanh.f32 %v13443_v49  ;;  %v13385_v1 = vadd.f32 %v13321_v20, %v22492_v52 }
 0xb44   : > { %14014 = vmatprep.mubr.bf16.mxu1 %v13667_v36  ;;  %v13629_v14 = vmul.f32 %v13565_v11, %v13117_v32  ;;  %16081 = vtanh.f32 %v13447_v41  ;;  %v13445_v8 = vmul.f32 0.7978846, %v13381_v35  ;;  %v13378_v10 = vadd.f32 %v23592_v47, %v22434_v15 }
 0xb45   : > { %v13633_v31 = vmul.f32 %v13569_v33, %v13121_v12  ;;  %v13449_v5 = vmul.f32 0.7978846, %v13385_v1  ;;  %v13382_v59 = vadd.f32 %v13318_v22, %v22479_v42  ;;  %v13114_v28 = vmul.f32 0.5, %v22368_v37 }
 0xb46   : > { %v16072_v23 = vpop.eup %16071  ;;  %16083 = vtanh.f32 %v13445_v8  ;;  %v13380_v53 = vadd.f32 %v22524_v55, %v22442_v24  ;;  %v13442_v29 = vmul.f32 0.7978846, %v13378_v10  ;;  %v13118_v57 = vmul.f32 0.5, %v22417_v54 }
 0xb47   : > { %v13669_v60 = vpack.c.bf16 %v13633_v31, %v13629_v14  ;;  %v16074_v26 = vpop.eup %16073  ;;  %v13562_v0 = vadd.f32 1.0, %v16072_v23  ;;  %16085 = vtanh.f32 %v13449_v5  ;;  %v13446_v43 = vmul.f32 0.7978846, %v13382_v59 }
 0xb48   : > { %v13566_v38 = vadd.f32 1.0, %v16074_v26  ;;  %v13384_v40 = vadd.f32 %v13320_v9, %v22482_v61  ;;  %v13444_v48 = vmul.f32 0.7978846, %v13380_v53  ;;  %16087 = vtanh.f32 %v13442_v29 }
 0xb49   : > { %14111 = vmatprep.mubr.bf16.mxu0 %v13669_v60  ;;  %v13626_v63 = vmul.f32 %v13562_v0, %v13114_v28  ;;  %16089 = vtanh.f32 %v13446_v43  ;;  %v13116_v16 = vmul.f32 0.5, %v22376_v50  ;;  %v13120_v54 = vmul.f32 0.5, %v22420_v45  ;;  %v16112_v28 = vld [vmem:[%s16481_s16] sm:$0x3f] }
 0xb4a   : > { %v13630_v37 = vmul.f32 %v13566_v38, %v13118_v57  ;;  %v13448_v44 = vmul.f32 0.7978846, %v13384_v40  ;;  %16091 = vtanh.f32 %v13444_v48  ;;  %v13123_v22 = vmul.f32 0.5, %v22460_v30 }
 0xb4b   : > { %v16076_v18 = vpop.eup %16075  ;;  %v13127_v2 = vmul.f32 0.5, %v22489_v34  ;;  %v13125_v50 = vmul.f32 0.5, %v22476_v4  ;;  %v13129_v45 = vmul.f32 0.5, %v22492_v52  ;;  %v13122_v33 = vmul.f32 0.5, %v22434_v15 }
 0xb4c   : > { %v13564_v62 = vadd.f32 1.0, %v16076_v18  ;;  %v16078_v55 = vpop.eup %16077  ;;  %v13666_v25 = vpack.c.bf16 %v13630_v37, %v13626_v63  ;;  %16093 = vtanh.f32 %v13448_v44  ;;  %v13126_v41 = vmul.f32 0.5, %v22479_v42  ;;  %v23593_v42 = vld [vmem:[#allocation19_spill] sm:$0xff] }
 0xb4d   : > { %v16080_v13 = vpop.eup %16079  ;;  %v13568_v51 = vadd.f32 1.0, %v16078_v55  ;;  %v13124_v4 = vmul.f32 0.5, %v22442_v24  ;;  %v13128_v8 = vmul.f32 0.5, %v22482_v61  ;;  %v13740_v23 = vsub.s32 5, %v23593_v42 }
 0xb4e   : > { %v16082_v7 = vpop.eup %16081  ;;  %14015 = vmatmul.mubr.bf16.gmra.mrb[152].mxu1 %v13666_v25  ;;  %v13571_v20 = vadd.f32 1.0, %v16080_v13  ;;  %v13628_v6 = vmul.f32 %v13564_v62, %v13116_v16  ;;  %v23594_v62 = vld [vmem:[#allocation32_spill] sm:$0xff] }
 0xb4f   : > { %v13632_v21 = vmul.f32 %v13568_v51, %v13120_v54  ;;  %v13575_v58 = vadd.f32 1.0, %v16082_v7  ;;  %v22673_v53 = vrot.slane %v16112_v28, %v13740_v23  ;;  %v23595_v13 = vld [vmem:[#allocation40_spill] sm:$0xff] }
 0xb50   : > { %v16084_v17 = vpop.eup %16083  ;;  %v13635_v56 = vmul.f32 %v13571_v20, %v13123_v22 }
 0xb51   : > { %v16086_v39 = vpop.eup %16085  ;;  %v13668_v19 = vpack.c.bf16 %v13632_v21, %v13628_v6  ;;  %v13639_v32 = vmul.f32 %v13575_v58, %v13127_v2  ;;  %v13573_v27 = vadd.f32 1.0, %v16084_v17 }
 0xb52   : > { %v13577_v46 = vadd.f32 1.0, %v16086_v39  ;;  %v16088_v3 = vpop.eup %16087 }
 0xb53   : > { %14112 = vmatmul.mubr.bf16.gmra.mrb[152].mxu0 %v13668_v19  ;;  %v13671_v30 = vpack.c.bf16 %v13639_v32, %v13635_v56  ;;  %v16090_v36 = vpop.eup %16089  ;;  %v13637_v12 = vmul.f32 %v13573_v27, %v13125_v50  ;;  %v13570_v49 = vadd.f32 1.0, %v16088_v3  ;;  %v23596_v50 = vld [vmem:[#allocation45_spill] sm:$0xff]  ;;  %v23597_v3 = vld [vmem:[#allocation51_spill] sm:$0xff] }
 0xb54   : > { %v13641_v11 = vmul.f32 %v13577_v46, %v13129_v45  ;;  %v16092_v34 = vpop.eup %16091  ;;  %v13574_v35 = vadd.f32 1.0, %v16090_v36 }
 0xb55   : > { %14022 = vmatprep.mubr.bf16.mxu1 %v13671_v30  ;;  %v13572_v52 = vadd.f32 1.0, %v16092_v34  ;;  %v13634_v14 = vmul.f32 %v13570_v49, %v13122_v33 }
 0xb56   : > { %v16094_v9 = vpop.eup %16093  ;;  %v13673_v1 = vpack.c.bf16 %v13641_v11, %v13637_v12  ;;  %v13638_v31 = vmul.f32 %v13574_v35, %v13126_v41 }
 0xb57   : > { %v13576_v5 = vadd.f32 1.0, %v16094_v9  ;;  %v13636_v10 = vmul.f32 %v13572_v52, %v13124_v4 }
 0xb58   : > { %14119 = vmatprep.mubr.bf16.mxu0 %v13673_v1  ;;  %v13670_v47 = vpack.c.bf16 %v13638_v31, %v13634_v14 }
 0xb59   : > { %v13640_v59 = vmul.f32 %v13576_v5, %v13128_v8  ;;  %v23598_v5 = vld [vmem:[#allocation25_spill] sm:$0xff] }
 0xb5a   : > { %14023 = vmatmul.mubr.bf16.gmra.mrb[156].mxu1 %v13670_v47 }
 0xb5b   : > { %v13672_v15 = vpack.c.bf16 %v13640_v59, %v13636_v10  ;;  %v23599_v59 = vld [vmem:[#allocation37_spill] sm:$0xff] }
 0xb5d   : > { %14120 = vmatmul.mubr.bf16.gmra.mrb[156].mxu0 %v13672_v15 }
 0xbb5   : > { %v14853_v60 = vpop.f32.mrb[128].mxu1 }
 0xbb6   : > { %v14854_v24 = vpop.f32.mrb[129].mxu1 }
 0xbb7   : > { %v14855_v26 = vadd.f32 %v14854_v24, %v14853_v60  ;;  %v14856_v0 = vpop.f32.mrb[130].mxu1 }
 0xbb8   : > { %v14917_v29 = vpop.f32.mrb[128].mxu0  ;;  %v14857_v61 = vpop.f32.mrb[131].mxu1 }
 0xbb9   : > { %v13969_v43 = vadd.f32 %v14855_v26, %v22673_v53  ;;  %v14918_v57 = vpop.f32.mrb[129].mxu0  ;;  %v14858_v38 = vadd.f32 %v14857_v61, %v14856_v0 }
 0xbba   : > { %v14919_v40 = vadd.f32 %v14918_v57, %v14917_v29  ;;  %v14920_v48 = vpop.f32.mrb[130].mxu0 }
 0xbbb   : > { %v13972_v18 = vadd.f32 %v14858_v38, %v22673_v53  ;;  %v14921_v63 = vpop.f32.mrb[131].mxu0 }
 0xbbc   : > { %v14066_v37 = vadd.f32 %v14919_v40, %v13969_v43  ;;  %v14922_v44 = vadd.f32 %v14921_v63, %v14920_v48  ;;  %v23600_v63 = vld [vmem:[#allocation28_spill] sm:$0xff] }
 0xbbe   : > { %v14128_v55 = vadd.f32 %v14066_v37, %v23594_v62  ;;  %v14069_v25 = vadd.f32 %v14922_v44, %v13972_v18  ;;  %v23601_v62 = vld [vmem:[#allocation38_spill] sm:$0xff] }
 0xbc0   : > { %14144 = vst [vmem:[%s16483_s30] sm:$0xff] %v14128_v55  ;;  %v14129_v16 = vadd.f32 %v14069_v25, %v23595_v13  ;;  %v14859_v54 = vpop.f32.mrb[132].mxu1 }
 0xbc1   : > { %v14860_v51 = vpop.f32.mrb[133].mxu1 }
 0xbc2   : > { %14145 = vst [vmem:[%s16483_s30 + $0x8] sm:$0xff] %v14129_v16  ;;  %v14923_v7 = vpop.f32.mrb[132].mxu0  ;;  %v14861_v22 = vadd.f32 %v14860_v51, %v14859_v54  ;;  %v14862_v20 = vpop.f32.mrb[134].mxu1 }
 0xbc3   : > { %v14924_v6 = vpop.f32.mrb[133].mxu0  ;;  %v14863_v21 = vpop.f32.mrb[135].mxu1 }
 0xbc4   : > { %v13977_v2 = vadd.f32 %v14861_v22, %v22673_v53  ;;  %v14925_v58 = vadd.f32 %v14924_v6, %v14923_v7  ;;  %v14926_v17 = vpop.f32.mrb[134].mxu0  ;;  %v14864_v39 = vadd.f32 %v14863_v21, %v14862_v20 }
 0xbc5   : > { %v14927_v19 = vpop.f32.mrb[135].mxu0 }
 0xbc6   : > { %v14074_v56 = vadd.f32 %v14925_v58, %v13977_v2  ;;  %v13980_v32 = vadd.f32 %v14864_v39, %v22673_v53  ;;  %v14928_v27 = vadd.f32 %v14927_v19, %v14926_v17 }
 0xbc8   : > { %v14130_v45 = vadd.f32 %v14074_v56, %v23596_v50  ;;  %v14077_v46 = vadd.f32 %v14928_v27, %v13980_v32  ;;  %v23602_v56 = vld [vmem:[#allocation52_spill] sm:$0xff] }
 0xbca   : > { %14146 = vst [vmem:[%s16483_s30 + $0x10] sm:$0xff] %v14130_v45  ;;  %v14131_v30 = vadd.f32 %v14077_v46, %v23597_v3  ;;  %v14865_v36 = vpop.f32.mrb[136].mxu1  ;;  %v23603_v46 = vld [vmem:[#allocation39_spill] sm:$0xff] }
 0xbcb   : > { %v14866_v12 = vpop.f32.mrb[137].mxu1 }
 0xbcc   : > { %14147 = vst [vmem:[%s16483_s30 + $0x18] sm:$0xff] %v14131_v30  ;;  %v14867_v11 = vadd.f32 %v14866_v12, %v14865_v36  ;;  %v14868_v49 = vpop.f32.mrb[138].mxu1 }
 0xbcd   : > { %v14869_v34 = vpop.f32.mrb[139].mxu1 }
 0xbce   : > { %v14870_v33 = vadd.f32 %v14869_v34, %v14868_v49  ;;  %v13985_v35 = vadd.f32 %v14867_v11, %v22673_v53 }
 0xbcf   : > { %v14929_v41 = vpop.f32.mrb[136].mxu0 }
 0xbd0   : > { %v14930_v9 = vpop.f32.mrb[137].mxu0  ;;  %v13988_v52 = vadd.f32 %v14870_v33, %v22673_v53 }
 0xbd1   : > { %v14931_v1 = vadd.f32 %v14930_v9, %v14929_v41  ;;  %v14932_v4 = vpop.f32.mrb[138].mxu0 }
 0xbd2   : > { %v14933_v14 = vpop.f32.mrb[139].mxu0 }
 0xbd3   : > { %v14082_v31 = vadd.f32 %v14931_v1, %v13985_v35  ;;  %v14934_v8 = vadd.f32 %v14933_v14, %v14932_v4  ;;  %v23604_v14 = vld [vmem:[#allocation23_spill] sm:$0xff] }
 0xbd5   : > { %v14132_v47 = vadd.f32 %v14082_v31, %v23598_v5  ;;  %v14085_v10 = vadd.f32 %v14934_v8, %v13988_v52  ;;  %v23605_v5 = vld [vmem:[#allocation31_spill] sm:$0xff] }
 0xbd7   : > { %14148 = vst [vmem:[%s16483_s30 + $0x20] sm:$0xff] %v14132_v47  ;;  %v14133_v15 = vadd.f32 %v14085_v10, %v23599_v59 }
 0xbd9   : > { %14149 = vst [vmem:[%s16483_s30 + $0x28] sm:$0xff] %v14133_v15 }
 0xbdd   : > { %v14871_v42 = vpop.f32.mrb[140].mxu1 }
 0xbde   : > { %v14872_v23 = vpop.f32.mrb[141].mxu1 }
 0xbdf   : > { %v14935_v60 = vpop.f32.mrb[140].mxu0  ;;  %v14873_v28 = vadd.f32 %v14872_v23, %v14871_v42  ;;  %v14874_v24 = vpop.f32.mrb[142].mxu1 }
 0xbe0   : > { %v14936_v26 = vpop.f32.mrb[141].mxu0  ;;  %v14875_v0 = vpop.f32.mrb[143].mxu1 }
 0xbe1   : > { %v13993_v29 = vadd.f32 %v14873_v28, %v22673_v53  ;;  %v14937_v61 = vadd.f32 %v14936_v26, %v14935_v60  ;;  %v14938_v43 = vpop.f32.mrb[142].mxu0  ;;  %v14876_v57 = vadd.f32 %v14875_v0, %v14874_v24 }
 0xbe2   : > { %v14939_v38 = vpop.f32.mrb[143].mxu0 }
 0xbe3   : > { %v14090_v40 = vadd.f32 %v14937_v61, %v13993_v29  ;;  %v13996_v48 = vadd.f32 %v14876_v57, %v22673_v53  ;;  %v14940_v18 = vadd.f32 %v14939_v38, %v14938_v43 }
 0xbe5   : > { %v14134_v37 = vadd.f32 %v14090_v40, %v23600_v63  ;;  %v14093_v44 = vadd.f32 %v14940_v18, %v13996_v48  ;;  %v23606_v40 = vld [vmem:[#allocation46_spill] sm:$0xff] }
 0xbe6   : > { %v23607_v63 = vld [vmem:[#allocation26_spill] sm:$0xff] }
 0xbe7   : > { %14150 = vst [vmem:[%s16483_s30 + $0x30] sm:$0xff] %v14134_v37  ;;  %v14135_v55 = vadd.f32 %v14093_v44, %v23601_v62 }
 0xbe9   : > { %14151 = vst [vmem:[%s16483_s30 + $0x38] sm:$0xff] %v14135_v55 }
 0xc0a   : > { %v14877_v25 = vpop.f32.mrb[144].mxu1 }
 0xc0b   : > { %v14878_v13 = vpop.f32.mrb[145].mxu1 }
 0xc0c   : > { %v14941_v16 = vpop.f32.mrb[144].mxu0  ;;  %v14879_v54 = vadd.f32 %v14878_v13, %v14877_v25  ;;  %v14880_v51 = vpop.f32.mrb[146].mxu1 }
 0xc0d   : > { %v14942_v7 = vpop.f32.mrb[145].mxu0  ;;  %v14881_v22 = vpop.f32.mrb[147].mxu1 }
 0xc0e   : > { %v14001_v20 = vadd.f32 %v14879_v54, %v22673_v53  ;;  %v14943_v6 = vadd.f32 %v14942_v7, %v14941_v16  ;;  %v14944_v21 = vpop.f32.mrb[146].mxu0  ;;  %v14882_v2 = vadd.f32 %v14881_v22, %v14880_v51 }
 0xc0f   : > { %v14945_v58 = vpop.f32.mrb[147].mxu0 }
 0xc10   : > { %v14098_v17 = vadd.f32 %v14943_v6, %v14001_v20  ;;  %v14004_v39 = vadd.f32 %v14882_v2, %v22673_v53  ;;  %v14946_v19 = vadd.f32 %v14945_v58, %v14944_v21 }
 0xc12   : > { %v14136_v32 = vadd.f32 %v14098_v17, %v23602_v56  ;;  %v14101_v27 = vadd.f32 %v14946_v19, %v14004_v39  ;;  %v23609_v17 = vld [vmem:[#allocation33_spill] sm:$0xff]  ;;  %v23612_v56 = vld [vmem:[#allocation24_spill] sm:$0xff] }
 0xc13   : > { %v14883_v50 = vpop.f32.mrb[148].mxu1 }
 0xc14   : > { %v14884_v45 = vpop.f32.mrb[149].mxu1  ;;  %14152 = vst [vmem:[%s16483_s30 + $0x40] sm:$0xff] %v14136_v32  ;;  %v14137_v3 = vadd.f32 %v14101_v27, %v23603_v46  ;;  %v14947_v30 = vpop.f32.mrb[148].mxu0 }
 0xc15   : > { %v14885_v36 = vadd.f32 %v14884_v45, %v14883_v50  ;;  %v14886_v12 = vpop.f32.mrb[150].mxu1  ;;  %v14948_v11 = vpop.f32.mrb[149].mxu0 }
 0xc16   : > { %v14887_v49 = vpop.f32.mrb[151].mxu1  ;;  %14153 = vst [vmem:[%s16483_s30 + $0x48] sm:$0xff] %v14137_v3  ;;  %v14949_v33 = vadd.f32 %v14948_v11, %v14947_v30  ;;  %v14950_v41 = vpop.f32.mrb[150].mxu0 }
 0xc17   : > { %v14009_v34 = vadd.f32 %v14885_v36, %v22673_v53  ;;  %v14888_v35 = vadd.f32 %v14887_v49, %v14886_v12  ;;  %v14951_v9 = vpop.f32.mrb[151].mxu0 }
 0xc18   : > { %v14952_v52 = vadd.f32 %v14951_v9, %v14950_v41 }
 0xc19   : > { %v14106_v1 = vadd.f32 %v14949_v33, %v14009_v34  ;;  %v14012_v4 = vadd.f32 %v14888_v35, %v22673_v53 }
 0xc1b   : > { %v14138_v31 = vadd.f32 %v14106_v1, %v23604_v14  ;;  %v14109_v8 = vadd.f32 %v14952_v52, %v14012_v4 }
 0xc1d   : > { %14154 = vst [vmem:[%s16483_s30 + $0x50] sm:$0xff] %v14138_v31  ;;  %v14139_v47 = vadd.f32 %v14109_v8, %v23605_v5 }
 0xc1f   : > { %14155 = vst [vmem:[%s16483_s30 + $0x58] sm:$0xff] %v14139_v47 }
 0xc21   : > { %v14889_v10 = vpop.f32.mrb[152].mxu1 }
 0xc22   : > { %v14890_v59 = vpop.f32.mrb[153].mxu1 }
 0xc23   : > { %v14891_v15 = vadd.f32 %v14890_v59, %v14889_v10  ;;  %v14892_v42 = vpop.f32.mrb[154].mxu1 }
 0xc24   : > { %v14893_v23 = vpop.f32.mrb[155].mxu1 }
 0xc25   : > { %v14894_v60 = vadd.f32 %v14893_v23, %v14892_v42  ;;  %v14017_v24 = vadd.f32 %v14891_v15, %v22673_v53 }
 0xc26   : > { %v14953_v28 = vpop.f32.mrb[152].mxu0 }
 0xc27   : > { %v14954_v26 = vpop.f32.mrb[153].mxu0  ;;  %v14020_v61 = vadd.f32 %v14894_v60, %v22673_v53 }
 0xc28   : > { %v14955_v0 = vadd.f32 %v14954_v26, %v14953_v28  ;;  %v14956_v29 = vpop.f32.mrb[154].mxu0 }
 0xc29   : > { %v14957_v43 = vpop.f32.mrb[155].mxu0 }
 0xc2a   : > { %v14114_v57 = vadd.f32 %v14955_v0, %v14017_v24  ;;  %v14958_v38 = vadd.f32 %v14957_v43, %v14956_v29 }
 0xc2c   : > { %v14140_v48 = vadd.f32 %v14114_v57, %v23606_v40  ;;  %v14117_v18 = vadd.f32 %v14958_v38, %v14020_v61 }
 0xc2d   : > { %v14895_v44 = vpop.f32.mrb[156].mxu1 }
 0xc2e   : > { %14156 = vst [vmem:[%s16483_s30 + $0x60] sm:$0xff] %v14140_v48  ;;  %v14141_v37 = vadd.f32 %v14117_v18, %v23607_v63  ;;  %v14896_v62 = vpop.f32.mrb[157].mxu1 }
 0xc2f   : > { %v14897_v25 = vadd.f32 %v14896_v62, %v14895_v44  ;;  %v14898_v13 = vpop.f32.mrb[158].mxu1 }
 0xc30   : > { %14157 = vst [vmem:[%s16483_s30 + $0x68] sm:$0xff] %v14141_v37  ;;  %v14959_v55 = vpop.f32.mrb[156].mxu0  ;;  %v14899_v54 = vpop.f32.mrb[159].mxu1 }
 0xc31   : > { %v14960_v16 = vpop.f32.mrb[157].mxu0  ;;  %v14025_v51 = vadd.f32 %v14897_v25, %v22673_v53  ;;  %v14900_v20 = vadd.f32 %v14899_v54, %v14898_v13 }
 0xc32   : > { %v14961_v7 = vadd.f32 %v14960_v16, %v14959_v55  ;;  %v14962_v22 = vpop.f32.mrb[158].mxu0 }
 0xc33   : > { %v14963_v6 = vpop.f32.mrb[159].mxu0  ;;  %v14028_v2 = vadd.f32 %v14900_v20, %v22673_v53 }
 0xc34   : > { %v14122_v21 = vadd.f32 %v14961_v7, %v14025_v51  ;;  %v14964_v58 = vadd.f32 %v14963_v6, %v14962_v22 }
 0xc36   : > { %v14142_v39 = vadd.f32 %v14122_v21, %v23609_v17  ;;  %v14125_v19 = vadd.f32 %v14964_v58, %v14028_v2 }
 0xc38   : > { %14158 = vst [vmem:[%s16483_s30 + $0x70] sm:$0xff] %v14142_v39  ;;  %v14143_v32 = vadd.f32 %v14125_v19, %v23612_v56 }
 0xc3a   : > { %14159 = vst [vmem:[%s16483_s30 + $0x78] sm:$0xff] %v14143_v32 }
 0xc3b   : > { %16156 = shalt.err (!%p16153_p8)
}
 0xc3c   : > { %s16157_s22 = scalar_lea.hbm %s22725_s23, 2048  ;;  %s16161_s20 = scalar_lea.hbm %s23611_s17, 4096 }
 0xc3d   : > { %p16158_p1 = scmp.ne.s32.totalorder %s22725_s23, %s16157_s22  ;;  %p16162_p10 = scmp.lt.u32.totalorder %s22725_s23, %s23611_s17 }
 0xc3e   : > { %p16163_p11 = scmp.lt.u32.totalorder %s16161_s20, %s16157_s22  ;;  %p16165_p0 = scmp.lt.u32.totalorder %s16157_s22, %s22725_s23 }
 0xc3f   : > { %p16159_p4 = pnand %p16158_p1, %p23613_p12 }
 0xc40   : > { %p16164_p9 = por %p16163_p11, %p16162_p10 }
 0xc41   : > { %p16160_p6 = pneg %p16159_p4 }
 0xc42   : > { %p16166_p13 = por %p16165_p0, %p16164_p9 }
 0xc44   : > { %p16167_p2 = pnand %p16166_p13, %p16160_p6 }
 0xc46   : > { %16170 = shalt.err (!%p16167_p2)
}
 0xc47   : > { %s16253_s16 = smov 128   ;;  %s16254_s30 = smov 8  }
 0xc48   : > { %15321 = dma.vmem_to_hbm [thread:$0]  (%p23613_p12), %s22727_s26, 2048, %s22725_s23, %s14161_s25, %s16253_s16, %s16253_s16, %s16254_s30  }
 0xc49 PF: > { %s23614_s2 = sld [smem:[#allocation13_spill]]  ;;  %s23615_s10 = sld [smem:[#allocation8_spill]] }
 0xc4a   : > { %s23616_s12 = sld [smem:[#allocation17_spill]] }
 0xc4f   : > { %p15332_p5 = scmp.ge.s32.totalorder %s23614_s2, 2  ;;  %s14190_s24 = sand.u32 1, %s23615_s10  }
 0xc50   : > { %p23617_p3 = scmp.ne.s32.totalorder %s23616_s12, 0  ;;  %s14191_s27 = scalar_lea.sflag [#allocation4], %s14190_s24 }
 0xc52   : > { %p15328_p7 = pnand %p15332_p5, %p23617_p3 }
 0xc54   : > { %16208 = dma.done.wait (!%p15328_p7), %s14191_s27, 2048  }
 0xc55   : > { %16210 = vsyncadd (!%p15328_p7), %s14191_s27, 4294965248  ;;  %s25_s16 = sadd.s32 1, %s23614_s2   ;;  %s23618_s30 = sld [smem:[#allocation9_spill]] }
 0xc56   : > { %p22_p8 = scmp.ge.s32.totalorder %s25_s16, 6   ;;  %s23619_s10 = sld [smem:[#allocation10_spill]] }
 0xc57   : > { %s23620_s11 = sld [smem:[#allocation18_spill]]  ;;  %s23621_s12 = sld [smem:[#allocation11_spill]] }
 0xc58   : > { %s23622_s13 = sld [smem:[#allocation12_spill]]  ;;  %s23623_s14 = sld [smem:[#allocation14_spill]] }
 0xc59   : > { %s23624_s15 = sld [smem:[#allocation15_spill]]  ;;  %24 = sbr.rel (!%p22_p8) target bundleno = 12 (0xc), region = 129 }
 0xc60   :  { %14196 = vsyncpa [#allocation3], 1 }
 0xc61   :  { %14198 = vsyncpa [#allocation3 + $0x1], 1 }
 0xc62   :  { %14199 = vsyncpa [#allocation4], 1 }
 0xc63   :  { %14201 = vsyncpa [#allocation4 + $0x1], 1 }

</bundles_post_ra>
